<compile_context>
chip_gen: v6e
topology: v6e:2x2x1
jax: 0.10.0
libtpu: 0.0.40
codegen_flags: <defaults>
</compile_context>

<pallas_src>
import numpy as np
import jax
import jax.numpy as jnp
from jax.experimental import pallas as pl
from jax.experimental.pallas import tpu as pltpu

H_IMG = 256
W_IMG = 256
CROP_TOP = 40   # transform_us shifts rows down by 40; inverse_transform_us shifts back


# --------------------------------------------------------------------------
# Pallas kernels / wrappers
# --------------------------------------------------------------------------

def _dilate_kernel(xp_ref, o_ref):
    # Init-time only (morphology_close).  xp_ref: (1, H+2, W+2) zero-padded
    # image; o_ref: (1, H, W).  3x3 all-ones conv + (>0) threshold = dilation.
    # TODO(synk): overlapping unaligned slices force relayouts; fine at init.
    H, W = o_ref.shape[1], o_ref.shape[2]
    xp = xp_ref[0]
    s = jnp.zeros((H, W), jnp.float32)
    for di in range(3):
        for dj in range(3):
            s = s + xp[di:di + H, dj:dj + W]
    o_ref[0] = (s > 0).astype(jnp.float32)


def binary_dilate(x):
    """x: (N, C, H, W) float32 in {0,1}. Returns (conv3x3_ones(x) > 0).float()."""
    N, C, H, W = x.shape
    xb = x.reshape(N * C, H, W)
    xp = jnp.pad(xb, ((0, 0), (1, 1), (1, 1)))
    out = pl.pallas_call(
        _dilate_kernel,
        grid=(N * C,),
        in_specs=[pl.BlockSpec((1, H + 2, W + 2), lambda i: (i, 0, 0))],
        out_specs=pl.BlockSpec((1, H, W), lambda i: (i, 0, 0)),
        out_shape=jax.ShapeDtypeStruct((N * C, H, W), jnp.float32),
        compiler_params=pltpu.CompilerParams(dimension_semantics=("parallel",)),
    )(xp)
    return out.reshape(N, C, H, W)


def fused_forward(X, mask2d, g_w, g_b, ae_w1, ae_b1, ae_w2, ae_b2,
                  *, pix_tile=16384):
    """Entire forward in one Pallas pass.

    For output row r < H-40:
        out[n,:,r,:] = mask[r,:] * AE(G(mask[r,:] * X[n,:,r,:]))
    For output row r >= H-40 (the inverse_transform_us pad region): 0.
    The transform_us(+40) / inverse_transform_us(-40) row shifts cancel, so
    the whole pipeline is pointwise in (row, col) with small channel mixes.

    Layout: batch is packed into the sublanes -> X viewed as (N*C, H*W),
    channel mixes become block-diagonal kron(I_N, W); G is folded into the
    AE encoder on the host so the kernel runs only 2 MXU matmuls per tile.
    """
    N, C, H, W = X.shape
    HW = H * W
    NC = N * C
    Hd = ae_w1.shape[1]
    NHd = N * Hd
    tp = min(pix_tile, HW)
    while HW % tp:            # robust tile pick, no divisibility assert
        tp //= 2
    valid_pix = (H - CROP_TOP) * W

    # ---- host-side weight prep (exact-ish: HIGHEST precision fold) ----
    hp = jax.lax.Precision.HIGHEST
    gw_t = g_w.T                                  # (C, C)
    w1_t = ae_w1.T                                # (Hd, C)
    w2_t = ae_w2.T                                # (C, Hd)
    # Fold G's 1x1 conv into the AE encoder: enc(G(x)) = w_enc @ x + b_enc.
    w_enc = jnp.dot(w1_t, gw_t, precision=hp)                               # (Hd, C)
    b_enc = jnp.dot(w1_t, g_b.reshape(-1, 1), precision=hp) + ae_b1.reshape(-1, 1)
    # Block-diagonal weights so the batch rides in the sublanes of one tile.
    w_enc_blk = jax.scipy.linalg.block_diag(*([w_enc] * N))                 # (N*Hd, N*C)
    b_enc_blk = jnp.tile(b_enc, (N, 1))                                     # (N*Hd, 1)
    w_dec_blk = jax.scipy.linalg.block_diag(*([w2_t] * N))                  # (N*C, N*Hd)
    b_dec_blk = jnp.tile(ae_b2.reshape(-1, 1), (N, 1))                      # (N*C, 1)

    Xf = X.reshape(NC, HW)                        # free contiguous reshape; 8 sublanes
    mf = mask2d.reshape(1, HW).astype(jnp.float32)

    def kernel(x_ref, m_ref, we_ref, be_ref, wd_ref, bd_ref, o_ref):
        t = pl.program_id(0)
        m = m_ref[...]                                   # (1, tp) fan mask
        xm = x_ref[...] * m                              # USR stub: fan masking, all N*C rows
        h = jnp.dot(we_ref[...], xm,
                    preferred_element_type=jnp.float32) + be_ref[...]   # G folded into AE enc
        h = jnp.maximum(h, 0.0)
        h = jnp.dot(wd_ref[...], h,
                    preferred_element_type=jnp.float32) + bd_ref[...]   # AE dec
        # Post-AE fan mask fused with inverse_transform_us: pixels belonging
        # to the last CROP_TOP output rows are the crop's zero-pad region.
        pix = t * tp + jax.lax.broadcasted_iota(jnp.int32, (1, tp), 1)
        keep = (pix < valid_pix).astype(jnp.float32)
        o_ref[...] = h * (m * keep)

    out = pl.pallas_call(
        kernel,
        grid=(HW // tp,),
        in_specs=[
            pl.BlockSpec((NC, tp), lambda t: (0, t)),      # X, batch in sublanes
            pl.BlockSpec((1, tp), lambda t: (0, t)),       # fan mask (each tile read once)
            pl.BlockSpec((NHd, NC), lambda t: (0, 0)),     # grid-invariant weights: DMA'd once
            pl.BlockSpec((NHd, 1), lambda t: (0, 0)),
            pl.BlockSpec((NC, NHd), lambda t: (0, 0)),
            pl.BlockSpec((NC, 1), lambda t: (0, 0)),
        ],
        out_specs=pl.BlockSpec((NC, tp), lambda t: (0, t)),
        out_shape=jax.ShapeDtypeStruct((NC, HW), jnp.float32),
        compiler_params=pltpu.CompilerParams(
            dimension_semantics=("parallel",)),
    )(Xf, mf, w_enc_blk, b_enc_blk, w_dec_blk, b_dec_blk)
    return out.reshape(N, C, H, W)


# --------------------------------------------------------------------------
# Pure-JAX glue (used only by the reference check and init)
# --------------------------------------------------------------------------

def transform_us(x):
    """T.Pad((0, 80, 0, 0)) then T.CenterCrop(256), for 256x256 inputs:
    result rows 0..39 are zero, rows 40..255 are the original rows 0..215."""
    H, W = x.shape[-2], x.shape[-1]
    zeros = jnp.zeros(x.shape[:-2] + (CROP_TOP, W), x.dtype)
    return jnp.concatenate([zeros, x[..., : H - CROP_TOP, :]], axis=-2)


# --------------------------------------------------------------------------
# The module
# --------------------------------------------------------------------------

class MergedLinearCut1:
    def __init__(self, num_channels=4, hidden=16, seed=42):
        # TODO(synk): USR / G / AE are checkpointed sub-networks in the original
        # module; they are replaced here with deterministic synthetic stubs.
        key = jax.random.PRNGKey(seed)
        k1, k2, k3, k4 = jax.random.split(key, 4)
        C, Hd = num_channels, hidden
        self.g_w = 0.1 * jax.random.normal(k1, (C, C), jnp.float32)
        self.g_b = 0.01 * jax.random.normal(k2, (C,), jnp.float32)
        self.ae_w1 = 0.1 * jax.random.normal(k3, (C, Hd), jnp.float32)
        self.ae_b1 = jnp.zeros((Hd,), jnp.float32)
        self.ae_w2 = 0.1 * jax.random.normal(k4, (Hd, C), jnp.float32)
        self.ae_b2 = jnp.zeros((C,), jnp.float32)

        # Fan geometry exactly as the module's init_grids would build it.
        grid, inverse_grid, mask = self.init_grids(
            w=W_IMG, h=H_IMG, center_x=W_IMG / 2.0, center_y=-30.0,
            r1=20.0, r2=float(H_IMG + 10), theta=np.pi / 4.0)
        self.grid = grid
        self.inverse_grid = inverse_grid
        self.mask_fan = mask[None]  # (1, 1, H, W) — stands in for USR.mask_fan

    # ---- grid construction (host-side setup, faithful to the module) ----
    def init_grids(self, w, h, center_x, center_y, r1, r2, theta):
        grid = self.compute_grid(w, h, center_x, center_y, r1, r2, theta)
        inverse_grid, mask = self.compute_grid_inverse(grid)
        grid = self.normalize_grid(grid)
        inverse_grid = self.normalize_grid(inverse_grid)
        return jnp.asarray(grid), jnp.asarray(inverse_grid), jnp.asarray(mask)

    def compute_grid(self, w, h, center_x, center_y, r1, r2, theta):
        angles = np.linspace(-theta, theta, w)
        radii = np.linspace(r1, r2, h)
        sin_angles = np.sin(angles)
        cos_angles = np.cos(angles)
        grid = np.zeros((h, w, 2), dtype=np.float32)
        for i, radius in enumerate(radii):
            grid[i, :, 0] = center_x + radius * sin_angles
            grid[i, :, 1] = center_y + radius * cos_angles
        return grid

    def compute_grid_inverse(self, grid):
        h, w, _ = grid.shape
        inverse_grid = np.zeros((h, w, 2), dtype=np.float32)
        mask = np.zeros((1, h, w), dtype=np.float32)
        rounded = np.round(grid).astype(np.int64).tolist()  # round-half-to-even, like torch
        for j in range(h):
            row = rounded[j]
            for i in range(w):
                xi, yi = row[i]
                if 0 <= xi < w and 0 <= yi < h:
                    inverse_grid[yi, xi] = (i, j)
                    mask[0, yi, xi] = 1.0
        closed = self.morphology_close(jnp.asarray(mask)[None])  # (1,1,h,w)
        return inverse_grid, np.asarray(closed[0])

    def normalize_grid(self, grid):
        # Faithful to the module (divides by [h, w]); identical here since h==w.
        h, w, _ = grid.shape
        return grid / np.array([h, w], dtype=np.float32) * 2.0 - 1.0

    # ---- morphology (Pallas 3x3 box-conv kernel; init-time only) ----
    def dilate(self, x, kernel_size=3):
        return binary_dilate(x)

    def erode(self, x, kernel_size=3):
        return 1.0 - binary_dilate(1.0 - x)

    def morphology_close(self, x, kernel_size=3):
        return self.erode(self.dilate(x, kernel_size), kernel_size)

    # ---- forward (single fused Pallas kernel) ----
    def forward(self, X, grid=None, inverse_grid=None, mask_fan=None):
        if mask_fan is None:
            mask_fan = self.mask_fan
        H, W = mask_fan.shape[-2], mask_fan.shape[-1]
        mask2d = mask_fan.reshape(H, W)
        # TODO(synk): real USR consumes (grid, inverse_grid) via grid_sample;
        # stubbed as fan masking inside the fused kernel.
        return fused_forward(X, mask2d, self.g_w, self.g_b,
                             self.ae_w1, self.ae_b1, self.ae_w2, self.ae_b2)

    __call__ = forward

    # ---- pure-JAX reference of the same (stubbed) math, for validation ----
    def forward_reference(self, X, mask_fan=None):
        if mask_fan is None:
            mask_fan = self.mask_fan
        hp = jax.lax.Precision.HIGHEST

        def mix(x, w, b):
            return (jnp.einsum('nihw,io->nohw', x, w, precision=hp)
                    + b[None, :, None, None])

        Xr = X * mask_fan                       # USR stub
        Xt = transform_us(Xr)
        Xg = mix(Xt, self.g_w, self.g_b)        # G stub
        h = jnp.maximum(mix(Xg, self.ae_w1, self.ae_b1), 0.0)
        ae0 = mix(h, self.ae_w2, self.ae_b2)    # AE stub
        prod = ae0 * transform_us(mask_fan)
        W = prod.shape[-1]
        zeros = jnp.zeros(prod.shape[:-2] + (CROP_TOP, W), prod.dtype)
        return jnp.concatenate([prod[..., CROP_TOP:, :], zeros], axis=-2)


# --------------------------------------------------------------------------

if __name__ == "__main__":
    model = MergedLinearCut1(num_channels=4, hidden=16, seed=42)
    key = jax.random.PRNGKey(0)
    X = jax.random.normal(key, (2, 4, H_IMG, W_IMG), dtype=jnp.float32)

    out = jax.block_until_ready(model(X))
    assert out.shape == (2, 4, H_IMG, W_IMG), out.shape
    assert out.dtype == jnp.float32
    assert bool(jnp.all(jnp.isfinite(out)))
    # bottom 40 rows must be zero (inverse_transform_us pad region)
    assert float(jnp.max(jnp.abs(out[..., H_IMG - CROP_TOP:, :]))) == 0.0

    # fused kernel (with G folded into the AE encoder) must match the
    # unfused pure-JAX pipeline
    ref = jax.block_until_ready(model.forward_reference(X))
    assert bool(jnp.allclose(out, ref, atol=1e-4, rtol=1e-3)), (
        float(jnp.max(jnp.abs(out - ref))))

    print("KERNEL_OK")
</pallas_src>

<mosaic_0001>
module attributes {stable_mosaic.version = 11 : i64} {
  func.func @_dilate_kernel(%arg0: i32, %arg1: memref<1x258x258xf32, #tpu.memory_space<vmem>>, %arg2: memref<1x256x256xf32, #tpu.memory_space<vmem>>) attributes {dimension_semantics = [#tpu.dimension_semantics<parallel>], iteration_bounds = array<i64: 1>, scalar_prefetch = 0 : i64, scratch_operands = 0 : i64, tpu.core_type = #tpu.core_type<tc>, window_params = [{transform_indices = @transform_0, window_bounds = array<i64: 1, 258, 258>}, {transform_indices = @transform_1, window_bounds = array<i64: 1, 256, 256>}]} {
    %c0 = arith.constant 0 : index
    %c0_0 = arith.constant 0 : index
    %c0_1 = arith.constant 0 : index
    %0 = vector.load %arg1[%c0, %c0_0, %c0_1] : memref<1x258x258xf32, #tpu.memory_space<vmem>>, vector<1x258x258xf32>
    %1 = vector.shape_cast %0 : vector<1x258x258xf32> to vector<258x258xf32>
    %cst = arith.constant 0.000000e+00 : f32
    %2 = vector.broadcast %cst : f32 to vector<256x256xf32>
    %3 = vector.extract_strided_slice %1 {offsets = [0, 0], sizes = [256, 256], strides = [1, 1]} : vector<258x258xf32> to vector<256x256xf32>
    %4 = arith.addf %2, %3 : vector<256x256xf32>
    %5 = vector.extract_strided_slice %1 {offsets = [0, 1], sizes = [256, 256], strides = [1, 1]} : vector<258x258xf32> to vector<256x256xf32>
    %6 = arith.addf %4, %5 : vector<256x256xf32>
    %7 = vector.extract_strided_slice %1 {offsets = [0, 2], sizes = [256, 256], strides = [1, 1]} : vector<258x258xf32> to vector<256x256xf32>
    %8 = arith.addf %6, %7 : vector<256x256xf32>
    %9 = vector.extract_strided_slice %1 {offsets = [1, 0], sizes = [256, 256], strides = [1, 1]} : vector<258x258xf32> to vector<256x256xf32>
    %10 = arith.addf %8, %9 : vector<256x256xf32>
    %11 = vector.extract_strided_slice %1 {offsets = [1, 1], sizes = [256, 256], strides = [1, 1]} : vector<258x258xf32> to vector<256x256xf32>
    %12 = arith.addf %10, %11 : vector<256x256xf32>
    %13 = vector.extract_strided_slice %1 {offsets = [1, 2], sizes = [256, 256], strides = [1, 1]} : vector<258x258xf32> to vector<256x256xf32>
    %14 = arith.addf %12, %13 : vector<256x256xf32>
    %15 = vector.extract_strided_slice %1 {offsets = [2, 0], sizes = [256, 256], strides = [1, 1]} : vector<258x258xf32> to vector<256x256xf32>
    %16 = arith.addf %14, %15 : vector<256x256xf32>
    %17 = vector.extract_strided_slice %1 {offsets = [2, 1], sizes = [256, 256], strides = [1, 1]} : vector<258x258xf32> to vector<256x256xf32>
    %18 = arith.addf %16, %17 : vector<256x256xf32>
    %19 = vector.extract_strided_slice %1 {offsets = [2, 2], sizes = [256, 256], strides = [1, 1]} : vector<258x258xf32> to vector<256x256xf32>
    %20 = arith.addf %18, %19 : vector<256x256xf32>
    %cst_2 = arith.constant 0.000000e+00 : f32
    %21 = vector.broadcast %cst_2 : f32 to vector<256x256xf32>
    %22 = arith.cmpf ogt, %20, %21 : vector<256x256xf32>
    %23 = arith.extui %22 : vector<256x256xi1> to vector<256x256xi32>
    %24 = arith.sitofp %23 : vector<256x256xi32> to vector<256x256xf32>
    %c0_3 = arith.constant 0 : index
    %c0_4 = arith.constant 0 : index
    %c0_5 = arith.constant 0 : index
    %25 = vector.load %arg2[%c0_3, %c0_4, %c0_5] : memref<1x256x256xf32, #tpu.memory_space<vmem>>, vector<1x256x256xf32>
    %26 = vector.shape_cast %25 : vector<1x256x256xf32> to vector<256x256xf32>
    %27 = vector.shape_cast %24 : vector<256x256xf32> to vector<1x256x256xf32>
    tpu.vector_store %arg2[%c0_3, %c0_4, %c0_5], %27 {strides = array<i32>} : memref<1x256x256xf32, #tpu.memory_space<vmem>>, vector<1x256x256xf32>,
    return
  }
  func.func @transform_0(%arg0: i32) -> (i32, i32, i32) {
    %c0_i32 = arith.constant 0 : i32
    %c0_i32_0 = arith.constant 0 : i32
    %c0_i32_1 = arith.constant 0 : i32
    return %arg0, %c0_i32, %c0_i32_0 : i32, i32, i32
  }
  func.func @transform_1(%arg0: i32) -> (i32, i32, i32) {
    %c0_i32 = arith.constant 0 : i32
    %c0_i32_0 = arith.constant 0 : i32
    %c0_i32_1 = arith.constant 0 : i32
    return %arg0, %c0_i32, %c0_i32_0 : i32, i32, i32
  }
}

</mosaic_0001>

<bundles_post_ra>
// kernel: tpu_custom_call.1
= control target key start
LH: loop header
LB: loop body
LE: loop exit
PB: predicated region body
PF: predicated region fallthrough
CT: control target
= control target key end

     0   :  { %s3734_s10 = smov 127   ;;  %s9277_s0 = inlined_call_operand.vmem [shape: f32[1,258,258], index: 0, kind: input, shape index: {}]   ;;  %s9278_s1 = inlined_call_operand.hbm [shape: f32[1,256,256], index: 1, kind: output, shape index: {}]  }
   0x1   :  { %v3753_v0 = vld [vmem:[%s9277_s0 + $0x10] sm:$0xff]  ;;  %v3758_v1 = vld [vmem:[%s9277_s0] sm:$0xff]  ;;  %v3767_v2 = vld [vmem:[%s9277_s0 + $0x18] sm:$0xff] }
   0x2   :  { %272 = vrot.lane.b32.xlu1 %v3753_v0, %s3734_s10  ;;  %268 = vrot.lane.b32.xlu0 %v3758_v1, %s3734_s10  ;;  %v3772_v3 = vld [vmem:[%s9277_s0 + $0x8] sm:$0xff]  ;;  %v3786_v5 = vld [vmem:[%s9277_s0 + $0x20] sm:$0xff] }
   0x3   :  { %v3781_v4 = vld [vmem:[%s9277_s0 + $0x28] sm:$0xff]  ;;  %v3795_v6 = vld [vmem:[%s9277_s0 + $0x38] sm:$0xff]  ;;  %v3800_v7 = vld [vmem:[%s9277_s0 + $0x30] sm:$0xff] }
   0x4   :  { %v3809_v8 = vld [vmem:[%s9277_s0 + $0x48] sm:$0xff]  ;;  %v3814_v9 = vld [vmem:[%s9277_s0 + $0x40] sm:$0xff]  ;;  %v3823_v10 = vld [vmem:[%s9277_s0 + $0x58] sm:$0xff] }
   0x5   :  { %v3828_v11 = vld [vmem:[%s9277_s0 + $0x50] sm:$0xff]  ;;  %v3837_v12 = vld [vmem:[%s9277_s0 + $0x68] sm:$0xff]  ;;  %v3842_v13 = vld [vmem:[%s9277_s0 + $0x60] sm:$0xff] }
   0x6   :  { %274 = vrot.lane.b32.xlu1 %v3767_v2, %s3734_s10  ;;  %270 = vrot.lane.b32.xlu0 %v3772_v3, %s3734_s10  ;;  %v3851_v14 = vld [vmem:[%s9277_s0 + $0x78] sm:$0xff]  ;;  %v3856_v15 = vld [vmem:[%s9277_s0 + $0x70] sm:$0xff] }
   0x7   :  { %v3865_v16 = vld [vmem:[%s9277_s0 + $0x88] sm:$0xff]  ;;  %v3870_v17 = vld [vmem:[%s9277_s0 + $0x80] sm:$0xff] }
   0xa   :  { %278 = vrot.lane.b32.xlu1 %v3781_v4, %s3734_s10  ;;  %276 = vrot.lane.b32.xlu0 %v3786_v5, %s3734_s10 }
   0xe   :  { %282 = vrot.lane.b32.xlu1 %v3795_v6, %s3734_s10  ;;  %280 = vrot.lane.b32.xlu0 %v3800_v7, %s3734_s10 }
  0x12   :  { %286 = vrot.lane.b32.xlu1 %v3809_v8, %s3734_s10  ;;  %284 = vrot.lane.b32.xlu0 %v3814_v9, %s3734_s10 }
  0x16   :  { %290 = vrot.lane.b32.xlu1 %v3823_v10, %s3734_s10  ;;  %288 = vrot.lane.b32.xlu0 %v3828_v11, %s3734_s10 }
  0x1a   :  { %294 = vrot.lane.b32.xlu1 %v3837_v12, %s3734_s10  ;;  %292 = vrot.lane.b32.xlu0 %v3842_v13, %s3734_s10 }
  0x1e   :  { %298 = vrot.lane.b32.xlu1 %v3851_v14, %s3734_s10  ;;  %296 = vrot.lane.b32.xlu0 %v3856_v15, %s3734_s10 }
  0x1f   :  { %6 = vsyncpa [#allocation3], 0  ;;  %v3879_v18 = vld [vmem:[%s9277_s0 + $0x98] sm:$0xff]  ;;  %v3884_v19 = vld [vmem:[%s9277_s0 + $0x90] sm:$0xff]  ;;  %s3735_s2 = smov 126   ;;  %vm1040_vm0 = vcmask 1046528  }
  0x20   :  { %v3893_v20 = vld [vmem:[%s9277_s0 + $0xa8] sm:$0xff]  ;;  %v3898_v21 = vld [vmem:[%s9277_s0 + $0xa0] sm:$0xff]  ;;  %v3907_v22 = vld [vmem:[%s9277_s0 + $0xb8] sm:$0xff]  ;;  %vm2133_vm1 = vcmask 1045504   ;;  %vm460_vm2 = vcmask 1039360   ;;  %vm845_vm3 = vcmask 1031168  }
  0x21   :  { %v3912_v23 = vld [vmem:[%s9277_s0 + $0xb0] sm:$0xff]  ;;  %v3921_v24 = vld [vmem:[%s9277_s0 + $0xc8] sm:$0xff]  ;;  %v3926_v25 = vld [vmem:[%s9277_s0 + $0xc0] sm:$0xff] }
  0x22   :  { %302 = vrot.lane.b32.xlu1 %v3865_v16, %s3734_s10  ;;  %300 = vrot.lane.b32.xlu0 %v3870_v17, %s3734_s10  ;;  %v3935_v26 = vld [vmem:[%s9277_s0 + $0xd8] sm:$0xff]  ;;  %v3940_v27 = vld [vmem:[%s9277_s0 + $0xd0] sm:$0xff] }
  0x23   :  { %v3949_v28 = vld [vmem:[%s9277_s0 + $0xe8] sm:$0xff]  ;;  %v3954_v29 = vld [vmem:[%s9277_s0 + $0xe0] sm:$0xff]  ;;  %v3963_v30 = vld [vmem:[%s9277_s0 + $0xf8] sm:$0xff] }
  0x24   :  { %v3968_v31 = vld [vmem:[%s9277_s0 + $0xf0] sm:$0xff]  ;;  %v3977_v32 = vld [vmem:[%s9277_s0 + $0x108] sm:$0xff]  ;;  %v3982_v33 = vld [vmem:[%s9277_s0 + $0x100] sm:$0xff] }
  0x25   :  { %v3991_v34 = vld [vmem:[%s9277_s0 + $0x118] sm:$0xff]  ;;  %v3996_v35 = vld [vmem:[%s9277_s0 + $0x110] sm:$0xff]  ;;  %v4005_v36 = vld [vmem:[%s9277_s0 + $0x128] sm:$0xff] }
  0x26   :  { %306 = vrot.lane.b32.xlu1 %v3879_v18, %s3734_s10  ;;  %304 = vrot.lane.b32.xlu0 %v3884_v19, %s3734_s10  ;;  %v4010_v37 = vld [vmem:[%s9277_s0 + $0x120] sm:$0xff]  ;;  %v4019_v38 = vld [vmem:[%s9277_s0 + $0x138] sm:$0xff] }
  0x27   :  { %v4024_v39 = vld [vmem:[%s9277_s0 + $0x130] sm:$0xff]  ;;  %v4033_v40 = vld [vmem:[%s9277_s0 + $0x148] sm:$0xff]  ;;  %v4038_v41 = vld [vmem:[%s9277_s0 + $0x140] sm:$0xff] }
  0x28   :  { %v4047_v42 = vld [vmem:[%s9277_s0 + $0x158] sm:$0xff]  ;;  %v4052_v43 = vld [vmem:[%s9277_s0 + $0x150] sm:$0xff]  ;;  %v4061_v44 = vld [vmem:[%s9277_s0 + $0x168] sm:$0xff] }
  0x29   :  { %v4066_v45 = vld [vmem:[%s9277_s0 + $0x160] sm:$0xff]  ;;  %v4075_v46 = vld [vmem:[%s9277_s0 + $0x178] sm:$0xff]  ;;  %v4080_v47 = vld [vmem:[%s9277_s0 + $0x170] sm:$0xff] }
  0x2a   :  { %310 = vrot.lane.b32.xlu1 %v3893_v20, %s3734_s10  ;;  %308 = vrot.lane.b32.xlu0 %v3898_v21, %s3734_s10  ;;  %v4089_v48 = vld [vmem:[%s9277_s0 + $0x188] sm:$0xff]  ;;  %v4094_v49 = vld [vmem:[%s9277_s0 + $0x180] sm:$0xff] }
  0x2b   :  { %v4103_v50 = vld [vmem:[%s9277_s0 + $0x198] sm:$0xff]  ;;  %v4108_v51 = vld [vmem:[%s9277_s0 + $0x190] sm:$0xff]  ;;  %v4117_v52 = vld [vmem:[%s9277_s0 + $0x1a8] sm:$0xff] }
  0x2c   :  { %v4122_v53 = vld [vmem:[%s9277_s0 + $0x1a0] sm:$0xff]  ;;  %v4131_v54 = vld [vmem:[%s9277_s0 + $0x1b8] sm:$0xff]  ;;  %v4136_v55 = vld [vmem:[%s9277_s0 + $0x1b0] sm:$0xff] }
  0x2d   :  { %v4145_v56 = vld [vmem:[%s9277_s0 + $0x1c8] sm:$0xff]  ;;  %v4150_v57 = vld [vmem:[%s9277_s0 + $0x1c0] sm:$0xff]  ;;  %v4159_v58 = vld [vmem:[%s9277_s0 + $0x1d8] sm:$0xff] }
  0x2e   :  { %314 = vrot.lane.b32.xlu1 %v3907_v22, %s3734_s10  ;;  %312 = vrot.lane.b32.xlu0 %v3912_v23, %s3734_s10  ;;  %9757 = vst [vmem:[#allocation5_spill] sm:$0xff] %v4150_v57  ;;  %9758 = vst [vmem:[#allocation6_spill] sm:$0xff] %v4159_v58  ;;  %v4164_v59 = vld [vmem:[%s9277_s0 + $0x1d0] sm:$0xff]  ;;  %v4177_v62 = vld [vmem:[%s9277_s0 + $0x1e8] sm:$0xff] }
  0x2f   :  { %9759 = vst [vmem:[#allocation7_spill] sm:$0xff] %v4164_v59  ;;  %9762 = vst [vmem:[#allocation10_spill] sm:$0xff] %v4177_v62  ;;  %v4182_v63 = vld [vmem:[%s9277_s0 + $0x1e0] sm:$0xff] }
  0x30   :  { %9763 = vst [vmem:[#allocation11_spill] sm:$0xff] %v4182_v63 }
  0x32   :  { %318 = vrot.lane.b32.xlu1 %v3921_v24, %s3734_s10  ;;  %316 = vrot.lane.b32.xlu0 %v3926_v25, %s3734_s10 }
  0x36   :  { %322 = vrot.lane.b32.xlu1 %v3935_v26, %s3734_s10  ;;  %320 = vrot.lane.b32.xlu0 %v3940_v27, %s3734_s10 }
  0x3a   :  { %326 = vrot.lane.b32.xlu1 %v3949_v28, %s3734_s10  ;;  %324 = vrot.lane.b32.xlu0 %v3954_v29, %s3734_s10 }
  0x3e   :  { %330 = vrot.lane.b32.xlu1 %v3963_v30, %s3734_s10  ;;  %328 = vrot.lane.b32.xlu0 %v3968_v31, %s3734_s10 }
  0x42   :  { %334 = vrot.lane.b32.xlu1 %v3977_v32, %s3734_s10  ;;  %332 = vrot.lane.b32.xlu0 %v3982_v33, %s3734_s10 }
  0x46   :  { %338 = vrot.lane.b32.xlu1 %v3991_v34, %s3734_s10  ;;  %336 = vrot.lane.b32.xlu0 %v3996_v35, %s3734_s10 }
  0x4a   :  { %342 = vrot.lane.b32.xlu1 %v4005_v36, %s3734_s10  ;;  %340 = vrot.lane.b32.xlu0 %v4010_v37, %s3734_s10 }
  0x4e   :  { %346 = vrot.lane.b32.xlu1 %v4019_v38, %s3734_s10  ;;  %344 = vrot.lane.b32.xlu0 %v4024_v39, %s3734_s10 }
  0x52   :  { %350 = vrot.lane.b32.xlu1 %v4033_v40, %s3734_s10  ;;  %348 = vrot.lane.b32.xlu0 %v4038_v41, %s3734_s10 }
  0x56   :  { %354 = vrot.lane.b32.xlu1 %v4047_v42, %s3734_s10  ;;  %352 = vrot.lane.b32.xlu0 %v4052_v43, %s3734_s10 }
  0x5a   :  { %358 = vrot.lane.b32.xlu1 %v4061_v44, %s3734_s10  ;;  %356 = vrot.lane.b32.xlu0 %v4066_v45, %s3734_s10 }
  0x5e   :  { %362 = vrot.lane.b32.xlu1 %v4075_v46, %s3734_s10  ;;  %360 = vrot.lane.b32.xlu0 %v4080_v47, %s3734_s10 }
  0x62   :  { %366 = vrot.lane.b32.xlu1 %v4089_v48, %s3734_s10  ;;  %364 = vrot.lane.b32.xlu0 %v4094_v49, %s3734_s10 }
  0x66   :  { %370 = vrot.lane.b32.xlu1 %v4103_v50, %s3734_s10  ;;  %368 = vrot.lane.b32.xlu0 %v4108_v51, %s3734_s10 }
  0x6a   :  { %374 = vrot.lane.b32.xlu1 %v4117_v52, %s3734_s10  ;;  %372 = vrot.lane.b32.xlu0 %v4122_v53, %s3734_s10 }
  0x6e   :  { %378 = vrot.lane.b32.xlu1 %v4131_v54, %s3734_s10  ;;  %376 = vrot.lane.b32.xlu0 %v4136_v55, %s3734_s10 }
  0x72   :  { %382 = vrot.lane.b32.xlu1 %v4145_v56, %s3734_s10  ;;  %380 = vrot.lane.b32.xlu0 %v4150_v57, %s3734_s10 }
  0x74   :  { %v4166_v60 = vpop.permute.xlu1 %272  ;;  %v4168_v61 = vpop.permute.xlu0 %268 }
  0x75   :  { %9760 = vst [vmem:[#allocation8_spill] sm:$0xff] %v4166_v60  ;;  %9761 = vst [vmem:[#allocation9_spill] sm:$0xff] %v4168_v61  ;;  %v4195_v61 = vld [vmem:[%s9277_s0 + $0x1f8] sm:$0xff] }
  0x76   :  { %386 = vrot.lane.b32.xlu1 %v4159_v58, %s3734_s10  ;;  %384 = vrot.lane.b32.xlu0 %v4164_v59, %s3734_s10  ;;  %9766 = vst [vmem:[#allocation14_spill] sm:$0xff] %v4195_v61  ;;  %v4200_v59 = vld [vmem:[%s9277_s0 + $0x1f0] sm:$0xff] }
  0x77   :  { %9767 = vst [vmem:[#allocation15_spill] sm:$0xff] %v4200_v59 }
  0x78   :  { %v4184_v57 = vpop.permute.xlu1 %274  ;;  %v4186_v60 = vpop.permute.xlu0 %270 }
  0x79   :  { %9764 = vst [vmem:[#allocation12_spill] sm:$0xff] %v4184_v57  ;;  %9765 = vst [vmem:[#allocation13_spill] sm:$0xff] %v4186_v60  ;;  %v4213_v60 = vld [vmem:[%s9277_s0 + $0x208] sm:$0xff] }
  0x7a   :  { %390 = vrot.lane.b32.xlu1 %v4177_v62, %s3734_s10  ;;  %388 = vrot.lane.b32.xlu0 %v4182_v63, %s3734_s10  ;;  %9770 = vst [vmem:[#allocation18_spill] sm:$0xff] %v4213_v60  ;;  %v4218_v63 = vld [vmem:[%s9277_s0 + $0x200] sm:$0xff] }
  0x7b   :  { %9771 = vst [vmem:[#allocation19_spill] sm:$0xff] %v4218_v63 }
  0x7c   :  { %v4202_v58 = vpop.permute.xlu1 %278  ;;  %v4204_v57 = vpop.permute.xlu0 %276 }
  0x7d   :  { %9768 = vst [vmem:[#allocation16_spill] sm:$0xff] %v4202_v58  ;;  %9769 = vst [vmem:[#allocation17_spill] sm:$0xff] %v4204_v57  ;;  %v4231_v57 = vld [vmem:[%s9277_s0 + $0x218] sm:$0xff] }
  0x7e   :  { %394 = vrot.lane.b32.xlu1 %v4195_v61, %s3734_s10  ;;  %392 = vrot.lane.b32.xlu0 %v4200_v59, %s3734_s10  ;;  %9774 = vst [vmem:[#allocation22_spill] sm:$0xff] %v4231_v57  ;;  %v4236_v59 = vld [vmem:[%s9277_s0 + $0x210] sm:$0xff] }
  0x7f   :  { %9775 = vst [vmem:[#allocation23_spill] sm:$0xff] %v4236_v59 }
  0x80   :  { %v4220_v62 = vpop.permute.xlu1 %282  ;;  %v4222_v58 = vpop.permute.xlu0 %280 }
  0x81   :  { %9772 = vst [vmem:[#allocation20_spill] sm:$0xff] %v4220_v62  ;;  %9773 = vst [vmem:[#allocation21_spill] sm:$0xff] %v4222_v58  ;;  %v4249_v58 = vld [vmem:[%s9277_s0 + $0x228] sm:$0xff] }
  0x82   :  { %398 = vrot.lane.b32.xlu1 %v4213_v60, %s3734_s10  ;;  %396 = vrot.lane.b32.xlu0 %v4218_v63, %s3734_s10  ;;  %9778 = vst [vmem:[#allocation26_spill] sm:$0xff] %v4249_v58  ;;  %v4254_v63 = vld [vmem:[%s9277_s0 + $0x220] sm:$0xff] }
  0x83   :  { %9779 = vst [vmem:[#allocation27_spill] sm:$0xff] %v4254_v63 }
  0x84   :  { %v4238_v61 = vpop.permute.xlu1 %286  ;;  %v4240_v62 = vpop.permute.xlu0 %284 }
  0x85   :  { %9776 = vst [vmem:[#allocation24_spill] sm:$0xff] %v4238_v61  ;;  %9777 = vst [vmem:[#allocation25_spill] sm:$0xff] %v4240_v62  ;;  %v4267_v62 = vld [vmem:[%s9277_s0 + $0x238] sm:$0xff] }
  0x86   :  { %402 = vrot.lane.b32.xlu1 %v4231_v57, %s3734_s10  ;;  %400 = vrot.lane.b32.xlu0 %v4236_v59, %s3734_s10  ;;  %9782 = vst [vmem:[#allocation30_spill] sm:$0xff] %v4267_v62  ;;  %v4272_v59 = vld [vmem:[%s9277_s0 + $0x230] sm:$0xff] }
  0x87   :  { %9783 = vst [vmem:[#allocation31_spill] sm:$0xff] %v4272_v59 }
  0x88   :  { %v4256_v60 = vpop.permute.xlu1 %290  ;;  %v4258_v61 = vpop.permute.xlu0 %288 }
  0x89   :  { %9780 = vst [vmem:[#allocation28_spill] sm:$0xff] %v4256_v60  ;;  %9781 = vst [vmem:[#allocation29_spill] sm:$0xff] %v4258_v61  ;;  %v4285_v61 = vld [vmem:[%s9277_s0 + $0x248] sm:$0xff] }
  0x8a   :  { %406 = vrot.lane.b32.xlu1 %v4249_v58, %s3734_s10  ;;  %404 = vrot.lane.b32.xlu0 %v4254_v63, %s3734_s10  ;;  %9786 = vst [vmem:[#allocation34_spill] sm:$0xff] %v4285_v61  ;;  %v4290_v63 = vld [vmem:[%s9277_s0 + $0x240] sm:$0xff] }
  0x8b   :  { %9787 = vst [vmem:[#allocation35_spill] sm:$0xff] %v4290_v63 }
  0x8c   :  { %v4274_v57 = vpop.permute.xlu1 %294  ;;  %v4276_v60 = vpop.permute.xlu0 %292 }
  0x8d   :  { %9784 = vst [vmem:[#allocation32_spill] sm:$0xff] %v4274_v57  ;;  %9785 = vst [vmem:[#allocation33_spill] sm:$0xff] %v4276_v60  ;;  %v4303_v60 = vld [vmem:[%s9277_s0 + $0x258] sm:$0xff] }
  0x8e   :  { %410 = vrot.lane.b32.xlu1 %v4267_v62, %s3734_s10  ;;  %408 = vrot.lane.b32.xlu0 %v4272_v59, %s3734_s10  ;;  %9790 = vst [vmem:[#allocation38_spill] sm:$0xff] %v4303_v60  ;;  %v4308_v59 = vld [vmem:[%s9277_s0 + $0x250] sm:$0xff] }
  0x8f   :  { %9791 = vst [vmem:[#allocation39_spill] sm:$0xff] %v4308_v59 }
  0x90   :  { %v4292_v58 = vpop.permute.xlu1 %298  ;;  %v4294_v57 = vpop.permute.xlu0 %296 }
  0x91   :  { %9788 = vst [vmem:[#allocation36_spill] sm:$0xff] %v4292_v58  ;;  %9789 = vst [vmem:[#allocation37_spill] sm:$0xff] %v4294_v57  ;;  %v4321_v57 = vld [vmem:[%s9277_s0 + $0x268] sm:$0xff] }
  0x92   :  { %414 = vrot.lane.b32.xlu1 %v4285_v61, %s3734_s10  ;;  %412 = vrot.lane.b32.xlu0 %v4290_v63, %s3734_s10  ;;  %9794 = vst [vmem:[#allocation42_spill] sm:$0xff] %v4321_v57  ;;  %v4326_v63 = vld [vmem:[%s9277_s0 + $0x260] sm:$0xff] }
  0x93   :  { %9795 = vst [vmem:[#allocation43_spill] sm:$0xff] %v4326_v63 }
  0x94   :  { %v4310_v62 = vpop.permute.xlu1 %302  ;;  %v4312_v58 = vpop.permute.xlu0 %300 }
  0x95   :  { %9792 = vst [vmem:[#allocation40_spill] sm:$0xff] %v4310_v62  ;;  %9793 = vst [vmem:[#allocation41_spill] sm:$0xff] %v4312_v58  ;;  %v4339_v58 = vld [vmem:[%s9277_s0 + $0x278] sm:$0xff] }
  0x96   :  { %418 = vrot.lane.b32.xlu1 %v4303_v60, %s3734_s10  ;;  %416 = vrot.lane.b32.xlu0 %v4308_v59, %s3734_s10  ;;  %9798 = vst [vmem:[#allocation46_spill] sm:$0xff] %v4339_v58  ;;  %v4344_v59 = vld [vmem:[%s9277_s0 + $0x270] sm:$0xff] }
  0x97   :  { %9799 = vst [vmem:[#allocation47_spill] sm:$0xff] %v4344_v59 }
  0x98   :  { %v4328_v61 = vpop.permute.xlu1 %306  ;;  %v4330_v62 = vpop.permute.xlu0 %304 }
  0x99   :  { %9796 = vst [vmem:[#allocation44_spill] sm:$0xff] %v4328_v61  ;;  %9797 = vst [vmem:[#allocation45_spill] sm:$0xff] %v4330_v62  ;;  %v4357_v62 = vld [vmem:[%s9277_s0 + $0x288] sm:$0xff] }
  0x9a   :  { %422 = vrot.lane.b32.xlu1 %v4321_v57, %s3734_s10  ;;  %420 = vrot.lane.b32.xlu0 %v4326_v63, %s3734_s10  ;;  %9802 = vst [vmem:[#allocation50_spill] sm:$0xff] %v4357_v62  ;;  %v4362_v63 = vld [vmem:[%s9277_s0 + $0x280] sm:$0xff] }
  0x9b   :  { %9803 = vst [vmem:[#allocation51_spill] sm:$0xff] %v4362_v63 }
  0x9c   :  { %v4346_v60 = vpop.permute.xlu1 %310  ;;  %v4348_v61 = vpop.permute.xlu0 %308 }
  0x9d   :  { %9800 = vst [vmem:[#allocation48_spill] sm:$0xff] %v4346_v60  ;;  %9801 = vst [vmem:[#allocation49_spill] sm:$0xff] %v4348_v61  ;;  %v4375_v61 = vld [vmem:[%s9277_s0 + $0x298] sm:$0xff] }
  0x9e   :  { %426 = vrot.lane.b32.xlu1 %v4339_v58, %s3734_s10  ;;  %424 = vrot.lane.b32.xlu0 %v4344_v59, %s3734_s10  ;;  %9806 = vst [vmem:[#allocation54_spill] sm:$0xff] %v4375_v61  ;;  %v4380_v59 = vld [vmem:[%s9277_s0 + $0x290] sm:$0xff] }
  0x9f   :  { %9807 = vst [vmem:[#allocation55_spill] sm:$0xff] %v4380_v59 }
  0xa0   :  { %v4364_v57 = vpop.permute.xlu1 %314  ;;  %v4366_v60 = vpop.permute.xlu0 %312 }
  0xa1   :  { %9804 = vst [vmem:[#allocation52_spill] sm:$0xff] %v4364_v57  ;;  %9805 = vst [vmem:[#allocation53_spill] sm:$0xff] %v4366_v60  ;;  %v4393_v60 = vld [vmem:[%s9277_s0 + $0x2a8] sm:$0xff] }
  0xa2   :  { %430 = vrot.lane.b32.xlu1 %v4357_v62, %s3734_s10  ;;  %428 = vrot.lane.b32.xlu0 %v4362_v63, %s3734_s10  ;;  %9810 = vst [vmem:[#allocation58_spill] sm:$0xff] %v4393_v60  ;;  %v4398_v63 = vld [vmem:[%s9277_s0 + $0x2a0] sm:$0xff] }
  0xa3   :  { %9811 = vst [vmem:[#allocation59_spill] sm:$0xff] %v4398_v63 }
  0xa4   :  { %v4382_v58 = vpop.permute.xlu1 %318  ;;  %v4384_v57 = vpop.permute.xlu0 %316 }
  0xa5   :  { %9808 = vst [vmem:[#allocation56_spill] sm:$0xff] %v4382_v58  ;;  %9809 = vst [vmem:[#allocation57_spill] sm:$0xff] %v4384_v57  ;;  %v4411_v57 = vld [vmem:[%s9277_s0 + $0x2b8] sm:$0xff] }
  0xa6   :  { %434 = vrot.lane.b32.xlu1 %v4375_v61, %s3734_s10  ;;  %432 = vrot.lane.b32.xlu0 %v4380_v59, %s3734_s10  ;;  %9814 = vst [vmem:[#allocation62_spill] sm:$0xff] %v4411_v57  ;;  %v4416_v59 = vld [vmem:[%s9277_s0 + $0x2b0] sm:$0xff] }
  0xa7   :  { %9815 = vst [vmem:[#allocation63_spill] sm:$0xff] %v4416_v59 }
  0xa8   :  { %v4400_v62 = vpop.permute.xlu1 %322  ;;  %v4402_v58 = vpop.permute.xlu0 %320 }
  0xa9   :  { %9812 = vst [vmem:[#allocation60_spill] sm:$0xff] %v4400_v62  ;;  %9813 = vst [vmem:[#allocation61_spill] sm:$0xff] %v4402_v58  ;;  %v4429_v58 = vld [vmem:[%s9277_s0 + $0x2c8] sm:$0xff] }
  0xaa   :  { %438 = vrot.lane.b32.xlu1 %v4393_v60, %s3734_s10  ;;  %436 = vrot.lane.b32.xlu0 %v4398_v63, %s3734_s10  ;;  %9818 = vst [vmem:[#allocation66_spill] sm:$0xff] %v4429_v58  ;;  %v4434_v63 = vld [vmem:[%s9277_s0 + $0x2c0] sm:$0xff] }
  0xab   :  { %9819 = vst [vmem:[#allocation67_spill] sm:$0xff] %v4434_v63 }
  0xac   :  { %v4418_v61 = vpop.permute.xlu1 %326  ;;  %v4420_v62 = vpop.permute.xlu0 %324 }
  0xad   :  { %9816 = vst [vmem:[#allocation64_spill] sm:$0xff] %v4418_v61  ;;  %9817 = vst [vmem:[#allocation65_spill] sm:$0xff] %v4420_v62  ;;  %v4447_v62 = vld [vmem:[%s9277_s0 + $0x2d8] sm:$0xff] }
  0xae   :  { %442 = vrot.lane.b32.xlu1 %v4411_v57, %s3734_s10  ;;  %440 = vrot.lane.b32.xlu0 %v4416_v59, %s3734_s10  ;;  %9822 = vst [vmem:[#allocation70_spill] sm:$0xff] %v4447_v62  ;;  %v4452_v59 = vld [vmem:[%s9277_s0 + $0x2d0] sm:$0xff] }
  0xaf   :  { %9823 = vst [vmem:[#allocation71_spill] sm:$0xff] %v4452_v59 }
  0xb0   :  { %v4436_v60 = vpop.permute.xlu1 %330  ;;  %v4438_v61 = vpop.permute.xlu0 %328 }
  0xb1   :  { %9820 = vst [vmem:[#allocation68_spill] sm:$0xff] %v4436_v60  ;;  %9821 = vst [vmem:[#allocation69_spill] sm:$0xff] %v4438_v61  ;;  %v4465_v61 = vld [vmem:[%s9277_s0 + $0x2e8] sm:$0xff] }
  0xb2   :  { %446 = vrot.lane.b32.xlu1 %v4429_v58, %s3734_s10  ;;  %444 = vrot.lane.b32.xlu0 %v4434_v63, %s3734_s10  ;;  %v4470_v63 = vld [vmem:[%s9277_s0 + $0x2e0] sm:$0xff] }
  0xb3   :  { %9826 = vst [vmem:[#allocation74_spill] sm:$0xff] %v4470_v63 }
  0xb4   :  { %v4454_v57 = vpop.permute.xlu1 %334  ;;  %v4456_v60 = vpop.permute.xlu0 %332 }
  0xb5   :  { %9824 = vst [vmem:[#allocation72_spill] sm:$0xff] %v4454_v57  ;;  %9825 = vst [vmem:[#allocation73_spill] sm:$0xff] %v4456_v60  ;;  %v4483_v60 = vld [vmem:[%s9277_s0 + $0x2f8] sm:$0xff] }
  0xb6   :  { %450 = vrot.lane.b32.xlu1 %v4447_v62, %s3734_s10  ;;  %448 = vrot.lane.b32.xlu0 %v4452_v59, %s3734_s10  ;;  %v4488_v59 = vld [vmem:[%s9277_s0 + $0x2f0] sm:$0xff] }
  0xb7   :  { %9829 = vst [vmem:[#allocation77_spill] sm:$0xff] %v4488_v59 }
  0xb8   :  { %v4472_v58 = vpop.permute.xlu1 %338  ;;  %v4474_v57 = vpop.permute.xlu0 %336 }
  0xb9   :  { %9827 = vst [vmem:[#allocation75_spill] sm:$0xff] %v4472_v58  ;;  %9828 = vst [vmem:[#allocation76_spill] sm:$0xff] %v4474_v57 }
  0xba   :  { %454 = vrot.lane.b32.xlu1 %v4465_v61, %s3734_s10  ;;  %452 = vrot.lane.b32.xlu0 %v4470_v63, %s3734_s10 }
  0xbc   :  { %v4490_v62 = vpop.permute.xlu1 %342  ;;  %v4492_v58 = vpop.permute.xlu0 %340 }
  0xbd   :  { %9830 = vst [vmem:[#allocation78_spill] sm:$0xff] %v4490_v62  ;;  %9831 = vst [vmem:[#allocation79_spill] sm:$0xff] %v4492_v58 }
  0xbe   :  { %458 = vrot.lane.b32.xlu1 %v4483_v60, %s3734_s10  ;;  %456 = vrot.lane.b32.xlu0 %v4488_v59, %s3734_s10 }
  0xc0   :  { %v4498_v57 = vpop.permute.xlu1 %346  ;;  %v4500_v63 = vpop.permute.xlu0 %344 }
  0xc1   :  { %9832 = vst [vmem:[#allocation80_spill] sm:$0xff] %v4498_v57  ;;  %9833 = vst [vmem:[#allocation81_spill] sm:$0xff] %v4500_v63 }
  0xc2   :  { %655 = vrot.lane.b32.xlu1 %v3772_v3, %s3735_s2  ;;  %653 = vrot.lane.b32.xlu0 %v3758_v1, %s3735_s2 }
  0xc4   :  { %v4506_v62 = vpop.permute.xlu1 %350  ;;  %v4508_v58 = vpop.permute.xlu0 %348 }
  0xc5   :  { %9834 = vst [vmem:[#allocation82_spill] sm:$0xff] %v4506_v62  ;;  %9835 = vst [vmem:[#allocation83_spill] sm:$0xff] %v4508_v58 }
  0xc6   :  { %659 = vrot.lane.b32.xlu1 %v3767_v2, %s3735_s2  ;;  %657 = vrot.lane.b32.xlu0 %v3753_v0, %s3735_s2 }
  0xc8   :  { %v4514_v57 = vpop.permute.xlu1 %354  ;;  %v4516_v63 = vpop.permute.xlu0 %352 }
  0xc9   :  { %9836 = vst [vmem:[#allocation84_spill] sm:$0xff] %v4514_v57  ;;  %9837 = vst [vmem:[#allocation85_spill] sm:$0xff] %v4516_v63 }
  0xca   :  { %663 = vrot.lane.b32.xlu1 %v3781_v4, %s3735_s2  ;;  %661 = vrot.lane.b32.xlu0 %v3786_v5, %s3735_s2 }
  0xcc   :  { %v4522_v59 = vpop.permute.xlu1 %358  ;;  %v4524_v62 = vpop.permute.xlu0 %356 }
  0xcd   :  { %9838 = vst [vmem:[#allocation86_spill] sm:$0xff] %v4522_v59  ;;  %9839 = vst [vmem:[#allocation87_spill] sm:$0xff] %v4524_v62 }
  0xce   :  { %667 = vrot.lane.b32.xlu1 %v3795_v6, %s3735_s2  ;;  %665 = vrot.lane.b32.xlu0 %v3800_v7, %s3735_s2 }
  0xd0   :  { %v4530_v58 = vpop.permute.xlu1 %362  ;;  %v4532_v57 = vpop.permute.xlu0 %360 }
  0xd1   :  { %9840 = vst [vmem:[#allocation88_spill] sm:$0xff] %v4530_v58  ;;  %9841 = vst [vmem:[#allocation89_spill] sm:$0xff] %v4532_v57 }
  0xd2   :  { %671 = vrot.lane.b32.xlu1 %v3809_v8, %s3735_s2  ;;  %669 = vrot.lane.b32.xlu0 %v3814_v9, %s3735_s2 }
  0xd4   :  { %v4538_v63 = vpop.permute.xlu1 %366  ;;  %v4540_v59 = vpop.permute.xlu0 %364 }
  0xd5   :  { %9842 = vst [vmem:[#allocation90_spill] sm:$0xff] %v4538_v63  ;;  %9843 = vst [vmem:[#allocation91_spill] sm:$0xff] %v4540_v59 }
  0xd6   :  { %675 = vrot.lane.b32.xlu1 %v3823_v10, %s3735_s2  ;;  %673 = vrot.lane.b32.xlu0 %v3828_v11, %s3735_s2 }
  0xd8   :  { %v4546_v62 = vpop.permute.xlu1 %370  ;;  %v4548_v58 = vpop.permute.xlu0 %368 }
  0xd9   :  { %9844 = vst [vmem:[#allocation92_spill] sm:$0xff] %v4546_v62  ;;  %9845 = vst [vmem:[#allocation93_spill] sm:$0xff] %v4548_v58 }
  0xda   :  { %679 = vrot.lane.b32.xlu1 %v3837_v12, %s3735_s2  ;;  %677 = vrot.lane.b32.xlu0 %v3842_v13, %s3735_s2 }
  0xdc   :  { %v4554_v57 = vpop.permute.xlu1 %374  ;;  %v4556_v63 = vpop.permute.xlu0 %372 }
  0xdd   :  { %9846 = vst [vmem:[#allocation94_spill] sm:$0xff] %v4554_v57  ;;  %9847 = vst [vmem:[#allocation95_spill] sm:$0xff] %v4556_v63 }
  0xde   :  { %683 = vrot.lane.b32.xlu1 %v3851_v14, %s3735_s2  ;;  %681 = vrot.lane.b32.xlu0 %v3856_v15, %s3735_s2 }
  0xe0   :  { %v4562_v59 = vpop.permute.xlu1 %378  ;;  %v4564_v62 = vpop.permute.xlu0 %376 }
  0xe1   :  { %9848 = vst [vmem:[#allocation96_spill] sm:$0xff] %v4562_v59  ;;  %9849 = vst [vmem:[#allocation97_spill] sm:$0xff] %v4564_v62 }
  0xe2   :  { %687 = vrot.lane.b32.xlu1 %v3865_v16, %s3735_s2  ;;  %685 = vrot.lane.b32.xlu0 %v3870_v17, %s3735_s2 }
  0xe4   :  { %v4570_v58 = vpop.permute.xlu1 %382  ;;  %v4572_v57 = vpop.permute.xlu0 %380 }
  0xe5   :  { %9850 = vst [vmem:[#allocation98_spill] sm:$0xff] %v4570_v58  ;;  %9851 = vst [vmem:[#allocation99_spill] sm:$0xff] %v4572_v57 }
  0xe6   :  { %691 = vrot.lane.b32.xlu1 %v3879_v18, %s3735_s2  ;;  %689 = vrot.lane.b32.xlu0 %v3884_v19, %s3735_s2 }
  0xe8   :  { %v4578_v63 = vpop.permute.xlu1 %386  ;;  %v4580_v59 = vpop.permute.xlu0 %384 }
  0xe9   :  { %9852 = vst [vmem:[#allocation100_spill] sm:$0xff] %v4578_v63  ;;  %9853 = vst [vmem:[#allocation101_spill] sm:$0xff] %v4580_v59 }
  0xea   :  { %695 = vrot.lane.b32.xlu1 %v3893_v20, %s3735_s2  ;;  %693 = vrot.lane.b32.xlu0 %v3898_v21, %s3735_s2 }
  0xec   :  { %v4586_v62 = vpop.permute.xlu1 %390  ;;  %v4588_v58 = vpop.permute.xlu0 %388 }
  0xed   :  { %9854 = vst [vmem:[#allocation102_spill] sm:$0xff] %v4586_v62  ;;  %9855 = vst [vmem:[#allocation103_spill] sm:$0xff] %v4588_v58 }
  0xee   :  { %699 = vrot.lane.b32.xlu1 %v3907_v22, %s3735_s2  ;;  %697 = vrot.lane.b32.xlu0 %v3912_v23, %s3735_s2 }
  0xf0   :  { %v4594_v57 = vpop.permute.xlu1 %394  ;;  %v4596_v63 = vpop.permute.xlu0 %392 }
  0xf1   :  { %9856 = vst [vmem:[#allocation104_spill] sm:$0xff] %v4594_v57  ;;  %9857 = vst [vmem:[#allocation105_spill] sm:$0xff] %v4596_v63 }
  0xf2   :  { %703 = vrot.lane.b32.xlu1 %v3921_v24, %s3735_s2  ;;  %701 = vrot.lane.b32.xlu0 %v3926_v25, %s3735_s2 }
  0xf4   :  { %v4602_v59 = vpop.permute.xlu1 %398  ;;  %v4604_v62 = vpop.permute.xlu0 %396 }
  0xf5   :  { %9858 = vst [vmem:[#allocation106_spill] sm:$0xff] %v4602_v59  ;;  %9859 = vst [vmem:[#allocation107_spill] sm:$0xff] %v4604_v62 }
  0xf6   :  { %707 = vrot.lane.b32.xlu1 %v3935_v26, %s3735_s2  ;;  %705 = vrot.lane.b32.xlu0 %v3940_v27, %s3735_s2 }
  0xf8   :  { %v4610_v58 = vpop.permute.xlu1 %402  ;;  %v4612_v57 = vpop.permute.xlu0 %400 }
  0xf9   :  { %9860 = vst [vmem:[#allocation108_spill] sm:$0xff] %v4610_v58  ;;  %9861 = vst [vmem:[#allocation109_spill] sm:$0xff] %v4612_v57 }
  0xfa   :  { %711 = vrot.lane.b32.xlu1 %v3949_v28, %s3735_s2  ;;  %709 = vrot.lane.b32.xlu0 %v3954_v29, %s3735_s2 }
  0xfc   :  { %v4618_v63 = vpop.permute.xlu1 %406  ;;  %v4620_v59 = vpop.permute.xlu0 %404 }
  0xfd   :  { %9862 = vst [vmem:[#allocation110_spill] sm:$0xff] %v4618_v63  ;;  %9863 = vst [vmem:[#allocation111_spill] sm:$0xff] %v4620_v59 }
  0xfe   :  { %715 = vrot.lane.b32.xlu1 %v3963_v30, %s3735_s2  ;;  %713 = vrot.lane.b32.xlu0 %v3968_v31, %s3735_s2 }
 0x100   :  { %v4626_v62 = vpop.permute.xlu1 %410  ;;  %v4628_v58 = vpop.permute.xlu0 %408 }
 0x101   :  { %9864 = vst [vmem:[#allocation112_spill] sm:$0xff] %v4626_v62  ;;  %9865 = vst [vmem:[#allocation113_spill] sm:$0xff] %v4628_v58 }
 0x102   :  { %719 = vrot.lane.b32.xlu1 %v3977_v32, %s3735_s2  ;;  %717 = vrot.lane.b32.xlu0 %v3982_v33, %s3735_s2 }
 0x104   :  { %v4634_v57 = vpop.permute.xlu1 %414  ;;  %v4636_v63 = vpop.permute.xlu0 %412 }
 0x105   :  { %9866 = vst [vmem:[#allocation114_spill] sm:$0xff] %v4634_v57  ;;  %9867 = vst [vmem:[#allocation115_spill] sm:$0xff] %v4636_v63 }
 0x106   :  { %723 = vrot.lane.b32.xlu1 %v3991_v34, %s3735_s2  ;;  %721 = vrot.lane.b32.xlu0 %v3996_v35, %s3735_s2 }
 0x108   :  { %v4642_v59 = vpop.permute.xlu1 %418  ;;  %v4644_v62 = vpop.permute.xlu0 %416 }
 0x109   :  { %9868 = vst [vmem:[#allocation116_spill] sm:$0xff] %v4642_v59  ;;  %9869 = vst [vmem:[#allocation117_spill] sm:$0xff] %v4644_v62 }
 0x10a   :  { %727 = vrot.lane.b32.xlu1 %v4005_v36, %s3735_s2  ;;  %725 = vrot.lane.b32.xlu0 %v4010_v37, %s3735_s2 }
 0x10c   :  { %v4650_v58 = vpop.permute.xlu1 %422  ;;  %v4652_v57 = vpop.permute.xlu0 %420 }
 0x10d   :  { %9870 = vst [vmem:[#allocation118_spill] sm:$0xff] %v4650_v58  ;;  %9871 = vst [vmem:[#allocation119_spill] sm:$0xff] %v4652_v57 }
 0x10e   :  { %731 = vrot.lane.b32.xlu1 %v4019_v38, %s3735_s2  ;;  %729 = vrot.lane.b32.xlu0 %v4024_v39, %s3735_s2 }
 0x110   :  { %v4658_v63 = vpop.permute.xlu1 %426  ;;  %v4660_v59 = vpop.permute.xlu0 %424 }
 0x111   :  { %9872 = vst [vmem:[#allocation120_spill] sm:$0xff] %v4658_v63  ;;  %9873 = vst [vmem:[#allocation121_spill] sm:$0xff] %v4660_v59 }
 0x112   :  { %735 = vrot.lane.b32.xlu1 %v4033_v40, %s3735_s2  ;;  %733 = vrot.lane.b32.xlu0 %v4038_v41, %s3735_s2 }
 0x114   :  { %v4666_v62 = vpop.permute.xlu1 %430  ;;  %v4668_v58 = vpop.permute.xlu0 %428 }
 0x115   :  { %9874 = vst [vmem:[#allocation122_spill] sm:$0xff] %v4666_v62  ;;  %9875 = vst [vmem:[#allocation123_spill] sm:$0xff] %v4668_v58 }
 0x116   :  { %739 = vrot.lane.b32.xlu1 %v4047_v42, %s3735_s2  ;;  %737 = vrot.lane.b32.xlu0 %v4052_v43, %s3735_s2 }
 0x118   :  { %v4674_v57 = vpop.permute.xlu1 %434  ;;  %v4676_v63 = vpop.permute.xlu0 %432 }
 0x119   :  { %9876 = vst [vmem:[#allocation124_spill] sm:$0xff] %v4674_v57  ;;  %9877 = vst [vmem:[#allocation125_spill] sm:$0xff] %v4676_v63 }
 0x11a   :  { %743 = vrot.lane.b32.xlu1 %v4061_v44, %s3735_s2  ;;  %741 = vrot.lane.b32.xlu0 %v4066_v45, %s3735_s2 }
 0x11c   :  { %v4682_v59 = vpop.permute.xlu1 %438  ;;  %v4684_v62 = vpop.permute.xlu0 %436 }
 0x11d   :  { %9878 = vst [vmem:[#allocation126_spill] sm:$0xff] %v4682_v59  ;;  %9879 = vst [vmem:[#allocation127_spill] sm:$0xff] %v4684_v62 }
 0x11e   :  { %747 = vrot.lane.b32.xlu1 %v4075_v46, %s3735_s2  ;;  %745 = vrot.lane.b32.xlu0 %v4080_v47, %s3735_s2 }
 0x120   :  { %v4690_v58 = vpop.permute.xlu1 %442  ;;  %v4692_v57 = vpop.permute.xlu0 %440 }
 0x121   :  { %9880 = vst [vmem:[#allocation128_spill] sm:$0xff] %v4690_v58  ;;  %9881 = vst [vmem:[#allocation129_spill] sm:$0xff] %v4692_v57  ;;  %v3575_v57 = vld [vmem:[%s9277_s0 + $0x1c8] sm:$0xff] }
 0x122   :  { %751 = vrot.lane.b32.xlu1 %v4089_v48, %s3735_s2  ;;  %749 = vrot.lane.b32.xlu0 %v4094_v49, %s3735_s2 }
 0x124   :  { %v4698_v63 = vpop.permute.xlu1 %446  ;;  %v4700_v59 = vpop.permute.xlu0 %444 }
 0x125   :  { %9882 = vst [vmem:[#allocation130_spill] sm:$0xff] %v4698_v63  ;;  %9883 = vst [vmem:[#allocation131_spill] sm:$0xff] %v4700_v59 }
 0x126   :  { %755 = vrot.lane.b32.xlu1 %v4103_v50, %s3735_s2  ;;  %753 = vrot.lane.b32.xlu0 %v4108_v51, %s3735_s2 }
 0x128   :  { %v4706_v62 = vpop.permute.xlu1 %450  ;;  %v4708_v58 = vpop.permute.xlu0 %448 }
 0x129   :  { %9884 = vst [vmem:[#allocation132_spill] sm:$0xff] %v4706_v62  ;;  %9885 = vst [vmem:[#allocation133_spill] sm:$0xff] %v4708_v58 }
 0x12a   :  { %759 = vrot.lane.b32.xlu1 %v4117_v52, %s3735_s2  ;;  %757 = vrot.lane.b32.xlu0 %v4122_v53, %s3735_s2  ;;  %v9890_v52 = vld [vmem:[#allocation5_spill] sm:$0xff] }
 0x12c   :  { %v4714_v48 = vpop.permute.xlu1 %454  ;;  %v4716_v63 = vpop.permute.xlu0 %452 }
 0x12d   :  { %9886 = vst [vmem:[#allocation134_spill] sm:$0xff] %v4714_v48  ;;  %9887 = vst [vmem:[#allocation135_spill] sm:$0xff] %v4716_v63  ;;  %v9893_v63 = vld [vmem:[#allocation6_spill] sm:$0xff] }
 0x12e   :  { %763 = vrot.lane.b32.xlu1 %v4131_v54, %s3735_s2  ;;  %761 = vrot.lane.b32.xlu0 %v4136_v55, %s3735_s2  ;;  %v9894_v54 = vld [vmem:[#allocation7_spill] sm:$0xff] }
 0x130   :  { %v4722_v50 = vpop.permute.xlu1 %458  ;;  %v4724_v62 = vpop.permute.xlu0 %456 }
 0x131   :  { %9888 = vst [vmem:[#allocation136_spill] sm:$0xff] %v4722_v50  ;;  %9889 = vst [vmem:[#allocation137_spill] sm:$0xff] %v4724_v62  ;;  %v9897_v62 = vld [vmem:[#allocation10_spill] sm:$0xff] }
 0x132   :  { %767 = vrot.lane.b32.xlu1 %v4145_v56, %s3735_s2  ;;  %765 = vrot.lane.b32.xlu0 %v9890_v52, %s3735_s2  ;;  %v9898_v56 = vld [vmem:[#allocation11_spill] sm:$0xff] }
 0x134   :  { %v4730_v53 = vpop.permute.xlu1 %655  ;;  %v4732_v48 = vpop.permute.xlu0 %653 }
 0x135   :  { %9891 = vst [vmem:[#allocation5_spill] sm:$0xff] %v4730_v53  ;;  %9892 = vst [vmem:[#allocation138_spill] sm:$0xff] %v4732_v48  ;;  %v9901_v48 = vld [vmem:[#allocation14_spill] sm:$0xff]  ;;  %v3573_v53 = vld [vmem:[%s9277_s0 + $0x1b8] sm:$0xff] }
 0x136   :  { %771 = vrot.lane.b32.xlu1 %v9893_v63, %s3735_s2  ;;  %769 = vrot.lane.b32.xlu0 %v9894_v54, %s3735_s2  ;;  %v9902_v63 = vld [vmem:[#allocation15_spill] sm:$0xff]  ;;  %v1113_v59 = vrot.slane %v3573_v53, 1 }
 0x137   :  { %v3574_v53 = vld [vmem:[%s9277_s0 + $0x1d0] sm:$0xff] }
 0x138   :  { %v4738_v55 = vpop.permute.xlu1 %659  ;;  %v4740_v50 = vpop.permute.xlu0 %657 }
 0x139   :  { %9895 = vst [vmem:[#allocation6_spill] sm:$0xff] %v4738_v55  ;;  %9896 = vst [vmem:[#allocation7_spill] sm:$0xff] %v4740_v50  ;;  %v9905_v50 = vld [vmem:[#allocation18_spill] sm:$0xff] }
 0x13a   :  { %775 = vrot.lane.b32.xlu1 %v9897_v62, %s3735_s2  ;;  %773 = vrot.lane.b32.xlu0 %v9898_v56, %s3735_s2  ;;  %v9906_v62 = vld [vmem:[#allocation19_spill] sm:$0xff] }
 0x13c   :  { %v4746_v52 = vpop.permute.xlu1 %663  ;;  %v4748_v58 = vpop.permute.xlu0 %661 }
 0x13d   :  { %9899 = vst [vmem:[#allocation10_spill] sm:$0xff] %v4746_v52  ;;  %9900 = vst [vmem:[#allocation11_spill] sm:$0xff] %v4748_v58  ;;  %v9909_v58 = vld [vmem:[#allocation22_spill] sm:$0xff] }
 0x13e   :  { %779 = vrot.lane.b32.xlu1 %v9901_v48, %s3735_s2  ;;  %777 = vrot.lane.b32.xlu0 %v9902_v63, %s3735_s2  ;;  %v9910_v48 = vld [vmem:[#allocation23_spill] sm:$0xff] }
 0x140   :  { %v4754_v54 = vpop.permute.xlu1 %667  ;;  %v4756_v55 = vpop.permute.xlu0 %665 }
 0x141   :  { %9903 = vst [vmem:[#allocation14_spill] sm:$0xff] %v4754_v54  ;;  %9904 = vst [vmem:[#allocation15_spill] sm:$0xff] %v4756_v55  ;;  %v9913_v55 = vld [vmem:[#allocation26_spill] sm:$0xff] }
 0x142   :  { %783 = vrot.lane.b32.xlu1 %v9905_v50, %s3735_s2  ;;  %781 = vrot.lane.b32.xlu0 %v9906_v62, %s3735_s2  ;;  %v9914_v50 = vld [vmem:[#allocation27_spill] sm:$0xff] }
 0x144   :  { %v4762_v56 = vpop.permute.xlu1 %671  ;;  %v4764_v52 = vpop.permute.xlu0 %669 }
 0x145   :  { %9907 = vst [vmem:[#allocation18_spill] sm:$0xff] %v4762_v56  ;;  %9908 = vst [vmem:[#allocation19_spill] sm:$0xff] %v4764_v52  ;;  %v9917_v52 = vld [vmem:[#allocation30_spill] sm:$0xff] }
 0x146   :  { %787 = vrot.lane.b32.xlu1 %v9909_v58, %s3735_s2  ;;  %785 = vrot.lane.b32.xlu0 %v9910_v48, %s3735_s2  ;;  %v9918_v58 = vld [vmem:[#allocation31_spill] sm:$0xff] }
 0x148   :  { %v4770_v63 = vpop.permute.xlu1 %675  ;;  %v4772_v54 = vpop.permute.xlu0 %673 }
 0x149   :  { %9911 = vst [vmem:[#allocation22_spill] sm:$0xff] %v4770_v63  ;;  %9912 = vst [vmem:[#allocation23_spill] sm:$0xff] %v4772_v54  ;;  %v9921_v54 = vld [vmem:[#allocation34_spill] sm:$0xff] }
 0x14a   :  { %791 = vrot.lane.b32.xlu1 %v9913_v55, %s3735_s2  ;;  %789 = vrot.lane.b32.xlu0 %v9914_v50, %s3735_s2  ;;  %v9922_v55 = vld [vmem:[#allocation35_spill] sm:$0xff] }
 0x14c   :  { %v4778_v62 = vpop.permute.xlu1 %679  ;;  %v4780_v56 = vpop.permute.xlu0 %677 }
 0x14d   :  { %9915 = vst [vmem:[#allocation26_spill] sm:$0xff] %v4778_v62  ;;  %9916 = vst [vmem:[#allocation27_spill] sm:$0xff] %v4780_v56  ;;  %v9925_v56 = vld [vmem:[#allocation38_spill] sm:$0xff] }
 0x14e   :  { %795 = vrot.lane.b32.xlu1 %v9917_v52, %s3735_s2  ;;  %793 = vrot.lane.b32.xlu0 %v9918_v58, %s3735_s2  ;;  %v9926_v52 = vld [vmem:[#allocation39_spill] sm:$0xff] }
 0x150   :  { %v4786_v48 = vpop.permute.xlu1 %683  ;;  %v4788_v63 = vpop.permute.xlu0 %681 }
 0x151   :  { %9919 = vst [vmem:[#allocation30_spill] sm:$0xff] %v4786_v48  ;;  %9920 = vst [vmem:[#allocation31_spill] sm:$0xff] %v4788_v63  ;;  %v9929_v63 = vld [vmem:[#allocation42_spill] sm:$0xff] }
 0x152   :  { %799 = vrot.lane.b32.xlu1 %v9921_v54, %s3735_s2  ;;  %797 = vrot.lane.b32.xlu0 %v9922_v55, %s3735_s2  ;;  %v9930_v54 = vld [vmem:[#allocation43_spill] sm:$0xff] }
 0x154   :  { %v4794_v50 = vpop.permute.xlu1 %687  ;;  %v4796_v62 = vpop.permute.xlu0 %685 }
 0x155   :  { %9923 = vst [vmem:[#allocation34_spill] sm:$0xff] %v4794_v50  ;;  %9924 = vst [vmem:[#allocation35_spill] sm:$0xff] %v4796_v62  ;;  %v9933_v62 = vld [vmem:[#allocation46_spill] sm:$0xff] }
 0x156   :  { %803 = vrot.lane.b32.xlu1 %v9925_v56, %s3735_s2  ;;  %801 = vrot.lane.b32.xlu0 %v9926_v52, %s3735_s2  ;;  %v9934_v56 = vld [vmem:[#allocation47_spill] sm:$0xff] }
 0x158   :  { %v4802_v58 = vpop.permute.xlu1 %691  ;;  %v4804_v48 = vpop.permute.xlu0 %689 }
 0x159   :  { %9927 = vst [vmem:[#allocation38_spill] sm:$0xff] %v4802_v58  ;;  %9928 = vst [vmem:[#allocation39_spill] sm:$0xff] %v4804_v48  ;;  %v9937_v48 = vld [vmem:[#allocation50_spill] sm:$0xff] }
 0x15a   :  { %807 = vrot.lane.b32.xlu1 %v9929_v63, %s3735_s2  ;;  %805 = vrot.lane.b32.xlu0 %v9930_v54, %s3735_s2  ;;  %v9938_v63 = vld [vmem:[#allocation51_spill] sm:$0xff] }
 0x15c   :  { %v4810_v55 = vpop.permute.xlu1 %695  ;;  %v4812_v50 = vpop.permute.xlu0 %693 }
 0x15d   :  { %9931 = vst [vmem:[#allocation42_spill] sm:$0xff] %v4810_v55  ;;  %9932 = vst [vmem:[#allocation43_spill] sm:$0xff] %v4812_v50  ;;  %v9941_v50 = vld [vmem:[#allocation54_spill] sm:$0xff] }
 0x15e   :  { %811 = vrot.lane.b32.xlu1 %v9933_v62, %s3735_s2  ;;  %809 = vrot.lane.b32.xlu0 %v9934_v56, %s3735_s2  ;;  %v9942_v62 = vld [vmem:[#allocation55_spill] sm:$0xff] }
 0x160   :  { %v4818_v52 = vpop.permute.xlu1 %699  ;;  %v4820_v58 = vpop.permute.xlu0 %697 }
 0x161   :  { %9935 = vst [vmem:[#allocation46_spill] sm:$0xff] %v4818_v52  ;;  %9936 = vst [vmem:[#allocation47_spill] sm:$0xff] %v4820_v58  ;;  %v9945_v58 = vld [vmem:[#allocation58_spill] sm:$0xff] }
 0x162   :  { %815 = vrot.lane.b32.xlu1 %v9937_v48, %s3735_s2  ;;  %813 = vrot.lane.b32.xlu0 %v9938_v63, %s3735_s2  ;;  %v9946_v48 = vld [vmem:[#allocation59_spill] sm:$0xff] }
 0x164   :  { %v4826_v54 = vpop.permute.xlu1 %703  ;;  %v4828_v55 = vpop.permute.xlu0 %701 }
 0x165   :  { %9939 = vst [vmem:[#allocation50_spill] sm:$0xff] %v4826_v54  ;;  %9940 = vst [vmem:[#allocation51_spill] sm:$0xff] %v4828_v55  ;;  %v9949_v55 = vld [vmem:[#allocation62_spill] sm:$0xff] }
 0x166   :  { %819 = vrot.lane.b32.xlu1 %v9941_v50, %s3735_s2  ;;  %817 = vrot.lane.b32.xlu0 %v9942_v62, %s3735_s2  ;;  %v9950_v50 = vld [vmem:[#allocation63_spill] sm:$0xff] }
 0x168   :  { %v4834_v56 = vpop.permute.xlu1 %707  ;;  %v4836_v52 = vpop.permute.xlu0 %705 }
 0x169   :  { %9943 = vst [vmem:[#allocation54_spill] sm:$0xff] %v4834_v56  ;;  %9944 = vst [vmem:[#allocation55_spill] sm:$0xff] %v4836_v52  ;;  %v9953_v52 = vld [vmem:[#allocation66_spill] sm:$0xff] }
 0x16a   :  { %823 = vrot.lane.b32.xlu1 %v9945_v58, %s3735_s2  ;;  %821 = vrot.lane.b32.xlu0 %v9946_v48, %s3735_s2  ;;  %v9954_v58 = vld [vmem:[#allocation67_spill] sm:$0xff] }
 0x16c   :  { %v4842_v63 = vpop.permute.xlu1 %711  ;;  %v4844_v54 = vpop.permute.xlu0 %709 }
 0x16d   :  { %9947 = vst [vmem:[#allocation58_spill] sm:$0xff] %v4842_v63  ;;  %9948 = vst [vmem:[#allocation59_spill] sm:$0xff] %v4844_v54  ;;  %v9957_v54 = vld [vmem:[#allocation70_spill] sm:$0xff] }
 0x16e   :  { %827 = vrot.lane.b32.xlu1 %v9949_v55, %s3735_s2  ;;  %825 = vrot.lane.b32.xlu0 %v9950_v50, %s3735_s2  ;;  %v9958_v55 = vld [vmem:[#allocation71_spill] sm:$0xff] }
 0x170   :  { %v4850_v62 = vpop.permute.xlu1 %715  ;;  %v4852_v56 = vpop.permute.xlu0 %713 }
 0x171   :  { %9951 = vst [vmem:[#allocation62_spill] sm:$0xff] %v4850_v62  ;;  %9952 = vst [vmem:[#allocation63_spill] sm:$0xff] %v4852_v56 }
 0x172   :  { %831 = vrot.lane.b32.xlu1 %v9953_v52, %s3735_s2  ;;  %829 = vrot.lane.b32.xlu0 %v9954_v58, %s3735_s2  ;;  %v9961_v52 = vld [vmem:[#allocation74_spill] sm:$0xff] }
 0x174   :  { %v4858_v48 = vpop.permute.xlu1 %719  ;;  %v4860_v63 = vpop.permute.xlu0 %717 }
 0x175   :  { %9955 = vst [vmem:[#allocation66_spill] sm:$0xff] %v4858_v48  ;;  %9956 = vst [vmem:[#allocation67_spill] sm:$0xff] %v4860_v63  ;;  %v1044_v63 = vrot.slane %v3772_v3, 1 }
 0x176   :  { %835 = vrot.lane.b32.xlu1 %v9957_v54, %s3735_s2  ;;  %833 = vrot.lane.b32.xlu0 %v9958_v55, %s3735_s2  ;;  %v1045_v54 = vrot.slane %v3786_v5, 1  ;;  %v1041_v55 = vrot.slane %v3758_v1, 1 }
 0x178   :  { %v4866_v50 = vpop.permute.xlu1 %723  ;;  %v4868_v62 = vpop.permute.xlu0 %721  ;;  %v4893_v5 = vsel %vm1040_vm0, %v1044_v63, %v1045_v54 }
 0x179   :  { %9959 = vst [vmem:[#allocation70_spill] sm:$0xff] %v4866_v50  ;;  %9960 = vst [vmem:[#allocation71_spill] sm:$0xff] %v4868_v62  ;;  %v1042_v50 = vrot.slane %v3767_v2, 1  ;;  %v1047_v2 = vrot.slane %v3800_v7, 1  ;;  %v1049_v7 = vrot.slane %v3795_v6, 1  ;;  %v1051_v6 = vrot.slane %v3809_v8, 1 }
 0x17a   :  { %839 = vrot.lane.b32.xlu1 %v4465_v61, %s3735_s2  ;;  %837 = vrot.lane.b32.xlu0 %v9961_v52, %s3735_s2  ;;  %v9964_v61 = vld [vmem:[#allocation77_spill] sm:$0xff]  ;;  %v1300_v52 = vrot.slane %v3753_v0, 1  ;;  %9967 = vst [vmem:[#allocation141_spill] sm:$0xff] %v4893_v5  ;;  %v1303_v0 = vrot.slane %v3814_v9, 1  ;;  %v1055_v8 = vrot.slane %v3842_v13, 1  ;;  %v1057_v13 = vrot.slane %v3837_v12, 1 }
 0x17b   :  { %v4896_v1 = vsel %vm1040_vm0, %v1041_v55, %v1042_v50  ;;  %v4912_v55 = vsel %vm1040_vm0, %v1042_v50, %v1047_v2  ;;  %v1053_v50 = vrot.slane %v3828_v11, 1  ;;  %v1059_v12 = vrot.slane %v3851_v14, 1  ;;  %v3571_v62 = vld [vmem:[%s9277_s0 + $0x1b0] sm:$0xff] }
 0x17c   :  { %v4874_v58 = vpop.permute.xlu1 %727  ;;  %v4876_v48 = vpop.permute.xlu0 %725  ;;  %9968 = vst [vmem:[#allocation142_spill] sm:$0xff] %v4896_v1  ;;  %9971 = vst [vmem:[#allocation145_spill] sm:$0xff] %v4912_v55  ;;  %v1063_v14 = vrot.slane %v3884_v19, 1  ;;  %v1065_v19 = vrot.slane %v3879_v18, 1  ;;  %v1067_v18 = vrot.slane %v3893_v20, 1  ;;  %v1071_v20 = vrot.slane %v3926_v25, 1 }
 0x17d   :  { %9962 = vst [vmem:[#allocation74_spill] sm:$0xff] %v4874_v58  ;;  %9963 = vst [vmem:[#allocation139_spill] sm:$0xff] %v4876_v48  ;;  %v1301_v58 = vrot.slane %v3781_v4, 1  ;;  %v1073_v25 = vrot.slane %v3921_v24, 1  ;;  %v1075_v24 = vrot.slane %v3935_v26, 1  ;;  %v1079_v26 = vrot.slane %v3968_v31, 1 }
 0x17e   :  { %843 = vrot.lane.b32.xlu1 %v4483_v60, %s3735_s2  ;;  %841 = vrot.lane.b32.xlu0 %v9964_v61, %s3735_s2  ;;  %v1081_v31 = vrot.slane %v3963_v30, 1  ;;  %v1083_v30 = vrot.slane %v3977_v32, 1  ;;  %v1087_v32 = vrot.slane %v4010_v37, 1  ;;  %v1089_v37 = vrot.slane %v4005_v36, 1 }
 0x17f   :  { %v4905_v4 = vsel %vm1040_vm0, %v1300_v52, %v1301_v58  ;;  %v4920_v9 = vsel %vm1040_vm0, %v1301_v58, %v1303_v0  ;;  %v1305_v58 = vrot.slane %v3823_v10, 1  ;;  %v1307_v10 = vrot.slane %v3856_v15, 1 }
 0x180   :  { %v4888_v48 = vpop.permute.xlu1 %731  ;;  %v4890_v3 = vpop.permute.xlu0 %729  ;;  %v1091_v36 = vrot.slane %v4019_v38, 1  ;;  %v1095_v38 = vrot.slane %v4052_v43, 1  ;;  %v1097_v43 = vrot.slane %v4047_v42, 1  ;;  %v1099_v42 = vrot.slane %v4061_v44, 1 }
 0x181   :  { %9965 = vst [vmem:[#allocation77_spill] sm:$0xff] %v4888_v48  ;;  %9966 = vst [vmem:[#allocation140_spill] sm:$0xff] %v4890_v3  ;;  %v4953_v11 = vsel %vm1040_vm0, %v1303_v0, %v1305_v58  ;;  %v4968_v15 = vsel %vm1040_vm0, %v1305_v58, %v1307_v10  ;;  %v1309_v58 = vrot.slane %v3865_v16, 1  ;;  %v1311_v16 = vrot.slane %v3898_v21, 1 }
 0x182   :  { %1367 = vrot.lane.b32.xlu1 %v4893_v5, %s3734_s10  ;;  %1365 = vrot.lane.b32.xlu0 %v4896_v1, %s3734_s10  ;;  %v1103_v44 = vrot.slane %v4094_v49, 1  ;;  %v3567_v49 = vld [vmem:[%s9277_s0 + $0x188] sm:$0xff]  ;;  %v1111_v56 = vrot.slane %v3571_v62, 1 }
 0x183   :  { %v5016_v21 = vsel %vm1040_vm0, %v1309_v58, %v1311_v16 }
 0x184   :  { %v4907_v60 = vpop.permute.xlu1 %735  ;;  %v4909_v63 = vpop.permute.xlu0 %733 }
 0x185   :  { %9969 = vst [vmem:[#allocation143_spill] sm:$0xff] %v4907_v60  ;;  %9970 = vst [vmem:[#allocation144_spill] sm:$0xff] %v4909_v63  ;;  %v4927_v60 = vsel %vm1040_vm0, %v1045_v54, %v1049_v7  ;;  %v4944_v54 = vsel %vm1040_vm0, %v1047_v2, %v1051_v6  ;;  %v4960_v2 = vsel %vm1040_vm0, %v1051_v6, %v1055_v8  ;;  %v1061_v6 = vrot.slane %v3870_v17, 1  ;;  %v3569_v63 = vld [vmem:[%s9277_s0 + $0x198] sm:$0xff] }
 0x186   :  { %1371 = vrot.lane.b32.xlu1 %v4912_v55, %s3734_s10  ;;  %1369 = vrot.lane.b32.xlu0 %v4905_v4, %s3734_s10  ;;  %9974 = vst [vmem:[#allocation148_spill] sm:$0xff] %v4927_v60  ;;  %9978 = vst [vmem:[#allocation152_spill] sm:$0xff] %v4944_v54  ;;  %v5001_v17 = vsel %vm1040_vm0, %v1307_v10, %v1309_v58  ;;  %v1313_v58 = vrot.slane %v3907_v22, 1  ;;  %v1315_v22 = vrot.slane %v3940_v27, 1  ;;  %v1107_v3 = vrot.slane %v3569_v63, 1 }
 0x187   :  { %9981 = vst [vmem:[#allocation155_spill] sm:$0xff] %v4960_v2 }
 0x188   :  { %v4922_v61 = vpop.permute.xlu1 %739  ;;  %v4924_v52 = vpop.permute.xlu0 %737  ;;  %v5064_v27 = vsel %vm1040_vm0, %v1313_v58, %v1315_v22  ;;  %v5288_v63 = vsel %vm1040_vm0, %v1103_v44, %v1107_v3  ;;  %v5308_v62 = vsel %vm1040_vm0, %v1107_v3, %v1111_v56 }
 0x189   :  { %9972 = vst [vmem:[#allocation146_spill] sm:$0xff] %v4922_v61  ;;  %9973 = vst [vmem:[#allocation147_spill] sm:$0xff] %v4924_v52  ;;  %v4941_v52 = vsel %vm1040_vm0, %v1049_v7, %v1053_v50 }
 0x18a   :  { %1375 = vrot.lane.b32.xlu1 %v4920_v9, %s3734_s10  ;;  %1373 = vrot.lane.b32.xlu0 %v4927_v60, %s3734_s10  ;;  %9977 = vst [vmem:[#allocation151_spill] sm:$0xff] %v4941_v52  ;;  %10048 = vst [vmem:[#allocation222_spill] sm:$0xff] %v5288_v63 }
 0x18b   :  { %10052 = vst [vmem:[#allocation226_spill] sm:$0xff] %v5308_v62 }
 0x18c   :  { %v4936_v48 = vpop.permute.xlu1 %743  ;;  %v4938_v61 = vpop.permute.xlu0 %741 }
 0x18d   :  { %9975 = vst [vmem:[#allocation149_spill] sm:$0xff] %v4936_v48  ;;  %9976 = vst [vmem:[#allocation150_spill] sm:$0xff] %v4938_v61 }
 0x18e   :  { %1379 = vrot.lane.b32.xlu1 %v4941_v52, %s3734_s10  ;;  %1377 = vrot.lane.b32.xlu0 %v4944_v54, %s3734_s10 }
 0x190   :  { %v4955_v48 = vpop.permute.xlu1 %747  ;;  %v4957_v7 = vpop.permute.xlu0 %745 }
 0x191   :  { %9979 = vst [vmem:[#allocation153_spill] sm:$0xff] %v4955_v48  ;;  %9980 = vst [vmem:[#allocation154_spill] sm:$0xff] %v4957_v7  ;;  %v4975_v48 = vsel %vm1040_vm0, %v1053_v50, %v1057_v13  ;;  %v4992_v50 = vsel %vm1040_vm0, %v1055_v8, %v1059_v12  ;;  %v5008_v8 = vsel %vm1040_vm0, %v1059_v12, %v1063_v14  ;;  %v1069_v12 = vrot.slane %v3912_v23, 1 }
 0x192   :  { %1383 = vrot.lane.b32.xlu1 %v4960_v2, %s3734_s10  ;;  %1381 = vrot.lane.b32.xlu0 %v4953_v11, %s3734_s10  ;;  %9984 = vst [vmem:[#allocation158_spill] sm:$0xff] %v4975_v48  ;;  %9988 = vst [vmem:[#allocation162_spill] sm:$0xff] %v4992_v50  ;;  %v5049_v23 = vsel %vm1040_vm0, %v1311_v16, %v1313_v58  ;;  %v1317_v58 = vrot.slane %v3949_v28, 1  ;;  %v1319_v28 = vrot.slane %v3982_v33, 1 }
 0x193   :  { %9991 = vst [vmem:[#allocation165_spill] sm:$0xff] %v5008_v8 }
 0x194   :  { %v4970_v0 = vpop.permute.xlu1 %751  ;;  %v4972_v61 = vpop.permute.xlu0 %749  ;;  %v5112_v33 = vsel %vm1040_vm0, %v1317_v58, %v1319_v28 }
 0x195   :  { %9982 = vst [vmem:[#allocation156_spill] sm:$0xff] %v4970_v0  ;;  %9983 = vst [vmem:[#allocation157_spill] sm:$0xff] %v4972_v61  ;;  %v4989_v61 = vsel %vm1040_vm0, %v1057_v13, %v1061_v6 }
 0x196   :  { %1387 = vrot.lane.b32.xlu1 %v4968_v15, %s3734_s10  ;;  %1385 = vrot.lane.b32.xlu0 %v4975_v48, %s3734_s10  ;;  %9987 = vst [vmem:[#allocation161_spill] sm:$0xff] %v4989_v61 }
 0x198   :  { %v4984_v7 = vpop.permute.xlu1 %755  ;;  %v4986_v0 = vpop.permute.xlu0 %753 }
 0x199   :  { %9985 = vst [vmem:[#allocation159_spill] sm:$0xff] %v4984_v7  ;;  %9986 = vst [vmem:[#allocation160_spill] sm:$0xff] %v4986_v0 }
 0x19a   :  { %1391 = vrot.lane.b32.xlu1 %v4989_v61, %s3734_s10  ;;  %1389 = vrot.lane.b32.xlu0 %v4992_v50, %s3734_s10 }
 0x19c   :  { %v5003_v7 = vpop.permute.xlu1 %759  ;;  %v5005_v13 = vpop.permute.xlu0 %757 }
 0x19d   :  { %9989 = vst [vmem:[#allocation163_spill] sm:$0xff] %v5003_v7  ;;  %9990 = vst [vmem:[#allocation164_spill] sm:$0xff] %v5005_v13  ;;  %v5023_v7 = vsel %vm1040_vm0, %v1061_v6, %v1065_v19  ;;  %v5040_v6 = vsel %vm1040_vm0, %v1063_v14, %v1067_v18  ;;  %v5056_v14 = vsel %vm1040_vm0, %v1067_v18, %v1071_v20  ;;  %v1077_v18 = vrot.slane %v3954_v29, 1 }
 0x19e   :  { %1395 = vrot.lane.b32.xlu1 %v5008_v8, %s3734_s10  ;;  %1393 = vrot.lane.b32.xlu0 %v5001_v17, %s3734_s10  ;;  %9994 = vst [vmem:[#allocation168_spill] sm:$0xff] %v5023_v7  ;;  %9998 = vst [vmem:[#allocation172_spill] sm:$0xff] %v5040_v6  ;;  %v5097_v29 = vsel %vm1040_vm0, %v1315_v22, %v1317_v58  ;;  %v1321_v58 = vrot.slane %v3991_v34, 1  ;;  %v1323_v34 = vrot.slane %v4024_v39, 1 }
 0x19f   :  { %10001 = vst [vmem:[#allocation175_spill] sm:$0xff] %v5056_v14 }
 0x1a0   :  { %v5018_v10 = vpop.permute.xlu1 %763  ;;  %v5020_v0 = vpop.permute.xlu0 %761  ;;  %v5160_v39 = vsel %vm1040_vm0, %v1321_v58, %v1323_v34 }
 0x1a1   :  { %9992 = vst [vmem:[#allocation166_spill] sm:$0xff] %v5018_v10  ;;  %9993 = vst [vmem:[#allocation167_spill] sm:$0xff] %v5020_v0  ;;  %v5037_v0 = vsel %vm1040_vm0, %v1065_v19, %v1069_v12 }
 0x1a2   :  { %1399 = vrot.lane.b32.xlu1 %v5016_v21, %s3734_s10  ;;  %1397 = vrot.lane.b32.xlu0 %v5023_v7, %s3734_s10  ;;  %9997 = vst [vmem:[#allocation171_spill] sm:$0xff] %v5037_v0 }
 0x1a4   :  { %v5032_v13 = vpop.permute.xlu1 %767  ;;  %v5034_v10 = vpop.permute.xlu0 %765 }
 0x1a5   :  { %9995 = vst [vmem:[#allocation169_spill] sm:$0xff] %v5032_v13  ;;  %9996 = vst [vmem:[#allocation170_spill] sm:$0xff] %v5034_v10 }
 0x1a6   :  { %1403 = vrot.lane.b32.xlu1 %v5037_v0, %s3734_s10  ;;  %1401 = vrot.lane.b32.xlu0 %v5040_v6, %s3734_s10 }
 0x1a8   :  { %v5051_v13 = vpop.permute.xlu1 %771  ;;  %v5053_v19 = vpop.permute.xlu0 %769 }
 0x1a9   :  { %9999 = vst [vmem:[#allocation173_spill] sm:$0xff] %v5051_v13  ;;  %10000 = vst [vmem:[#allocation174_spill] sm:$0xff] %v5053_v19  ;;  %v5071_v13 = vsel %vm1040_vm0, %v1069_v12, %v1073_v25  ;;  %v5088_v12 = vsel %vm1040_vm0, %v1071_v20, %v1075_v24  ;;  %v5104_v20 = vsel %vm1040_vm0, %v1075_v24, %v1079_v26  ;;  %v1085_v24 = vrot.slane %v3996_v35, 1 }
 0x1aa   :  { %1407 = vrot.lane.b32.xlu1 %v5056_v14, %s3734_s10  ;;  %1405 = vrot.lane.b32.xlu0 %v5049_v23, %s3734_s10  ;;  %10004 = vst [vmem:[#allocation178_spill] sm:$0xff] %v5071_v13  ;;  %10008 = vst [vmem:[#allocation182_spill] sm:$0xff] %v5088_v12  ;;  %v5145_v35 = vsel %vm1040_vm0, %v1319_v28, %v1321_v58  ;;  %v1325_v58 = vrot.slane %v4033_v40, 1  ;;  %v1327_v40 = vrot.slane %v4066_v45, 1 }
 0x1ab   :  { %10011 = vst [vmem:[#allocation185_spill] sm:$0xff] %v5104_v20 }
 0x1ac   :  { %v5066_v16 = vpop.permute.xlu1 %775  ;;  %v5068_v10 = vpop.permute.xlu0 %773  ;;  %v5208_v45 = vsel %vm1040_vm0, %v1325_v58, %v1327_v40 }
 0x1ad   :  { %10002 = vst [vmem:[#allocation176_spill] sm:$0xff] %v5066_v16  ;;  %10003 = vst [vmem:[#allocation177_spill] sm:$0xff] %v5068_v10  ;;  %v5085_v10 = vsel %vm1040_vm0, %v1073_v25, %v1077_v18 }
 0x1ae   :  { %1411 = vrot.lane.b32.xlu1 %v5064_v27, %s3734_s10  ;;  %1409 = vrot.lane.b32.xlu0 %v5071_v13, %s3734_s10  ;;  %10007 = vst [vmem:[#allocation181_spill] sm:$0xff] %v5085_v10 }
 0x1b0   :  { %v5080_v19 = vpop.permute.xlu1 %779  ;;  %v5082_v16 = vpop.permute.xlu0 %777 }
 0x1b1   :  { %10005 = vst [vmem:[#allocation179_spill] sm:$0xff] %v5080_v19  ;;  %10006 = vst [vmem:[#allocation180_spill] sm:$0xff] %v5082_v16 }
 0x1b2   :  { %1415 = vrot.lane.b32.xlu1 %v5085_v10, %s3734_s10  ;;  %1413 = vrot.lane.b32.xlu0 %v5088_v12, %s3734_s10 }
 0x1b4   :  { %v5099_v19 = vpop.permute.xlu1 %783  ;;  %v5101_v25 = vpop.permute.xlu0 %781 }
 0x1b5   :  { %10009 = vst [vmem:[#allocation183_spill] sm:$0xff] %v5099_v19  ;;  %10010 = vst [vmem:[#allocation184_spill] sm:$0xff] %v5101_v25  ;;  %v5119_v19 = vsel %vm1040_vm0, %v1077_v18, %v1081_v31  ;;  %v5136_v18 = vsel %vm1040_vm0, %v1079_v26, %v1083_v30  ;;  %v5152_v26 = vsel %vm1040_vm0, %v1083_v30, %v1087_v32  ;;  %v1093_v30 = vrot.slane %v4038_v41, 1 }
 0x1b6   :  { %1419 = vrot.lane.b32.xlu1 %v5104_v20, %s3734_s10  ;;  %1417 = vrot.lane.b32.xlu0 %v5097_v29, %s3734_s10  ;;  %10014 = vst [vmem:[#allocation188_spill] sm:$0xff] %v5119_v19  ;;  %10018 = vst [vmem:[#allocation192_spill] sm:$0xff] %v5136_v18  ;;  %v5193_v41 = vsel %vm1040_vm0, %v1323_v34, %v1325_v58  ;;  %v1329_v58 = vrot.slane %v4075_v46, 1  ;;  %v1331_v46 = vrot.slane %v4108_v51, 1 }
 0x1b7   :  { %10021 = vst [vmem:[#allocation195_spill] sm:$0xff] %v5152_v26 }
 0x1b8   :  { %v5114_v22 = vpop.permute.xlu1 %787  ;;  %v5116_v16 = vpop.permute.xlu0 %785  ;;  %v5258_v51 = vsel %vm1040_vm0, %v1329_v58, %v1331_v46 }
 0x1b9   :  { %10012 = vst [vmem:[#allocation186_spill] sm:$0xff] %v5114_v22  ;;  %10013 = vst [vmem:[#allocation187_spill] sm:$0xff] %v5116_v16  ;;  %v5133_v16 = vsel %vm1040_vm0, %v1081_v31, %v1085_v24 }
 0x1ba   :  { %1423 = vrot.lane.b32.xlu1 %v5112_v33, %s3734_s10  ;;  %1421 = vrot.lane.b32.xlu0 %v5119_v19, %s3734_s10  ;;  %10017 = vst [vmem:[#allocation191_spill] sm:$0xff] %v5133_v16 }
 0x1bc   :  { %v5128_v25 = vpop.permute.xlu1 %791  ;;  %v5130_v22 = vpop.permute.xlu0 %789 }
 0x1bd   :  { %10015 = vst [vmem:[#allocation189_spill] sm:$0xff] %v5128_v25  ;;  %10016 = vst [vmem:[#allocation190_spill] sm:$0xff] %v5130_v22 }
 0x1be   :  { %1427 = vrot.lane.b32.xlu1 %v5133_v16, %s3734_s10  ;;  %1425 = vrot.lane.b32.xlu0 %v5136_v18, %s3734_s10 }
 0x1c0   :  { %v5147_v25 = vpop.permute.xlu1 %795  ;;  %v5149_v31 = vpop.permute.xlu0 %793 }
 0x1c1   :  { %10019 = vst [vmem:[#allocation193_spill] sm:$0xff] %v5147_v25  ;;  %10020 = vst [vmem:[#allocation194_spill] sm:$0xff] %v5149_v31  ;;  %v5167_v25 = vsel %vm1040_vm0, %v1085_v24, %v1089_v37  ;;  %v5184_v24 = vsel %vm1040_vm0, %v1087_v32, %v1091_v36  ;;  %v5200_v32 = vsel %vm1040_vm0, %v1091_v36, %v1095_v38  ;;  %v1101_v36 = vrot.slane %v4080_v47, 1 }
 0x1c2   :  { %1431 = vrot.lane.b32.xlu1 %v5152_v26, %s3734_s10  ;;  %1429 = vrot.lane.b32.xlu0 %v5145_v35, %s3734_s10  ;;  %10024 = vst [vmem:[#allocation198_spill] sm:$0xff] %v5167_v25  ;;  %10028 = vst [vmem:[#allocation202_spill] sm:$0xff] %v5184_v24  ;;  %v5241_v47 = vsel %vm1040_vm0, %v1327_v40, %v1329_v58 }
 0x1c3   :  { %10031 = vst [vmem:[#allocation205_spill] sm:$0xff] %v5200_v32 }
 0x1c4   :  { %v5162_v28 = vpop.permute.xlu1 %799  ;;  %v5164_v22 = vpop.permute.xlu0 %797 }
 0x1c5   :  { %10022 = vst [vmem:[#allocation196_spill] sm:$0xff] %v5162_v28  ;;  %10023 = vst [vmem:[#allocation197_spill] sm:$0xff] %v5164_v22  ;;  %v5181_v22 = vsel %vm1040_vm0, %v1089_v37, %v1093_v30 }
 0x1c6   :  { %1435 = vrot.lane.b32.xlu1 %v5160_v39, %s3734_s10  ;;  %1433 = vrot.lane.b32.xlu0 %v5167_v25, %s3734_s10  ;;  %10027 = vst [vmem:[#allocation201_spill] sm:$0xff] %v5181_v22 }
 0x1c8   :  { %v5176_v31 = vpop.permute.xlu1 %803  ;;  %v5178_v28 = vpop.permute.xlu0 %801 }
 0x1c9   :  { %10025 = vst [vmem:[#allocation199_spill] sm:$0xff] %v5176_v31  ;;  %10026 = vst [vmem:[#allocation200_spill] sm:$0xff] %v5178_v28 }
 0x1ca   :  { %1439 = vrot.lane.b32.xlu1 %v5181_v22, %s3734_s10  ;;  %1437 = vrot.lane.b32.xlu0 %v5184_v24, %s3734_s10 }
 0x1cc   :  { %v5195_v31 = vpop.permute.xlu1 %807  ;;  %v5197_v37 = vpop.permute.xlu0 %805 }
 0x1cd   :  { %10029 = vst [vmem:[#allocation203_spill] sm:$0xff] %v5195_v31  ;;  %10030 = vst [vmem:[#allocation204_spill] sm:$0xff] %v5197_v37  ;;  %v5215_v31 = vsel %vm1040_vm0, %v1093_v30, %v1097_v43  ;;  %v5232_v30 = vsel %vm1040_vm0, %v1095_v38, %v1099_v42  ;;  %v5248_v38 = vsel %vm1040_vm0, %v1099_v42, %v1103_v44 }
 0x1ce   :  { %1443 = vrot.lane.b32.xlu1 %v5200_v32, %s3734_s10  ;;  %1441 = vrot.lane.b32.xlu0 %v5193_v41, %s3734_s10  ;;  %10034 = vst [vmem:[#allocation208_spill] sm:$0xff] %v5215_v31  ;;  %10038 = vst [vmem:[#allocation212_spill] sm:$0xff] %v5232_v30 }
 0x1cf   :  { %10041 = vst [vmem:[#allocation215_spill] sm:$0xff] %v5248_v38 }
 0x1d0   :  { %v5210_v34 = vpop.permute.xlu1 %811  ;;  %v5212_v28 = vpop.permute.xlu0 %809 }
 0x1d1   :  { %10032 = vst [vmem:[#allocation206_spill] sm:$0xff] %v5210_v34  ;;  %10033 = vst [vmem:[#allocation207_spill] sm:$0xff] %v5212_v28  ;;  %v5229_v28 = vsel %vm1040_vm0, %v1097_v43, %v1101_v36 }
 0x1d2   :  { %1447 = vrot.lane.b32.xlu1 %v5208_v45, %s3734_s10  ;;  %1445 = vrot.lane.b32.xlu0 %v5215_v31, %s3734_s10  ;;  %10037 = vst [vmem:[#allocation211_spill] sm:$0xff] %v5229_v28 }
 0x1d4   :  { %v5224_v37 = vpop.permute.xlu1 %815  ;;  %v5226_v34 = vpop.permute.xlu0 %813 }
 0x1d5   :  { %10035 = vst [vmem:[#allocation209_spill] sm:$0xff] %v5224_v37  ;;  %10036 = vst [vmem:[#allocation210_spill] sm:$0xff] %v5226_v34  ;;  %v1105_v34 = vrot.slane %v3567_v49, 1  ;;  %v3568_v49 = vld [vmem:[%s9277_s0 + $0x1a0] sm:$0xff] }
 0x1d6   :  { %1451 = vrot.lane.b32.xlu1 %v5229_v28, %s3734_s10  ;;  %1449 = vrot.lane.b32.xlu0 %v5232_v30, %s3734_s10 }
 0x1d7   :  { %v5265_v42 = vsel %vm1040_vm0, %v1101_v36, %v1105_v34  ;;  %v3570_v36 = vld [vmem:[%s9277_s0 + $0x1a8] sm:$0xff] }
 0x1d8   :  { %v5243_v37 = vpop.permute.xlu1 %819  ;;  %v5245_v43 = vpop.permute.xlu0 %817  ;;  %10044 = vst [vmem:[#allocation218_spill] sm:$0xff] %v5265_v42  ;;  %v1333_v58 = vrot.slane %v3570_v36, 1  ;;  %v3572_v36 = vld [vmem:[%s9277_s0 + $0x1c0] sm:$0xff] }
 0x1d9   :  { %10039 = vst [vmem:[#allocation213_spill] sm:$0xff] %v5243_v37  ;;  %10040 = vst [vmem:[#allocation214_spill] sm:$0xff] %v5245_v43  ;;  %v1109_v43 = vrot.slane %v3568_v49, 1 }
 0x1da   :  { %1455 = vrot.lane.b32.xlu1 %v5248_v38, %s3734_s10  ;;  %1453 = vrot.lane.b32.xlu0 %v5241_v47, %s3734_s10 }
 0x1db   :  { %v5285_v49 = vsel %vm1040_vm0, %v1105_v34, %v1109_v43  ;;  %v1335_v34 = vrot.slane %v3572_v36, 1  ;;  %v5325_v3 = vsel %vm1040_vm0, %v1109_v43, %v1113_v59  ;;  %v3576_v43 = vld [vmem:[%s9277_s0 + $0x1d8] sm:$0xff] }
 0x1dc   :  { %v5260_v40 = vpop.permute.xlu1 %823  ;;  %v5262_v37 = vpop.permute.xlu0 %821  ;;  %10047 = vst [vmem:[#allocation221_spill] sm:$0xff] %v5285_v49  ;;  %10056 = vst [vmem:[#allocation230_spill] sm:$0xff] %v5325_v3 }
 0x1dd   :  { %10042 = vst [vmem:[#allocation216_spill] sm:$0xff] %v5260_v40  ;;  %10043 = vst [vmem:[#allocation217_spill] sm:$0xff] %v5262_v37 }
 0x1de   :  { %1459 = vrot.lane.b32.xlu1 %v5258_v51, %s3734_s10  ;;  %1457 = vrot.lane.b32.xlu0 %v5265_v42, %s3734_s10 }
 0x1e0   :  { %v5280_v37 = vpop.permute.xlu1 %827  ;;  %v5282_v40 = vpop.permute.xlu0 %825 }
 0x1e1   :  { %10045 = vst [vmem:[#allocation219_spill] sm:$0xff] %v5280_v37  ;;  %10046 = vst [vmem:[#allocation220_spill] sm:$0xff] %v5282_v40  ;;  %v5301_v37 = vsel %vm1040_vm0, %v1331_v46, %v1333_v58  ;;  %v5318_v46 = vsel %vm1040_vm0, %v1333_v58, %v1335_v34  ;;  %v1337_v58 = vrot.slane %v3576_v43, 1  ;;  %v3578_v43 = vld [vmem:[%s9277_s0 + $0x1f0] sm:$0xff] }
 0x1e2   :  { %1463 = vrot.lane.b32.xlu1 %v5285_v49, %s3734_s10  ;;  %1461 = vrot.lane.b32.xlu0 %v5288_v63, %s3734_s10  ;;  %10049 = vst [vmem:[#allocation223_spill] sm:$0xff] %v5301_v37  ;;  %10053 = vst [vmem:[#allocation227_spill] sm:$0xff] %v5318_v46 }
 0x1e4   :  { %v5303_v44 = vpop.permute.xlu1 %831  ;;  %v5305_v40 = vpop.permute.xlu0 %829 }
 0x1e5   :  { %10050 = vst [vmem:[#allocation224_spill] sm:$0xff] %v5303_v44  ;;  %10051 = vst [vmem:[#allocation225_spill] sm:$0xff] %v5305_v40  ;;  %v1117_v40 = vrot.slane %v3574_v53, 1 }
 0x1e6   :  { %1467 = vrot.lane.b32.xlu1 %v5308_v62, %s3734_s10  ;;  %1465 = vrot.lane.b32.xlu0 %v5301_v37, %s3734_s10  ;;  %v1115_v37 = vrot.slane %v3575_v57, 1 }
 0x1e7   :  { %v5345_v53 = vsel %vm1040_vm0, %v1113_v59, %v1117_v40  ;;  %v1339_v59 = vrot.slane %v3578_v43, 1 }
 0x1e8   :  { %v5320_v36 = vpop.permute.xlu1 %835  ;;  %v5322_v44 = vpop.permute.xlu0 %833  ;;  %10059 = vst [vmem:[#allocation233_spill] sm:$0xff] %v5345_v53  ;;  %v5348_v57 = vsel %vm1040_vm0, %v1111_v56, %v1115_v37 }
 0x1e9   :  { %10054 = vst [vmem:[#allocation228_spill] sm:$0xff] %v5320_v36  ;;  %10055 = vst [vmem:[#allocation229_spill] sm:$0xff] %v5322_v44 }
 0x1ea   :  { %1471 = vrot.lane.b32.xlu1 %v5318_v46, %s3734_s10  ;;  %1469 = vrot.lane.b32.xlu0 %v5325_v3, %s3734_s10  ;;  %10060 = vst [vmem:[#allocation234_spill] sm:$0xff] %v5348_v57  ;;  %v3577_v46 = vld [vmem:[%s9277_s0 + $0x1e0] sm:$0xff] }
 0x1eb   :  { %v1119_v3 = vrot.slane %v3577_v46, 1 }
 0x1ec   :  { %v5340_v44 = vpop.permute.xlu1 %839  ;;  %v5342_v36 = vpop.permute.xlu0 %837 }
 0x1ed   :  { %10057 = vst [vmem:[#allocation231_spill] sm:$0xff] %v5340_v44  ;;  %10058 = vst [vmem:[#allocation232_spill] sm:$0xff] %v5342_v36  ;;  %v5361_v44 = vsel %vm1040_vm0, %v1335_v34, %v1337_v58  ;;  %v5368_v46 = vsel %vm1040_vm0, %v1115_v37, %v1119_v3  ;;  %v5378_v34 = vsel %vm1040_vm0, %v1337_v58, %v1339_v59 }
 0x1ee   :  { %1475 = vrot.lane.b32.xlu1 %v5345_v53, %s3734_s10  ;;  %1473 = vrot.lane.b32.xlu0 %v5348_v57, %s3734_s10  ;;  %10061 = vst [vmem:[#allocation235_spill] sm:$0xff] %v5361_v44  ;;  %10064 = vst [vmem:[#allocation238_spill] sm:$0xff] %v5368_v46  ;;  %v3579_v53 = vld [vmem:[%s9277_s0 + $0x1e8] sm:$0xff] }
 0x1ef   :  { %v1121_v57 = vrot.slane %v3579_v53, 1  ;;  %10065 = vst [vmem:[#allocation239_spill] sm:$0xff] %v5378_v34  ;;  %v3580_v53 = vld [vmem:[%s9277_s0 + $0x200] sm:$0xff] }
 0x1f0   :  { %v5363_v56 = vpop.permute.xlu1 %843  ;;  %v5365_v36 = vpop.permute.xlu0 %841 }
 0x1f1   :  { %10062 = vst [vmem:[#allocation236_spill] sm:$0xff] %v5363_v56  ;;  %10063 = vst [vmem:[#allocation237_spill] sm:$0xff] %v5365_v36  ;;  %v5385_v37 = vsel %vm1040_vm0, %v1117_v40, %v1121_v57  ;;  %v1125_v36 = vrot.slane %v3580_v53, 1  ;;  %v3582_v40 = vld [vmem:[%s9277_s0 + $0x208] sm:$0xff] }
 0x1f2   :  { %1479 = vrot.lane.b32.xlu1 %v5368_v46, %s3734_s10  ;;  %1477 = vrot.lane.b32.xlu0 %v5361_v44, %s3734_s10  ;;  %10068 = vst [vmem:[#allocation242_spill] sm:$0xff] %v5385_v37  ;;  %v3581_v46 = vld [vmem:[%s9277_s0 + $0x1f8] sm:$0xff]  ;;  %v1341_v58 = vrot.slane %v3582_v40, 1  ;;  %v3584_v40 = vld [vmem:[%s9277_s0 + $0x220] sm:$0xff] }
 0x1f3   :  { %v1123_v44 = vrot.slane %v3581_v46, 1  ;;  %v5405_v53 = vsel %vm1040_vm0, %v1121_v57, %v1125_v36  ;;  %v1343_v57 = vrot.slane %v3584_v40, 1 }
 0x1f4   :  { %v5380_v43 = vpop.permute.xlu1 %1367  ;;  %v5382_v56 = vpop.permute.xlu0 %1365  ;;  %10071 = vst [vmem:[#allocation245_spill] sm:$0xff] %v5405_v53 }
 0x1f5   :  { %10066 = vst [vmem:[#allocation240_spill] sm:$0xff] %v5380_v43  ;;  %10067 = vst [vmem:[#allocation241_spill] sm:$0xff] %v5382_v56  ;;  %v5408_v46 = vsel %vm1040_vm0, %v1119_v3, %v1123_v44 }
 0x1f6   :  { %1483 = vrot.lane.b32.xlu1 %v5378_v34, %s3734_s10  ;;  %1481 = vrot.lane.b32.xlu0 %v5385_v37, %s3734_s10  ;;  %10072 = vst [vmem:[#allocation246_spill] sm:$0xff] %v5408_v46  ;;  %v3583_v34 = vld [vmem:[%s9277_s0 + $0x210] sm:$0xff] }
 0x1f7   :  { %v1127_v37 = vrot.slane %v3583_v34, 1 }
 0x1f8   :  { %v5400_v56 = vpop.permute.xlu1 %1371  ;;  %v5402_v43 = vpop.permute.xlu0 %1369 }
 0x1f9   :  { %10069 = vst [vmem:[#allocation243_spill] sm:$0xff] %v5400_v56  ;;  %10070 = vst [vmem:[#allocation244_spill] sm:$0xff] %v5402_v43  ;;  %v5421_v56 = vsel %vm1040_vm0, %v1339_v59, %v1341_v58  ;;  %v5428_v34 = vsel %vm1040_vm0, %v1123_v44, %v1127_v37  ;;  %v5438_v59 = vsel %vm1040_vm0, %v1341_v58, %v1343_v57 }
 0x1fa   :  { %1487 = vrot.lane.b32.xlu1 %v5405_v53, %s3734_s10  ;;  %1485 = vrot.lane.b32.xlu0 %v5408_v46, %s3734_s10  ;;  %10073 = vst [vmem:[#allocation247_spill] sm:$0xff] %v5421_v56  ;;  %10076 = vst [vmem:[#allocation250_spill] sm:$0xff] %v5428_v34  ;;  %v3585_v53 = vld [vmem:[%s9277_s0 + $0x218] sm:$0xff] }
 0x1fb   :  { %v1129_v46 = vrot.slane %v3585_v53, 1  ;;  %10077 = vst [vmem:[#allocation251_spill] sm:$0xff] %v5438_v59  ;;  %v3586_v53 = vld [vmem:[%s9277_s0 + $0x230] sm:$0xff] }
 0x1fc   :  { %v5423_v3 = vpop.permute.xlu1 %1375  ;;  %v5425_v43 = vpop.permute.xlu0 %1373 }
 0x1fd   :  { %10074 = vst [vmem:[#allocation248_spill] sm:$0xff] %v5423_v3  ;;  %10075 = vst [vmem:[#allocation249_spill] sm:$0xff] %v5425_v43  ;;  %v5445_v44 = vsel %vm1040_vm0, %v1125_v36, %v1129_v46  ;;  %v1133_v43 = vrot.slane %v3586_v53, 1  ;;  %v3588_v36 = vld [vmem:[%s9277_s0 + $0x238] sm:$0xff] }
 0x1fe   :  { %1491 = vrot.lane.b32.xlu1 %v5428_v34, %s3734_s10  ;;  %1489 = vrot.lane.b32.xlu0 %v5421_v56, %s3734_s10  ;;  %10080 = vst [vmem:[#allocation254_spill] sm:$0xff] %v5445_v44  ;;  %v3587_v34 = vld [vmem:[%s9277_s0 + $0x228] sm:$0xff]  ;;  %v1345_v58 = vrot.slane %v3588_v36, 1  ;;  %v3590_v36 = vld [vmem:[%s9277_s0 + $0x250] sm:$0xff] }
 0x1ff   :  { %v1131_v56 = vrot.slane %v3587_v34, 1  ;;  %v5465_v53 = vsel %vm1040_vm0, %v1129_v46, %v1133_v43  ;;  %v1347_v46 = vrot.slane %v3590_v36, 1 }
 0x200   :  { %v5440_v40 = vpop.permute.xlu1 %1379  ;;  %v5442_v3 = vpop.permute.xlu0 %1377  ;;  %10083 = vst [vmem:[#allocation257_spill] sm:$0xff] %v5465_v53 }
 0x201   :  { %10078 = vst [vmem:[#allocation252_spill] sm:$0xff] %v5440_v40  ;;  %10079 = vst [vmem:[#allocation253_spill] sm:$0xff] %v5442_v3  ;;  %v5468_v34 = vsel %vm1040_vm0, %v1127_v37, %v1131_v56 }
 0x202   :  { %1495 = vrot.lane.b32.xlu1 %v5438_v59, %s3734_s10  ;;  %1493 = vrot.lane.b32.xlu0 %v5445_v44, %s3734_s10  ;;  %10084 = vst [vmem:[#allocation258_spill] sm:$0xff] %v5468_v34  ;;  %v3589_v59 = vld [vmem:[%s9277_s0 + $0x240] sm:$0xff] }
 0x203   :  { %v1135_v44 = vrot.slane %v3589_v59, 1 }
 0x204   :  { %v5460_v3 = vpop.permute.xlu1 %1383  ;;  %v5462_v40 = vpop.permute.xlu0 %1381 }
 0x205   :  { %10081 = vst [vmem:[#allocation255_spill] sm:$0xff] %v5460_v3  ;;  %10082 = vst [vmem:[#allocation256_spill] sm:$0xff] %v5462_v40  ;;  %v5481_v3 = vsel %vm1040_vm0, %v1343_v57, %v1345_v58  ;;  %v5488_v59 = vsel %vm1040_vm0, %v1131_v56, %v1135_v44  ;;  %v5498_v57 = vsel %vm1040_vm0, %v1345_v58, %v1347_v46 }
 0x206   :  { %1499 = vrot.lane.b32.xlu1 %v5465_v53, %s3734_s10  ;;  %1497 = vrot.lane.b32.xlu0 %v5468_v34, %s3734_s10  ;;  %10085 = vst [vmem:[#allocation259_spill] sm:$0xff] %v5481_v3  ;;  %10088 = vst [vmem:[#allocation262_spill] sm:$0xff] %v5488_v59  ;;  %v3591_v53 = vld [vmem:[%s9277_s0 + $0x248] sm:$0xff] }
 0x207   :  { %v1137_v34 = vrot.slane %v3591_v53, 1  ;;  %10089 = vst [vmem:[#allocation263_spill] sm:$0xff] %v5498_v57  ;;  %v3592_v53 = vld [vmem:[%s9277_s0 + $0x260] sm:$0xff] }
 0x208   :  { %v5483_v37 = vpop.permute.xlu1 %1387  ;;  %v5485_v40 = vpop.permute.xlu0 %1385 }
 0x209   :  { %10086 = vst [vmem:[#allocation260_spill] sm:$0xff] %v5483_v37  ;;  %10087 = vst [vmem:[#allocation261_spill] sm:$0xff] %v5485_v40  ;;  %v5505_v56 = vsel %vm1040_vm0, %v1133_v43, %v1137_v34  ;;  %v1141_v40 = vrot.slane %v3592_v53, 1  ;;  %v3594_v43 = vld [vmem:[%s9277_s0 + $0x268] sm:$0xff] }
 0x20a   :  { %1503 = vrot.lane.b32.xlu1 %v5488_v59, %s3734_s10  ;;  %1501 = vrot.lane.b32.xlu0 %v5481_v3, %s3734_s10  ;;  %10092 = vst [vmem:[#allocation266_spill] sm:$0xff] %v5505_v56  ;;  %v3593_v59 = vld [vmem:[%s9277_s0 + $0x258] sm:$0xff]  ;;  %v1349_v58 = vrot.slane %v3594_v43, 1  ;;  %v3596_v43 = vld [vmem:[%s9277_s0 + $0x280] sm:$0xff] }
 0x20b   :  { %v1139_v3 = vrot.slane %v3593_v59, 1  ;;  %v5525_v53 = vsel %vm1040_vm0, %v1137_v34, %v1141_v40  ;;  %v1351_v34 = vrot.slane %v3596_v43, 1 }
 0x20c   :  { %v5500_v36 = vpop.permute.xlu1 %1391  ;;  %v5502_v37 = vpop.permute.xlu0 %1389  ;;  %10095 = vst [vmem:[#allocation269_spill] sm:$0xff] %v5525_v53 }
 0x20d   :  { %10090 = vst [vmem:[#allocation264_spill] sm:$0xff] %v5500_v36  ;;  %10091 = vst [vmem:[#allocation265_spill] sm:$0xff] %v5502_v37  ;;  %v5528_v59 = vsel %vm1040_vm0, %v1135_v44, %v1139_v3 }
 0x20e   :  { %1507 = vrot.lane.b32.xlu1 %v5498_v57, %s3734_s10  ;;  %1505 = vrot.lane.b32.xlu0 %v5505_v56, %s3734_s10  ;;  %10096 = vst [vmem:[#allocation270_spill] sm:$0xff] %v5528_v59  ;;  %v3595_v57 = vld [vmem:[%s9277_s0 + $0x270] sm:$0xff] }
 0x20f   :  { %v1143_v56 = vrot.slane %v3595_v57, 1 }
 0x210   :  { %v5520_v37 = vpop.permute.xlu1 %1395  ;;  %v5522_v36 = vpop.permute.xlu0 %1393 }
 0x211   :  { %10093 = vst [vmem:[#allocation267_spill] sm:$0xff] %v5520_v37  ;;  %10094 = vst [vmem:[#allocation268_spill] sm:$0xff] %v5522_v36  ;;  %v5541_v37 = vsel %vm1040_vm0, %v1347_v46, %v1349_v58  ;;  %v5548_v57 = vsel %vm1040_vm0, %v1139_v3, %v1143_v56  ;;  %v5558_v46 = vsel %vm1040_vm0, %v1349_v58, %v1351_v34 }
 0x212   :  { %1511 = vrot.lane.b32.xlu1 %v5525_v53, %s3734_s10  ;;  %1509 = vrot.lane.b32.xlu0 %v5528_v59, %s3734_s10  ;;  %10097 = vst [vmem:[#allocation271_spill] sm:$0xff] %v5541_v37  ;;  %10100 = vst [vmem:[#allocation274_spill] sm:$0xff] %v5548_v57  ;;  %v3597_v53 = vld [vmem:[%s9277_s0 + $0x278] sm:$0xff] }
 0x213   :  { %v1145_v59 = vrot.slane %v3597_v53, 1  ;;  %10101 = vst [vmem:[#allocation275_spill] sm:$0xff] %v5558_v46  ;;  %v3598_v53 = vld [vmem:[%s9277_s0 + $0x290] sm:$0xff] }
 0x214   :  { %v5543_v44 = vpop.permute.xlu1 %1399  ;;  %v5545_v36 = vpop.permute.xlu0 %1397 }
 0x215   :  { %10098 = vst [vmem:[#allocation272_spill] sm:$0xff] %v5543_v44  ;;  %10099 = vst [vmem:[#allocation273_spill] sm:$0xff] %v5545_v36  ;;  %v5565_v3 = vsel %vm1040_vm0, %v1141_v40, %v1145_v59  ;;  %v1149_v36 = vrot.slane %v3598_v53, 1  ;;  %v3600_v40 = vld [vmem:[%s9277_s0 + $0x298] sm:$0xff] }
 0x216   :  { %1515 = vrot.lane.b32.xlu1 %v5548_v57, %s3734_s10  ;;  %1513 = vrot.lane.b32.xlu0 %v5541_v37, %s3734_s10  ;;  %10104 = vst [vmem:[#allocation278_spill] sm:$0xff] %v5565_v3  ;;  %v3599_v57 = vld [vmem:[%s9277_s0 + $0x288] sm:$0xff]  ;;  %v1353_v58 = vrot.slane %v3600_v40, 1  ;;  %v3602_v40 = vld [vmem:[%s9277_s0 + $0x2b0] sm:$0xff] }
 0x217   :  { %v1147_v37 = vrot.slane %v3599_v57, 1  ;;  %v5585_v53 = vsel %vm1040_vm0, %v1145_v59, %v1149_v36  ;;  %v1355_v59 = vrot.slane %v3602_v40, 1 }
 0x218   :  { %v5560_v43 = vpop.permute.xlu1 %1403  ;;  %v5562_v44 = vpop.permute.xlu0 %1401  ;;  %10107 = vst [vmem:[#allocation281_spill] sm:$0xff] %v5585_v53 }
 0x219   :  { %10102 = vst [vmem:[#allocation276_spill] sm:$0xff] %v5560_v43  ;;  %10103 = vst [vmem:[#allocation277_spill] sm:$0xff] %v5562_v44  ;;  %v5588_v57 = vsel %vm1040_vm0, %v1143_v56, %v1147_v37 }
 0x21a   :  { %1519 = vrot.lane.b32.xlu1 %v5558_v46, %s3734_s10  ;;  %1517 = vrot.lane.b32.xlu0 %v5565_v3, %s3734_s10  ;;  %10108 = vst [vmem:[#allocation282_spill] sm:$0xff] %v5588_v57  ;;  %v3601_v46 = vld [vmem:[%s9277_s0 + $0x2a0] sm:$0xff] }
 0x21b   :  { %v1151_v3 = vrot.slane %v3601_v46, 1 }
 0x21c   :  { %v5580_v44 = vpop.permute.xlu1 %1407  ;;  %v5582_v43 = vpop.permute.xlu0 %1405 }
 0x21d   :  { %10105 = vst [vmem:[#allocation279_spill] sm:$0xff] %v5580_v44  ;;  %10106 = vst [vmem:[#allocation280_spill] sm:$0xff] %v5582_v43  ;;  %v5601_v44 = vsel %vm1040_vm0, %v1351_v34, %v1353_v58  ;;  %v5608_v46 = vsel %vm1040_vm0, %v1147_v37, %v1151_v3  ;;  %v5618_v34 = vsel %vm1040_vm0, %v1353_v58, %v1355_v59 }
 0x21e   :  { %1523 = vrot.lane.b32.xlu1 %v5585_v53, %s3734_s10  ;;  %1521 = vrot.lane.b32.xlu0 %v5588_v57, %s3734_s10  ;;  %10109 = vst [vmem:[#allocation283_spill] sm:$0xff] %v5601_v44  ;;  %10112 = vst [vmem:[#allocation286_spill] sm:$0xff] %v5608_v46  ;;  %v3603_v53 = vld [vmem:[%s9277_s0 + $0x2a8] sm:$0xff] }
 0x21f   :  { %v1153_v57 = vrot.slane %v3603_v53, 1  ;;  %10113 = vst [vmem:[#allocation287_spill] sm:$0xff] %v5618_v34  ;;  %v3604_v53 = vld [vmem:[%s9277_s0 + $0x2c0] sm:$0xff] }
 0x220   :  { %v5603_v56 = vpop.permute.xlu1 %1411  ;;  %v5605_v43 = vpop.permute.xlu0 %1409 }
 0x221   :  { %10110 = vst [vmem:[#allocation284_spill] sm:$0xff] %v5603_v56  ;;  %10111 = vst [vmem:[#allocation285_spill] sm:$0xff] %v5605_v43  ;;  %v5625_v37 = vsel %vm1040_vm0, %v1149_v36, %v1153_v57  ;;  %v1157_v43 = vrot.slane %v3604_v53, 1  ;;  %v3606_v36 = vld [vmem:[%s9277_s0 + $0x2c8] sm:$0xff] }
 0x222   :  { %1527 = vrot.lane.b32.xlu1 %v5608_v46, %s3734_s10  ;;  %1525 = vrot.lane.b32.xlu0 %v5601_v44, %s3734_s10  ;;  %10116 = vst [vmem:[#allocation290_spill] sm:$0xff] %v5625_v37  ;;  %v3605_v46 = vld [vmem:[%s9277_s0 + $0x2b8] sm:$0xff]  ;;  %v1357_v58 = vrot.slane %v3606_v36, 1  ;;  %v3608_v36 = vld [vmem:[%s9277_s0 + $0x2e0] sm:$0xff] }
 0x223   :  { %v1155_v44 = vrot.slane %v3605_v46, 1  ;;  %v5645_v53 = vsel %vm1040_vm0, %v1153_v57, %v1157_v43  ;;  %v1359_v57 = vrot.slane %v3608_v36, 1 }
 0x224   :  { %v5620_v40 = vpop.permute.xlu1 %1415  ;;  %v5622_v56 = vpop.permute.xlu0 %1413  ;;  %10119 = vst [vmem:[#allocation293_spill] sm:$0xff] %v5645_v53 }
 0x225   :  { %10114 = vst [vmem:[#allocation288_spill] sm:$0xff] %v5620_v40  ;;  %10115 = vst [vmem:[#allocation289_spill] sm:$0xff] %v5622_v56  ;;  %v5648_v46 = vsel %vm1040_vm0, %v1151_v3, %v1155_v44 }
 0x226   :  { %1531 = vrot.lane.b32.xlu1 %v5618_v34, %s3734_s10  ;;  %1529 = vrot.lane.b32.xlu0 %v5625_v37, %s3734_s10  ;;  %10120 = vst [vmem:[#allocation294_spill] sm:$0xff] %v5648_v46  ;;  %v3607_v34 = vld [vmem:[%s9277_s0 + $0x2d0] sm:$0xff] }
 0x227   :  { %v1159_v37 = vrot.slane %v3607_v34, 1 }
 0x228   :  { %v5640_v56 = vpop.permute.xlu1 %1419  ;;  %v5642_v40 = vpop.permute.xlu0 %1417 }
 0x229   :  { %10117 = vst [vmem:[#allocation291_spill] sm:$0xff] %v5640_v56  ;;  %10118 = vst [vmem:[#allocation292_spill] sm:$0xff] %v5642_v40  ;;  %v5661_v56 = vsel %vm1040_vm0, %v1355_v59, %v1357_v58  ;;  %v5668_v34 = vsel %vm1040_vm0, %v1155_v44, %v1159_v37  ;;  %v5678_v59 = vsel %vm1040_vm0, %v1357_v58, %v1359_v57  ;;  %v3612_v58 = vld [vmem:[%s9277_s0 + $0x2f8] sm:$0xff] }
 0x22a   :  { %1535 = vrot.lane.b32.xlu1 %v5645_v53, %s3734_s10  ;;  %1533 = vrot.lane.b32.xlu0 %v5648_v46, %s3734_s10  ;;  %10121 = vst [vmem:[#allocation295_spill] sm:$0xff] %v5661_v56  ;;  %10124 = vst [vmem:[#allocation298_spill] sm:$0xff] %v5668_v34  ;;  %v3609_v53 = vld [vmem:[%s9277_s0 + $0x2d8] sm:$0xff] }
 0x22b   :  { %v1161_v46 = vrot.slane %v3609_v53, 1  ;;  %10125 = vst [vmem:[#allocation299_spill] sm:$0xff] %v5678_v59  ;;  %v3610_v53 = vld [vmem:[%s9277_s0 + $0x2f0] sm:$0xff] }
 0x22c   :  { %v5663_v3 = vpop.permute.xlu1 %1423  ;;  %v5665_v40 = vpop.permute.xlu0 %1421 }
 0x22d   :  { %10122 = vst [vmem:[#allocation296_spill] sm:$0xff] %v5663_v3  ;;  %10123 = vst [vmem:[#allocation297_spill] sm:$0xff] %v5665_v40  ;;  %v5685_v44 = vsel %vm1040_vm0, %v1157_v43, %v1161_v46  ;;  %v1165_v40 = vrot.slane %v3610_v53, 1  ;;  %v105_v43 = vld [vmem:[%s9277_s0 + $0x300] sm:$0x3]  ;;  %v1361_v53 = vrot.slane %v3612_v58, 1 }
 0x22e   :  { %1539 = vrot.lane.b32.xlu1 %v5668_v34, %s3734_s10  ;;  %1537 = vrot.lane.b32.xlu0 %v5661_v56, %s3734_s10  ;;  %10128 = vst [vmem:[#allocation302_spill] sm:$0xff] %v5685_v44  ;;  %v3611_v34 = vld [vmem:[%s9277_s0 + $0x2e8] sm:$0xff]  ;;  %v1167_v62 = vrot.slane %v105_v43, 1 }
 0x22f   :  { %v1163_v56 = vrot.slane %v3611_v34, 1  ;;  %v107_v34 = vld [vmem:[%s9277_s0 + $0x310] sm:$0x3]  ;;  %v106_v58 = vld [vmem:[%s9277_s0 + $0x308] sm:$0x3] }
 0x230   :  { %v5680_v36 = vpop.permute.xlu1 %1427  ;;  %v5682_v3 = vpop.permute.xlu0 %1425  ;;  %v1169_v43 = vrot.slane %v106_v58, 1 }
 0x231   :  { %10126 = vst [vmem:[#allocation300_spill] sm:$0xff] %v5680_v36  ;;  %10127 = vst [vmem:[#allocation301_spill] sm:$0xff] %v5682_v3 }
 0x232   :  { %1543 = vrot.lane.b32.xlu1 %v5678_v59, %s3734_s10  ;;  %1541 = vrot.lane.b32.xlu0 %v5685_v44, %s3734_s10  ;;  %v5711_v59 = vsel %vm1040_vm0, %v1161_v46, %v1165_v40  ;;  %v5714_v44 = vsel %vm1040_vm0, %v1159_v37, %v1163_v56  ;;  %v5731_v37 = vsel %vm1040_vm0, %v1163_v56, %v1167_v62 }
 0x233   :  { %10131 = vst [vmem:[#allocation305_spill] sm:$0xff] %v5711_v59  ;;  %10132 = vst [vmem:[#allocation306_spill] sm:$0xff] %v5714_v44 }
 0x234   :  { %v5703_v3 = vpop.permute.xlu1 %1431  ;;  %v5705_v36 = vpop.permute.xlu0 %1429  ;;  %10135 = vst [vmem:[#allocation309_spill] sm:$0xff] %v5731_v37 }
 0x235   :  { %10129 = vst [vmem:[#allocation303_spill] sm:$0xff] %v5703_v3  ;;  %10130 = vst [vmem:[#allocation304_spill] sm:$0xff] %v5705_v36  ;;  %v5724_v3 = vsel %vm1040_vm0, %v1359_v57, %v1361_v53  ;;  %v1363_v36 = vrot.slane %v107_v34, 1 }
 0x236   :  { %1547 = vrot.lane.b32.xlu1 %v5711_v59, %s3734_s10  ;;  %1545 = vrot.lane.b32.xlu0 %v5714_v44, %s3734_s10 }
 0x237   :  { %v5738_v44 = vsel %vm1040_vm0, %v1361_v53, %v1363_v36 }
 0x238   :  { %v5726_v46 = vpop.permute.xlu1 %1435  ;;  %v5728_v63 = vpop.permute.xlu0 %1433 }
 0x239   :  { %10133 = vst [vmem:[#allocation307_spill] sm:$0xff] %v5726_v46  ;;  %10134 = vst [vmem:[#allocation308_spill] sm:$0xff] %v5728_v63  ;;  %v5745_v46 = vsel %vm1040_vm0, %v1165_v40, %v1169_v43 }
 0x23a   :  { %1551 = vrot.lane.b32.xlu1 %v5731_v37, %s3734_s10  ;;  %1549 = vrot.lane.b32.xlu0 %v5724_v3, %s3734_s10  ;;  %10138 = vst [vmem:[#allocation312_spill] sm:$0xff] %v5745_v46 }
 0x23c   :  { %v5740_v57 = vpop.permute.xlu1 %1439  ;;  %v5742_v34 = vpop.permute.xlu0 %1437 }
 0x23d   :  { %10136 = vst [vmem:[#allocation310_spill] sm:$0xff] %v5740_v57  ;;  %10137 = vst [vmem:[#allocation311_spill] sm:$0xff] %v5742_v34  ;;  %v10224_v34 = vld [vmem:[#allocation257_spill] sm:$0xff]  ;;  %v10225_v57 = vld [vmem:[#allocation258_spill] sm:$0xff] }
 0x23e   :  { %1555 = vrot.lane.b32.xlu1 %v5738_v44, %s3734_s10  ;;  %1553 = vrot.lane.b32.xlu0 %v5745_v46, %s3734_s10 }
 0x240   :  { %v5751_v62 = vpop.permute.xlu1 %1443  ;;  %v5753_v56 = vpop.permute.xlu0 %1441 }
 0x241   :  { %10139 = vst [vmem:[#allocation313_spill] sm:$0xff] %v5751_v62  ;;  %10140 = vst [vmem:[#allocation314_spill] sm:$0xff] %v5753_v56  ;;  %v10221_v62 = vld [vmem:[#allocation254_spill] sm:$0xff] }
 0x242   :  { %1751 = vrot.lane.b32.xlu1 %v4893_v5, %s3735_s2  ;;  %1749 = vrot.lane.b32.xlu0 %v4896_v1, %s3735_s2  ;;  %v6515_v5 = vld [vmem:[%s9277_s0 + $0x108] sm:$0xff] }
 0x244   :  { %v5759_v36 = vpop.permute.xlu1 %1447  ;;  %v5761_v40 = vpop.permute.xlu0 %1445 }
 0x245   :  { %10141 = vst [vmem:[#allocation315_spill] sm:$0xff] %v5759_v36  ;;  %10142 = vst [vmem:[#allocation316_spill] sm:$0xff] %v5761_v40 }
 0x246   :  { %1755 = vrot.lane.b32.xlu1 %v4912_v55, %s3735_s2  ;;  %1753 = vrot.lane.b32.xlu0 %v4905_v4, %s3735_s2 }
 0x248   :  { %v5767_v53 = vpop.permute.xlu1 %1451  ;;  %v5769_v58 = vpop.permute.xlu0 %1449 }
 0x249   :  { %10143 = vst [vmem:[#allocation317_spill] sm:$0xff] %v5767_v53  ;;  %10144 = vst [vmem:[#allocation318_spill] sm:$0xff] %v5769_v58  ;;  %v10220_v58 = vld [vmem:[#allocation251_spill] sm:$0xff] }
 0x24a   :  { %1759 = vrot.lane.b32.xlu1 %v4920_v9, %s3735_s2  ;;  %1757 = vrot.lane.b32.xlu0 %v4927_v60, %s3735_s2 }
 0x24c   :  { %v5775_v43 = vpop.permute.xlu1 %1455  ;;  %v5777_v36 = vpop.permute.xlu0 %1453 }
 0x24d   :  { %10145 = vst [vmem:[#allocation319_spill] sm:$0xff] %v5775_v43  ;;  %10146 = vst [vmem:[#allocation320_spill] sm:$0xff] %v5777_v36 }
 0x24e   :  { %1763 = vrot.lane.b32.xlu1 %v4941_v52, %s3735_s2  ;;  %1761 = vrot.lane.b32.xlu0 %v4944_v54, %s3735_s2  ;;  %v6489_v52 = vld [vmem:[%s9277_s0 + $0xf8] sm:$0xff] }
 0x24f   :  { %v2174_v54 = vrot.slane %v6489_v52, 2 }
 0x250   :  { %v5783_v4 = vpop.permute.xlu1 %1459  ;;  %v5785_v53 = vpop.permute.xlu0 %1457 }
 0x251   :  { %10147 = vst [vmem:[#allocation321_spill] sm:$0xff] %v5783_v4  ;;  %10148 = vst [vmem:[#allocation322_spill] sm:$0xff] %v5785_v53 }
 0x252   :  { %1767 = vrot.lane.b32.xlu1 %v4960_v2, %s3735_s2  ;;  %1765 = vrot.lane.b32.xlu0 %v4953_v11, %s3735_s2 }
 0x254   :  { %v5791_v9 = vpop.permute.xlu1 %1463  ;;  %v5793_v43 = vpop.permute.xlu0 %1461 }
 0x255   :  { %10149 = vst [vmem:[#allocation323_spill] sm:$0xff] %v5791_v9  ;;  %10150 = vst [vmem:[#allocation324_spill] sm:$0xff] %v5793_v43 }
 0x256   :  { %1771 = vrot.lane.b32.xlu1 %v4968_v15, %s3735_s2  ;;  %1769 = vrot.lane.b32.xlu0 %v4975_v48, %s3735_s2 }
 0x258   :  { %v5799_v36 = vpop.permute.xlu1 %1467  ;;  %v5801_v4 = vpop.permute.xlu0 %1465 }
 0x259   :  { %10151 = vst [vmem:[#allocation325_spill] sm:$0xff] %v5799_v36  ;;  %10152 = vst [vmem:[#allocation326_spill] sm:$0xff] %v5801_v4 }
 0x25a   :  { %1775 = vrot.lane.b32.xlu1 %v4989_v61, %s3735_s2  ;;  %1773 = vrot.lane.b32.xlu0 %v4992_v50, %s3735_s2  ;;  %v6466_v50 = vld [vmem:[%s9277_s0 + $0xf0] sm:$0xff] }
 0x25b   :  { %v2172_v48 = vrot.slane %v6466_v50, 2 }
 0x25c   :  { %v5807_v11 = vpop.permute.xlu1 %1471  ;;  %v5809_v9 = vpop.permute.xlu0 %1469 }
 0x25d   :  { %10153 = vst [vmem:[#allocation327_spill] sm:$0xff] %v5807_v11  ;;  %10154 = vst [vmem:[#allocation328_spill] sm:$0xff] %v5809_v9  ;;  %v10216_v9 = vld [vmem:[#allocation250_spill] sm:$0xff] }
 0x25e   :  { %1779 = vrot.lane.b32.xlu1 %v5008_v8, %s3735_s2  ;;  %1777 = vrot.lane.b32.xlu0 %v5001_v17, %s3735_s2 }
 0x260   :  { %v5815_v15 = vpop.permute.xlu1 %1475  ;;  %v5817_v36 = vpop.permute.xlu0 %1473 }
 0x261   :  { %10155 = vst [vmem:[#allocation329_spill] sm:$0xff] %v5815_v15  ;;  %10156 = vst [vmem:[#allocation330_spill] sm:$0xff] %v5817_v36 }
 0x262   :  { %1783 = vrot.lane.b32.xlu1 %v5016_v21, %s3735_s2  ;;  %1781 = vrot.lane.b32.xlu0 %v5023_v7, %s3735_s2 }
 0x264   :  { %v5823_v4 = vpop.permute.xlu1 %1479  ;;  %v5825_v11 = vpop.permute.xlu0 %1477 }
 0x265   :  { %10157 = vst [vmem:[#allocation331_spill] sm:$0xff] %v5823_v4  ;;  %10158 = vst [vmem:[#allocation332_spill] sm:$0xff] %v5825_v11 }
 0x266   :  { %1787 = vrot.lane.b32.xlu1 %v5037_v0, %s3735_s2  ;;  %1785 = vrot.lane.b32.xlu0 %v5040_v6, %s3735_s2  ;;  %v6443_v6 = vld [vmem:[%s9277_s0 + $0xd8] sm:$0xff] }
 0x268   :  { %v5831_v17 = vpop.permute.xlu1 %1483  ;;  %v5833_v15 = vpop.permute.xlu0 %1481 }
 0x269   :  { %10159 = vst [vmem:[#allocation333_spill] sm:$0xff] %v5831_v17  ;;  %10160 = vst [vmem:[#allocation334_spill] sm:$0xff] %v5833_v15  ;;  %v10213_v15 = vld [vmem:[#allocation246_spill] sm:$0xff] }
 0x26a   :  { %1791 = vrot.lane.b32.xlu1 %v5056_v14, %s3735_s2  ;;  %1789 = vrot.lane.b32.xlu0 %v5049_v23, %s3735_s2 }
 0x26c   :  { %v5839_v21 = vpop.permute.xlu1 %1487  ;;  %v5841_v4 = vpop.permute.xlu0 %1485 }
 0x26d   :  { %10161 = vst [vmem:[#allocation335_spill] sm:$0xff] %v5839_v21  ;;  %10162 = vst [vmem:[#allocation336_spill] sm:$0xff] %v5841_v4 }
 0x26e   :  { %1795 = vrot.lane.b32.xlu1 %v5064_v27, %s3735_s2  ;;  %1793 = vrot.lane.b32.xlu0 %v5071_v13, %s3735_s2  ;;  %v6417_v13 = vld [vmem:[%s9277_s0 + $0xc8] sm:$0xff] }
 0x26f   :  { %v2166_v14 = vrot.slane %v6417_v13, 2 }
 0x270   :  { %v5847_v11 = vpop.permute.xlu1 %1491  ;;  %v5849_v17 = vpop.permute.xlu0 %1489 }
 0x271   :  { %10163 = vst [vmem:[#allocation337_spill] sm:$0xff] %v5847_v11  ;;  %10164 = vst [vmem:[#allocation338_spill] sm:$0xff] %v5849_v17 }
 0x272   :  { %1799 = vrot.lane.b32.xlu1 %v5085_v10, %s3735_s2  ;;  %1797 = vrot.lane.b32.xlu0 %v5088_v12, %s3735_s2 }
 0x274   :  { %v5855_v23 = vpop.permute.xlu1 %1495  ;;  %v5857_v21 = vpop.permute.xlu0 %1493 }
 0x275   :  { %10165 = vst [vmem:[#allocation339_spill] sm:$0xff] %v5855_v23  ;;  %10166 = vst [vmem:[#allocation340_spill] sm:$0xff] %v5857_v21  ;;  %v10209_v21 = vld [vmem:[#allocation242_spill] sm:$0xff] }
 0x276   :  { %1803 = vrot.lane.b32.xlu1 %v5104_v20, %s3735_s2  ;;  %1801 = vrot.lane.b32.xlu0 %v5097_v29, %s3735_s2  ;;  %v6394_v20 = vld [vmem:[%s9277_s0 + $0xc0] sm:$0xff] }
 0x277   :  { %v2164_v10 = vrot.slane %v6394_v20, 2 }
 0x278   :  { %v5863_v27 = vpop.permute.xlu1 %1499  ;;  %v5865_v11 = vpop.permute.xlu0 %1497 }
 0x279   :  { %10167 = vst [vmem:[#allocation341_spill] sm:$0xff] %v5863_v27  ;;  %10168 = vst [vmem:[#allocation342_spill] sm:$0xff] %v5865_v11 }
 0x27a   :  { %1807 = vrot.lane.b32.xlu1 %v5112_v33, %s3735_s2  ;;  %1805 = vrot.lane.b32.xlu0 %v5119_v19, %s3735_s2 }
 0x27c   :  { %v5871_v17 = vpop.permute.xlu1 %1503  ;;  %v5873_v23 = vpop.permute.xlu0 %1501 }
 0x27d   :  { %10169 = vst [vmem:[#allocation343_spill] sm:$0xff] %v5871_v17  ;;  %10170 = vst [vmem:[#allocation344_spill] sm:$0xff] %v5873_v23 }
 0x27e   :  { %1811 = vrot.lane.b32.xlu1 %v5133_v16, %s3735_s2  ;;  %1809 = vrot.lane.b32.xlu0 %v5136_v18, %s3735_s2 }
 0x280   :  { %v5879_v29 = vpop.permute.xlu1 %1507  ;;  %v5881_v27 = vpop.permute.xlu0 %1505 }
 0x281   :  { %10171 = vst [vmem:[#allocation345_spill] sm:$0xff] %v5879_v29  ;;  %10172 = vst [vmem:[#allocation346_spill] sm:$0xff] %v5881_v27  ;;  %v10201_v27 = vld [vmem:[#allocation234_spill] sm:$0xff] }
 0x282   :  { %1815 = vrot.lane.b32.xlu1 %v5152_v26, %s3735_s2  ;;  %1813 = vrot.lane.b32.xlu0 %v5145_v35, %s3735_s2 }
 0x284   :  { %v5887_v33 = vpop.permute.xlu1 %1511  ;;  %v5889_v17 = vpop.permute.xlu0 %1509 }
 0x285   :  { %10173 = vst [vmem:[#allocation347_spill] sm:$0xff] %v5887_v33  ;;  %10174 = vst [vmem:[#allocation348_spill] sm:$0xff] %v5889_v17 }
 0x286   :  { %1819 = vrot.lane.b32.xlu1 %v5160_v39, %s3735_s2  ;;  %1817 = vrot.lane.b32.xlu0 %v5167_v25, %s3735_s2  ;;  %v6371_v25 = vld [vmem:[%s9277_s0 + $0xa8] sm:$0xff] }
 0x288   :  { %v5895_v23 = vpop.permute.xlu1 %1515  ;;  %v5897_v29 = vpop.permute.xlu0 %1513 }
 0x289   :  { %10175 = vst [vmem:[#allocation349_spill] sm:$0xff] %v5895_v23  ;;  %10176 = vst [vmem:[#allocation350_spill] sm:$0xff] %v5897_v29 }
 0x28a   :  { %1823 = vrot.lane.b32.xlu1 %v5181_v22, %s3735_s2  ;;  %1821 = vrot.lane.b32.xlu0 %v5184_v24, %s3735_s2  ;;  %v6345_v22 = vld [vmem:[%s9277_s0 + $0x98] sm:$0xff] }
 0x28b   :  { %v2158_v24 = vrot.slane %v6345_v22, 2 }
 0x28c   :  { %v5903_v35 = vpop.permute.xlu1 %1519  ;;  %v5905_v33 = vpop.permute.xlu0 %1517 }
 0x28d   :  { %10177 = vst [vmem:[#allocation351_spill] sm:$0xff] %v5903_v35  ;;  %10178 = vst [vmem:[#allocation352_spill] sm:$0xff] %v5905_v33  ;;  %v10197_v33 = vld [vmem:[#allocation230_spill] sm:$0xff] }
 0x28e   :  { %1827 = vrot.lane.b32.xlu1 %v5200_v32, %s3735_s2  ;;  %1825 = vrot.lane.b32.xlu0 %v5193_v41, %s3735_s2 }
 0x290   :  { %v5911_v39 = vpop.permute.xlu1 %1523  ;;  %v5913_v23 = vpop.permute.xlu0 %1521 }
 0x291   :  { %10179 = vst [vmem:[#allocation353_spill] sm:$0xff] %v5911_v39  ;;  %10180 = vst [vmem:[#allocation354_spill] sm:$0xff] %v5913_v23 }
 0x292   :  { %1831 = vrot.lane.b32.xlu1 %v5208_v45, %s3735_s2  ;;  %1829 = vrot.lane.b32.xlu0 %v5215_v31, %s3735_s2 }
 0x294   :  { %v5919_v29 = vpop.permute.xlu1 %1527  ;;  %v5921_v35 = vpop.permute.xlu0 %1525 }
 0x295   :  { %10181 = vst [vmem:[#allocation355_spill] sm:$0xff] %v5919_v29  ;;  %10182 = vst [vmem:[#allocation356_spill] sm:$0xff] %v5921_v35 }
 0x296   :  { %1835 = vrot.lane.b32.xlu1 %v5229_v28, %s3735_s2  ;;  %1833 = vrot.lane.b32.xlu0 %v5232_v30, %s3735_s2  ;;  %v6322_v30 = vld [vmem:[%s9277_s0 + $0x90] sm:$0xff] }
 0x297   :  { %v2156_v31 = vrot.slane %v6322_v30, 2 }
 0x298   :  { %v5927_v41 = vpop.permute.xlu1 %1531  ;;  %v5929_v39 = vpop.permute.xlu0 %1529 }
 0x299   :  { %10183 = vst [vmem:[#allocation357_spill] sm:$0xff] %v5927_v41  ;;  %10184 = vst [vmem:[#allocation358_spill] sm:$0xff] %v5929_v39  ;;  %v10189_v39 = vld [vmem:[#allocation222_spill] sm:$0xff] }
 0x29a   :  { %1839 = vrot.lane.b32.xlu1 %v5248_v38, %s3735_s2  ;;  %1837 = vrot.lane.b32.xlu0 %v5241_v47, %s3735_s2 }
 0x29c   :  { %v5935_v45 = vpop.permute.xlu1 %1535  ;;  %v5937_v29 = vpop.permute.xlu0 %1533 }
 0x29d   :  { %10185 = vst [vmem:[#allocation359_spill] sm:$0xff] %v5935_v45  ;;  %10186 = vst [vmem:[#allocation360_spill] sm:$0xff] %v5937_v29  ;;  %v10192_v29 = vld [vmem:[#allocation226_spill] sm:$0xff] }
 0x29e   :  { %1843 = vrot.lane.b32.xlu1 %v5258_v51, %s3735_s2  ;;  %1841 = vrot.lane.b32.xlu0 %v5265_v42, %s3735_s2  ;;  %v10193_v51 = vld [vmem:[#allocation223_spill] sm:$0xff] }
 0x2a0   :  { %v5943_v35 = vpop.permute.xlu1 %1539  ;;  %v5945_v41 = vpop.permute.xlu0 %1537 }
 0x2a1   :  { %10187 = vst [vmem:[#allocation361_spill] sm:$0xff] %v5943_v35  ;;  %10188 = vst [vmem:[#allocation362_spill] sm:$0xff] %v5945_v41  ;;  %v10196_v41 = vld [vmem:[#allocation227_spill] sm:$0xff] }
 0x2a2   :  { %1847 = vrot.lane.b32.xlu1 %v5285_v49, %s3735_s2  ;;  %1845 = vrot.lane.b32.xlu0 %v10189_v39, %s3735_s2 }
 0x2a4   :  { %v5951_v47 = vpop.permute.xlu1 %1543  ;;  %v5953_v45 = vpop.permute.xlu0 %1541 }
 0x2a5   :  { %10190 = vst [vmem:[#allocation363_spill] sm:$0xff] %v5951_v47  ;;  %10191 = vst [vmem:[#allocation364_spill] sm:$0xff] %v5953_v45  ;;  %v10200_v45 = vld [vmem:[#allocation233_spill] sm:$0xff] }
 0x2a6   :  { %1851 = vrot.lane.b32.xlu1 %v10192_v29, %s3735_s2  ;;  %1849 = vrot.lane.b32.xlu0 %v10193_v51, %s3735_s2  ;;  %v6299_v29 = vld [vmem:[%s9277_s0 + $0x78] sm:$0xff] }
 0x2a8   :  { %v5959_v23 = vpop.permute.xlu1 %1547  ;;  %v5961_v35 = vpop.permute.xlu0 %1545 }
 0x2a9   :  { %10194 = vst [vmem:[#allocation223_spill] sm:$0xff] %v5959_v23  ;;  %10195 = vst [vmem:[#allocation365_spill] sm:$0xff] %v5961_v35  ;;  %v10204_v35 = vld [vmem:[#allocation238_spill] sm:$0xff] }
 0x2aa   :  { %1855 = vrot.lane.b32.xlu1 %v10196_v41, %s3735_s2  ;;  %1853 = vrot.lane.b32.xlu0 %v10197_v33, %s3735_s2  ;;  %v10205_v41 = vld [vmem:[#allocation235_spill] sm:$0xff]  ;;  %v6273_v33 = vld [vmem:[%s9277_s0 + $0x68] sm:$0xff] }
 0x2ab   :  { %v2150_v49 = vrot.slane %v6273_v33, 2 }
 0x2ac   :  { %v5967_v17 = vpop.permute.xlu1 %1551  ;;  %v5969_v47 = vpop.permute.xlu0 %1549 }
 0x2ad   :  { %10198 = vst [vmem:[#allocation227_spill] sm:$0xff] %v5967_v17  ;;  %10199 = vst [vmem:[#allocation366_spill] sm:$0xff] %v5969_v47  ;;  %v10208_v47 = vld [vmem:[#allocation239_spill] sm:$0xff] }
 0x2ae   :  { %1859 = vrot.lane.b32.xlu1 %v10200_v45, %s3735_s2  ;;  %1857 = vrot.lane.b32.xlu0 %v10201_v27, %s3735_s2 }
 0x2b0   :  { %v5975_v51 = vpop.permute.xlu1 %1555  ;;  %v5977_v23 = vpop.permute.xlu0 %1553 }
 0x2b1   :  { %10202 = vst [vmem:[#allocation367_spill] sm:$0xff] %v5975_v51  ;;  %10203 = vst [vmem:[#allocation368_spill] sm:$0xff] %v5977_v23  ;;  %v10212_v23 = vld [vmem:[#allocation245_spill] sm:$0xff] }
 0x2b2   :  { %1863 = vrot.lane.b32.xlu1 %v10204_v35, %s3735_s2  ;;  %1861 = vrot.lane.b32.xlu0 %v10205_v41, %s3735_s2 }
 0x2b4   :  { %v5983_v11 = vpop.permute.xlu1 %1751  ;;  %v5985_v17 = vpop.permute.xlu0 %1749 }
 0x2b5   :  { %10206 = vst [vmem:[#allocation235_spill] sm:$0xff] %v5983_v11  ;;  %10207 = vst [vmem:[#allocation369_spill] sm:$0xff] %v5985_v17  ;;  %v6250_v11 = vld [vmem:[%s9277_s0 + $0x60] sm:$0xff] }
 0x2b6   :  { %1867 = vrot.lane.b32.xlu1 %v10208_v47, %s3735_s2  ;;  %1865 = vrot.lane.b32.xlu0 %v10209_v21, %s3735_s2  ;;  %v10217_v47 = vld [vmem:[#allocation247_spill] sm:$0xff]  ;;  %v2148_v45 = vrot.slane %v6250_v11, 2 }
 0x2b8   :  { %v5991_v4 = vpop.permute.xlu1 %1755  ;;  %v5993_v51 = vpop.permute.xlu0 %1753 }
 0x2b9   :  { %10210 = vst [vmem:[#allocation239_spill] sm:$0xff] %v5991_v4  ;;  %10211 = vst [vmem:[#allocation370_spill] sm:$0xff] %v5993_v51  ;;  %v6201_v51 = vld [vmem:[%s9277_s0 + $0x38] sm:$0xff] }
 0x2ba   :  { %1871 = vrot.lane.b32.xlu1 %v10212_v23, %s3735_s2  ;;  %1869 = vrot.lane.b32.xlu0 %v10213_v15, %s3735_s2  ;;  %v6227_v15 = vld [vmem:[%s9277_s0 + $0x48] sm:$0xff] }
 0x2bc   :  { %v5999_v41 = vpop.permute.xlu1 %1759  ;;  %v6001_v36 = vpop.permute.xlu0 %1757 }
 0x2bd   :  { %10214 = vst [vmem:[#allocation371_spill] sm:$0xff] %v5999_v41  ;;  %10215 = vst [vmem:[#allocation372_spill] sm:$0xff] %v6001_v36  ;;  %v10233_v41 = vld [vmem:[#allocation266_spill] sm:$0xff] }
 0x2be   :  { %1875 = vrot.lane.b32.xlu1 %v10216_v9, %s3735_s2  ;;  %1873 = vrot.lane.b32.xlu0 %v10217_v47, %s3735_s2  ;;  %v10237_v36 = vld [vmem:[#allocation270_spill] sm:$0xff]  ;;  %v2142_v9 = vrot.slane %v6201_v51, 2 }
 0x2c0   :  { %v6007_v43 = vpop.permute.xlu1 %1763  ;;  %v6009_v53 = vpop.permute.xlu0 %1761 }
 0x2c1   :  { %10218 = vst [vmem:[#allocation247_spill] sm:$0xff] %v6007_v43  ;;  %10219 = vst [vmem:[#allocation373_spill] sm:$0xff] %v6009_v53  ;;  %v10228_v53 = vld [vmem:[#allocation262_spill] sm:$0xff] }
 0x2c2   :  { %1879 = vrot.lane.b32.xlu1 %v10220_v58, %s3735_s2  ;;  %1877 = vrot.lane.b32.xlu0 %v10221_v62, %s3735_s2  ;;  %v10229_v58 = vld [vmem:[#allocation259_spill] sm:$0xff] }
 0x2c4   :  { %v6015_v40 = vpop.permute.xlu1 %1767  ;;  %v6017_v56 = vpop.permute.xlu0 %1765 }
 0x2c5   :  { %10222 = vst [vmem:[#allocation251_spill] sm:$0xff] %v6015_v40  ;;  %10223 = vst [vmem:[#allocation374_spill] sm:$0xff] %v6017_v56  ;;  %v10232_v56 = vld [vmem:[#allocation263_spill] sm:$0xff] }
 0x2c6   :  { %1883 = vrot.lane.b32.xlu1 %v10224_v34, %s3735_s2  ;;  %1881 = vrot.lane.b32.xlu0 %v10225_v57, %s3735_s2  ;;  %v6178_v57 = vld [vmem:[%s9277_s0 + $0x30] sm:$0xff] }
 0x2c8   :  { %v6023_v47 = vpop.permute.xlu1 %1771  ;;  %v6025_v63 = vpop.permute.xlu0 %1769 }
 0x2c9   :  { %10226 = vst [vmem:[#allocation375_spill] sm:$0xff] %v6023_v47  ;;  %10227 = vst [vmem:[#allocation376_spill] sm:$0xff] %v6025_v63  ;;  %v10236_v63 = vld [vmem:[#allocation269_spill] sm:$0xff] }
 0x2ca   :  { %1887 = vrot.lane.b32.xlu1 %v10228_v53, %s3735_s2  ;;  %1885 = vrot.lane.b32.xlu0 %v10229_v58, %s3735_s2 }
 0x2cc   :  { %v6031_v43 = vpop.permute.xlu1 %1775  ;;  %v6033_v40 = vpop.permute.xlu0 %1773 }
 0x2cd   :  { %10230 = vst [vmem:[#allocation259_spill] sm:$0xff] %v6031_v43  ;;  %10231 = vst [vmem:[#allocation377_spill] sm:$0xff] %v6033_v40  ;;  %v10240_v40 = vld [vmem:[#allocation274_spill] sm:$0xff] }
 0x2ce   :  { %1891 = vrot.lane.b32.xlu1 %v10232_v56, %s3735_s2  ;;  %1889 = vrot.lane.b32.xlu0 %v10233_v41, %s3735_s2  ;;  %v10241_v56 = vld [vmem:[#allocation271_spill] sm:$0xff] }
 0x2d0   :  { %v6039_v4 = vpop.permute.xlu1 %1779  ;;  %v6041_v47 = vpop.permute.xlu0 %1777 }
 0x2d1   :  { %10234 = vst [vmem:[#allocation263_spill] sm:$0xff] %v6039_v4  ;;  %10235 = vst [vmem:[#allocation378_spill] sm:$0xff] %v6041_v47  ;;  %v10244_v47 = vld [vmem:[#allocation275_spill] sm:$0xff] }
 0x2d2   :  { %1895 = vrot.lane.b32.xlu1 %v10236_v63, %s3735_s2  ;;  %1893 = vrot.lane.b32.xlu0 %v10237_v36, %s3735_s2  ;;  %v10245_v63 = vld [vmem:[#allocation278_spill] sm:$0xff] }
 0x2d4   :  { %v6047_v58 = vpop.permute.xlu1 %1783  ;;  %v6049_v43 = vpop.permute.xlu0 %1781 }
 0x2d5   :  { %10238 = vst [vmem:[#allocation379_spill] sm:$0xff] %v6047_v58  ;;  %10239 = vst [vmem:[#allocation380_spill] sm:$0xff] %v6049_v43  ;;  %v10248_v43 = vld [vmem:[#allocation281_spill] sm:$0xff] }
 0x2d6   :  { %1899 = vrot.lane.b32.xlu1 %v10240_v40, %s3735_s2  ;;  %1897 = vrot.lane.b32.xlu0 %v10241_v56, %s3735_s2  ;;  %v10249_v40 = vld [vmem:[#allocation282_spill] sm:$0xff] }
 0x2d8   :  { %v6055_v41 = vpop.permute.xlu1 %1787  ;;  %v6057_v4 = vpop.permute.xlu0 %1785 }
 0x2d9   :  { %10242 = vst [vmem:[#allocation271_spill] sm:$0xff] %v6055_v41  ;;  %10243 = vst [vmem:[#allocation381_spill] sm:$0xff] %v6057_v4  ;;  %v10252_v4 = vld [vmem:[#allocation286_spill] sm:$0xff] }
 0x2da   :  { %1903 = vrot.lane.b32.xlu1 %v10244_v47, %s3735_s2  ;;  %1901 = vrot.lane.b32.xlu0 %v10245_v63, %s3735_s2  ;;  %v10253_v47 = vld [vmem:[#allocation283_spill] sm:$0xff] }
 0x2dc   :  { %v6063_v36 = vpop.permute.xlu1 %1791  ;;  %v6065_v58 = vpop.permute.xlu0 %1789 }
 0x2dd   :  { %10246 = vst [vmem:[#allocation275_spill] sm:$0xff] %v6063_v36  ;;  %10247 = vst [vmem:[#allocation382_spill] sm:$0xff] %v6065_v58  ;;  %v10256_v58 = vld [vmem:[#allocation287_spill] sm:$0xff] }
 0x2de   :  { %1907 = vrot.lane.b32.xlu1 %v10248_v43, %s3735_s2  ;;  %1905 = vrot.lane.b32.xlu0 %v10249_v40, %s3735_s2  ;;  %v10257_v43 = vld [vmem:[#allocation290_spill] sm:$0xff] }
 0x2e0   :  { %v6071_v56 = vpop.permute.xlu1 %1795  ;;  %v6073_v41 = vpop.permute.xlu0 %1793 }
 0x2e1   :  { %10250 = vst [vmem:[#allocation383_spill] sm:$0xff] %v6071_v56  ;;  %10251 = vst [vmem:[#allocation384_spill] sm:$0xff] %v6073_v41  ;;  %v10260_v41 = vld [vmem:[#allocation293_spill] sm:$0xff] }
 0x2e2   :  { %1911 = vrot.lane.b32.xlu1 %v10252_v4, %s3735_s2  ;;  %1909 = vrot.lane.b32.xlu0 %v10253_v47, %s3735_s2  ;;  %v10261_v4 = vld [vmem:[#allocation294_spill] sm:$0xff] }
 0x2e4   :  { %v6079_v63 = vpop.permute.xlu1 %1799  ;;  %v6081_v36 = vpop.permute.xlu0 %1797 }
 0x2e5   :  { %10254 = vst [vmem:[#allocation283_spill] sm:$0xff] %v6079_v63  ;;  %10255 = vst [vmem:[#allocation385_spill] sm:$0xff] %v6081_v36  ;;  %v10264_v36 = vld [vmem:[#allocation298_spill] sm:$0xff] }
 0x2e6   :  { %1915 = vrot.lane.b32.xlu1 %v10256_v58, %s3735_s2  ;;  %1913 = vrot.lane.b32.xlu0 %v10257_v43, %s3735_s2  ;;  %v10265_v58 = vld [vmem:[#allocation295_spill] sm:$0xff] }
 0x2e8   :  { %v6087_v40 = vpop.permute.xlu1 %1803  ;;  %v6089_v56 = vpop.permute.xlu0 %1801 }
 0x2e9   :  { %10258 = vst [vmem:[#allocation287_spill] sm:$0xff] %v6087_v40  ;;  %10259 = vst [vmem:[#allocation386_spill] sm:$0xff] %v6089_v56  ;;  %v10268_v56 = vld [vmem:[#allocation299_spill] sm:$0xff] }
 0x2ea   :  { %1919 = vrot.lane.b32.xlu1 %v10260_v41, %s3735_s2  ;;  %1917 = vrot.lane.b32.xlu0 %v10261_v4, %s3735_s2  ;;  %v10269_v41 = vld [vmem:[#allocation302_spill] sm:$0xff] }
 0x2ec   :  { %v6095_v47 = vpop.permute.xlu1 %1807  ;;  %v6097_v63 = vpop.permute.xlu0 %1805 }
 0x2ed   :  { %10262 = vst [vmem:[#allocation387_spill] sm:$0xff] %v6095_v47  ;;  %10263 = vst [vmem:[#allocation388_spill] sm:$0xff] %v6097_v63 }
 0x2ee   :  { %1923 = vrot.lane.b32.xlu1 %v10264_v36, %s3735_s2  ;;  %1921 = vrot.lane.b32.xlu0 %v10265_v58, %s3735_s2  ;;  %v10272_v36 = vld [vmem:[#allocation306_spill] sm:$0xff] }
 0x2f0   :  { %v6103_v43 = vpop.permute.xlu1 %1811  ;;  %v6105_v40 = vpop.permute.xlu0 %1809 }
 0x2f1   :  { %10266 = vst [vmem:[#allocation295_spill] sm:$0xff] %v6103_v43  ;;  %10267 = vst [vmem:[#allocation389_spill] sm:$0xff] %v6105_v40  ;;  %v3618_v40 = vld [vmem:[%s9277_s0 + $0x28] sm:$0xff] }
 0x2f2   :  { %1927 = vrot.lane.b32.xlu1 %v10268_v56, %s3735_s2  ;;  %1925 = vrot.lane.b32.xlu0 %v10269_v41, %s3735_s2  ;;  %v2393_v63 = vrot.slane %v3618_v40, 2 }
 0x2f4   :  { %v6111_v4 = vpop.permute.xlu1 %1815  ;;  %v6113_v47 = vpop.permute.xlu0 %1813 }
 0x2f5   :  { %10270 = vst [vmem:[#allocation299_spill] sm:$0xff] %v6111_v4  ;;  %10271 = vst [vmem:[#allocation390_spill] sm:$0xff] %v6113_v47 }
 0x2f6   :  { %1931 = vrot.lane.b32.xlu1 %v5711_v59, %s3735_s2  ;;  %1929 = vrot.lane.b32.xlu0 %v10272_v36, %s3735_s2  ;;  %v6134_v59 = vld [vmem:[%s9277_s0 + $0x8] sm:$0xff] }
 0x2f7   :  { %v2137_v36 = vrot.slane %v6134_v59, 2 }
 0x2f8   :  { %v6119_v58 = vpop.permute.xlu1 %1819  ;;  %v6121_v43 = vpop.permute.xlu0 %1817 }
 0x2f9   :  { %10273 = vst [vmem:[#allocation391_spill] sm:$0xff] %v6119_v58  ;;  %10274 = vst [vmem:[#allocation392_spill] sm:$0xff] %v6121_v43  ;;  %v6140_v58 = vld [vmem:[%s9277_s0 + $0x20] sm:$0xff]  ;;  %v3617_v43 = vld [vmem:[%s9277_s0 + $0x10] sm:$0xff] }
 0x2fa   :  { %1935 = vrot.lane.b32.xlu1 %v5731_v37, %s3735_s2  ;;  %1933 = vrot.lane.b32.xlu0 %v5724_v3, %s3735_s2  ;;  %v2138_v37 = vrot.slane %v6140_v58, 2  ;;  %v6146_v3 = vld [vmem:[%s9277_s0] sm:$0xff]  ;;  %v2392_v47 = vrot.slane %v3617_v43, 2  ;;  %v2140_v43 = vrot.slane %v6178_v57, 2 }
 0x2fc   :  { %v6127_v56 = vpop.permute.xlu1 %1823  ;;  %v6129_v41 = vpop.permute.xlu0 %1821 }
 0x2fd   :  { %10275 = vst [vmem:[#allocation393_spill] sm:$0xff] %v6127_v56  ;;  %10276 = vst [vmem:[#allocation394_spill] sm:$0xff] %v6129_v41  ;;  %v2134_v41 = vrot.slane %v6146_v3, 2  ;;  %v6152_v56 = vld [vmem:[%s9277_s0 + $0x18] sm:$0xff] }
 0x2fe   :  { %v2135_v4 = vrot.slane %v6152_v56, 2  ;;  %1939 = vrot.lane.b32.xlu1 %v5738_v44, %s3735_s2  ;;  %1937 = vrot.lane.b32.xlu0 %v5745_v46, %s3735_s2  ;;  %v6170_v44 = vsel %vm2133_vm1, %v2137_v36, %v2138_v37  ;;  %v3620_v36 = vld [vmem:[%s9277_s0 + $0x40] sm:$0xff] }
 0x2ff   :  { %10279 = vst [vmem:[#allocation397_spill] sm:$0xff] %v6170_v44  ;;  %v2395_v40 = vrot.slane %v3620_v36, 2 }
 0x300   :  { %v6165_v53 = vpop.permute.xlu1 %1827  ;;  %v6167_v34 = vpop.permute.xlu0 %1825  ;;  %v6173_v46 = vsel %vm2133_vm1, %v2134_v41, %v2135_v4  ;;  %v6189_v41 = vsel %vm2133_vm1, %v2392_v47, %v2393_v63  ;;  %v6196_v62 = vsel %vm2133_vm1, %v2135_v4, %v2140_v43 }
 0x301   :  { %10277 = vst [vmem:[#allocation395_spill] sm:$0xff] %v6165_v53  ;;  %10278 = vst [vmem:[#allocation396_spill] sm:$0xff] %v6167_v34  ;;  %v6209_v47 = vsel %vm2133_vm1, %v2393_v63, %v2395_v40  ;;  %v2144_v63 = vrot.slane %v6227_v15, 2 }
 0x302   :  { %10280 = vst [vmem:[#allocation398_spill] sm:$0xff] %v6173_v46  ;;  %2459 = vrot.lane.b32.xlu1 %v6170_v44, %s3734_s10  ;;  %2457 = vrot.lane.b32.xlu0 %v6173_v46, %s3734_s10  ;;  %10283 = vst [vmem:[#allocation401_spill] sm:$0xff] %v6196_v62 }
 0x303   :  { %v6245_v17 = vsel %vm2133_vm1, %v2140_v43, %v2144_v63  ;;  %v6268_v27 = vsel %vm2133_vm1, %v2144_v63, %v2148_v45 }
 0x304   :  { %v6191_v53 = vpop.permute.xlu1 %1831  ;;  %v6193_v34 = vpop.permute.xlu0 %1829  ;;  %10290 = vst [vmem:[#allocation408_spill] sm:$0xff] %v6245_v17  ;;  %10293 = vst [vmem:[#allocation411_spill] sm:$0xff] %v6268_v27 }
 0x305   :  { %10281 = vst [vmem:[#allocation399_spill] sm:$0xff] %v6191_v53  ;;  %10282 = vst [vmem:[#allocation400_spill] sm:$0xff] %v6193_v34  ;;  %v6216_v53 = vsel %vm2133_vm1, %v2138_v37, %v2142_v9  ;;  %v6221_v34 = vld [vmem:[%s9277_s0 + $0x50] sm:$0xff]  ;;  %v3624_v37 = vld [vmem:[%s9277_s0 + $0x58] sm:$0xff] }
 0x306   :  { %2463 = vrot.lane.b32.xlu1 %v6196_v62, %s3734_s10  ;;  %2461 = vrot.lane.b32.xlu0 %v6189_v41, %s3734_s10  ;;  %10286 = vst [vmem:[#allocation404_spill] sm:$0xff] %v6216_v53  ;;  %v2146_v23 = vrot.slane %v6221_v34, 2 }
 0x308   :  { %v6211_v36 = vpop.permute.xlu1 %1835  ;;  %v6213_v4 = vpop.permute.xlu0 %1833  ;;  %v6242_v35 = vsel %vm2133_vm1, %v2142_v9, %v2146_v23  ;;  %v3626_v9 = vld [vmem:[%s9277_s0 + $0x70] sm:$0xff] }
 0x309   :  { %10284 = vst [vmem:[#allocation402_spill] sm:$0xff] %v6211_v36  ;;  %10285 = vst [vmem:[#allocation403_spill] sm:$0xff] %v6213_v4  ;;  %v2397_v4 = vrot.slane %v3624_v37, 2  ;;  %v2399_v37 = vrot.slane %v3626_v9, 2 }
 0x30a   :  { %2467 = vrot.lane.b32.xlu1 %v6209_v47, %s3734_s10  ;;  %2465 = vrot.lane.b32.xlu0 %v6216_v53, %s3734_s10  ;;  %10289 = vst [vmem:[#allocation407_spill] sm:$0xff] %v6242_v35 }
 0x30b   :  { %v6261_v43 = vsel %vm2133_vm1, %v2395_v40, %v2397_v4  ;;  %v6281_v40 = vsel %vm2133_vm1, %v2397_v4, %v2399_v37  ;;  %v2152_v4 = vrot.slane %v6299_v29, 2 }
 0x30c   :  { %v6237_v36 = vpop.permute.xlu1 %1839  ;;  %v6239_v21 = vpop.permute.xlu0 %1837 }
 0x30d   :  { %10287 = vst [vmem:[#allocation405_spill] sm:$0xff] %v6237_v36  ;;  %10288 = vst [vmem:[#allocation406_spill] sm:$0xff] %v6239_v21  ;;  %v6317_v28 = vsel %vm2133_vm1, %v2148_v45, %v2152_v4  ;;  %v6340_v32 = vsel %vm2133_vm1, %v2152_v4, %v2156_v31 }
 0x30e   :  { %2471 = vrot.lane.b32.xlu1 %v6242_v35, %s3734_s10  ;;  %2469 = vrot.lane.b32.xlu0 %v6245_v17, %s3734_s10  ;;  %10300 = vst [vmem:[#allocation418_spill] sm:$0xff] %v6317_v28  ;;  %10303 = vst [vmem:[#allocation421_spill] sm:$0xff] %v6340_v32 }
 0x310   :  { %v6263_v36 = vpop.permute.xlu1 %1843  ;;  %v6265_v21 = vpop.permute.xlu0 %1841 }
 0x311   :  { %10291 = vst [vmem:[#allocation409_spill] sm:$0xff] %v6263_v36  ;;  %10292 = vst [vmem:[#allocation410_spill] sm:$0xff] %v6265_v21  ;;  %v6288_v36 = vsel %vm2133_vm1, %v2146_v23, %v2150_v49  ;;  %v6293_v21 = vld [vmem:[%s9277_s0 + $0x80] sm:$0xff]  ;;  %v3630_v23 = vld [vmem:[%s9277_s0 + $0x88] sm:$0xff] }
 0x312   :  { %2475 = vrot.lane.b32.xlu1 %v6268_v27, %s3734_s10  ;;  %2473 = vrot.lane.b32.xlu0 %v6261_v43, %s3734_s10  ;;  %10296 = vst [vmem:[#allocation414_spill] sm:$0xff] %v6288_v36  ;;  %v2154_v39 = vrot.slane %v6293_v21, 2 }
 0x314   :  { %v6283_v9 = vpop.permute.xlu1 %1847  ;;  %v6285_v63 = vpop.permute.xlu0 %1845  ;;  %v6314_v38 = vsel %vm2133_vm1, %v2150_v49, %v2154_v39  ;;  %v3632_v49 = vld [vmem:[%s9277_s0 + $0xa0] sm:$0xff] }
 0x315   :  { %10294 = vst [vmem:[#allocation412_spill] sm:$0xff] %v6283_v9  ;;  %10295 = vst [vmem:[#allocation413_spill] sm:$0xff] %v6285_v63  ;;  %v2401_v63 = vrot.slane %v3630_v23, 2  ;;  %v2403_v23 = vrot.slane %v3632_v49, 2 }
 0x316   :  { %2479 = vrot.lane.b32.xlu1 %v6281_v40, %s3734_s10  ;;  %2477 = vrot.lane.b32.xlu0 %v6288_v36, %s3734_s10  ;;  %10299 = vst [vmem:[#allocation417_spill] sm:$0xff] %v6314_v38 }
 0x317   :  { %v6333_v45 = vsel %vm2133_vm1, %v2399_v37, %v2401_v63  ;;  %v6353_v37 = vsel %vm2133_vm1, %v2401_v63, %v2403_v23  ;;  %v2160_v63 = vrot.slane %v6371_v25, 2 }
 0x318   :  { %v6309_v9 = vpop.permute.xlu1 %1851  ;;  %v6311_v42 = vpop.permute.xlu0 %1849 }
 0x319   :  { %10297 = vst [vmem:[#allocation415_spill] sm:$0xff] %v6309_v9  ;;  %10298 = vst [vmem:[#allocation416_spill] sm:$0xff] %v6311_v42  ;;  %v6389_v19 = vsel %vm2133_vm1, %v2156_v31, %v2160_v63  ;;  %v6412_v12 = vsel %vm2133_vm1, %v2160_v63, %v2164_v10 }
 0x31a   :  { %2483 = vrot.lane.b32.xlu1 %v6314_v38, %s3734_s10  ;;  %2481 = vrot.lane.b32.xlu0 %v6317_v28, %s3734_s10  ;;  %10310 = vst [vmem:[#allocation428_spill] sm:$0xff] %v6389_v19  ;;  %10313 = vst [vmem:[#allocation431_spill] sm:$0xff] %v6412_v12 }
 0x31c   :  { %v6335_v9 = vpop.permute.xlu1 %1855  ;;  %v6337_v42 = vpop.permute.xlu0 %1853 }
 0x31d   :  { %10301 = vst [vmem:[#allocation419_spill] sm:$0xff] %v6335_v9  ;;  %10302 = vst [vmem:[#allocation420_spill] sm:$0xff] %v6337_v42  ;;  %v6360_v9 = vsel %vm2133_vm1, %v2154_v39, %v2158_v24  ;;  %v6365_v42 = vld [vmem:[%s9277_s0 + $0xb0] sm:$0xff]  ;;  %v3636_v39 = vld [vmem:[%s9277_s0 + $0xb8] sm:$0xff] }
 0x31e   :  { %2487 = vrot.lane.b32.xlu1 %v6340_v32, %s3734_s10  ;;  %2485 = vrot.lane.b32.xlu0 %v6333_v45, %s3734_s10  ;;  %10306 = vst [vmem:[#allocation424_spill] sm:$0xff] %v6360_v9  ;;  %v2162_v16 = vrot.slane %v6365_v42, 2 }
 0x320   :  { %v6355_v49 = vpop.permute.xlu1 %1859  ;;  %v6357_v4 = vpop.permute.xlu0 %1857  ;;  %v6386_v18 = vsel %vm2133_vm1, %v2158_v24, %v2162_v16  ;;  %v3638_v24 = vld [vmem:[%s9277_s0 + $0xd0] sm:$0xff] }
 0x321   :  { %10304 = vst [vmem:[#allocation422_spill] sm:$0xff] %v6355_v49  ;;  %10305 = vst [vmem:[#allocation423_spill] sm:$0xff] %v6357_v4  ;;  %v2405_v4 = vrot.slane %v3636_v39, 2  ;;  %v2407_v39 = vrot.slane %v3638_v24, 2 }
 0x322   :  { %2491 = vrot.lane.b32.xlu1 %v6353_v37, %s3734_s10  ;;  %2489 = vrot.lane.b32.xlu0 %v6360_v9, %s3734_s10  ;;  %10309 = vst [vmem:[#allocation427_spill] sm:$0xff] %v6386_v18 }
 0x323   :  { %v6405_v31 = vsel %vm2133_vm1, %v2403_v23, %v2405_v4  ;;  %v6425_v23 = vsel %vm2133_vm1, %v2405_v4, %v2407_v39  ;;  %v2168_v4 = vrot.slane %v6443_v6, 2 }
 0x324   :  { %v6381_v49 = vpop.permute.xlu1 %1863  ;;  %v6383_v26 = vpop.permute.xlu0 %1861 }
 0x325   :  { %10307 = vst [vmem:[#allocation425_spill] sm:$0xff] %v6381_v49  ;;  %10308 = vst [vmem:[#allocation426_spill] sm:$0xff] %v6383_v26  ;;  %v6461_v8 = vsel %vm2133_vm1, %v2164_v10, %v2168_v4  ;;  %v6484_v2 = vsel %vm2133_vm1, %v2168_v4, %v2172_v48 }
 0x326   :  { %2495 = vrot.lane.b32.xlu1 %v6386_v18, %s3734_s10  ;;  %2493 = vrot.lane.b32.xlu0 %v6389_v19, %s3734_s10  ;;  %10320 = vst [vmem:[#allocation438_spill] sm:$0xff] %v6461_v8  ;;  %10324 = vst [vmem:[#allocation442_spill] sm:$0xff] %v6484_v2 }
 0x328   :  { %v6407_v49 = vpop.permute.xlu1 %1867  ;;  %v6409_v26 = vpop.permute.xlu0 %1865 }
 0x329   :  { %10311 = vst [vmem:[#allocation429_spill] sm:$0xff] %v6407_v49  ;;  %10312 = vst [vmem:[#allocation430_spill] sm:$0xff] %v6409_v26  ;;  %v6432_v49 = vsel %vm2133_vm1, %v2162_v16, %v2166_v14  ;;  %v6437_v26 = vld [vmem:[%s9277_s0 + $0xe0] sm:$0xff]  ;;  %v3642_v16 = vld [vmem:[%s9277_s0 + $0xe8] sm:$0xff] }
 0x32a   :  { %2499 = vrot.lane.b32.xlu1 %v6412_v12, %s3734_s10  ;;  %2497 = vrot.lane.b32.xlu0 %v6405_v31, %s3734_s10  ;;  %10316 = vst [vmem:[#allocation434_spill] sm:$0xff] %v6432_v49  ;;  %v2170_v0 = vrot.slane %v6437_v26, 2 }
 0x32c   :  { %v6427_v24 = vpop.permute.xlu1 %1871  ;;  %v6429_v63 = vpop.permute.xlu0 %1869  ;;  %v6458_v7 = vsel %vm2133_vm1, %v2166_v14, %v2170_v0  ;;  %v3644_v14 = vld [vmem:[%s9277_s0 + $0x100] sm:$0xff] }
 0x32d   :  { %10314 = vst [vmem:[#allocation432_spill] sm:$0xff] %v6427_v24  ;;  %10315 = vst [vmem:[#allocation433_spill] sm:$0xff] %v6429_v63  ;;  %v2409_v63 = vrot.slane %v3642_v16, 2  ;;  %v2411_v16 = vrot.slane %v3644_v14, 2 }
 0x32e   :  { %2503 = vrot.lane.b32.xlu1 %v6425_v23, %s3734_s10  ;;  %2501 = vrot.lane.b32.xlu0 %v6432_v49, %s3734_s10  ;;  %10319 = vst [vmem:[#allocation437_spill] sm:$0xff] %v6458_v7 }
 0x32f   :  { %v6477_v10 = vsel %vm2133_vm1, %v2407_v39, %v2409_v63  ;;  %v6497_v39 = vsel %vm2133_vm1, %v2409_v63, %v2411_v16  ;;  %v2176_v63 = vrot.slane %v6515_v5, 2 }
 0x330   :  { %v6453_v24 = vpop.permute.xlu1 %1875  ;;  %v6455_v61 = vpop.permute.xlu0 %1873  ;;  %10321 = vst [vmem:[#allocation439_spill] sm:$0xff] %v6477_v10  ;;  %10325 = vst [vmem:[#allocation443_spill] sm:$0xff] %v6497_v39 }
 0x331   :  { %10317 = vst [vmem:[#allocation435_spill] sm:$0xff] %v6453_v24  ;;  %10318 = vst [vmem:[#allocation436_spill] sm:$0xff] %v6455_v61 }
 0x332   :  { %2507 = vrot.lane.b32.xlu1 %v6458_v7, %s3734_s10  ;;  %2505 = vrot.lane.b32.xlu0 %v6461_v8, %s3734_s10 }
 0x334   :  { %v6479_v24 = vpop.permute.xlu1 %1879  ;;  %v6481_v61 = vpop.permute.xlu0 %1877 }
 0x335   :  { %10322 = vst [vmem:[#allocation440_spill] sm:$0xff] %v6479_v24  ;;  %10323 = vst [vmem:[#allocation441_spill] sm:$0xff] %v6481_v61  ;;  %v6504_v24 = vsel %vm2133_vm1, %v2170_v0, %v2174_v54  ;;  %v6509_v61 = vld [vmem:[%s9277_s0 + $0x110] sm:$0xff]  ;;  %v3648_v0 = vld [vmem:[%s9277_s0 + $0x118] sm:$0xff] }
 0x336   :  { %2511 = vrot.lane.b32.xlu1 %v6484_v2, %s3734_s10  ;;  %2509 = vrot.lane.b32.xlu0 %v6477_v10, %s3734_s10  ;;  %10328 = vst [vmem:[#allocation446_spill] sm:$0xff] %v6504_v24  ;;  %v2178_v60 = vrot.slane %v6509_v61, 2  ;;  %v6533_v10 = vsel %vm2133_vm1, %v2172_v48, %v2176_v63 }
 0x337   :  { %10332 = vst [vmem:[#allocation450_spill] sm:$0xff] %v6533_v10 }
 0x338   :  { %v6499_v14 = vpop.permute.xlu1 %1883  ;;  %v6501_v4 = vpop.permute.xlu0 %1881  ;;  %v6530_v55 = vsel %vm2133_vm1, %v2174_v54, %v2178_v60  ;;  %v3650_v54 = vld [vmem:[%s9277_s0 + $0x130] sm:$0xff] }
 0x339   :  { %10326 = vst [vmem:[#allocation444_spill] sm:$0xff] %v6499_v14  ;;  %10327 = vst [vmem:[#allocation445_spill] sm:$0xff] %v6501_v4  ;;  %v2413_v4 = vrot.slane %v3648_v0, 2  ;;  %v2415_v0 = vrot.slane %v3650_v54, 2 }
 0x33a   :  { %2515 = vrot.lane.b32.xlu1 %v6497_v39, %s3734_s10  ;;  %2513 = vrot.lane.b32.xlu0 %v6504_v24, %s3734_s10  ;;  %10331 = vst [vmem:[#allocation449_spill] sm:$0xff] %v6530_v55  ;;  %v6538_v39 = vld [vmem:[%s9277_s0 + $0x120] sm:$0xff] }
 0x33b   :  { %v2180_v24 = vrot.slane %v6538_v39, 2  ;;  %v6549_v48 = vsel %vm2133_vm1, %v2411_v16, %v2413_v4  ;;  %v6569_v16 = vsel %vm2133_vm1, %v2413_v4, %v2415_v0 }
 0x33c   :  { %v6525_v14 = vpop.permute.xlu1 %1887  ;;  %v6527_v1 = vpop.permute.xlu0 %1885  ;;  %10333 = vst [vmem:[#allocation451_spill] sm:$0xff] %v6549_v48  ;;  %10338 = vst [vmem:[#allocation456_spill] sm:$0xff] %v6569_v16 }
 0x33d   :  { %10329 = vst [vmem:[#allocation447_spill] sm:$0xff] %v6525_v14  ;;  %10330 = vst [vmem:[#allocation448_spill] sm:$0xff] %v6527_v1  ;;  %v6556_v2 = vsel %vm2133_vm1, %v2176_v63, %v2180_v24 }
 0x33e   :  { %2519 = vrot.lane.b32.xlu1 %v6530_v55, %s3734_s10  ;;  %2517 = vrot.lane.b32.xlu0 %v6533_v10, %s3734_s10  ;;  %10336 = vst [vmem:[#allocation454_spill] sm:$0xff] %v6556_v2  ;;  %v6561_v55 = vld [vmem:[%s9277_s0 + $0x128] sm:$0xff] }
 0x33f   :  { %10337 = vst [vmem:[#allocation455_spill] sm:$0xff] %v6561_v55  ;;  %v2182_v10 = vrot.slane %v6561_v55, 2 }
 0x340   :  { %v6551_v14 = vpop.permute.xlu1 %1891  ;;  %v6553_v1 = vpop.permute.xlu0 %1889 }
 0x341   :  { %10334 = vst [vmem:[#allocation452_spill] sm:$0xff] %v6551_v14  ;;  %10335 = vst [vmem:[#allocation453_spill] sm:$0xff] %v6553_v1  ;;  %v6576_v14 = vsel %vm2133_vm1, %v2178_v60, %v2182_v10  ;;  %v6581_v1 = vld [vmem:[%s9277_s0 + $0x140] sm:$0xff]  ;;  %v3654_v60 = vld [vmem:[%s9277_s0 + $0x148] sm:$0xff] }
 0x342   :  { %2523 = vrot.lane.b32.xlu1 %v6556_v2, %s3734_s10  ;;  %2521 = vrot.lane.b32.xlu0 %v6549_v48, %s3734_s10  ;;  %10341 = vst [vmem:[#allocation459_spill] sm:$0xff] %v6576_v14  ;;  %10342 = vst [vmem:[#allocation460_spill] sm:$0xff] %v6581_v1  ;;  %v2186_v2 = vrot.slane %v6581_v1, 2  ;;  %v6587_v48 = vld [vmem:[%s9277_s0 + $0x138] sm:$0xff] }
 0x343   :  { %10343 = vst [vmem:[#allocation461_spill] sm:$0xff] %v6587_v48  ;;  %v2184_v4 = vrot.slane %v6587_v48, 2 }
 0x344   :  { %v6571_v54 = vpop.permute.xlu1 %1895  ;;  %v6573_v63 = vpop.permute.xlu0 %1893  ;;  %v6602_v55 = vsel %vm2133_vm1, %v2182_v10, %v2186_v2  ;;  %v3656_v10 = vld [vmem:[%s9277_s0 + $0x160] sm:$0xff] }
 0x345   :  { %10339 = vst [vmem:[#allocation457_spill] sm:$0xff] %v6571_v54  ;;  %10340 = vst [vmem:[#allocation458_spill] sm:$0xff] %v6573_v63  ;;  %v2417_v63 = vrot.slane %v3654_v60, 2  ;;  %v6605_v48 = vsel %vm2133_vm1, %v2180_v24, %v2184_v4  ;;  %v2419_v60 = vrot.slane %v3656_v10, 2 }
 0x346   :  { %2527 = vrot.lane.b32.xlu1 %v6569_v16, %s3734_s10  ;;  %2525 = vrot.lane.b32.xlu0 %v6576_v14, %s3734_s10  ;;  %10346 = vst [vmem:[#allocation464_spill] sm:$0xff] %v6602_v55  ;;  %10347 = vst [vmem:[#allocation465_spill] sm:$0xff] %v6605_v48  ;;  %v6610_v16 = vld [vmem:[%s9277_s0 + $0x150] sm:$0xff] }
 0x347   :  { %10348 = vst [vmem:[#allocation466_spill] sm:$0xff] %v6610_v16  ;;  %v2188_v14 = vrot.slane %v6610_v16, 2  ;;  %v6621_v24 = vsel %vm2133_vm1, %v2415_v0, %v2417_v63  ;;  %v6641_v0 = vsel %vm2133_vm1, %v2417_v63, %v2419_v60 }
 0x348   :  { %v6597_v54 = vpop.permute.xlu1 %1899  ;;  %v6599_v1 = vpop.permute.xlu0 %1897  ;;  %10349 = vst [vmem:[#allocation467_spill] sm:$0xff] %v6621_v24  ;;  %10354 = vst [vmem:[#allocation472_spill] sm:$0xff] %v6641_v0 }
 0x349   :  { %10344 = vst [vmem:[#allocation462_spill] sm:$0xff] %v6597_v54  ;;  %10345 = vst [vmem:[#allocation463_spill] sm:$0xff] %v6599_v1  ;;  %v6628_v16 = vsel %vm2133_vm1, %v2184_v4, %v2188_v14 }
 0x34a   :  { %2531 = vrot.lane.b32.xlu1 %v6602_v55, %s3734_s10  ;;  %2529 = vrot.lane.b32.xlu0 %v6605_v48, %s3734_s10  ;;  %10352 = vst [vmem:[#allocation470_spill] sm:$0xff] %v6628_v16  ;;  %v6633_v55 = vld [vmem:[%s9277_s0 + $0x158] sm:$0xff] }
 0x34b   :  { %10353 = vst [vmem:[#allocation471_spill] sm:$0xff] %v6633_v55  ;;  %v2190_v48 = vrot.slane %v6633_v55, 2 }
 0x34c   :  { %v6623_v54 = vpop.permute.xlu1 %1903  ;;  %v6625_v1 = vpop.permute.xlu0 %1901 }
 0x34d   :  { %10350 = vst [vmem:[#allocation468_spill] sm:$0xff] %v6623_v54  ;;  %10351 = vst [vmem:[#allocation469_spill] sm:$0xff] %v6625_v1  ;;  %v6648_v54 = vsel %vm2133_vm1, %v2186_v2, %v2190_v48  ;;  %v6653_v1 = vld [vmem:[%s9277_s0 + $0x170] sm:$0xff]  ;;  %v3660_v2 = vld [vmem:[%s9277_s0 + $0x178] sm:$0xff] }
 0x34e   :  { %2535 = vrot.lane.b32.xlu1 %v6628_v16, %s3734_s10  ;;  %2533 = vrot.lane.b32.xlu0 %v6621_v24, %s3734_s10  ;;  %10357 = vst [vmem:[#allocation475_spill] sm:$0xff] %v6648_v54  ;;  %10358 = vst [vmem:[#allocation476_spill] sm:$0xff] %v6653_v1  ;;  %v2194_v16 = vrot.slane %v6653_v1, 2  ;;  %v6659_v24 = vld [vmem:[%s9277_s0 + $0x168] sm:$0xff] }
 0x34f   :  { %10359 = vst [vmem:[#allocation477_spill] sm:$0xff] %v6659_v24  ;;  %v2192_v63 = vrot.slane %v6659_v24, 2 }
 0x350   :  { %v6643_v10 = vpop.permute.xlu1 %1907  ;;  %v6645_v4 = vpop.permute.xlu0 %1905  ;;  %v6674_v55 = vsel %vm2133_vm1, %v2190_v48, %v2194_v16  ;;  %v3662_v48 = vld [vmem:[%s9277_s0 + $0x190] sm:$0xff] }
 0x351   :  { %10355 = vst [vmem:[#allocation473_spill] sm:$0xff] %v6643_v10  ;;  %10356 = vst [vmem:[#allocation474_spill] sm:$0xff] %v6645_v4  ;;  %v2421_v4 = vrot.slane %v3660_v2, 2  ;;  %v6677_v24 = vsel %vm2133_vm1, %v2188_v14, %v2192_v63  ;;  %v2423_v2 = vrot.slane %v3662_v48, 2 }
 0x352   :  { %2539 = vrot.lane.b32.xlu1 %v6641_v0, %s3734_s10  ;;  %2537 = vrot.lane.b32.xlu0 %v6648_v54, %s3734_s10  ;;  %10362 = vst [vmem:[#allocation480_spill] sm:$0xff] %v6674_v55  ;;  %10363 = vst [vmem:[#allocation481_spill] sm:$0xff] %v6677_v24  ;;  %v6682_v0 = vld [vmem:[%s9277_s0 + $0x180] sm:$0xff] }
 0x353   :  { %10364 = vst [vmem:[#allocation482_spill] sm:$0xff] %v6682_v0  ;;  %v2196_v54 = vrot.slane %v6682_v0, 2  ;;  %v6693_v14 = vsel %vm2133_vm1, %v2419_v60, %v2421_v4  ;;  %v6713_v60 = vsel %vm2133_vm1, %v2421_v4, %v2423_v2 }
 0x354   :  { %v6669_v10 = vpop.permute.xlu1 %1911  ;;  %v6671_v1 = vpop.permute.xlu0 %1909  ;;  %10365 = vst [vmem:[#allocation483_spill] sm:$0xff] %v6693_v14  ;;  %10370 = vst [vmem:[#allocation488_spill] sm:$0xff] %v6713_v60 }
 0x355   :  { %10360 = vst [vmem:[#allocation478_spill] sm:$0xff] %v6669_v10  ;;  %10361 = vst [vmem:[#allocation479_spill] sm:$0xff] %v6671_v1  ;;  %v6700_v0 = vsel %vm2133_vm1, %v2192_v63, %v2196_v54 }
 0x356   :  { %2543 = vrot.lane.b32.xlu1 %v6674_v55, %s3734_s10  ;;  %2541 = vrot.lane.b32.xlu0 %v6677_v24, %s3734_s10  ;;  %10368 = vst [vmem:[#allocation486_spill] sm:$0xff] %v6700_v0  ;;  %v6705_v55 = vld [vmem:[%s9277_s0 + $0x188] sm:$0xff] }
 0x357   :  { %10369 = vst [vmem:[#allocation487_spill] sm:$0xff] %v6705_v55  ;;  %v2198_v24 = vrot.slane %v6705_v55, 2 }
 0x358   :  { %v6695_v10 = vpop.permute.xlu1 %1915  ;;  %v6697_v1 = vpop.permute.xlu0 %1913 }
 0x359   :  { %10366 = vst [vmem:[#allocation484_spill] sm:$0xff] %v6695_v10  ;;  %10367 = vst [vmem:[#allocation485_spill] sm:$0xff] %v6697_v1  ;;  %v6720_v10 = vsel %vm2133_vm1, %v2194_v16, %v2198_v24  ;;  %v6725_v1 = vld [vmem:[%s9277_s0 + $0x1a0] sm:$0xff]  ;;  %v3666_v16 = vld [vmem:[%s9277_s0 + $0x1a8] sm:$0xff] }
 0x35a   :  { %2547 = vrot.lane.b32.xlu1 %v6700_v0, %s3734_s10  ;;  %2545 = vrot.lane.b32.xlu0 %v6693_v14, %s3734_s10  ;;  %10373 = vst [vmem:[#allocation491_spill] sm:$0xff] %v6720_v10  ;;  %10374 = vst [vmem:[#allocation492_spill] sm:$0xff] %v6725_v1  ;;  %v2202_v0 = vrot.slane %v6725_v1, 2  ;;  %v6731_v14 = vld [vmem:[%s9277_s0 + $0x198] sm:$0xff] }
 0x35b   :  { %10375 = vst [vmem:[#allocation493_spill] sm:$0xff] %v6731_v14  ;;  %v2200_v4 = vrot.slane %v6731_v14, 2 }
 0x35c   :  { %v6715_v48 = vpop.permute.xlu1 %1919  ;;  %v6717_v63 = vpop.permute.xlu0 %1917  ;;  %v6746_v55 = vsel %vm2133_vm1, %v2198_v24, %v2202_v0  ;;  %v3668_v24 = vld [vmem:[%s9277_s0 + $0x1c0] sm:$0xff] }
 0x35d   :  { %10371 = vst [vmem:[#allocation489_spill] sm:$0xff] %v6715_v48  ;;  %10372 = vst [vmem:[#allocation490_spill] sm:$0xff] %v6717_v63  ;;  %v2425_v63 = vrot.slane %v3666_v16, 2  ;;  %v6749_v14 = vsel %vm2133_vm1, %v2196_v54, %v2200_v4  ;;  %v2427_v16 = vrot.slane %v3668_v24, 2 }
 0x35e   :  { %2551 = vrot.lane.b32.xlu1 %v6713_v60, %s3734_s10  ;;  %2549 = vrot.lane.b32.xlu0 %v6720_v10, %s3734_s10  ;;  %10378 = vst [vmem:[#allocation496_spill] sm:$0xff] %v6746_v55  ;;  %10379 = vst [vmem:[#allocation497_spill] sm:$0xff] %v6749_v14  ;;  %v6754_v60 = vld [vmem:[%s9277_s0 + $0x1b0] sm:$0xff] }
 0x35f   :  { %10380 = vst [vmem:[#allocation498_spill] sm:$0xff] %v6754_v60  ;;  %v2204_v10 = vrot.slane %v6754_v60, 2  ;;  %v6765_v54 = vsel %vm2133_vm1, %v2423_v2, %v2425_v63  ;;  %v6785_v2 = vsel %vm2133_vm1, %v2425_v63, %v2427_v16 }
 0x360   :  { %v6741_v48 = vpop.permute.xlu1 %1923  ;;  %v6743_v1 = vpop.permute.xlu0 %1921  ;;  %10381 = vst [vmem:[#allocation499_spill] sm:$0xff] %v6765_v54  ;;  %10386 = vst [vmem:[#allocation504_spill] sm:$0xff] %v6785_v2 }
 0x361   :  { %10376 = vst [vmem:[#allocation494_spill] sm:$0xff] %v6741_v48  ;;  %10377 = vst [vmem:[#allocation495_spill] sm:$0xff] %v6743_v1  ;;  %v6772_v60 = vsel %vm2133_vm1, %v2200_v4, %v2204_v10 }
 0x362   :  { %2555 = vrot.lane.b32.xlu1 %v6746_v55, %s3734_s10  ;;  %2553 = vrot.lane.b32.xlu0 %v6749_v14, %s3734_s10  ;;  %10384 = vst [vmem:[#allocation502_spill] sm:$0xff] %v6772_v60  ;;  %v6777_v55 = vld [vmem:[%s9277_s0 + $0x1b8] sm:$0xff] }
 0x363   :  { %10385 = vst [vmem:[#allocation503_spill] sm:$0xff] %v6777_v55  ;;  %v2206_v14 = vrot.slane %v6777_v55, 2 }
 0x364   :  { %v6767_v48 = vpop.permute.xlu1 %1927  ;;  %v6769_v1 = vpop.permute.xlu0 %1925 }
 0x365   :  { %10382 = vst [vmem:[#allocation500_spill] sm:$0xff] %v6767_v48  ;;  %10383 = vst [vmem:[#allocation501_spill] sm:$0xff] %v6769_v1  ;;  %v6792_v48 = vsel %vm2133_vm1, %v2202_v0, %v2206_v14  ;;  %v6797_v1 = vld [vmem:[%s9277_s0 + $0x1d0] sm:$0xff]  ;;  %v3672_v0 = vld [vmem:[%s9277_s0 + $0x1d8] sm:$0xff] }
 0x366   :  { %2559 = vrot.lane.b32.xlu1 %v6772_v60, %s3734_s10  ;;  %2557 = vrot.lane.b32.xlu0 %v6765_v54, %s3734_s10  ;;  %10389 = vst [vmem:[#allocation507_spill] sm:$0xff] %v6792_v48  ;;  %10390 = vst [vmem:[#allocation508_spill] sm:$0xff] %v6797_v1  ;;  %v2210_v60 = vrot.slane %v6797_v1, 2  ;;  %v6803_v54 = vld [vmem:[%s9277_s0 + $0x1c8] sm:$0xff] }
 0x367   :  { %10391 = vst [vmem:[#allocation509_spill] sm:$0xff] %v6803_v54  ;;  %v2208_v63 = vrot.slane %v6803_v54, 2 }
 0x368   :  { %v6787_v24 = vpop.permute.xlu1 %1931  ;;  %v6789_v4 = vpop.permute.xlu0 %1929  ;;  %v6818_v55 = vsel %vm2133_vm1, %v2206_v14, %v2210_v60  ;;  %v3674_v14 = vld [vmem:[%s9277_s0 + $0x1f0] sm:$0xff] }
 0x369   :  { %10387 = vst [vmem:[#allocation505_spill] sm:$0xff] %v6787_v24  ;;  %10388 = vst [vmem:[#allocation506_spill] sm:$0xff] %v6789_v4  ;;  %v2429_v4 = vrot.slane %v3672_v0, 2  ;;  %v6821_v54 = vsel %vm2133_vm1, %v2204_v10, %v2208_v63  ;;  %v2431_v0 = vrot.slane %v3674_v14, 2 }
 0x36a   :  { %2563 = vrot.lane.b32.xlu1 %v6785_v2, %s3734_s10  ;;  %2561 = vrot.lane.b32.xlu0 %v6792_v48, %s3734_s10  ;;  %10394 = vst [vmem:[#allocation512_spill] sm:$0xff] %v6818_v55  ;;  %10395 = vst [vmem:[#allocation513_spill] sm:$0xff] %v6821_v54  ;;  %v6826_v2 = vld [vmem:[%s9277_s0 + $0x1e0] sm:$0xff] }
 0x36b   :  { %10396 = vst [vmem:[#allocation514_spill] sm:$0xff] %v6826_v2  ;;  %v2212_v48 = vrot.slane %v6826_v2, 2  ;;  %v6837_v10 = vsel %vm2133_vm1, %v2427_v16, %v2429_v4  ;;  %v6857_v16 = vsel %vm2133_vm1, %v2429_v4, %v2431_v0 }
 0x36c   :  { %v6813_v24 = vpop.permute.xlu1 %1935  ;;  %v6815_v1 = vpop.permute.xlu0 %1933  ;;  %10397 = vst [vmem:[#allocation515_spill] sm:$0xff] %v6837_v10  ;;  %10402 = vst [vmem:[#allocation520_spill] sm:$0xff] %v6857_v16 }
 0x36d   :  { %10392 = vst [vmem:[#allocation510_spill] sm:$0xff] %v6813_v24  ;;  %10393 = vst [vmem:[#allocation511_spill] sm:$0xff] %v6815_v1  ;;  %v6844_v2 = vsel %vm2133_vm1, %v2208_v63, %v2212_v48 }
 0x36e   :  { %2567 = vrot.lane.b32.xlu1 %v6818_v55, %s3734_s10  ;;  %2565 = vrot.lane.b32.xlu0 %v6821_v54, %s3734_s10  ;;  %10400 = vst [vmem:[#allocation518_spill] sm:$0xff] %v6844_v2  ;;  %v6849_v55 = vld [vmem:[%s9277_s0 + $0x1e8] sm:$0xff] }
 0x36f   :  { %10401 = vst [vmem:[#allocation519_spill] sm:$0xff] %v6849_v55  ;;  %v2214_v54 = vrot.slane %v6849_v55, 2 }
 0x370   :  { %v6839_v24 = vpop.permute.xlu1 %1939  ;;  %v6841_v1 = vpop.permute.xlu0 %1937 }
 0x371   :  { %10398 = vst [vmem:[#allocation516_spill] sm:$0xff] %v6839_v24  ;;  %10399 = vst [vmem:[#allocation517_spill] sm:$0xff] %v6841_v1  ;;  %v6864_v24 = vsel %vm2133_vm1, %v2210_v60, %v2214_v54  ;;  %v6869_v1 = vld [vmem:[%s9277_s0 + $0x200] sm:$0xff]  ;;  %v3678_v60 = vld [vmem:[%s9277_s0 + $0x208] sm:$0xff] }
 0x372   :  { %2571 = vrot.lane.b32.xlu1 %v6844_v2, %s3734_s10  ;;  %2569 = vrot.lane.b32.xlu0 %v6837_v10, %s3734_s10  ;;  %10405 = vst [vmem:[#allocation523_spill] sm:$0xff] %v6864_v24  ;;  %10406 = vst [vmem:[#allocation524_spill] sm:$0xff] %v6869_v1  ;;  %v2218_v2 = vrot.slane %v6869_v1, 2  ;;  %v6875_v10 = vld [vmem:[%s9277_s0 + $0x1f8] sm:$0xff] }
 0x373   :  { %10407 = vst [vmem:[#allocation525_spill] sm:$0xff] %v6875_v10  ;;  %v2216_v4 = vrot.slane %v6875_v10, 2 }
 0x374   :  { %v6859_v14 = vpop.permute.xlu1 %2459  ;;  %v6861_v63 = vpop.permute.xlu0 %2457  ;;  %v6890_v55 = vsel %vm2133_vm1, %v2214_v54, %v2218_v2  ;;  %v3680_v54 = vld [vmem:[%s9277_s0 + $0x220] sm:$0xff] }
 0x375   :  { %10403 = vst [vmem:[#allocation521_spill] sm:$0xff] %v6859_v14  ;;  %10404 = vst [vmem:[#allocation522_spill] sm:$0xff] %v6861_v63  ;;  %v2433_v63 = vrot.slane %v3678_v60, 2  ;;  %v6893_v10 = vsel %vm2133_vm1, %v2212_v48, %v2216_v4  ;;  %v2435_v60 = vrot.slane %v3680_v54, 2 }
 0x376   :  { %2575 = vrot.lane.b32.xlu1 %v6857_v16, %s3734_s10  ;;  %2573 = vrot.lane.b32.xlu0 %v6864_v24, %s3734_s10  ;;  %10410 = vst [vmem:[#allocation528_spill] sm:$0xff] %v6890_v55  ;;  %10411 = vst [vmem:[#allocation529_spill] sm:$0xff] %v6893_v10  ;;  %v6898_v16 = vld [vmem:[%s9277_s0 + $0x210] sm:$0xff] }
 0x377   :  { %10412 = vst [vmem:[#allocation530_spill] sm:$0xff] %v6898_v16  ;;  %v2220_v24 = vrot.slane %v6898_v16, 2  ;;  %v6909_v48 = vsel %vm2133_vm1, %v2431_v0, %v2433_v63  ;;  %v6929_v0 = vsel %vm2133_vm1, %v2433_v63, %v2435_v60 }
 0x378   :  { %v6885_v14 = vpop.permute.xlu1 %2463  ;;  %v6887_v1 = vpop.permute.xlu0 %2461  ;;  %10413 = vst [vmem:[#allocation531_spill] sm:$0xff] %v6909_v48  ;;  %10418 = vst [vmem:[#allocation536_spill] sm:$0xff] %v6929_v0 }
 0x379   :  { %10408 = vst [vmem:[#allocation526_spill] sm:$0xff] %v6885_v14  ;;  %10409 = vst [vmem:[#allocation527_spill] sm:$0xff] %v6887_v1  ;;  %v6916_v16 = vsel %vm2133_vm1, %v2216_v4, %v2220_v24 }
 0x37a   :  { %2579 = vrot.lane.b32.xlu1 %v6890_v55, %s3734_s10  ;;  %2577 = vrot.lane.b32.xlu0 %v6893_v10, %s3734_s10  ;;  %10416 = vst [vmem:[#allocation534_spill] sm:$0xff] %v6916_v16  ;;  %v6921_v55 = vld [vmem:[%s9277_s0 + $0x218] sm:$0xff] }
 0x37b   :  { %10417 = vst [vmem:[#allocation535_spill] sm:$0xff] %v6921_v55  ;;  %v2222_v10 = vrot.slane %v6921_v55, 2 }
 0x37c   :  { %v6911_v14 = vpop.permute.xlu1 %2467  ;;  %v6913_v1 = vpop.permute.xlu0 %2465 }
 0x37d   :  { %10414 = vst [vmem:[#allocation532_spill] sm:$0xff] %v6911_v14  ;;  %10415 = vst [vmem:[#allocation533_spill] sm:$0xff] %v6913_v1  ;;  %v6936_v14 = vsel %vm2133_vm1, %v2218_v2, %v2222_v10  ;;  %v6941_v1 = vld [vmem:[%s9277_s0 + $0x230] sm:$0xff]  ;;  %v3684_v2 = vld [vmem:[%s9277_s0 + $0x238] sm:$0xff] }
 0x37e   :  { %2583 = vrot.lane.b32.xlu1 %v6916_v16, %s3734_s10  ;;  %2581 = vrot.lane.b32.xlu0 %v6909_v48, %s3734_s10  ;;  %10421 = vst [vmem:[#allocation539_spill] sm:$0xff] %v6936_v14  ;;  %10422 = vst [vmem:[#allocation540_spill] sm:$0xff] %v6941_v1  ;;  %v2226_v16 = vrot.slane %v6941_v1, 2  ;;  %v6947_v48 = vld [vmem:[%s9277_s0 + $0x228] sm:$0xff] }
 0x37f   :  { %10423 = vst [vmem:[#allocation541_spill] sm:$0xff] %v6947_v48  ;;  %v2224_v63 = vrot.slane %v6947_v48, 2 }
 0x380   :  { %v6931_v54 = vpop.permute.xlu1 %2471  ;;  %v6933_v4 = vpop.permute.xlu0 %2469  ;;  %v6962_v55 = vsel %vm2133_vm1, %v2222_v10, %v2226_v16  ;;  %v3686_v10 = vld [vmem:[%s9277_s0 + $0x250] sm:$0xff] }
 0x381   :  { %10419 = vst [vmem:[#allocation537_spill] sm:$0xff] %v6931_v54  ;;  %10420 = vst [vmem:[#allocation538_spill] sm:$0xff] %v6933_v4  ;;  %v2437_v4 = vrot.slane %v3684_v2, 2  ;;  %v6965_v48 = vsel %vm2133_vm1, %v2220_v24, %v2224_v63  ;;  %v2439_v2 = vrot.slane %v3686_v10, 2 }
 0x382   :  { %2587 = vrot.lane.b32.xlu1 %v6929_v0, %s3734_s10  ;;  %2585 = vrot.lane.b32.xlu0 %v6936_v14, %s3734_s10  ;;  %10426 = vst [vmem:[#allocation544_spill] sm:$0xff] %v6962_v55  ;;  %10427 = vst [vmem:[#allocation545_spill] sm:$0xff] %v6965_v48  ;;  %v6970_v0 = vld [vmem:[%s9277_s0 + $0x240] sm:$0xff] }
 0x383   :  { %10428 = vst [vmem:[#allocation546_spill] sm:$0xff] %v6970_v0  ;;  %v2228_v14 = vrot.slane %v6970_v0, 2  ;;  %v6981_v24 = vsel %vm2133_vm1, %v2435_v60, %v2437_v4  ;;  %v7001_v60 = vsel %vm2133_vm1, %v2437_v4, %v2439_v2 }
 0x384   :  { %v6957_v54 = vpop.permute.xlu1 %2475  ;;  %v6959_v1 = vpop.permute.xlu0 %2473  ;;  %10429 = vst [vmem:[#allocation547_spill] sm:$0xff] %v6981_v24  ;;  %10434 = vst [vmem:[#allocation552_spill] sm:$0xff] %v7001_v60 }
 0x385   :  { %10424 = vst [vmem:[#allocation542_spill] sm:$0xff] %v6957_v54  ;;  %10425 = vst [vmem:[#allocation543_spill] sm:$0xff] %v6959_v1  ;;  %v6988_v0 = vsel %vm2133_vm1, %v2224_v63, %v2228_v14 }
 0x386   :  { %2591 = vrot.lane.b32.xlu1 %v6962_v55, %s3734_s10  ;;  %2589 = vrot.lane.b32.xlu0 %v6965_v48, %s3734_s10  ;;  %10432 = vst [vmem:[#allocation550_spill] sm:$0xff] %v6988_v0  ;;  %v6993_v55 = vld [vmem:[%s9277_s0 + $0x248] sm:$0xff] }
 0x387   :  { %10433 = vst [vmem:[#allocation551_spill] sm:$0xff] %v6993_v55  ;;  %v2230_v48 = vrot.slane %v6993_v55, 2 }
 0x388   :  { %v6983_v54 = vpop.permute.xlu1 %2479  ;;  %v6985_v1 = vpop.permute.xlu0 %2477 }
 0x389   :  { %10430 = vst [vmem:[#allocation548_spill] sm:$0xff] %v6983_v54  ;;  %10431 = vst [vmem:[#allocation549_spill] sm:$0xff] %v6985_v1  ;;  %v7008_v54 = vsel %vm2133_vm1, %v2226_v16, %v2230_v48  ;;  %v7013_v1 = vld [vmem:[%s9277_s0 + $0x260] sm:$0xff]  ;;  %v3690_v16 = vld [vmem:[%s9277_s0 + $0x268] sm:$0xff] }
 0x38a   :  { %2595 = vrot.lane.b32.xlu1 %v6988_v0, %s3734_s10  ;;  %2593 = vrot.lane.b32.xlu0 %v6981_v24, %s3734_s10  ;;  %10437 = vst [vmem:[#allocation555_spill] sm:$0xff] %v7008_v54  ;;  %10438 = vst [vmem:[#allocation556_spill] sm:$0xff] %v7013_v1  ;;  %v2234_v0 = vrot.slane %v7013_v1, 2  ;;  %v7019_v24 = vld [vmem:[%s9277_s0 + $0x258] sm:$0xff] }
 0x38b   :  { %10439 = vst [vmem:[#allocation557_spill] sm:$0xff] %v7019_v24  ;;  %v2232_v4 = vrot.slane %v7019_v24, 2 }
 0x38c   :  { %v7003_v10 = vpop.permute.xlu1 %2483  ;;  %v7005_v63 = vpop.permute.xlu0 %2481  ;;  %v7034_v55 = vsel %vm2133_vm1, %v2230_v48, %v2234_v0  ;;  %v3692_v48 = vld [vmem:[%s9277_s0 + $0x280] sm:$0xff] }
 0x38d   :  { %10435 = vst [vmem:[#allocation553_spill] sm:$0xff] %v7003_v10  ;;  %10436 = vst [vmem:[#allocation554_spill] sm:$0xff] %v7005_v63  ;;  %v2441_v63 = vrot.slane %v3690_v16, 2  ;;  %v7037_v24 = vsel %vm2133_vm1, %v2228_v14, %v2232_v4  ;;  %v2443_v16 = vrot.slane %v3692_v48, 2 }
 0x38e   :  { %2599 = vrot.lane.b32.xlu1 %v7001_v60, %s3734_s10  ;;  %2597 = vrot.lane.b32.xlu0 %v7008_v54, %s3734_s10  ;;  %10442 = vst [vmem:[#allocation560_spill] sm:$0xff] %v7034_v55  ;;  %10443 = vst [vmem:[#allocation561_spill] sm:$0xff] %v7037_v24  ;;  %v7042_v60 = vld [vmem:[%s9277_s0 + $0x270] sm:$0xff] }
 0x38f   :  { %10444 = vst [vmem:[#allocation562_spill] sm:$0xff] %v7042_v60  ;;  %v2236_v54 = vrot.slane %v7042_v60, 2  ;;  %v7053_v14 = vsel %vm2133_vm1, %v2439_v2, %v2441_v63  ;;  %v7073_v2 = vsel %vm2133_vm1, %v2441_v63, %v2443_v16 }
 0x390   :  { %v7029_v10 = vpop.permute.xlu1 %2487  ;;  %v7031_v1 = vpop.permute.xlu0 %2485  ;;  %10445 = vst [vmem:[#allocation563_spill] sm:$0xff] %v7053_v14  ;;  %10450 = vst [vmem:[#allocation568_spill] sm:$0xff] %v7073_v2 }
 0x391   :  { %10440 = vst [vmem:[#allocation558_spill] sm:$0xff] %v7029_v10  ;;  %10441 = vst [vmem:[#allocation559_spill] sm:$0xff] %v7031_v1  ;;  %v7060_v60 = vsel %vm2133_vm1, %v2232_v4, %v2236_v54 }
 0x392   :  { %2603 = vrot.lane.b32.xlu1 %v7034_v55, %s3734_s10  ;;  %2601 = vrot.lane.b32.xlu0 %v7037_v24, %s3734_s10  ;;  %10448 = vst [vmem:[#allocation566_spill] sm:$0xff] %v7060_v60  ;;  %v7065_v55 = vld [vmem:[%s9277_s0 + $0x278] sm:$0xff] }
 0x393   :  { %10449 = vst [vmem:[#allocation567_spill] sm:$0xff] %v7065_v55  ;;  %v2238_v24 = vrot.slane %v7065_v55, 2 }
 0x394   :  { %v7055_v10 = vpop.permute.xlu1 %2491  ;;  %v7057_v1 = vpop.permute.xlu0 %2489 }
 0x395   :  { %10446 = vst [vmem:[#allocation564_spill] sm:$0xff] %v7055_v10  ;;  %10447 = vst [vmem:[#allocation565_spill] sm:$0xff] %v7057_v1  ;;  %v7080_v10 = vsel %vm2133_vm1, %v2234_v0, %v2238_v24  ;;  %v7085_v1 = vld [vmem:[%s9277_s0 + $0x290] sm:$0xff]  ;;  %v3696_v0 = vld [vmem:[%s9277_s0 + $0x298] sm:$0xff] }
 0x396   :  { %2607 = vrot.lane.b32.xlu1 %v7060_v60, %s3734_s10  ;;  %2605 = vrot.lane.b32.xlu0 %v7053_v14, %s3734_s10  ;;  %10453 = vst [vmem:[#allocation571_spill] sm:$0xff] %v7080_v10  ;;  %10454 = vst [vmem:[#allocation572_spill] sm:$0xff] %v7085_v1  ;;  %v2242_v60 = vrot.slane %v7085_v1, 2  ;;  %v7091_v14 = vld [vmem:[%s9277_s0 + $0x288] sm:$0xff] }
 0x397   :  { %10455 = vst [vmem:[#allocation573_spill] sm:$0xff] %v7091_v14  ;;  %v2240_v63 = vrot.slane %v7091_v14, 2 }
 0x398   :  { %v7075_v48 = vpop.permute.xlu1 %2495  ;;  %v7077_v4 = vpop.permute.xlu0 %2493  ;;  %v7106_v55 = vsel %vm2133_vm1, %v2238_v24, %v2242_v60  ;;  %v3698_v24 = vld [vmem:[%s9277_s0 + $0x2b0] sm:$0xff] }
 0x399   :  { %10451 = vst [vmem:[#allocation569_spill] sm:$0xff] %v7075_v48  ;;  %10452 = vst [vmem:[#allocation570_spill] sm:$0xff] %v7077_v4  ;;  %v2445_v4 = vrot.slane %v3696_v0, 2  ;;  %v7109_v14 = vsel %vm2133_vm1, %v2236_v54, %v2240_v63  ;;  %v2447_v0 = vrot.slane %v3698_v24, 2 }
 0x39a   :  { %2611 = vrot.lane.b32.xlu1 %v7073_v2, %s3734_s10  ;;  %2609 = vrot.lane.b32.xlu0 %v7080_v10, %s3734_s10  ;;  %10458 = vst [vmem:[#allocation576_spill] sm:$0xff] %v7106_v55  ;;  %10459 = vst [vmem:[#allocation577_spill] sm:$0xff] %v7109_v14  ;;  %v7114_v2 = vld [vmem:[%s9277_s0 + $0x2a0] sm:$0xff] }
 0x39b   :  { %10460 = vst [vmem:[#allocation578_spill] sm:$0xff] %v7114_v2  ;;  %v2244_v10 = vrot.slane %v7114_v2, 2  ;;  %v7125_v54 = vsel %vm2133_vm1, %v2443_v16, %v2445_v4  ;;  %v7145_v16 = vsel %vm2133_vm1, %v2445_v4, %v2447_v0 }
 0x39c   :  { %v7101_v48 = vpop.permute.xlu1 %2499  ;;  %v7103_v1 = vpop.permute.xlu0 %2497  ;;  %10461 = vst [vmem:[#allocation579_spill] sm:$0xff] %v7125_v54  ;;  %10466 = vst [vmem:[#allocation584_spill] sm:$0xff] %v7145_v16 }
 0x39d   :  { %10456 = vst [vmem:[#allocation574_spill] sm:$0xff] %v7101_v48  ;;  %10457 = vst [vmem:[#allocation575_spill] sm:$0xff] %v7103_v1  ;;  %v7132_v2 = vsel %vm2133_vm1, %v2240_v63, %v2244_v10 }
 0x39e   :  { %2615 = vrot.lane.b32.xlu1 %v7106_v55, %s3734_s10  ;;  %2613 = vrot.lane.b32.xlu0 %v7109_v14, %s3734_s10  ;;  %10464 = vst [vmem:[#allocation582_spill] sm:$0xff] %v7132_v2  ;;  %v7137_v55 = vld [vmem:[%s9277_s0 + $0x2a8] sm:$0xff] }
 0x39f   :  { %10465 = vst [vmem:[#allocation583_spill] sm:$0xff] %v7137_v55  ;;  %v2246_v14 = vrot.slane %v7137_v55, 2 }
 0x3a0   :  { %v7127_v48 = vpop.permute.xlu1 %2503  ;;  %v7129_v1 = vpop.permute.xlu0 %2501 }
 0x3a1   :  { %10462 = vst [vmem:[#allocation580_spill] sm:$0xff] %v7127_v48  ;;  %10463 = vst [vmem:[#allocation581_spill] sm:$0xff] %v7129_v1  ;;  %v7152_v48 = vsel %vm2133_vm1, %v2242_v60, %v2246_v14  ;;  %v7157_v1 = vld [vmem:[%s9277_s0 + $0x2c0] sm:$0xff]  ;;  %v3702_v60 = vld [vmem:[%s9277_s0 + $0x2c8] sm:$0xff] }
 0x3a2   :  { %2619 = vrot.lane.b32.xlu1 %v7132_v2, %s3734_s10  ;;  %2617 = vrot.lane.b32.xlu0 %v7125_v54, %s3734_s10  ;;  %10469 = vst [vmem:[#allocation587_spill] sm:$0xff] %v7152_v48  ;;  %10470 = vst [vmem:[#allocation588_spill] sm:$0xff] %v7157_v1  ;;  %v2250_v2 = vrot.slane %v7157_v1, 2  ;;  %v7163_v54 = vld [vmem:[%s9277_s0 + $0x2b8] sm:$0xff] }
 0x3a3   :  { %10471 = vst [vmem:[#allocation589_spill] sm:$0xff] %v7163_v54  ;;  %v2248_v4 = vrot.slane %v7163_v54, 2 }
 0x3a4   :  { %v7147_v24 = vpop.permute.xlu1 %2507  ;;  %v7149_v63 = vpop.permute.xlu0 %2505  ;;  %v7178_v55 = vsel %vm2133_vm1, %v2246_v14, %v2250_v2  ;;  %v3704_v14 = vld [vmem:[%s9277_s0 + $0x2e0] sm:$0xff] }
 0x3a5   :  { %10467 = vst [vmem:[#allocation585_spill] sm:$0xff] %v7147_v24  ;;  %10468 = vst [vmem:[#allocation586_spill] sm:$0xff] %v7149_v63  ;;  %v2449_v63 = vrot.slane %v3702_v60, 2  ;;  %v7181_v54 = vsel %vm2133_vm1, %v2244_v10, %v2248_v4  ;;  %v2451_v60 = vrot.slane %v3704_v14, 2 }
 0x3a6   :  { %2623 = vrot.lane.b32.xlu1 %v7145_v16, %s3734_s10  ;;  %2621 = vrot.lane.b32.xlu0 %v7152_v48, %s3734_s10  ;;  %10474 = vst [vmem:[#allocation592_spill] sm:$0xff] %v7178_v55  ;;  %10475 = vst [vmem:[#allocation593_spill] sm:$0xff] %v7181_v54  ;;  %v7186_v16 = vld [vmem:[%s9277_s0 + $0x2d0] sm:$0xff] }
 0x3a7   :  { %10476 = vst [vmem:[#allocation594_spill] sm:$0xff] %v7186_v16  ;;  %v2252_v48 = vrot.slane %v7186_v16, 2  ;;  %v7197_v10 = vsel %vm2133_vm1, %v2447_v0, %v2449_v63  ;;  %v7217_v0 = vsel %vm2133_vm1, %v2449_v63, %v2451_v60 }
 0x3a8   :  { %v7173_v24 = vpop.permute.xlu1 %2511  ;;  %v7175_v1 = vpop.permute.xlu0 %2509  ;;  %10477 = vst [vmem:[#allocation595_spill] sm:$0xff] %v7197_v10  ;;  %10482 = vst [vmem:[#allocation600_spill] sm:$0xff] %v7217_v0 }
 0x3a9   :  { %10472 = vst [vmem:[#allocation590_spill] sm:$0xff] %v7173_v24  ;;  %10473 = vst [vmem:[#allocation591_spill] sm:$0xff] %v7175_v1  ;;  %v7204_v16 = vsel %vm2133_vm1, %v2248_v4, %v2252_v48 }
 0x3aa   :  { %2627 = vrot.lane.b32.xlu1 %v7178_v55, %s3734_s10  ;;  %2625 = vrot.lane.b32.xlu0 %v7181_v54, %s3734_s10  ;;  %10480 = vst [vmem:[#allocation598_spill] sm:$0xff] %v7204_v16  ;;  %v7209_v55 = vld [vmem:[%s9277_s0 + $0x2d8] sm:$0xff] }
 0x3ab   :  { %10481 = vst [vmem:[#allocation599_spill] sm:$0xff] %v7209_v55  ;;  %v2254_v54 = vrot.slane %v7209_v55, 2 }
 0x3ac   :  { %v7199_v24 = vpop.permute.xlu1 %2515  ;;  %v7201_v1 = vpop.permute.xlu0 %2513 }
 0x3ad   :  { %10478 = vst [vmem:[#allocation596_spill] sm:$0xff] %v7199_v24  ;;  %10479 = vst [vmem:[#allocation597_spill] sm:$0xff] %v7201_v1  ;;  %v7224_v24 = vsel %vm2133_vm1, %v2250_v2, %v2254_v54  ;;  %v7229_v1 = vld [vmem:[%s9277_s0 + $0x2f0] sm:$0xff]  ;;  %v3708_v2 = vld [vmem:[%s9277_s0 + $0x2f8] sm:$0xff] }
 0x3ae   :  { %2631 = vrot.lane.b32.xlu1 %v7204_v16, %s3734_s10  ;;  %2629 = vrot.lane.b32.xlu0 %v7197_v10, %s3734_s10  ;;  %10485 = vst [vmem:[#allocation603_spill] sm:$0xff] %v7224_v24  ;;  %10486 = vst [vmem:[#allocation604_spill] sm:$0xff] %v7229_v1  ;;  %v2258_v16 = vrot.slane %v7229_v1, 2  ;;  %v7235_v10 = vld [vmem:[%s9277_s0 + $0x2e8] sm:$0xff] }
 0x3af   :  { %10487 = vst [vmem:[#allocation605_spill] sm:$0xff] %v7235_v10  ;;  %v2256_v63 = vrot.slane %v7235_v10, 2 }
 0x3b0   :  { %v7219_v14 = vpop.permute.xlu1 %2519  ;;  %v7221_v4 = vpop.permute.xlu0 %2517  ;;  %v7250_v55 = vsel %vm2133_vm1, %v2254_v54, %v2258_v16  ;;  %v3710_v54 = vld [vmem:[%s9277_s0 + $0x310] sm:$0x3] }
 0x3b1   :  { %10483 = vst [vmem:[#allocation601_spill] sm:$0xff] %v7219_v14  ;;  %10484 = vst [vmem:[#allocation602_spill] sm:$0xff] %v7221_v4  ;;  %v2453_v4 = vrot.slane %v3708_v2, 2  ;;  %v7253_v10 = vsel %vm2133_vm1, %v2252_v48, %v2256_v63  ;;  %v2455_v48 = vrot.slane %v3710_v54, 2 }
 0x3b2   :  { %2635 = vrot.lane.b32.xlu1 %v7217_v0, %s3734_s10  ;;  %2633 = vrot.lane.b32.xlu0 %v7224_v24, %s3734_s10  ;;  %10490 = vst [vmem:[#allocation608_spill] sm:$0xff] %v7250_v55  ;;  %10491 = vst [vmem:[#allocation609_spill] sm:$0xff] %v7253_v10  ;;  %v3709_v0 = vld [vmem:[%s9277_s0 + $0x300] sm:$0x3] }
 0x3b3   :  { %v2260_v24 = vrot.slane %v3709_v0, 2  ;;  %v7263_v2 = vsel %vm2133_vm1, %v2451_v60, %v2453_v4  ;;  %v7283_v60 = vsel %vm2133_vm1, %v2453_v4, %v2455_v48 }
 0x3b4   :  { %v7245_v14 = vpop.permute.xlu1 %2523  ;;  %v7247_v1 = vpop.permute.xlu0 %2521  ;;  %10492 = vst [vmem:[#allocation610_spill] sm:$0xff] %v7263_v2  ;;  %10496 = vst [vmem:[#allocation614_spill] sm:$0xff] %v7283_v60 }
 0x3b5   :  { %10488 = vst [vmem:[#allocation606_spill] sm:$0xff] %v7245_v14  ;;  %10489 = vst [vmem:[#allocation607_spill] sm:$0xff] %v7247_v1  ;;  %v7273_v0 = vsel %vm2133_vm1, %v2256_v63, %v2260_v24 }
 0x3b6   :  { %2639 = vrot.lane.b32.xlu1 %v7250_v55, %s3734_s10  ;;  %2637 = vrot.lane.b32.xlu0 %v7253_v10, %s3734_s10  ;;  %10495 = vst [vmem:[#allocation613_spill] sm:$0xff] %v7273_v0  ;;  %v3711_v55 = vld [vmem:[%s9277_s0 + $0x308] sm:$0x3]  ;;  %s3737_s0 = smov [#allocation2]  }
 0x3b7   :  { %v2262_v10 = vrot.slane %v3711_v55, 2 }
 0x3b8   :  { %v7268_v14 = vpop.permute.xlu1 %2527  ;;  %v7270_v1 = vpop.permute.xlu0 %2525 }
 0x3b9   :  { %10493 = vst [vmem:[#allocation611_spill] sm:$0xff] %v7268_v14  ;;  %10494 = vst [vmem:[#allocation612_spill] sm:$0xff] %v7270_v1  ;;  %v7290_v24 = vsel %vm2133_vm1, %v2258_v16, %v2262_v10 }
 0x3ba   :  { %2643 = vrot.lane.b32.xlu1 %v7273_v0, %s3734_s10  ;;  %2641 = vrot.lane.b32.xlu0 %v7263_v2, %s3734_s10  ;;  %10499 = vst [vmem:[#allocation617_spill] sm:$0xff] %v7290_v24  ;;  %v10532_v0 = vld [vmem:[#allocation32_spill] sm:$0xff] }
 0x3bc   :  { %v7285_v54 = vpop.permute.xlu1 %2531  ;;  %v7287_v14 = vpop.permute.xlu0 %2529 }
 0x3bd   :  { %10497 = vst [vmem:[#allocation615_spill] sm:$0xff] %v7285_v54  ;;  %10498 = vst [vmem:[#allocation616_spill] sm:$0xff] %v7287_v14  ;;  %v10533_v14 = vld [vmem:[#allocation33_spill] sm:$0xff] }
 0x3be   :  { %2647 = vrot.lane.b32.xlu1 %v7283_v60, %s3734_s10  ;;  %2645 = vrot.lane.b32.xlu0 %v7290_v24, %s3734_s10  ;;  %v10528_v60 = vld [vmem:[#allocation25_spill] sm:$0xff]  ;;  %v469_v54 = vsel %vm460_vm2, %v10533_v14, %v10532_v0  ;;  %s3486_s10 = sshll.u32 %s3737_s0, 4  ;;  %s3487_s10 = int_to_ptr.vmem [resolvable:$true] %s3486_s10 }
 0x3bf   :  { %p3717_p1 = scmp.lt.s32.totalorder %s3487_s10, %s3487_s10 }
 0x3c0   :  { %v7296_v55 = vpop.permute.xlu1 %2535  ;;  %v7298_v63 = vpop.permute.xlu0 %2533 }
 0x3c1   :  { %10500 = vst [vmem:[#allocation618_spill] sm:$0xff] %v7296_v55  ;;  %10501 = vst [vmem:[#allocation619_spill] sm:$0xff] %v7298_v63 }
 0x3c2   :  { %2843 = vrot.lane.b32.xlu1 %v6170_v44, %s3735_s2  ;;  %2841 = vrot.lane.b32.xlu0 %v6173_v46, %s3735_s2  ;;  %v10648_v44 = vld [vmem:[#allocation125_spill] sm:$0xff]  ;;  %v10649_v46 = vld [vmem:[#allocation122_spill] sm:$0xff] }
 0x3c4   :  { %v7304_v4 = vpop.permute.xlu1 %2539  ;;  %v7306_v16 = vpop.permute.xlu0 %2537 }
 0x3c5   :  { %10502 = vst [vmem:[#allocation620_spill] sm:$0xff] %v7304_v4  ;;  %10503 = vst [vmem:[#allocation621_spill] sm:$0xff] %v7306_v16 }
 0x3c6   :  { %2847 = vrot.lane.b32.xlu1 %v6196_v62, %s3735_s2  ;;  %2845 = vrot.lane.b32.xlu0 %v6189_v41, %s3735_s2  ;;  %v10646_v62 = vld [vmem:[#allocation121_spill] sm:$0xff] }
 0x3c8   :  { %v7312_v10 = vpop.permute.xlu1 %2543  ;;  %v7314_v48 = vpop.permute.xlu0 %2541 }
 0x3c9   :  { %10504 = vst [vmem:[#allocation622_spill] sm:$0xff] %v7312_v10  ;;  %10505 = vst [vmem:[#allocation623_spill] sm:$0xff] %v7314_v48  ;;  %v10524_v48 = vld [vmem:[#allocation12_spill] sm:$0xff] }
 0x3ca   :  { %2851 = vrot.lane.b32.xlu1 %v6209_v47, %s3735_s2  ;;  %2849 = vrot.lane.b32.xlu0 %v6216_v53, %s3735_s2  ;;  %v10643_v53 = vld [vmem:[#allocation116_spill] sm:$0xff] }
 0x3cc   :  { %v7320_v55 = vpop.permute.xlu1 %2547  ;;  %v7322_v4 = vpop.permute.xlu0 %2545 }
 0x3cd   :  { %10506 = vst [vmem:[#allocation624_spill] sm:$0xff] %v7320_v55  ;;  %10507 = vst [vmem:[#allocation625_spill] sm:$0xff] %v7322_v4 }
 0x3ce   :  { %2855 = vrot.lane.b32.xlu1 %v6242_v35, %s3735_s2  ;;  %2853 = vrot.lane.b32.xlu0 %v6245_v17, %s3735_s2 }
 0x3d0   :  { %v7328_v41 = vpop.permute.xlu1 %2551  ;;  %v7330_v10 = vpop.permute.xlu0 %2549 }
 0x3d1   :  { %10508 = vst [vmem:[#allocation626_spill] sm:$0xff] %v7328_v41  ;;  %10509 = vst [vmem:[#allocation627_spill] sm:$0xff] %v7330_v10 }
 0x3d2   :  { %2859 = vrot.lane.b32.xlu1 %v6268_v27, %s3735_s2  ;;  %2857 = vrot.lane.b32.xlu0 %v6261_v43, %s3735_s2 }
 0x3d4   :  { %v7336_v47 = vpop.permute.xlu1 %2555  ;;  %v7338_v55 = vpop.permute.xlu0 %2553 }
 0x3d5   :  { %10510 = vst [vmem:[#allocation628_spill] sm:$0xff] %v7336_v47  ;;  %10511 = vst [vmem:[#allocation629_spill] sm:$0xff] %v7338_v55  ;;  %v10521_v55 = vld [vmem:[#allocation9_spill] sm:$0xff] }
 0x3d6   :  { %2863 = vrot.lane.b32.xlu1 %v6281_v40, %s3735_s2  ;;  %2861 = vrot.lane.b32.xlu0 %v6288_v36, %s3735_s2 }
 0x3d8   :  { %v7344_v4 = vpop.permute.xlu1 %2559  ;;  %v7346_v41 = vpop.permute.xlu0 %2557 }
 0x3d9   :  { %10512 = vst [vmem:[#allocation630_spill] sm:$0xff] %v7344_v4  ;;  %10513 = vst [vmem:[#allocation631_spill] sm:$0xff] %v7346_v41  ;;  %v10520_v41 = vld [vmem:[#allocation13_spill] sm:$0xff] }
 0x3da   :  { %2867 = vrot.lane.b32.xlu1 %v6314_v38, %s3735_s2  ;;  %2865 = vrot.lane.b32.xlu0 %v6317_v28, %s3735_s2  ;;  %v461_v10 = vsel %vm460_vm2, %v10521_v55, %v10520_v41  ;;  %v10527_v55 = vld [vmem:[#allocation21_spill] sm:$0xff] }
 0x3db   :  { %v10613_v28 = vld [vmem:[#allocation109_spill] sm:$0xff] }
 0x3dc   :  { %v7352_v43 = vpop.permute.xlu1 %2563  ;;  %v7354_v47 = vpop.permute.xlu0 %2561 }
 0x3dd   :  { %10514 = vst [vmem:[#allocation632_spill] sm:$0xff] %v7352_v43  ;;  %10515 = vst [vmem:[#allocation633_spill] sm:$0xff] %v7354_v47 }
 0x3de   :  { %2871 = vrot.lane.b32.xlu1 %v6340_v32, %s3735_s2  ;;  %2869 = vrot.lane.b32.xlu0 %v6333_v45, %s3735_s2  ;;  %v10522_v45 = vld [vmem:[#allocation8_spill] sm:$0xff] }
 0x3df   :  { %v10610_v32 = vld [vmem:[#allocation492_spill] sm:$0xff] }
 0x3e0   :  { %v7360_v40 = vpop.permute.xlu1 %2567  ;;  %v7362_v4 = vpop.permute.xlu0 %2565 }
 0x3e1   :  { %10516 = vst [vmem:[#allocation634_spill] sm:$0xff] %v7360_v40  ;;  %10517 = vst [vmem:[#allocation635_spill] sm:$0xff] %v7362_v4  ;;  %v462_v40 = vsel %vm460_vm2, %v10520_v41, %v10522_v45  ;;  %v10523_v4 = vld [vmem:[#allocation17_spill] sm:$0xff] }
 0x3e2   :  { %2875 = vrot.lane.b32.xlu1 %v6353_v37, %s3735_s2  ;;  %2873 = vrot.lane.b32.xlu0 %v6360_v9, %s3735_s2  ;;  %v463_v16 = vsel %vm460_vm2, %v10524_v48, %v10523_v4  ;;  %v10525_v37 = vld [vmem:[#allocation16_spill] sm:$0xff]  ;;  %v10529_v45 = vld [vmem:[#allocation29_spill] sm:$0xff]  ;;  %v10607_v9 = vld [vmem:[#allocation443_spill] sm:$0xff] }
 0x3e3   :  { %v464_v24 = vsel %vm460_vm2, %v10523_v4, %v10525_v37  ;;  %v10530_v48 = vld [vmem:[#allocation24_spill] sm:$0xff]  ;;  %v7398_v4 = vadd.f32 %v6146_v3, %v461_v10  ;;  %v7417_v3 = vadd.f32 %v6152_v56, %v463_v16  ;;  %v10542_v16 = vld [vmem:[#allocation49_spill] sm:$0xff] }
 0x3e4   :  { %v7368_v43 = vpop.permute.xlu1 %2571  ;;  %v7370_v47 = vpop.permute.xlu0 %2569  ;;  %v467_v63 = vsel %vm460_vm2, %v10530_v48, %v10529_v45  ;;  %v10531_v37 = vld [vmem:[#allocation28_spill] sm:$0xff]  ;;  %v7414_v48 = vadd.f32 %v6134_v59, %v462_v40  ;;  %v7420_v10 = vadd.f32 %v6140_v58, %v464_v24  ;;  %v7442_v58 = vadd.f32 %v6250_v11, %v469_v54  ;;  %v10543_v11 = vld [vmem:[#allocation53_spill] sm:$0xff] }
 0x3e5   :  { %10518 = vst [vmem:[#allocation636_spill] sm:$0xff] %v7368_v43  ;;  %10519 = vst [vmem:[#allocation637_spill] sm:$0xff] %v7370_v47  ;;  %v10526_v43 = vld [vmem:[#allocation20_spill] sm:$0xff]  ;;  %v468_v2 = vsel %vm460_vm2, %v10529_v45, %v10531_v37  ;;  %v10537_v45 = vld [vmem:[#allocation41_spill] sm:$0xff] }
 0x3e6   :  { %2879 = vrot.lane.b32.xlu1 %v6386_v18, %s3735_s2  ;;  %2877 = vrot.lane.b32.xlu0 %v6389_v19, %s3735_s2  ;;  %v465_v47 = vsel %vm460_vm2, %v10527_v55, %v10526_v43  ;;  %v466_v41 = vsel %vm460_vm2, %v10526_v43, %v10528_v60  ;;  %v10534_v55 = vld [vmem:[#allocation37_spill] sm:$0xff]  ;;  %v10538_v37 = vld [vmem:[#allocation36_spill] sm:$0xff]  ;;  %v7439_v59 = vadd.f32 %v6221_v34, %v468_v2 }
 0x3e7   :  { %v470_v1 = vsel %vm460_vm2, %v10532_v0, %v10534_v55  ;;  %v471_v14 = vsel %vm460_vm2, %v10538_v37, %v10537_v45  ;;  %v7426_v18 = vadd.f32 %v6178_v57, %v465_v47  ;;  %v7429_v0 = vadd.f32 %v6201_v51, %v466_v41  ;;  %v10539_v51 = vld [vmem:[#allocation40_spill] sm:$0xff]  ;;  %v10549_v41 = vld [vmem:[#allocation57_spill] sm:$0xff] }
 0x3e8   :  { %v7409_v60 = vpop.permute.xlu1 %2575  ;;  %v7411_v43 = vpop.permute.xlu0 %2573  ;;  %v7432_v55 = vadd.f32 %v6227_v15, %v467_v63  ;;  %v7445_v57 = vadd.f32 %v6273_v33, %v470_v1  ;;  %v472_v15 = vsel %vm460_vm2, %v10537_v45, %v10539_v51  ;;  %v7451_v56 = vadd.f32 %v6299_v29, %v471_v14  ;;  %v10540_v24 = vld [vmem:[#allocation44_spill] sm:$0xff]  ;;  %v10541_v63 = vld [vmem:[#allocation45_spill] sm:$0xff] }
 0x3e9   :  { %10535 = vst [vmem:[#allocation13_spill] sm:$0xff] %v7409_v60  ;;  %10536 = vst [vmem:[#allocation9_spill] sm:$0xff] %v7411_v43  ;;  %v474_v34 = vsel %vm460_vm2, %v10540_v24, %v10542_v16  ;;  %v10544_v2 = vld [vmem:[#allocation48_spill] sm:$0xff]  ;;  %v10550_v37 = vld [vmem:[#allocation61_spill] sm:$0xff] }
 0x3ea   :  { %2883 = vrot.lane.b32.xlu1 %v6412_v12, %s3735_s2  ;;  %2881 = vrot.lane.b32.xlu0 %v6405_v31, %s3735_s2  ;;  %v473_v31 = vsel %vm460_vm2, %v10541_v63, %v10540_v24  ;;  %v475_v1 = vsel %vm460_vm2, %v10544_v2, %v10543_v11  ;;  %v10547_v47 = vld [vmem:[#allocation52_spill] sm:$0xff]  ;;  %v10551_v51 = vld [vmem:[#allocation65_spill] sm:$0xff] }
 0x3eb   :  { %v476_v29 = vsel %vm460_vm2, %v10543_v11, %v10547_v47  ;;  %v10548_v40 = vld [vmem:[#allocation56_spill] sm:$0xff]  ;;  %v10556_v47 = vld [vmem:[#allocation73_spill] sm:$0xff] }
 0x3ec   :  { %v7462_v33 = vpop.permute.xlu1 %2579  ;;  %v7464_v54 = vpop.permute.xlu0 %2577  ;;  %v477_v45 = vsel %vm460_vm2, %v10549_v41, %v10548_v40  ;;  %v478_v14 = vsel %vm460_vm2, %v10548_v40, %v10550_v37  ;;  %v10552_v24 = vld [vmem:[#allocation60_spill] sm:$0xff]  ;;  %v7492_v40 = vadd.f32 %v6293_v21, %v472_v15  ;;  %v7495_v37 = vadd.f32 %v6322_v30, %v473_v31  ;;  %v10579_v60 = vld [vmem:[#allocation93_spill] sm:$0xff] }
 0x3ed   :  { %10545 = vst [vmem:[#allocation8_spill] sm:$0xff] %v7462_v33  ;;  %10546 = vst [vmem:[#allocation17_spill] sm:$0xff] %v7464_v54  ;;  %v479_v63 = vsel %vm460_vm2, %v10552_v24, %v10551_v51  ;;  %v10553_v16 = vld [vmem:[#allocation64_spill] sm:$0xff]  ;;  %v10555_v33 = vld [vmem:[#allocation69_spill] sm:$0xff]  ;;  %v7510_v24 = vadd.f32 %v6417_v13, %v478_v14 }
 0x3ee   :  { %v480_v2 = vsel %vm460_vm2, %v10551_v51, %v10553_v16  ;;  %v10554_v54 = vld [vmem:[#allocation68_spill] sm:$0xff]  ;;  %2887 = vrot.lane.b32.xlu1 %v6425_v23, %s3735_s2  ;;  %2885 = vrot.lane.b32.xlu0 %v6432_v49, %s3735_s2  ;;  %v7498_v51 = vadd.f32 %v6345_v22, %v474_v34  ;;  %v7507_v23 = vadd.f32 %v6394_v20, %v477_v45  ;;  %v10561_v34 = vld [vmem:[#allocation75_spill] sm:$0xff]  ;;  %v10564_v16 = vld [vmem:[#allocation81_spill] sm:$0xff] }
 0x3ef   :  { %v481_v11 = vsel %vm460_vm2, %v10555_v33, %v10554_v54  ;;  %v482_v41 = vsel %vm460_vm2, %v10554_v54, %v10556_v47  ;;  %v7501_v33 = vadd.f32 %v6371_v25, %v475_v1  ;;  %v7504_v54 = vadd.f32 %v6365_v42, %v476_v29  ;;  %v10557_v21 = vld [vmem:[#allocation76_spill] sm:$0xff]  ;;  %v10562_v29 = vld [vmem:[#allocation78_spill] sm:$0xff]  ;;  %v10563_v45 = vld [vmem:[#allocation79_spill] sm:$0xff] }
 0x3f0   :  { %v10558_v15 = vld [vmem:[#allocation72_spill] sm:$0xff]  ;;  %v7515_v31 = vpop.permute.xlu1 %2583  ;;  %v7517_v22 = vpop.permute.xlu0 %2581  ;;  %v7520_v25 = vadd.f32 %v6443_v6, %v479_v63  ;;  %v7523_v42 = vadd.f32 %v6437_v26, %v480_v2  ;;  %v7526_v20 = vadd.f32 %v6466_v50, %v481_v11  ;;  %v7529_v13 = vadd.f32 %v6489_v52, %v482_v41  ;;  %v10565_v50 = vld [vmem:[#allocation83_spill] sm:$0xff]  ;;  %v10567_v2 = vld [vmem:[#allocation82_spill] sm:$0xff] }
 0x3f1   :  { %v483_v30 = vsel %vm460_vm2, %v10558_v15, %v10557_v21  ;;  %10559 = vst [vmem:[#allocation12_spill] sm:$0xff] %v7515_v31  ;;  %10560 = vst [vmem:[#allocation16_spill] sm:$0xff] %v7517_v22  ;;  %v484_v1 = vsel %vm460_vm2, %v10557_v21, %v10561_v34  ;;  %v485_v14 = vsel %vm460_vm2, %v10563_v45, %v10562_v29  ;;  %v10566_v26 = vld [vmem:[#allocation80_spill] sm:$0xff]  ;;  %v10569_v41 = vld [vmem:[#allocation85_spill] sm:$0xff] }
 0x3f2   :  { %v486_v6 = vsel %vm460_vm2, %v10562_v29, %v10564_v16  ;;  %2891 = vrot.lane.b32.xlu1 %v6458_v7, %s3735_s2  ;;  %2889 = vrot.lane.b32.xlu0 %v6461_v8, %s3735_s2  ;;  %v7545_v52 = vadd.f32 %v6515_v5, %v483_v30  ;;  %v487_v63 = vsel %vm460_vm2, %v10566_v26, %v10565_v50  ;;  %v10568_v47 = vld [vmem:[#allocation84_spill] sm:$0xff]  ;;  %v10570_v15 = vld [vmem:[#allocation87_spill] sm:$0xff]  ;;  %v10571_v29 = vld [vmem:[#allocation89_spill] sm:$0xff] }
 0x3f3   :  { %v488_v11 = vsel %vm460_vm2, %v10565_v50, %v10567_v2  ;;  %v489_v21 = vsel %vm460_vm2, %v10569_v41, %v10568_v47  ;;  %v490_v34 = vsel %vm460_vm2, %v10568_v47, %v10570_v15  ;;  %v10572_v45 = vld [vmem:[#allocation86_spill] sm:$0xff]  ;;  %v10573_v30 = vld [vmem:[#allocation88_spill] sm:$0xff]  ;;  %v10575_v31 = vld [vmem:[#allocation91_spill] sm:$0xff]  ;;  %v7573_v41 = vadd.f32 %v6509_v61, %v484_v1 }
 0x3f4   :  { %v491_v5 = vsel %vm460_vm2, %v10572_v45, %v10571_v29  ;;  %v492_v16 = vsel %vm460_vm2, %v10571_v29, %v10573_v30  ;;  %v10574_v26 = vld [vmem:[#allocation90_spill] sm:$0xff]  ;;  %v7568_v2 = vpop.permute.xlu1 %2587  ;;  %v7570_v22 = vpop.permute.xlu0 %2585  ;;  %v7576_v47 = vadd.f32 %v6538_v39, %v485_v14  ;;  %v10578_v15 = vld [vmem:[#allocation455_spill] sm:$0xff]  ;;  %v10580_v30 = vld [vmem:[#allocation461_spill] sm:$0xff] }
 0x3f5   :  { %v493_v50 = vsel %vm460_vm2, %v10575_v31, %v10574_v26  ;;  %10576 = vst [vmem:[#allocation20_spill] sm:$0xff] %v7568_v2  ;;  %10577 = vst [vmem:[#allocation21_spill] sm:$0xff] %v7570_v22  ;;  %v7579_v45 = vadd.f32 %v10578_v15, %v486_v6  ;;  %v494_v29 = vsel %vm460_vm2, %v10574_v26, %v10579_v60  ;;  %v10581_v31 = vld [vmem:[#allocation460_spill] sm:$0xff]  ;;  %v10582_v22 = vld [vmem:[#allocation466_spill] sm:$0xff] }
 0x3f6   :  { %v7585_v43 = vadd.f32 %v10580_v30, %v487_v63  ;;  %v7588_v2 = vadd.f32 %v10581_v31, %v488_v11  ;;  %v7591_v7 = vadd.f32 %v10582_v22, %v489_v21  ;;  %v10583_v61 = vld [vmem:[#allocation442_spill] sm:$0xff]  ;;  %v10584_v39 = vld [vmem:[#allocation439_spill] sm:$0xff]  ;;  %v10586_v6 = vld [vmem:[#allocation477_spill] sm:$0xff] }
 0x3f7   :  { %2895 = vrot.lane.b32.xlu1 %v10583_v61, %s3735_s2  ;;  %2893 = vrot.lane.b32.xlu0 %v10584_v39, %s3735_s2  ;;  %v10585_v1 = vld [vmem:[#allocation471_spill] sm:$0xff]  ;;  %v7601_v60 = vadd.f32 %v10586_v6, %v491_v5  ;;  %v10587_v63 = vld [vmem:[#allocation476_spill] sm:$0xff]  ;;  %v10588_v11 = vld [vmem:[#allocation482_spill] sm:$0xff] }
 0x3f8   :  { %v7598_v14 = vadd.f32 %v10585_v1, %v490_v34  ;;  %v7604_v26 = vadd.f32 %v10587_v63, %v492_v16  ;;  %v7607_v15 = vadd.f32 %v10588_v11, %v493_v50  ;;  %v10589_v22 = vld [vmem:[#allocation487_spill] sm:$0xff]  ;;  %v10591_v31 = vld [vmem:[#allocation92_spill] sm:$0xff]  ;;  %v10592_v39 = vld [vmem:[#allocation94_spill] sm:$0xff]  ;;  %v7621_v16 = vpop.permute.xlu1 %2591  ;;  %v7623_v63 = vpop.permute.xlu0 %2589 }
 0x3f9   :  { %v7610_v21 = vadd.f32 %v10589_v22, %v494_v29  ;;  %v10590_v30 = vld [vmem:[#allocation95_spill] sm:$0xff]  ;;  %v10593_v1 = vld [vmem:[#allocation96_spill] sm:$0xff]  ;;  %v10594_v5 = vld [vmem:[#allocation97_spill] sm:$0xff]  ;;  %10595 = vst [vmem:[#allocation25_spill] sm:$0xff] %v7621_v16 }
 0x3fa   :  { %v495_v61 = vsel %vm460_vm2, %v10591_v31, %v10590_v30  ;;  %v496_v34 = vsel %vm460_vm2, %v10590_v30, %v10592_v39  ;;  %v497_v6 = vsel %vm460_vm2, %v10594_v5, %v10593_v1  ;;  %10596 = vst [vmem:[#allocation29_spill] sm:$0xff] %v7623_v63  ;;  %v10597_v50 = vld [vmem:[#allocation99_spill] sm:$0xff]  ;;  %v10598_v11 = vld [vmem:[#allocation101_spill] sm:$0xff]  ;;  %v10599_v22 = vld [vmem:[#allocation98_spill] sm:$0xff] }
 0x3fb   :  { %v498_v29 = vsel %vm460_vm2, %v10593_v1, %v10597_v50  ;;  %v499_v31 = vsel %vm460_vm2, %v10599_v22, %v10598_v11  ;;  %v10600_v8 = vld [vmem:[#allocation100_spill] sm:$0xff]  ;;  %v10601_v39 = vld [vmem:[#allocation102_spill] sm:$0xff]  ;;  %v10602_v49 = vld [vmem:[#allocation103_spill] sm:$0xff]  ;;  %2899 = vrot.lane.b32.xlu1 %v10607_v9, %s3735_s2  ;;  %v7654_v38 = vadd.f32 %v10610_v32, %v496_v34 }
 0x3fc   :  { %v500_v30 = vsel %vm460_vm2, %v10598_v11, %v10600_v8  ;;  %v501_v5 = vsel %vm460_vm2, %v10602_v49, %v10601_v39  ;;  %v10603_v12 = vld [vmem:[#allocation105_spill] sm:$0xff]  ;;  %v10604_v16 = vld [vmem:[#allocation107_spill] sm:$0xff]  ;;  %v10605_v19 = vld [vmem:[#allocation104_spill] sm:$0xff]  ;;  %v7674_v34 = vpop.permute.xlu1 %2595 }
 0x3fd   :  { %v502_v63 = vsel %vm460_vm2, %v10601_v39, %v10603_v12  ;;  %v503_v1 = vsel %vm460_vm2, %v10605_v19, %v10604_v16  ;;  %v10606_v50 = vld [vmem:[#allocation106_spill] sm:$0xff]  ;;  %v10609_v11 = vld [vmem:[#allocation493_spill] sm:$0xff]  ;;  %v10612_v19 = vld [vmem:[#allocation108_spill] sm:$0xff]  ;;  %10620 = vst [vmem:[#allocation32_spill] sm:$0xff] %v7674_v34 }
 0x3fe   :  { %v504_v22 = vsel %vm460_vm2, %v10604_v16, %v10606_v50  ;;  %v10608_v8 = vld [vmem:[#allocation446_spill] sm:$0xff]  ;;  %v7651_v49 = vadd.f32 %v10609_v11, %v495_v61  ;;  %v505_v36 = vsel %vm460_vm2, %v10613_v28, %v10612_v19  ;;  %v10614_v16 = vld [vmem:[#allocation503_spill] sm:$0xff]  ;;  %v10615_v9 = vld [vmem:[#allocation509_spill] sm:$0xff] }
 0x3ff   :  { %2897 = vrot.lane.b32.xlu0 %v10608_v8, %s3735_s2  ;;  %v10611_v12 = vld [vmem:[#allocation498_spill] sm:$0xff]  ;;  %v7663_v50 = vadd.f32 %v10614_v16, %v498_v29  ;;  %v7666_v27 = vadd.f32 %v10615_v9, %v499_v31  ;;  %v10617_v8 = vld [vmem:[#allocation508_spill] sm:$0xff]  ;;  %v10619_v61 = vld [vmem:[#allocation111_spill] sm:$0xff] }
 0x400   :  { %v7657_v39 = vadd.f32 %v10611_v12, %v497_v6  ;;  %v7669_v35 = vadd.f32 %v10617_v8, %v500_v30  ;;  %v506_v32 = vsel %vm460_vm2, %v10612_v19, %v10619_v61  ;;  %v7676_v6 = vpop.permute.xlu0 %2593  ;;  %v10622_v11 = vld [vmem:[#allocation514_spill] sm:$0xff]  ;;  %v10624_v28 = vld [vmem:[#allocation519_spill] sm:$0xff]  ;;  %v10626_v16 = vld [vmem:[#allocation525_spill] sm:$0xff] }
 0x401   :  { %10616 = vst [vmem:[#allocation24_spill] sm:$0xff] %v7666_v27  ;;  %10621 = vst [vmem:[#allocation33_spill] sm:$0xff] %v7676_v6  ;;  %v7679_v12 = vadd.f32 %v10622_v11, %v501_v5  ;;  %v7682_v29 = vadd.f32 %v10624_v28, %v502_v63  ;;  %v7685_v31 = vadd.f32 %v10626_v16, %v503_v1  ;;  %v10628_v9 = vld [vmem:[#allocation524_spill] sm:$0xff]  ;;  %v10630_v8 = vld [vmem:[#allocation530_spill] sm:$0xff] }
 0x402   :  { %10618 = vst [vmem:[#allocation28_spill] sm:$0xff] %v7669_v35  ;;  %v7688_v30 = vadd.f32 %v10628_v9, %v504_v22  ;;  %v7691_v17 = vadd.f32 %v10630_v8, %v505_v36  ;;  %v10632_v19 = vld [vmem:[#allocation113_spill] sm:$0xff]  ;;  %v10633_v61 = vld [vmem:[#allocation110_spill] sm:$0xff]  ;;  %v10634_v6 = vld [vmem:[#allocation112_spill] sm:$0xff] }
 0x403   :  { %10623 = vst [vmem:[#allocation37_spill] sm:$0xff] %v7679_v12  ;;  %10625 = vst [vmem:[#allocation41_spill] sm:$0xff] %v7682_v29  ;;  %v507_v34 = vsel %vm460_vm2, %v10633_v61, %v10632_v19  ;;  %v508_v5 = vsel %vm460_vm2, %v10632_v19, %v10634_v6  ;;  %v10635_v63 = vld [vmem:[#allocation449_spill] sm:$0xff]  ;;  %v10636_v1 = vld [vmem:[#allocation450_spill] sm:$0xff] }
 0x404   :  { %10627 = vst [vmem:[#allocation36_spill] sm:$0xff] %v7685_v31  ;;  %10629 = vst [vmem:[#allocation40_spill] sm:$0xff] %v7688_v30  ;;  %2903 = vrot.lane.b32.xlu1 %v10635_v63, %s3735_s2  ;;  %2901 = vrot.lane.b32.xlu0 %v10636_v1, %s3735_s2  ;;  %v10637_v11 = vld [vmem:[#allocation535_spill] sm:$0xff]  ;;  %v10639_v28 = vld [vmem:[#allocation114_spill] sm:$0xff] }
 0x405   :  { %10631 = vst [vmem:[#allocation44_spill] sm:$0xff] %v7691_v17  ;;  %v7704_v22 = vadd.f32 %v10637_v11, %v506_v32  ;;  %v10640_v36 = vld [vmem:[#allocation115_spill] sm:$0xff]  ;;  %v10641_v9 = vld [vmem:[#allocation117_spill] sm:$0xff]  ;;  %v10644_v19 = vld [vmem:[#allocation118_spill] sm:$0xff] }
 0x406   :  { %v509_v16 = vsel %vm460_vm2, %v10640_v36, %v10639_v28  ;;  %v510_v8 = vsel %vm460_vm2, %v10639_v28, %v10641_v9  ;;  %v10642_v61 = vld [vmem:[#allocation119_spill] sm:$0xff]  ;;  %v10645_v1 = vld [vmem:[#allocation120_spill] sm:$0xff]  ;;  %v515_v28 = vsel %vm460_vm2, %v10649_v46, %v10648_v44  ;;  %v7727_v9 = vpop.permute.xlu1 %2599  ;;  %v10657_v31 = vld [vmem:[#allocation126_spill] sm:$0xff] }
 0x407   :  { %10638 = vst [vmem:[#allocation45_spill] sm:$0xff] %v7704_v22  ;;  %v511_v6 = vsel %vm460_vm2, %v10643_v53, %v10642_v61  ;;  %v512_v63 = vsel %vm460_vm2, %v10642_v61, %v10644_v19  ;;  %v513_v32 = vsel %vm460_vm2, %v10646_v62, %v10645_v1  ;;  %v10647_v11 = vld [vmem:[#allocation123_spill] sm:$0xff]  ;;  %10650 = vst [vmem:[#allocation49_spill] sm:$0xff] %v7727_v9  ;;  %v7729_v22 = vpop.permute.xlu0 %2597  ;;  %v10652_v53 = vld [vmem:[#allocation541_spill] sm:$0xff] }
 0x408   :  { %v514_v36 = vsel %vm460_vm2, %v10645_v1, %v10647_v11  ;;  %10651 = vst [vmem:[#allocation53_spill] sm:$0xff] %v7729_v22  ;;  %v7732_v17 = vadd.f32 %v10652_v53, %v507_v34  ;;  %v10654_v61 = vld [vmem:[#allocation540_spill] sm:$0xff]  ;;  %v10658_v1 = vld [vmem:[#allocation127_spill] sm:$0xff]  ;;  %v10659_v29 = vld [vmem:[#allocation546_spill] sm:$0xff] }
 0x409   :  { %v7735_v19 = vadd.f32 %v10654_v61, %v508_v5  ;;  %v10656_v30 = vld [vmem:[#allocation124_spill] sm:$0xff]  ;;  %v517_v11 = vsel %vm460_vm2, %v10658_v1, %v10657_v31  ;;  %v7744_v46 = vadd.f32 %v10659_v29, %v509_v16  ;;  %v10661_v9 = vld [vmem:[#allocation551_spill] sm:$0xff]  ;;  %v10663_v22 = vld [vmem:[#allocation557_spill] sm:$0xff] }
 0x40a   :  { %10653 = vst [vmem:[#allocation48_spill] sm:$0xff] %v7732_v17  ;;  %v516_v62 = vsel %vm460_vm2, %v10648_v44, %v10656_v30  ;;  %v7747_v12 = vadd.f32 %v10661_v9, %v510_v8  ;;  %v7750_v34 = vadd.f32 %v10663_v22, %v511_v6  ;;  %v10665_v5 = vld [vmem:[#allocation454_spill] sm:$0xff]  ;;  %v10666_v53 = vld [vmem:[#allocation451_spill] sm:$0xff]  ;;  %v10667_v44 = vld [vmem:[#allocation556_spill] sm:$0xff] }
 0x40b   :  { %10655 = vst [vmem:[#allocation52_spill] sm:$0xff] %v7735_v19  ;;  %10660 = vst [vmem:[#allocation56_spill] sm:$0xff] %v7744_v46  ;;  %2907 = vrot.lane.b32.xlu1 %v10665_v5, %s3735_s2  ;;  %2905 = vrot.lane.b32.xlu0 %v10666_v53, %s3735_s2  ;;  %v7757_v30 = vadd.f32 %v10667_v44, %v512_v63  ;;  %v10669_v61 = vld [vmem:[#allocation562_spill] sm:$0xff]  ;;  %v10671_v29 = vld [vmem:[#allocation567_spill] sm:$0xff] }
 0x40c   :  { %10662 = vst [vmem:[#allocation57_spill] sm:$0xff] %v7747_v12  ;;  %10664 = vst [vmem:[#allocation61_spill] sm:$0xff] %v7750_v34  ;;  %v7760_v1 = vadd.f32 %v10669_v61, %v513_v32  ;;  %v7763_v16 = vadd.f32 %v10671_v29, %v514_v36  ;;  %v10673_v8 = vld [vmem:[#allocation573_spill] sm:$0xff]  ;;  %v10675_v22 = vld [vmem:[#allocation572_spill] sm:$0xff]  ;;  %v7780_v61 = vpop.permute.xlu1 %2603  ;;  %v7782_v36 = vpop.permute.xlu0 %2601 }
 0x40d   :  { %10668 = vst [vmem:[#allocation65_spill] sm:$0xff] %v7757_v30  ;;  %v7766_v9 = vadd.f32 %v10673_v8, %v515_v28  ;;  %v7769_v6 = vadd.f32 %v10675_v22, %v516_v62  ;;  %v10677_v34 = vld [vmem:[#allocation578_spill] sm:$0xff]  ;;  %v10679_v12 = vld [vmem:[#allocation129_spill] sm:$0xff]  ;;  %v10680_v53 = vld [vmem:[#allocation131_spill] sm:$0xff] }
 0x40e   :  { %10670 = vst [vmem:[#allocation60_spill] sm:$0xff] %v7760_v1  ;;  %10672 = vst [vmem:[#allocation64_spill] sm:$0xff] %v7763_v16  ;;  %v7772_v5 = vadd.f32 %v10677_v34, %v517_v11  ;;  %v518_v63 = vsel %vm460_vm2, %v10657_v31, %v10679_v12  ;;  %v10681_v44 = vld [vmem:[#allocation128_spill] sm:$0xff]  ;;  %v10684_v28 = vld [vmem:[#allocation130_spill] sm:$0xff] }
 0x40f   :  { %10674 = vst [vmem:[#allocation68_spill] sm:$0xff] %v7766_v9  ;;  %10676 = vst [vmem:[#allocation69_spill] sm:$0xff] %v7769_v6  ;;  %v519_v32 = vsel %vm460_vm2, %v10681_v44, %v10680_v53  ;;  %v520_v62 = vsel %vm460_vm2, %v10680_v53, %v10684_v28  ;;  %v10685_v29 = vld [vmem:[#allocation5_spill] sm:$0xff]  ;;  %v10686_v8 = vld [vmem:[#allocation138_spill] sm:$0xff] }
 0x410   :  { %10678 = vst [vmem:[#allocation73_spill] sm:$0xff] %v7772_v5  ;;  %10682 = vst [vmem:[#allocation76_spill] sm:$0xff] %v7780_v61  ;;  %v846_v11 = vsel %vm845_vm3, %v10686_v8, %v10685_v29  ;;  %v10687_v34 = vld [vmem:[#allocation7_spill] sm:$0xff]  ;;  %v10689_v22 = vld [vmem:[#allocation6_spill] sm:$0xff]  ;;  %v7827_v35 = vpop.permute.xlu1 %2607 }
 0x411   :  { %10683 = vst [vmem:[#allocation72_spill] sm:$0xff] %v7782_v36  ;;  %v847_v12 = vsel %vm845_vm3, %v10685_v29, %v10687_v34  ;;  %v10688_v31 = vld [vmem:[#allocation11_spill] sm:$0xff]  ;;  %v10690_v5 = vld [vmem:[#allocation10_spill] sm:$0xff]  ;;  %v10694_v9 = vld [vmem:[#allocation456_spill] sm:$0xff] }
 0x412   :  { %v848_v44 = vsel %vm845_vm3, %v10689_v22, %v10688_v31  ;;  %v849_v36 = vsel %vm845_vm3, %v10688_v31, %v10690_v5  ;;  %v10691_v61 = vld [vmem:[#allocation14_spill] sm:$0xff]  ;;  %v10692_v6 = vld [vmem:[#allocation15_spill] sm:$0xff]  ;;  %2911 = vrot.lane.b32.xlu1 %v10694_v9, %s3735_s2  ;;  %v10696_v34 = vld [vmem:[#allocation132_spill] sm:$0xff]  ;;  %v974_v9 = vadd.f32 %v846_v11, %v7398_v4  ;;  %10704 = vst [vmem:[#allocation75_spill] sm:$0xff] %v7827_v35 }
 0x413   :  { %v850_v53 = vsel %vm845_vm3, %v10692_v6, %v10691_v61  ;;  %v10693_v28 = vld [vmem:[#allocation19_spill] sm:$0xff]  ;;  %v10697_v22 = vld [vmem:[#allocation133_spill] sm:$0xff]  ;;  %v10700_v6 = vld [vmem:[#allocation134_spill] sm:$0xff]  ;;  %v977_v27 = vadd.f32 %v849_v36, %v7420_v10 }
 0x414   :  { %v851_v8 = vsel %vm845_vm3, %v10691_v61, %v10693_v28  ;;  %v10695_v29 = vld [vmem:[#allocation459_spill] sm:$0xff]  ;;  %v521_v16 = vsel %vm460_vm2, %v10697_v22, %v10696_v34  ;;  %v10699_v31 = vld [vmem:[#allocation137_spill] sm:$0xff]  ;;  %v10701_v46 = vld [vmem:[#allocation136_spill] sm:$0xff]  ;;  %v975_v28 = vadd.f32 %v847_v12, %v7414_v48 }
 0x415   :  { %2909 = vrot.lane.b32.xlu0 %v10695_v29, %s3735_s2  ;;  %v10698_v1 = vld [vmem:[#allocation135_spill] sm:$0xff]  ;;  %v523_v30 = vsel %vm460_vm2, %v10700_v6, %v10699_v31  ;;  %v524_v61 = vsel %vm460_vm2, %v10699_v31, %v10701_v46  ;;  %v976_v29 = vadd.f32 %v848_v44, %v7417_v3  ;;  %v10703_v22 = vld [vmem:[#allocation18_spill] sm:$0xff]  ;;  %v978_v46 = vadd.f32 %v850_v53, %v7426_v18  ;;  %v10708_v48 = vld [vmem:[#allocation589_spill] sm:$0xff] }
 0x416   :  { %v522_v5 = vsel %vm460_vm2, %v10696_v34, %v10698_v1  ;;  %v10702_v19 = vld [vmem:[#allocation23_spill] sm:$0xff]  ;;  %v7829_v1 = vpop.permute.xlu0 %2605  ;;  %v979_v4 = vadd.f32 %v851_v8, %v7429_v0  ;;  %v7838_v11 = vadd.f32 %v10708_v48, %v519_v32  ;;  %v10710_v3 = vld [vmem:[#allocation588_spill] sm:$0xff]  ;;  %v10712_v44 = vld [vmem:[#allocation594_spill] sm:$0xff] }
 0x417   :  { %v852_v17 = vsel %vm845_vm3, %v10703_v22, %v10702_v19  ;;  %10705 = vst [vmem:[#allocation78_spill] sm:$0xff] %v7829_v1  ;;  %v10706_v34 = vld [vmem:[#allocation583_spill] sm:$0xff]  ;;  %v7841_v12 = vadd.f32 %v10710_v3, %v520_v62  ;;  %v7844_v31 = vadd.f32 %v10712_v44, %v521_v16  ;;  %v10714_v22 = vld [vmem:[#allocation464_spill] sm:$0xff]  ;;  %v10718_v18 = vld [vmem:[#allocation605_spill] sm:$0xff] }
 0x418   :  { %v7832_v6 = vadd.f32 %v10706_v34, %v518_v63  ;;  %10709 = vst [vmem:[#allocation81_spill] sm:$0xff] %v7838_v11  ;;  %2915 = vrot.lane.b32.xlu1 %v10714_v22, %s3735_s2  ;;  %v10715_v63 = vld [vmem:[#allocation465_spill] sm:$0xff]  ;;  %v10716_v10 = vld [vmem:[#allocation599_spill] sm:$0xff]  ;;  %v7854_v0 = vadd.f32 %v10718_v18, %v523_v30  ;;  %v10720_v32 = vld [vmem:[#allocation604_spill] sm:$0xff]  ;;  %v980_v62 = vadd.f32 %v852_v17, %v7432_v55  ;;  %v7872_v30 = vpop.permute.xlu1 %2611 }
 0x419   :  { %10711 = vst [vmem:[#allocation83_spill] sm:$0xff] %v7841_v12  ;;  %10713 = vst [vmem:[#allocation80_spill] sm:$0xff] %v7844_v31  ;;  %2913 = vrot.lane.b32.xlu0 %v10715_v63, %s3735_s2  ;;  %v7851_v36 = vadd.f32 %v10716_v10, %v522_v5  ;;  %v7857_v53 = vadd.f32 %v10720_v32, %v524_v61  ;;  %v10722_v8 = vld [vmem:[#allocation22_spill] sm:$0xff]  ;;  %v10723_v34 = vld [vmem:[#allocation145_spill] sm:$0xff] }
 0x41a   :  { %10707 = vst [vmem:[#allocation79_spill] sm:$0xff] %v7832_v6  ;;  %10719 = vst [vmem:[#allocation84_spill] sm:$0xff] %v7854_v0  ;;  %v853_v16 = vsel %vm845_vm3, %v10702_v19, %v10722_v8  ;;  %v7864_v48 = vadd.f32 %v10723_v34, %v976_v29  ;;  %v10724_v3 = vld [vmem:[#allocation142_spill] sm:$0xff]  ;;  %v10725_v5 = vld [vmem:[#allocation141_spill] sm:$0xff]  ;;  %v7874_v18 = vpop.permute.xlu0 %2609 }
 0x41b   :  { %10717 = vst [vmem:[#allocation82_spill] sm:$0xff] %v7851_v36  ;;  %10721 = vst [vmem:[#allocation85_spill] sm:$0xff] %v7857_v53  ;;  %v7867_v44 = vadd.f32 %v10724_v3, %v974_v9  ;;  %v7870_v10 = vadd.f32 %v10725_v5, %v975_v28  ;;  %v10728_v61 = vld [vmem:[#allocation26_spill] sm:$0xff]  ;;  %v10729_v32 = vld [vmem:[#allocation27_spill] sm:$0xff] }
 0x41c   :  { %10726 = vst [vmem:[#allocation87_spill] sm:$0xff] %v7872_v30  ;;  %10727 = vst [vmem:[#allocation89_spill] sm:$0xff] %v7874_v18  ;;  %v854_v17 = vsel %vm845_vm3, %v10729_v32, %v10728_v61  ;;  %v10730_v55 = vld [vmem:[#allocation148_spill] sm:$0xff]  ;;  %v10732_v8 = vld [vmem:[#allocation151_spill] sm:$0xff]  ;;  %v7921_v31 = vpop.permute.xlu1 %2615 }
 0x41d   :  { %v7880_v53 = vadd.f32 %v10730_v55, %v977_v27  ;;  %v10731_v19 = vld [vmem:[#allocation152_spill] sm:$0xff]  ;;  %v7886_v9 = vadd.f32 %v10732_v8, %v979_v4  ;;  %v10733_v34 = vld [vmem:[#allocation31_spill] sm:$0xff]  ;;  %v10735_v5 = vld [vmem:[#allocation30_spill] sm:$0xff]  ;;  %v981_v4 = vadd.f32 %v853_v16, %v7439_v59  ;;  %10748 = vst [vmem:[#allocation86_spill] sm:$0xff] %v7921_v31 }
 0x41e   :  { %v7883_v29 = vadd.f32 %v10731_v19, %v978_v46  ;;  %v855_v28 = vsel %vm845_vm3, %v10728_v61, %v10733_v34  ;;  %v10734_v3 = vld [vmem:[#allocation35_spill] sm:$0xff]  ;;  %v10736_v36 = vld [vmem:[#allocation34_spill] sm:$0xff] }
 0x41f   :  { %v856_v0 = vsel %vm845_vm3, %v10735_v5, %v10734_v3  ;;  %v857_v32 = vsel %vm845_vm3, %v10734_v3, %v10736_v36  ;;  %v10737_v27 = vld [vmem:[#allocation470_spill] sm:$0xff]  ;;  %v10738_v46 = vld [vmem:[#allocation467_spill] sm:$0xff]  ;;  %v982_v36 = vadd.f32 %v854_v17, %v7442_v58 }
 0x420   :  { %2919 = vrot.lane.b32.xlu1 %v10737_v27, %s3735_s2  ;;  %2917 = vrot.lane.b32.xlu0 %v10738_v46, %s3735_s2  ;;  %v10739_v55 = vld [vmem:[#allocation38_spill] sm:$0xff]  ;;  %v10740_v19 = vld [vmem:[#allocation39_spill] sm:$0xff]  ;;  %v984_v58 = vadd.f32 %v856_v0, %v7451_v56  ;;  %v985_v17 = vadd.f32 %v857_v32, %v7492_v40 }
 0x421   :  { %v858_v61 = vsel %vm845_vm3, %v10740_v19, %v10739_v55  ;;  %v10741_v8 = vld [vmem:[#allocation43_spill] sm:$0xff]  ;;  %v10744_v35 = vld [vmem:[#allocation42_spill] sm:$0xff] }
 0x422   :  { %v859_v34 = vsel %vm845_vm3, %v10739_v55, %v10741_v8  ;;  %v10742_v5 = vld [vmem:[#allocation155_spill] sm:$0xff]  ;;  %v10745_v46 = vld [vmem:[#allocation46_spill] sm:$0xff]  ;;  %v7923_v55 = vpop.permute.xlu0 %2613 }
 0x423   :  { %v7909_v30 = vadd.f32 %v10742_v5, %v980_v62  ;;  %v10743_v3 = vld [vmem:[#allocation47_spill] sm:$0xff]  ;;  %v10746_v16 = vld [vmem:[#allocation50_spill] sm:$0xff]  ;;  %10749 = vst [vmem:[#allocation88_spill] sm:$0xff] %v7923_v55  ;;  %v983_v62 = vadd.f32 %v855_v28, %v7445_v57  ;;  %v986_v5 = vadd.f32 %v858_v61, %v7495_v37  ;;  %v10753_v55 = vld [vmem:[#allocation472_spill] sm:$0xff] }
 0x424   :  { %v860_v18 = vsel %vm845_vm3, %v10744_v35, %v10743_v3  ;;  %v861_v59 = vsel %vm845_vm3, %v10743_v3, %v10745_v46  ;;  %v10747_v1 = vld [vmem:[#allocation51_spill] sm:$0xff]  ;;  %v987_v3 = vadd.f32 %v859_v34, %v7498_v51  ;;  %2923 = vrot.lane.b32.xlu1 %v10753_v55, %s3735_s2  ;;  %v10755_v28 = vld [vmem:[#allocation58_spill] sm:$0xff] }
 0x425   :  { %v862_v19 = vsel %vm845_vm3, %v10747_v1, %v10746_v16  ;;  %v10750_v8 = vld [vmem:[#allocation55_spill] sm:$0xff]  ;;  %v10752_v1 = vld [vmem:[#allocation54_spill] sm:$0xff]  ;;  %v988_v56 = vadd.f32 %v860_v18, %v7501_v33  ;;  %v989_v40 = vadd.f32 %v861_v59, %v7504_v54  ;;  %v7956_v33 = vpop.permute.xlu1 %2619  ;;  %v10762_v18 = vld [vmem:[#allocation165_spill] sm:$0xff] }
 0x426   :  { %v863_v35 = vsel %vm845_vm3, %v10746_v16, %v10750_v8  ;;  %v10751_v46 = vld [vmem:[#allocation59_spill] sm:$0xff]  ;;  %v990_v0 = vadd.f32 %v862_v19, %v7507_v23  ;;  %v10756_v32 = vld [vmem:[#allocation62_spill] sm:$0xff]  ;;  %10760 = vst [vmem:[#allocation90_spill] sm:$0xff] %v7956_v33  ;;  %v7958_v54 = vpop.permute.xlu0 %2617  ;;  %v7962_v59 = vadd.f32 %v10762_v18, %v984_v58  ;;  %v10783_v33 = vld [vmem:[#allocation77_spill] sm:$0xff] }
 0x427   :  { %v864_v31 = vsel %vm845_vm3, %v10752_v1, %v10751_v46  ;;  %v10754_v57 = vld [vmem:[#allocation475_spill] sm:$0xff]  ;;  %v865_v37 = vsel %vm845_vm3, %v10751_v46, %v10755_v28  ;;  %v991_v51 = vadd.f32 %v863_v35, %v7510_v24  ;;  %v10758_v16 = vld [vmem:[#allocation158_spill] sm:$0xff]  ;;  %10761 = vst [vmem:[#allocation91_spill] sm:$0xff] %v7958_v54  ;;  %v10763_v24 = vld [vmem:[#allocation168_spill] sm:$0xff] }
 0x428   :  { %2921 = vrot.lane.b32.xlu0 %v10754_v57, %s3735_s2  ;;  %v10757_v61 = vld [vmem:[#allocation63_spill] sm:$0xff]  ;;  %v7951_v55 = vadd.f32 %v10758_v16, %v981_v4  ;;  %v10759_v8 = vld [vmem:[#allocation162_spill] sm:$0xff]  ;;  %v992_v23 = vadd.f32 %v864_v31, %v7520_v25  ;;  %v7965_v19 = vadd.f32 %v10763_v24, %v985_v17  ;;  %v10764_v35 = vld [vmem:[#allocation161_spill] sm:$0xff]  ;;  %v993_v4 = vadd.f32 %v865_v37, %v7523_v42 }
 0x429   :  { %v866_v34 = vsel %vm845_vm3, %v10757_v61, %v10756_v32  ;;  %v7954_v1 = vadd.f32 %v10759_v8, %v982_v36  ;;  %v7968_v46 = vadd.f32 %v10764_v35, %v983_v62  ;;  %v10765_v28 = vld [vmem:[#allocation172_spill] sm:$0xff]  ;;  %v10766_v61 = vld [vmem:[#allocation171_spill] sm:$0xff]  ;;  %v10768_v25 = vld [vmem:[#allocation481_spill] sm:$0xff] }
 0x42a   :  { %v7972_v36 = vadd.f32 %v10765_v28, %v986_v5  ;;  %v7975_v16 = vadd.f32 %v10766_v61, %v987_v3  ;;  %v10767_v8 = vld [vmem:[#allocation480_spill] sm:$0xff]  ;;  %v994_v31 = vadd.f32 %v866_v34, %v7526_v20  ;;  %v10769_v58 = vld [vmem:[#allocation175_spill] sm:$0xff]  ;;  %v10770_v62 = vld [vmem:[#allocation178_spill] sm:$0xff] }
 0x42b   :  { %2927 = vrot.lane.b32.xlu1 %v10767_v8, %s3735_s2  ;;  %v7983_v17 = vadd.f32 %v10769_v58, %v988_v56  ;;  %v7986_v18 = vadd.f32 %v10770_v62, %v989_v40  ;;  %v10771_v42 = vld [vmem:[#allocation182_spill] sm:$0xff]  ;;  %v10772_v37 = vld [vmem:[#allocation67_spill] sm:$0xff]  ;;  %v10776_v56 = vld [vmem:[#allocation181_spill] sm:$0xff]  ;;  %v8003_v40 = vpop.permute.xlu1 %2623  ;;  %v8005_v58 = vpop.permute.xlu0 %2621 }
 0x42c   :  { %2925 = vrot.lane.b32.xlu0 %v10768_v25, %s3735_s2  ;;  %v7989_v5 = vadd.f32 %v10771_v42, %v990_v0  ;;  %v867_v3 = vsel %vm845_vm3, %v10756_v32, %v10772_v37  ;;  %v10773_v24 = vld [vmem:[#allocation71_spill] sm:$0xff]  ;;  %v10774_v35 = vld [vmem:[#allocation66_spill] sm:$0xff]  ;;  %v8001_v34 = vadd.f32 %v10776_v56, %v991_v51  ;;  %10777 = vst [vmem:[#allocation455_spill] sm:$0xff] %v8003_v40  ;;  %10778 = vst [vmem:[#allocation93_spill] sm:$0xff] %v8005_v58 }
 0x42d   :  { %v868_v28 = vsel %vm845_vm3, %v10774_v35, %v10773_v24  ;;  %v10775_v61 = vld [vmem:[#allocation70_spill] sm:$0xff]  ;;  %v10780_v62 = vld [vmem:[#allocation139_spill] sm:$0xff]  ;;  %v10781_v32 = vld [vmem:[#allocation140_spill] sm:$0xff] }
 0x42e   :  { %v869_v20 = vsel %vm845_vm3, %v10773_v24, %v10775_v61  ;;  %v10779_v0 = vld [vmem:[#allocation74_spill] sm:$0xff]  ;;  %v10782_v35 = vld [vmem:[#allocation144_spill] sm:$0xff]  ;;  %v10784_v24 = vld [vmem:[#allocation185_spill] sm:$0xff] }
 0x42f   :  { %v870_v42 = vsel %vm845_vm3, %v10780_v62, %v10779_v0  ;;  %v871_v37 = vsel %vm845_vm3, %v10779_v0, %v10781_v32  ;;  %v872_v54 = vsel %vm845_vm3, %v10783_v33, %v10782_v35  ;;  %v8017_v61 = vadd.f32 %v10784_v24, %v992_v23  ;;  %v10785_v51 = vld [vmem:[#allocation143_spill] sm:$0xff]  ;;  %v10786_v40 = vld [vmem:[#allocation146_spill] sm:$0xff]  ;;  %v10788_v62 = vld [vmem:[#allocation188_spill] sm:$0xff] }
 0x430   :  { %v873_v56 = vsel %vm845_vm3, %v10782_v35, %v10785_v51  ;;  %v10787_v58 = vld [vmem:[#allocation147_spill] sm:$0xff]  ;;  %v8026_v11 = vadd.f32 %v10788_v62, %v993_v4  ;;  %v10789_v0 = vld [vmem:[#allocation486_spill] sm:$0xff]  ;;  %v995_v33 = vadd.f32 %v867_v3, %v7529_v13  ;;  %v996_v23 = vadd.f32 %v868_v28, %v7545_v52  ;;  %v10791_v35 = vld [vmem:[#allocation192_spill] sm:$0xff]  ;;  %v8046_v13 = vpop.permute.xlu0 %2625 }
 0x431   :  { %v874_v12 = vsel %vm845_vm3, %v10787_v58, %v10786_v40  ;;  %2931 = vrot.lane.b32.xlu1 %v10789_v0, %s3735_s2  ;;  %v10790_v32 = vld [vmem:[#allocation483_spill] sm:$0xff]  ;;  %v997_v24 = vadd.f32 %v869_v20, %v7573_v41  ;;  %v8036_v51 = vadd.f32 %v10791_v35, %v994_v31  ;;  %v998_v58 = vadd.f32 %v870_v42, %v7576_v47  ;;  %v10792_v6 = vld [vmem:[#allocation150_spill] sm:$0xff]  ;;  %v10796_v3 = vld [vmem:[#allocation149_spill] sm:$0xff] }
 0x432   :  { %2929 = vrot.lane.b32.xlu0 %v10790_v32, %s3735_s2  ;;  %v999_v4 = vadd.f32 %v871_v37, %v7579_v45  ;;  %v1000_v62 = vadd.f32 %v872_v54, %v7585_v43  ;;  %v875_v0 = vsel %vm845_vm3, %v10786_v40, %v10792_v6  ;;  %v8044_v32 = vpop.permute.xlu1 %2627  ;;  %10794 = vst [vmem:[#allocation460_spill] sm:$0xff] %v8046_v13  ;;  %v10795_v31 = vld [vmem:[#allocation154_spill] sm:$0xff]  ;;  %v10797_v28 = vld [vmem:[#allocation153_spill] sm:$0xff]  ;;  %v10798_v45 = vld [vmem:[#allocation156_spill] sm:$0xff] }
 0x433   :  { %10793 = vst [vmem:[#allocation461_spill] sm:$0xff] %v8044_v32  ;;  %v1001_v52 = vadd.f32 %v873_v56, %v7588_v2  ;;  %v1002_v41 = vadd.f32 %v874_v12, %v7591_v7  ;;  %v876_v47 = vsel %vm845_vm3, %v10796_v3, %v10795_v31  ;;  %v877_v43 = vsel %vm845_vm3, %v10795_v31, %v10797_v28  ;;  %v10799_v54 = vld [vmem:[#allocation157_spill] sm:$0xff]  ;;  %v10800_v20 = vld [vmem:[#allocation160_spill] sm:$0xff]  ;;  %v10802_v2 = vld [vmem:[#allocation159_spill] sm:$0xff] }
 0x434   :  { %v878_v6 = vsel %vm845_vm3, %v10799_v54, %v10798_v45  ;;  %v879_v40 = vsel %vm845_vm3, %v10798_v45, %v10800_v20  ;;  %v10801_v42 = vld [vmem:[#allocation164_spill] sm:$0xff]  ;;  %v10804_v37 = vld [vmem:[#allocation491_spill] sm:$0xff]  ;;  %v1003_v56 = vadd.f32 %v875_v0, %v7598_v14  ;;  %v10806_v3 = vld [vmem:[#allocation198_spill] sm:$0xff]  ;;  %v1004_v20 = vadd.f32 %v876_v47, %v7601_v60  ;;  %v8089_v0 = vpop.permute.xlu0 %2629 }
 0x435   :  { %v880_v7 = vsel %vm845_vm3, %v10802_v2, %v10801_v42  ;;  %v10803_v12 = vld [vmem:[#allocation488_spill] sm:$0xff]  ;;  %v10805_v35 = vld [vmem:[#allocation195_spill] sm:$0xff]  ;;  %v8074_v28 = vadd.f32 %v10806_v3, %v997_v24  ;;  %v1005_v2 = vadd.f32 %v877_v43, %v7604_v26  ;;  %v10809_v32 = vld [vmem:[#allocation202_spill] sm:$0xff]  ;;  %10811 = vst [vmem:[#allocation439_spill] sm:$0xff] %v8089_v0 }
 0x436   :  { %2935 = vrot.lane.b32.xlu1 %v10803_v12, %s3735_s2  ;;  %2933 = vrot.lane.b32.xlu0 %v10804_v37, %s3735_s2  ;;  %v8071_v31 = vadd.f32 %v10805_v35, %v996_v23  ;;  %v10807_v54 = vld [vmem:[#allocation191_spill] sm:$0xff]  ;;  %v8085_v37 = vadd.f32 %v10809_v32, %v998_v58  ;;  %v8087_v14 = vpop.permute.xlu1 %2631  ;;  %v1006_v23 = vadd.f32 %v878_v6, %v7607_v15  ;;  %v10812_v60 = vld [vmem:[#allocation201_spill] sm:$0xff]  ;;  %v10815_v58 = vld [vmem:[#allocation212_spill] sm:$0xff] }
 0x437   :  { %v8077_v45 = vadd.f32 %v10807_v54, %v995_v33  ;;  %v10808_v13 = vld [vmem:[#allocation163_spill] sm:$0xff]  ;;  %10810 = vst [vmem:[#allocation466_spill] sm:$0xff] %v8087_v14  ;;  %v1007_v33 = vadd.f32 %v879_v40, %v7610_v21  ;;  %v1008_v24 = vadd.f32 %v880_v7, %v7651_v49  ;;  %v8095_v47 = vadd.f32 %v10812_v60, %v999_v4  ;;  %v10813_v26 = vld [vmem:[#allocation205_spill] sm:$0xff]  ;;  %v10816_v35 = vld [vmem:[#allocation496_spill] sm:$0xff] }
 0x438   :  { %v881_v12 = vsel %vm845_vm3, %v10801_v42, %v10808_v13  ;;  %v8098_v43 = vadd.f32 %v10813_v26, %v1000_v62  ;;  %v10814_v13 = vld [vmem:[#allocation208_spill] sm:$0xff]  ;;  %v8104_v32 = vadd.f32 %v10815_v58, %v1002_v41  ;;  %v10817_v15 = vld [vmem:[#allocation497_spill] sm:$0xff]  ;;  %v10818_v49 = vld [vmem:[#allocation166_spill] sm:$0xff] }
 0x439   :  { %v8101_v42 = vadd.f32 %v10814_v13, %v1001_v52  ;;  %v1009_v21 = vadd.f32 %v881_v12, %v7654_v38  ;;  %v10819_v4 = vld [vmem:[#allocation167_spill] sm:$0xff]  ;;  %v10820_v62 = vld [vmem:[#allocation170_spill] sm:$0xff]  ;;  %v10823_v3 = vld [vmem:[#allocation169_spill] sm:$0xff] }
 0x43a   :  { %2939 = vrot.lane.b32.xlu1 %v10816_v35, %s3735_s2  ;;  %2937 = vrot.lane.b32.xlu0 %v10817_v15, %s3735_s2  ;;  %v882_v6 = vsel %vm845_vm3, %v10819_v4, %v10818_v49  ;;  %v883_v52 = vsel %vm845_vm3, %v10818_v49, %v10820_v62  ;;  %v10821_v40 = vld [vmem:[#allocation211_spill] sm:$0xff]  ;;  %v10822_v41 = vld [vmem:[#allocation174_spill] sm:$0xff]  ;;  %v10824_v60 = vld [vmem:[#allocation173_spill] sm:$0xff]  ;;  %v8132_v4 = vpop.permute.xlu1 %2635  ;;  %v8134_v49 = vpop.permute.xlu0 %2633 }
 0x43b   :  { %v8118_v7 = vadd.f32 %v10821_v40, %v1003_v56  ;;  %v884_v54 = vsel %vm845_vm3, %v10823_v3, %v10822_v41  ;;  %v885_v26 = vsel %vm845_vm3, %v10822_v41, %v10824_v60  ;;  %v10825_v38 = vld [vmem:[#allocation215_spill] sm:$0xff]  ;;  %v10827_v13 = vld [vmem:[#allocation218_spill] sm:$0xff]  ;;  %10829 = vst [vmem:[#allocation476_spill] sm:$0xff] %v8132_v4  ;;  %10830 = vst [vmem:[#allocation482_spill] sm:$0xff] %v8134_v49 }
 0x43c   :  { %v8127_v12 = vadd.f32 %v10825_v38, %v1004_v20  ;;  %v8130_v58 = vadd.f32 %v10827_v13, %v1005_v2  ;;  %v10831_v56 = vld [vmem:[#allocation176_spill] sm:$0xff]  ;;  %v10832_v62 = vld [vmem:[#allocation177_spill] sm:$0xff]  ;;  %v10833_v14 = vld [vmem:[#allocation226_spill] sm:$0xff]  ;;  %v1010_v2 = vadd.f32 %v882_v6, %v7657_v39  ;;  %v1011_v60 = vadd.f32 %v883_v52, %v7663_v50 }
 0x43d   :  { %v886_v40 = vsel %vm845_vm3, %v10832_v62, %v10831_v56  ;;  %v8140_v3 = vadd.f32 %v10833_v14, %v1008_v24  ;;  %v10835_v0 = vld [vmem:[#allocation222_spill] sm:$0xff]  ;;  %v10837_v41 = vld [vmem:[#allocation221_spill] sm:$0xff]  ;;  %v10839_v38 = vld [vmem:[#allocation180_spill] sm:$0xff] }
 0x43e   :  { %10826 = vst [vmem:[#allocation471_spill] sm:$0xff] %v8127_v12  ;;  %10828 = vst [vmem:[#allocation477_spill] sm:$0xff] %v8130_v58  ;;  %v8143_v35 = vadd.f32 %v10835_v0, %v1006_v23  ;;  %v8146_v20 = vadd.f32 %v10837_v41, %v1007_v33  ;;  %v887_v13 = vsel %vm845_vm3, %v10831_v56, %v10839_v38  ;;  %v10840_v4 = vld [vmem:[#allocation502_spill] sm:$0xff]  ;;  %v10841_v14 = vld [vmem:[#allocation499_spill] sm:$0xff] }
 0x43f   :  { %10834 = vst [vmem:[#allocation487_spill] sm:$0xff] %v8140_v3  ;;  %2943 = vrot.lane.b32.xlu1 %v10840_v4, %s3735_s2  ;;  %2941 = vrot.lane.b32.xlu0 %v10841_v14, %s3735_s2  ;;  %v10842_v24 = vld [vmem:[#allocation24_spill] sm:$0xff]  ;;  %v10845_v41 = vld [vmem:[#allocation179_spill] sm:$0xff]  ;;  %v10846_v6 = vld [vmem:[#allocation230_spill] sm:$0xff] }
 0x440   :  { %10836 = vst [vmem:[#allocation95_spill] sm:$0xff] %v8143_v35  ;;  %10838 = vst [vmem:[#allocation92_spill] sm:$0xff] %v8146_v20  ;;  %v1012_v0 = vadd.f32 %v884_v54, %v10842_v24  ;;  %v10843_v23 = vld [vmem:[#allocation28_spill] sm:$0xff]  ;;  %v8163_v50 = vadd.f32 %v10846_v6, %v1009_v21  ;;  %v10848_v52 = vld [vmem:[#allocation37_spill] sm:$0xff]  ;;  %v8175_v24 = vpop.permute.xlu1 %2639 }
 0x441   :  { %v1013_v62 = vadd.f32 %v885_v26, %v10843_v23  ;;  %v10844_v33 = vld [vmem:[#allocation184_spill] sm:$0xff]  ;;  %v1014_v49 = vadd.f32 %v886_v40, %v10848_v52  ;;  %v10849_v56 = vld [vmem:[#allocation183_spill] sm:$0xff]  ;;  %v10850_v4 = vld [vmem:[#allocation186_spill] sm:$0xff]  ;;  %10853 = vst [vmem:[#allocation96_spill] sm:$0xff] %v8175_v24  ;;  %v8177_v23 = vpop.permute.xlu0 %2637 }
 0x442   :  { %v888_v39 = vsel %vm845_vm3, %v10845_v41, %v10844_v33  ;;  %10847 = vst [vmem:[#allocation94_spill] sm:$0xff] %v8163_v50  ;;  %v889_v38 = vsel %vm845_vm3, %v10844_v33, %v10849_v56  ;;  %v10851_v3 = vld [vmem:[#allocation187_spill] sm:$0xff]  ;;  %v10852_v54 = vld [vmem:[#allocation190_spill] sm:$0xff]  ;;  %10854 = vst [vmem:[#allocation97_spill] sm:$0xff] %v8177_v23 }
 0x443   :  { %v890_v14 = vsel %vm845_vm3, %v10851_v3, %v10850_v4  ;;  %v891_v26 = vsel %vm845_vm3, %v10850_v4, %v10852_v54  ;;  %v10855_v21 = vld [vmem:[#allocation41_spill] sm:$0xff]  ;;  %v10856_v6 = vld [vmem:[#allocation194_spill] sm:$0xff]  ;;  %v10859_v56 = vld [vmem:[#allocation240_spill] sm:$0xff] }
 0x444   :  { %v1015_v41 = vadd.f32 %v887_v13, %v10855_v21  ;;  %v10857_v40 = vld [vmem:[#allocation189_spill] sm:$0xff]  ;;  %v10861_v20 = vld [vmem:[#allocation36_spill] sm:$0xff]  ;;  %v10862_v54 = vld [vmem:[#allocation234_spill] sm:$0xff] }
 0x445   :  { %v892_v52 = vsel %vm845_vm3, %v10857_v40, %v10856_v6  ;;  %v10858_v50 = vld [vmem:[#allocation193_spill] sm:$0xff]  ;;  %v1016_v4 = vadd.f32 %v888_v39, %v10861_v20  ;;  %v8191_v24 = vadd.f32 %v10862_v54, %v1010_v2  ;;  %v10866_v13 = vld [vmem:[#allocation504_spill] sm:$0xff]  ;;  %v10867_v21 = vld [vmem:[#allocation507_spill] sm:$0xff] }
 0x446   :  { %v893_v33 = vsel %vm845_vm3, %v10856_v6, %v10858_v50  ;;  %v10860_v3 = vld [vmem:[#allocation241_spill] sm:$0xff]  ;;  %2947 = vrot.lane.b32.xlu1 %v10866_v13, %s3735_s2  ;;  %2945 = vrot.lane.b32.xlu0 %v10867_v21, %s3735_s2  ;;  %v10868_v40 = vld [vmem:[#allocation40_spill] sm:$0xff]  ;;  %v10871_v12 = vld [vmem:[#allocation235_spill] sm:$0xff] }
 0x447   :  { %v1557_v15 = vsel %vm460_vm2, %v10860_v3, %v10859_v56  ;;  %10863 = vst [vmem:[#allocation99_spill] sm:$0xff] %v8191_v24  ;;  %v10864_v23 = vld [vmem:[#allocation233_spill] sm:$0xff]  ;;  %v1017_v50 = vadd.f32 %v889_v38, %v10868_v40  ;;  %v10869_v6 = vld [vmem:[#allocation44_spill] sm:$0xff]  ;;  %v8212_v24 = vpop.permute.xlu1 %2643  ;;  %v8214_v38 = vpop.permute.xlu0 %2641 }
 0x448   :  { %v8194_v35 = vadd.f32 %v10864_v23, %v1011_v60  ;;  %v1018_v8 = vadd.f32 %v890_v14, %v10869_v6  ;;  %v10870_v58 = vld [vmem:[#allocation45_spill] sm:$0xff]  ;;  %v10873_v39 = vld [vmem:[#allocation48_spill] sm:$0xff]  ;;  %10876 = vst [vmem:[#allocation98_spill] sm:$0xff] %v8212_v24  ;;  %10877 = vst [vmem:[#allocation100_spill] sm:$0xff] %v8214_v38 }
 0x449   :  { %v1019_v3 = vadd.f32 %v891_v26, %v10870_v58  ;;  %v10872_v20 = vld [vmem:[#allocation369_spill] sm:$0xff]  ;;  %v1020_v54 = vadd.f32 %v892_v52, %v10873_v39  ;;  %v10874_v60 = vld [vmem:[#allocation52_spill] sm:$0xff]  ;;  %v10878_v14 = vld [vmem:[#allocation238_spill] sm:$0xff] }
 0x44a   :  { %10865 = vst [vmem:[#allocation101_spill] sm:$0xff] %v8194_v35  ;;  %v1941_v2 = vsel %vm845_vm3, %v10872_v20, %v10871_v12  ;;  %v1021_v23 = vadd.f32 %v893_v33, %v10874_v60  ;;  %v1685_v35 = vadd.f32 %v1557_v15, %v7867_v44  ;;  %v10875_v13 = vld [vmem:[#allocation244_spill] sm:$0xff]  ;;  %v8217_v58 = vadd.f32 %v10878_v14, %v1012_v0  ;;  %v10879_v26 = vld [vmem:[#allocation242_spill] sm:$0xff]  ;;  %v10882_v33 = vld [vmem:[#allocation245_spill] sm:$0xff] }
 0x44b   :  { %v1558_v21 = vsel %vm460_vm2, %v10859_v56, %v10875_v13  ;;  %v8220_v40 = vadd.f32 %v10879_v26, %v1013_v62  ;;  %v10880_v6 = vld [vmem:[#allocation246_spill] sm:$0xff]  ;;  %v8226_v20 = vadd.f32 %v10882_v33, %v1015_v41  ;;  %v10887_v0 = vld [vmem:[#allocation512_spill] sm:$0xff]  ;;  %v10888_v62 = vld [vmem:[#allocation513_spill] sm:$0xff] }
 0x44c   :  { %v8223_v52 = vadd.f32 %v10880_v6, %v1014_v49  ;;  %v10884_v44 = vld [vmem:[#allocation250_spill] sm:$0xff]  ;;  %v2069_v56 = vadd.f32 %v1941_v2, %v1685_v35  ;;  %2951 = vrot.lane.b32.xlu1 %v10887_v0, %s3735_s2  ;;  %2949 = vrot.lane.b32.xlu0 %v10888_v62, %s3735_s2  ;;  %v1686_v49 = vadd.f32 %v1558_v21, %v7870_v10  ;;  %v10895_v2 = vld [vmem:[#allocation249_spill] sm:$0xff]  ;;  %v10896_v6 = vld [vmem:[#allocation243_spill] sm:$0xff] }
 0x44d   :  { %10883 = vst [vmem:[#allocation103_spill] sm:$0xff] %v8226_v20  ;;  %v8229_v15 = vadd.f32 %v10884_v44, %v1016_v4  ;;  %v10886_v39 = vld [vmem:[#allocation370_spill] sm:$0xff]  ;;  %v10893_v4 = vld [vmem:[#allocation257_spill] sm:$0xff]  ;;  %v10897_v33 = vld [vmem:[#allocation248_spill] sm:$0xff] }
 0x44e   :  { %10881 = vst [vmem:[#allocation102_spill] sm:$0xff] %v8223_v52  ;;  %v1942_v60 = vsel %vm845_vm3, %v10871_v12, %v10886_v39  ;;  %v10889_v13 = vld [vmem:[#allocation254_spill] sm:$0xff]  ;;  %v8246_v35 = vadd.f32 %v10893_v4, %v1019_v3  ;;  %v1559_v12 = vsel %vm460_vm2, %v10896_v6, %v10895_v2  ;;  %v1560_v44 = vsel %vm460_vm2, %v10895_v2, %v10897_v33  ;;  %v10904_v3 = vld [vmem:[#allocation253_spill] sm:$0xff] }
 0x44f   :  { %10885 = vst [vmem:[#allocation105_spill] sm:$0xff] %v8229_v15  ;;  %v8240_v14 = vadd.f32 %v10889_v13, %v1017_v50  ;;  %v10891_v41 = vld [vmem:[#allocation258_spill] sm:$0xff]  ;;  %v2648_v50 = vpop.permute.xlu1 %2647  ;;  %v10903_v13 = vld [vmem:[#allocation252_spill] sm:$0xff]  ;;  %v2070_v4 = vadd.f32 %v1942_v60, %v1686_v49  ;;  %v10905_v38 = vld [vmem:[#allocation521_spill] sm:$0xff] }
 0x450   :  { %v8243_v26 = vadd.f32 %v10891_v41, %v1018_v8  ;;  %10894 = vst [vmem:[#allocation106_spill] sm:$0xff] %v8246_v35  ;;  %v10898_v39 = vld [vmem:[#allocation262_spill] sm:$0xff]  ;;  %v8260_v8 = vpop.permute.xlu0 %2645  ;;  %v1561_v41 = vsel %vm460_vm2, %v10904_v3, %v10903_v13  ;;  %v10909_v33 = vld [vmem:[#allocation197_spill] sm:$0xff]  ;;  %v10913_v49 = vld [vmem:[#allocation515_spill] sm:$0xff]  ;;  %v1687_v3 = vadd.f32 %v1559_v12, %v7864_v48 }
 0x451   :  { %10890 = vst [vmem:[#allocation107_spill] sm:$0xff] %v8240_v14  ;;  %v8255_v24 = vadd.f32 %v10898_v39, %v1020_v54  ;;  %v10900_v10 = vld [vmem:[#allocation266_spill] sm:$0xff]  ;;  %10902 = vst [vmem:[#allocation492_spill] sm:$0xff] %v8260_v8  ;;  %v8270_v2 = vsel %vm460_vm2, %v8260_v8, %v2648_v50  ;;  %v10908_v54 = vld [vmem:[#allocation196_spill] sm:$0xff]  ;;  %2953 = vrot.lane.b32.xlu0 %v10913_v49, %s3735_s2  ;;  %v1688_v50 = vadd.f32 %v1560_v44, %v7880_v53 }
 0x452   :  { %10892 = vst [vmem:[#allocation104_spill] sm:$0xff] %v8243_v26  ;;  %v8258_v21 = vadd.f32 %v10900_v10, %v1021_v23  ;;  %v10906_v6 = vld [vmem:[#allocation522_spill] sm:$0xff]  ;;  %10907 = vst [vmem:[#allocation498_spill] sm:$0xff] %v8270_v2  ;;  %v894_v23 = vsel %vm845_vm3, %v10909_v33, %v10908_v54  ;;  %v10910_v39 = vld [vmem:[#allocation200_spill] sm:$0xff] }
 0x453   :  { %10899 = vst [vmem:[#allocation443_spill] sm:$0xff] %v8255_v24  ;;  %v2649_v35 = vsel %vm460_vm2, %v10906_v6, %v10905_v38  ;;  %v895_v10 = vsel %vm845_vm3, %v10908_v54, %v10910_v39  ;;  %v10912_v60 = vld [vmem:[#allocation518_spill] sm:$0xff]  ;;  %v10914_v6 = vld [vmem:[#allocation372_spill] sm:$0xff]  ;;  %v10915_v2 = vld [vmem:[#allocation239_spill] sm:$0xff]  ;;  %v2844_v53 = vpop.permute.xlu1 %2843 }
 0x454   :  { %10901 = vst [vmem:[#allocation493_spill] sm:$0xff] %v8258_v21  ;;  %v10911_v21 = vld [vmem:[#allocation398_spill] sm:$0xff]  ;;  %2955 = vrot.lane.b32.xlu1 %v10912_v60, %s3735_s2  ;;  %v1943_v33 = vsel %vm845_vm3, %v10915_v2, %v10914_v6  ;;  %v10916_v8 = vld [vmem:[#allocation371_spill] sm:$0xff]  ;;  %v10919_v49 = vld [vmem:[#allocation373_spill] sm:$0xff]  ;;  %v2842_v44 = vpop.permute.xlu0 %2841 }
 0x455   :  { %v2328_v24 = vadd.f32 %v10911_v21, %v2069_v56  ;;  %v1944_v54 = vsel %vm845_vm3, %v10914_v6, %v10916_v8  ;;  %v1689_v56 = vadd.f32 %v1561_v41, %v7883_v29  ;;  %v10917_v21 = vld [vmem:[#allocation256_spill] sm:$0xff]  ;;  %v10918_v26 = vld [vmem:[#allocation247_spill] sm:$0xff]  ;;  %v10920_v14 = vld [vmem:[#allocation261_spill] sm:$0xff]  ;;  %v3033_v41 = vsel %vm845_vm3, %v2842_v44, %v2844_v53 }
 0x456   :  { %v1562_v39 = vsel %vm460_vm2, %v10903_v13, %v10917_v21  ;;  %v1945_v48 = vsel %vm845_vm3, %v10919_v49, %v10918_v26  ;;  %v10921_v15 = vld [vmem:[#allocation255_spill] sm:$0xff]  ;;  %v10922_v20 = vld [vmem:[#allocation397_spill] sm:$0xff]  ;;  %v2071_v13 = vadd.f32 %v1943_v33, %v1687_v3  ;;  %v2072_v6 = vadd.f32 %v1944_v54, %v1688_v50  ;;  %v10924_v49 = vld [vmem:[#allocation520_spill] sm:$0xff] }
 0x457   :  { %v2777_v12 = vadd.f32 %v2649_v35, %v2328_v24  ;;  %v1563_v2 = vsel %vm460_vm2, %v10921_v15, %v10920_v14  ;;  %v2329_v60 = vadd.f32 %v10922_v20, %v2070_v4  ;;  %v10923_v8 = vld [vmem:[#allocation527_spill] sm:$0xff]  ;;  %v10926_v35 = vld [vmem:[#allocation56_spill] sm:$0xff]  ;;  %v10927_v15 = vld [vmem:[#allocation57_spill] sm:$0xff]  ;;  %v1690_v4 = vadd.f32 %v1562_v39, %v7886_v9  ;;  %v2848_v54 = vpop.permute.xlu1 %2847 }
 0x458   :  { %v2650_v29 = vsel %vm460_vm2, %v10905_v38, %v10923_v8  ;;  %2959 = vrot.lane.b32.xlu1 %v10924_v49, %s3735_s2  ;;  %v10925_v24 = vld [vmem:[#allocation523_spill] sm:$0xff]  ;;  %v8311_v52 = vadd.f32 %v894_v23, %v10926_v35  ;;  %v8314_v20 = vadd.f32 %v895_v10, %v10927_v15  ;;  %v2073_v38 = vadd.f32 %v1945_v48, %v1689_v56  ;;  %v10928_v8 = vld [vmem:[#allocation260_spill] sm:$0xff]  ;;  %v10929_v44 = vld [vmem:[#allocation533_spill] sm:$0xff] }
 0x459   :  { %v3161_v21 = vadd.f32 %v3033_v41, %v2777_v12  ;;  %2957 = vrot.lane.b32.xlu0 %v10925_v24, %s3735_s2  ;;  %v1564_v3 = vsel %vm460_vm2, %v10920_v14, %v10928_v8  ;;  %v1691_v50 = vadd.f32 %v1563_v2, %v7909_v30  ;;  %v2778_v33 = vadd.f32 %v2650_v29, %v2329_v60  ;;  %v2846_v12 = vpop.permute.xlu0 %2845  ;;  %v10930_v41 = vld [vmem:[#allocation526_spill] sm:$0xff]  ;;  %v10931_v49 = vld [vmem:[#allocation532_spill] sm:$0xff]  ;;  %v10932_v14 = vld [vmem:[#allocation401_spill] sm:$0xff] }
 0x45a   :  { %v2651_v23 = vsel %vm460_vm2, %v10930_v41, %v10929_v44  ;;  %v2652_v10 = vsel %vm460_vm2, %v10929_v44, %v10931_v49  ;;  %v9755_v9 = vmov 0.0   ;;  %v3034_v39 = vsel %vm845_vm3, %v2844_v53, %v2846_v12  ;;  %v10933_v30 = vld [vmem:[#allocation404_spill] sm:$0xff]  ;;  %v10937_v15 = vld [vmem:[#allocation265_spill] sm:$0xff]  ;;  %v10939_v12 = vld [vmem:[#allocation374_spill] sm:$0xff] }
 0x45b   :  { %vm3225_vm4 = vcmp.gt.f32.partialorder %v3161_v21, 0.0  ;;  %v2330_v48 = vadd.f32 %v10932_v14, %v2071_v13  ;;  %v2331_v60 = vadd.f32 %v10933_v30, %v2072_v6  ;;  %v3162_v2 = vadd.f32 %v3034_v39, %v2778_v33  ;;  %v10934_v29 = vld [vmem:[#allocation528_spill] sm:$0xff]  ;;  %v10935_v21 = vld [vmem:[#allocation529_spill] sm:$0xff]  ;;  %v10942_v49 = vld [vmem:[#allocation251_spill] sm:$0xff]  ;;  %v2852_v30 = vpop.permute.xlu1 %2851 }
 0x45c   :  { %v3497_v56 = vsel %vm3225_vm4, 1.0, %v9755_v9  ;;  %2963 = vrot.lane.b32.xlu1 %v10934_v29, %s3735_s2  ;;  %v10936_v35 = vld [vmem:[#allocation264_spill] sm:$0xff]  ;;  %v1946_v13 = vsel %vm845_vm3, %v10918_v26, %v10939_v12  ;;  %v10944_v29 = vld [vmem:[#allocation538_spill] sm:$0xff] }
 0x45d   :  { %3417 = vst [vmem:[#allocation2] sm:$0xff] %v3497_v56  ;;  %2961 = vrot.lane.b32.xlu0 %v10935_v21, %s3735_s2  ;;  %v1565_v8 = vsel %vm460_vm2, %v10937_v15, %v10936_v35  ;;  %v10938_v44 = vld [vmem:[#allocation268_spill] sm:$0xff]  ;;  %v2779_v39 = vadd.f32 %v2651_v23, %v2330_v48  ;;  %v2780_v14 = vadd.f32 %v2652_v10, %v2331_v60  ;;  %vm3226_vm5 = vcmp.gt.f32.partialorder %v3162_v2, 0.0  ;;  %v2850_v9 = vpop.permute.xlu0 %2849  ;;  %v10943_v15 = vld [vmem:[#allocation537_spill] sm:$0xff]  ;;  %v10946_v23 = vld [vmem:[#allocation534_spill] sm:$0xff] }
 0x45e   :  { %v1566_v53 = vsel %vm460_vm2, %v10936_v35, %v10938_v44  ;;  %v10940_v6 = vld [vmem:[#allocation408_spill] sm:$0xff]  ;;  %v2653_v21 = vsel %vm460_vm2, %v10944_v29, %v10943_v15  ;;  %v10945_v35 = vmov 0.0   ;;  %v3035_v24 = vsel %vm845_vm3, %v2848_v54, %v2850_v9  ;;  %v10947_v10 = vld [vmem:[#allocation531_spill] sm:$0xff] }
 0x45f   :  { %v2332_v33 = vadd.f32 %v10940_v6, %v2073_v38  ;;  %v10941_v41 = vld [vmem:[#allocation376_spill] sm:$0xff]  ;;  %v3498_v44 = vsel %vm3226_vm5, 1.0, %v10945_v35  ;;  %v3036_v26 = vsel %vm845_vm3, %v2850_v9, %v2852_v30  ;;  %v2074_v38 = vadd.f32 %v1946_v13, %v1690_v4  ;;  %v10948_v29 = vld [vmem:[#allocation375_spill] sm:$0xff] }
 0x460   :  { %v1947_v56 = vsel %vm845_vm3, %v10942_v49, %v10941_v41  ;;  %3418 = vst [vmem:[#allocation2 + $0x8] sm:$0xff] %v3498_v44  ;;  %v3163_v12 = vadd.f32 %v3035_v24, %v2779_v39  ;;  %v3164_v6 = vadd.f32 %v3036_v26, %v2780_v14  ;;  %2967 = vrot.lane.b32.xlu1 %v10946_v23, %s3735_s2  ;;  %v2856_v24 = vpop.permute.xlu1 %2855  ;;  %v10949_v49 = vld [vmem:[#allocation543_spill] sm:$0xff]  ;;  %v10955_v30 = vld [vmem:[#allocation272_spill] sm:$0xff]  ;;  %v10957_v26 = vld [vmem:[#allocation277_spill] sm:$0xff] }
 0x461   :  { %2965 = vrot.lane.b32.xlu0 %v10947_v10, %s3735_s2  ;;  %v1692_v48 = vadd.f32 %v1564_v3, %v7951_v55  ;;  %v1693_v60 = vadd.f32 %v1565_v8, %v7954_v1  ;;  %v1694_v2 = vadd.f32 %v1566_v53, %v7968_v46  ;;  %v1948_v54 = vsel %vm845_vm3, %v10941_v41, %v10948_v29  ;;  %v2854_v13 = vpop.permute.xlu0 %2853  ;;  %v10950_v8 = vld [vmem:[#allocation407_spill] sm:$0xff]  ;;  %v10953_v41 = vld [vmem:[#allocation273_spill] sm:$0xff]  ;;  %v10956_v44 = vld [vmem:[#allocation276_spill] sm:$0xff] }
 0x462   :  { %v2075_v4 = vadd.f32 %v1947_v56, %v1691_v50  ;;  %v2781_v9 = vadd.f32 %v2653_v21, %v2332_v33  ;;  %vm3227_vm6 = vcmp.gt.f32.partialorder %v3163_v12, 0.0  ;;  %vm3228_vm7 = vcmp.gt.f32.partialorder %v3164_v6, 0.0  ;;  %v10951_v21 = vld [vmem:[#allocation536_spill] sm:$0xff]  ;;  %v10952_v33 = vld [vmem:[#allocation539_spill] sm:$0xff]  ;;  %v10959_v6 = vld [vmem:[#allocation377_spill] sm:$0xff] }
 0x463   :  { %v2654_v39 = vsel %vm460_vm2, %v10943_v15, %v10949_v49  ;;  %v3499_v55 = vsel %vm3227_vm6, 1.0, %v10945_v35  ;;  %v3500_v1 = vsel %vm3228_vm7, 1.0, %v10945_v35  ;;  %v3037_v46 = vsel %vm845_vm3, %v2854_v13, %v2856_v24  ;;  %v10954_v56 = vld [vmem:[#allocation267_spill] sm:$0xff] }
 0x464   :  { %v2076_v3 = vadd.f32 %v1948_v54, %v1692_v48  ;;  %v2333_v53 = vadd.f32 %v10950_v8, %v2074_v38  ;;  %3419 = vst [vmem:[#allocation2 + $0x10] sm:$0xff] %v3499_v55  ;;  %3420 = vst [vmem:[#allocation2 + $0x18] sm:$0xff] %v3500_v1  ;;  %v3165_v50 = vadd.f32 %v3037_v46, %v2781_v9  ;;  %2971 = vrot.lane.b32.xlu1 %v10951_v21, %s3735_s2  ;;  %v10958_v12 = vld [vmem:[#allocation259_spill] sm:$0xff]  ;;  %v10960_v48 = vld [vmem:[#allocation378_spill] sm:$0xff]  ;;  %v2860_v49 = vpop.permute.xlu1 %2859 }
 0x465   :  { %2969 = vrot.lane.b32.xlu0 %v10952_v33, %s3735_s2  ;;  %v1567_v14 = vsel %vm460_vm2, %v10954_v56, %v10953_v41  ;;  %v1568_v15 = vsel %vm460_vm2, %v10953_v41, %v10955_v30  ;;  %v1569_v38 = vsel %vm460_vm2, %v10957_v26, %v10956_v44  ;;  %v1949_v10 = vsel %vm845_vm3, %v10959_v6, %v10958_v12  ;;  %v10961_v54 = vld [vmem:[#allocation411_spill] sm:$0xff]  ;;  %v2858_v55 = vpop.permute.xlu0 %2857  ;;  %v10962_v1 = vld [vmem:[#allocation549_spill] sm:$0xff]  ;;  %v10963_v46 = vld [vmem:[#allocation542_spill] sm:$0xff] }
 0x466   :  { %v1950_v29 = vsel %vm845_vm3, %v10958_v12, %v10960_v48  ;;  %v2334_v9 = vadd.f32 %v10961_v54, %v2075_v4  ;;  %v2782_v13 = vadd.f32 %v2654_v39, %v2333_v53  ;;  %vm3229_vm8 = vcmp.gt.f32.partialorder %v3165_v50, 0.0  ;;  %v10964_v21 = vld [vmem:[#allocation548_spill] sm:$0xff]  ;;  %v10965_v12 = vld [vmem:[#allocation414_spill] sm:$0xff]  ;;  %v10967_v53 = vld [vmem:[#allocation545_spill] sm:$0xff] }
 0x467   :  { %v2655_v8 = vsel %vm460_vm2, %v10963_v46, %v10962_v1  ;;  %v2656_v41 = vsel %vm460_vm2, %v10962_v1, %v10964_v21  ;;  %v3501_v56 = vsel %vm3229_vm8, 1.0, %v10945_v35  ;;  %v3038_v30 = vsel %vm845_vm3, %v2856_v24, %v2858_v55  ;;  %v10966_v39 = vld [vmem:[#allocation544_spill] sm:$0xff]  ;;  %v10969_v55 = vld [vmem:[#allocation553_spill] sm:$0xff]  ;;  %v10970_v21 = vld [vmem:[#allocation554_spill] sm:$0xff] }
 0x468   :  { %v2077_v26 = vadd.f32 %v1949_v10, %v1693_v60  ;;  %v2335_v6 = vadd.f32 %v10965_v12, %v2076_v3  ;;  %3421 = vst [vmem:[#allocation2 + $0x20] sm:$0xff] %v3501_v56  ;;  %v3166_v4 = vadd.f32 %v3038_v30, %v2782_v13  ;;  %2975 = vrot.lane.b32.xlu1 %v10966_v39, %s3735_s2  ;;  %v10968_v46 = vld [vmem:[#allocation280_spill] sm:$0xff]  ;;  %v2864_v10 = vpop.permute.xlu1 %2863  ;;  %v10977_v12 = vld [vmem:[#allocation263_spill] sm:$0xff] }
 0x469   :  { %2973 = vrot.lane.b32.xlu0 %v10967_v53, %s3735_s2  ;;  %v1695_v50 = vadd.f32 %v1567_v14, %v7962_v59  ;;  %v1696_v48 = vadd.f32 %v1568_v15, %v7965_v19  ;;  %v1697_v54 = vadd.f32 %v1569_v38, %v7972_v36  ;;  %v2078_v1 = vadd.f32 %v1950_v29, %v1694_v2  ;;  %v2862_v13 = vpop.permute.xlu0 %2861  ;;  %v10971_v2 = vld [vmem:[#allocation418_spill] sm:$0xff]  ;;  %v10973_v29 = vld [vmem:[#allocation547_spill] sm:$0xff]  ;;  %v10976_v30 = vld [vmem:[#allocation380_spill] sm:$0xff] }
 0x46a   :  { %v1570_v60 = vsel %vm460_vm2, %v10956_v44, %v10968_v46  ;;  %v2783_v24 = vadd.f32 %v2655_v8, %v2334_v9  ;;  %v2784_v3 = vadd.f32 %v2656_v41, %v2335_v6  ;;  %vm3230_vm9 = vcmp.gt.f32.partialorder %v3166_v4, 0.0  ;;  %v10972_v38 = vld [vmem:[#allocation550_spill] sm:$0xff]  ;;  %v10974_v9 = vld [vmem:[#allocation285_spill] sm:$0xff]  ;;  %v10975_v8 = vld [vmem:[#allocation279_spill] sm:$0xff] }
 0x46b   :  { %v2657_v56 = vsel %vm460_vm2, %v10970_v21, %v10969_v55  ;;  %v3502_v59 = vsel %vm3230_vm9, 1.0, %v10945_v35  ;;  %v3039_v19 = vsel %vm845_vm3, %v2860_v49, %v2862_v13  ;;  %v3040_v36 = vsel %vm845_vm3, %v2862_v13, %v2864_v10  ;;  %v10978_v6 = vld [vmem:[#allocation379_spill] sm:$0xff]  ;;  %v10979_v4 = vld [vmem:[#allocation417_spill] sm:$0xff] }
 0x46c   :  { %v2336_v14 = vadd.f32 %v10971_v2, %v2077_v26  ;;  %3422 = vst [vmem:[#allocation2 + $0x28] sm:$0xff] %v3502_v59  ;;  %v3167_v15 = vadd.f32 %v3039_v19, %v2783_v24  ;;  %v3168_v44 = vadd.f32 %v3040_v36, %v2784_v3  ;;  %2979 = vrot.lane.b32.xlu1 %v10972_v38, %s3735_s2  ;;  %v10980_v24 = vld [vmem:[#allocation271_spill] sm:$0xff]  ;;  %v10981_v3 = vld [vmem:[#allocation381_spill] sm:$0xff]  ;;  %v2868_v21 = vpop.permute.xlu1 %2867 }
 0x46d   :  { %2977 = vrot.lane.b32.xlu0 %v10973_v29, %s3735_s2  ;;  %v1571_v41 = vsel %vm460_vm2, %v10975_v8, %v10974_v9  ;;  %v1951_v49 = vsel %vm845_vm3, %v10977_v12, %v10976_v30  ;;  %v1952_v26 = vsel %vm845_vm3, %v10976_v30, %v10978_v6  ;;  %v2337_v46 = vadd.f32 %v10979_v4, %v2078_v1  ;;  %v2866_v59 = vpop.permute.xlu0 %2865  ;;  %v10982_v19 = vld [vmem:[#allocation559_spill] sm:$0xff]  ;;  %v10986_v6 = vld [vmem:[#allocation269_spill] sm:$0xff] }
 0x46e   :  { %v1953_v10 = vsel %vm845_vm3, %v10981_v3, %v10980_v24  ;;  %v2785_v13 = vadd.f32 %v2657_v56, %v2336_v14  ;;  %vm3231_vm10 = vcmp.gt.f32.partialorder %v3167_v15, 0.0  ;;  %vm3232_vm11 = vcmp.gt.f32.partialorder %v3168_v44, 0.0  ;;  %v10983_v56 = vld [vmem:[#allocation552_spill] sm:$0xff]  ;;  %v10984_v14 = vld [vmem:[#allocation555_spill] sm:$0xff] }
 0x46f   :  { %v2658_v36 = vsel %vm460_vm2, %v10969_v55, %v10982_v19  ;;  %v3503_v2 = vsel %vm3231_vm10, 1.0, %v10945_v35  ;;  %v3504_v29 = vsel %vm3232_vm11, 1.0, %v10945_v35  ;;  %v3041_v8 = vsel %vm845_vm3, %v2866_v59, %v2868_v21  ;;  %v10985_v55 = vld [vmem:[#allocation270_spill] sm:$0xff]  ;;  %v10990_v19 = vld [vmem:[#allocation564_spill] sm:$0xff] }
 0x470   :  { %v2079_v1 = vadd.f32 %v1951_v49, %v1695_v50  ;;  %v2080_v30 = vadd.f32 %v1952_v26, %v1696_v48  ;;  %3423 = vst [vmem:[#allocation2 + $0x30] sm:$0xff] %v3503_v2  ;;  %3424 = vst [vmem:[#allocation2 + $0x38] sm:$0xff] %v3504_v29  ;;  %v3169_v12 = vadd.f32 %v3041_v8, %v2785_v13  ;;  %2983 = vrot.lane.b32.xlu1 %v10983_v56, %s3735_s2  ;;  %v10987_v48 = vld [vmem:[#allocation284_spill] sm:$0xff]  ;;  %v2872_v13 = vpop.permute.xlu1 %2871  ;;  %v10991_v2 = vld [vmem:[#allocation421_spill] sm:$0xff] }
 0x471   :  { %2981 = vrot.lane.b32.xlu0 %v10984_v14, %s3735_s2  ;;  %v1698_v15 = vadd.f32 %v1570_v60, %v7975_v16  ;;  %v8447_v44 = vadd.f32 %v10985_v55, %v8311_v52  ;;  %v8451_v4 = vadd.f32 %v10986_v6, %v8314_v20  ;;  %v2081_v50 = vadd.f32 %v1953_v10, %v1697_v54  ;;  %v2870_v59 = vpop.permute.xlu0 %2869  ;;  %v10988_v16 = vld [vmem:[#allocation565_spill] sm:$0xff]  ;;  %v10989_v60 = vld [vmem:[#allocation558_spill] sm:$0xff]  ;;  %v10992_v29 = vld [vmem:[#allocation424_spill] sm:$0xff] }
 0x472   :  { %v1572_v49 = vsel %vm460_vm2, %v10974_v9, %v10987_v48  ;;  %v1699_v26 = vadd.f32 %v1571_v41, %v7983_v17  ;;  %v2786_v3 = vadd.f32 %v2658_v36, %v2337_v46  ;;  %vm3233_vm12 = vcmp.gt.f32.partialorder %v3169_v12, 0.0  ;;  %v10993_v46 = vld [vmem:[#allocation560_spill] sm:$0xff]  ;;  %v10994_v36 = vld [vmem:[#allocation561_spill] sm:$0xff]  ;;  %v10998_v6 = vld [vmem:[#allocation382_spill] sm:$0xff] }
 0x473   :  { %v2659_v52 = vsel %vm460_vm2, %v10989_v60, %v10988_v16  ;;  %v2660_v20 = vsel %vm460_vm2, %v10988_v16, %v10990_v19  ;;  %v3505_v54 = vsel %vm3233_vm12, 1.0, %v10945_v35  ;;  %v3042_v10 = vsel %vm845_vm3, %v2868_v21, %v2870_v59  ;;  %v10995_v8 = vld [vmem:[#allocation288_spill] sm:$0xff]  ;;  %v10996_v12 = vld [vmem:[#allocation289_spill] sm:$0xff]  ;;  %v11001_v59 = vld [vmem:[#allocation275_spill] sm:$0xff] }
 0x474   :  { %v2338_v9 = vadd.f32 %v10991_v2, %v2079_v1  ;;  %v2339_v17 = vadd.f32 %v10992_v29, %v2080_v30  ;;  %3425 = vst [vmem:[#allocation2 + $0x40] sm:$0xff] %v3505_v54  ;;  %v3170_v41 = vadd.f32 %v3042_v10, %v2786_v3  ;;  %2987 = vrot.lane.b32.xlu1 %v10993_v46, %s3735_s2  ;;  %v10997_v55 = vld [vmem:[#allocation292_spill] sm:$0xff]  ;;  %v2876_v54 = vpop.permute.xlu1 %2875  ;;  %v11002_v2 = vld [vmem:[#allocation569_spill] sm:$0xff]  ;;  %v11003_v29 = vld [vmem:[#allocation570_spill] sm:$0xff] }
 0x475   :  { %2985 = vrot.lane.b32.xlu0 %v10994_v36, %s3735_s2  ;;  %v1573_v56 = vsel %vm460_vm2, %v10996_v12, %v10995_v8  ;;  %v1574_v21 = vsel %vm460_vm2, %v10995_v8, %v10997_v55  ;;  %v1954_v1 = vsel %vm845_vm3, %v10980_v24, %v10998_v6  ;;  %v10999_v30 = vld [vmem:[#allocation428_spill] sm:$0xff]  ;;  %v2874_v10 = vpop.permute.xlu0 %2873  ;;  %v2661_v12 = vsel %vm460_vm2, %v11003_v29, %v11002_v2 }
 0x476   :  { %v2340_v48 = vadd.f32 %v10999_v30, %v2081_v50  ;;  %v11000_v3 = vld [vmem:[#allocation384_spill] sm:$0xff]  ;;  %v2787_v60 = vadd.f32 %v2659_v52, %v2338_v9  ;;  %v2788_v19 = vadd.f32 %v2660_v20, %v2339_v17  ;;  %vm3234_vm13 = vcmp.gt.f32.partialorder %v3170_v41, 0.0  ;;  %v11004_v52 = vld [vmem:[#allocation566_spill] sm:$0xff]  ;;  %v11005_v20 = vld [vmem:[#allocation563_spill] sm:$0xff] }
 0x477   :  { %v1955_v16 = vsel %vm845_vm3, %v11001_v59, %v11000_v3  ;;  %v3506_v8 = vsel %vm3234_vm13, 1.0, %v10945_v35  ;;  %v3043_v55 = vsel %vm845_vm3, %v2872_v13, %v2874_v10  ;;  %v3044_v24 = vsel %vm845_vm3, %v2874_v10, %v2876_v54  ;;  %v11006_v59 = vld [vmem:[#allocation383_spill] sm:$0xff] }
 0x478   :  { %v2082_v50 = vadd.f32 %v1954_v1, %v1698_v15  ;;  %3426 = vst [vmem:[#allocation2 + $0x48] sm:$0xff] %v3506_v8  ;;  %v3171_v6 = vadd.f32 %v3043_v55, %v2787_v60  ;;  %v3172_v30 = vadd.f32 %v3044_v24, %v2788_v19  ;;  %2991 = vrot.lane.b32.xlu1 %v11004_v52, %s3735_s2  ;;  %v2880_v60 = vpop.permute.xlu1 %2879  ;;  %v11007_v54 = vld [vmem:[#allocation575_spill] sm:$0xff]  ;;  %v11014_v55 = vld [vmem:[#allocation300_spill] sm:$0xff]  ;;  %v11015_v24 = vld [vmem:[#allocation301_spill] sm:$0xff] }
 0x479   :  { %2989 = vrot.lane.b32.xlu0 %v11005_v20, %s3735_s2  ;;  %v1700_v9 = vadd.f32 %v1572_v49, %v7986_v18  ;;  %v1701_v17 = vadd.f32 %v1573_v56, %v7989_v5  ;;  %v1702_v41 = vadd.f32 %v1574_v21, %v8001_v34  ;;  %v1956_v13 = vsel %vm845_vm3, %v11000_v3, %v11006_v59  ;;  %v2878_v19 = vpop.permute.xlu0 %2877  ;;  %v11008_v56 = vld [vmem:[#allocation427_spill] sm:$0xff] }
 0x47a   :  { %v2083_v15 = vadd.f32 %v1955_v16, %v1699_v26  ;;  %v2789_v1 = vadd.f32 %v2661_v12, %v2340_v48  ;;  %vm3235_vm14 = vcmp.gt.f32.partialorder %v3171_v6, 0.0  ;;  %vm3236_vm15 = vcmp.gt.f32.partialorder %v3172_v30, 0.0  ;;  %v11009_v48 = vld [vmem:[#allocation568_spill] sm:$0xff]  ;;  %v11010_v3 = vld [vmem:[#allocation571_spill] sm:$0xff]  ;;  %v11011_v16 = vld [vmem:[#allocation297_spill] sm:$0xff] }
 0x47b   :  { %v2662_v10 = vsel %vm460_vm2, %v11002_v2, %v11007_v54  ;;  %v3507_v18 = vsel %vm3235_vm14, 1.0, %v10945_v35  ;;  %v3508_v5 = vsel %vm3236_vm15, 1.0, %v10945_v35  ;;  %v3045_v34 = vsel %vm845_vm3, %v2878_v19, %v2880_v60  ;;  %v11012_v2 = vld [vmem:[#allocation291_spill] sm:$0xff]  ;;  %v11013_v12 = vld [vmem:[#allocation296_spill] sm:$0xff]  ;;  %v11017_v30 = vld [vmem:[#allocation385_spill] sm:$0xff] }
 0x47c   :  { %v2084_v49 = vadd.f32 %v1956_v13, %v1700_v9  ;;  %v2341_v21 = vadd.f32 %v11008_v56, %v2082_v50  ;;  %3427 = vst [vmem:[#allocation2 + $0x50] sm:$0xff] %v3507_v18  ;;  %3428 = vst [vmem:[#allocation2 + $0x58] sm:$0xff] %v3508_v5  ;;  %v3173_v26 = vadd.f32 %v3045_v34, %v2789_v1  ;;  %2995 = vrot.lane.b32.xlu1 %v11009_v48, %s3735_s2  ;;  %v11016_v6 = vld [vmem:[#allocation283_spill] sm:$0xff]  ;;  %v11018_v9 = vld [vmem:[#allocation386_spill] sm:$0xff]  ;;  %v2884_v54 = vpop.permute.xlu1 %2883 }
 0x47d   :  { %2993 = vrot.lane.b32.xlu0 %v11010_v3, %s3735_s2  ;;  %v1575_v29 = vsel %vm460_vm2, %v11012_v2, %v11011_v16  ;;  %v1576_v8 = vsel %vm460_vm2, %v11011_v16, %v11013_v12  ;;  %v1577_v50 = vsel %vm460_vm2, %v11015_v24, %v11014_v55  ;;  %v1957_v20 = vsel %vm845_vm3, %v11017_v30, %v11016_v6  ;;  %v11019_v13 = vld [vmem:[#allocation431_spill] sm:$0xff]  ;;  %v2882_v18 = vpop.permute.xlu0 %2881  ;;  %v11020_v5 = vld [vmem:[#allocation581_spill] sm:$0xff]  ;;  %v11021_v34 = vld [vmem:[#allocation574_spill] sm:$0xff] }
 0x47e   :  { %v1958_v59 = vsel %vm845_vm3, %v11016_v6, %v11018_v9  ;;  %v2342_v1 = vadd.f32 %v11019_v13, %v2083_v15  ;;  %v2790_v19 = vadd.f32 %v2662_v10, %v2341_v21  ;;  %vm3237_vm0 = vcmp.gt.f32.partialorder %v3173_v26, 0.0  ;;  %v11022_v48 = vld [vmem:[#allocation580_spill] sm:$0xff]  ;;  %v11023_v6 = vld [vmem:[#allocation434_spill] sm:$0xff]  ;;  %v11025_v21 = vld [vmem:[#allocation577_spill] sm:$0xff] }
 0x47f   :  { %v2663_v56 = vsel %vm460_vm2, %v11021_v34, %v11020_v5  ;;  %v2664_v16 = vsel %vm460_vm2, %v11020_v5, %v11022_v48  ;;  %v3509_v2 = vsel %vm3237_vm0, 1.0, %v10945_v35  ;;  %v3046_v12 = vsel %vm845_vm3, %v2880_v60, %v2882_v18  ;;  %v11024_v10 = vld [vmem:[#allocation576_spill] sm:$0xff]  ;;  %v11027_v9 = vld [vmem:[#allocation199_spill] sm:$0xff]  ;;  %v11028_v48 = vld [vmem:[#allocation585_spill] sm:$0xff] }
 0x480   :  { %v2085_v24 = vadd.f32 %v1957_v20, %v1701_v17  ;;  %v2343_v30 = vadd.f32 %v11023_v6, %v2084_v49  ;;  %3429 = vst [vmem:[#allocation2 + $0x60] sm:$0xff] %v3509_v2  ;;  %v3174_v15 = vadd.f32 %v3046_v12, %v2790_v19  ;;  %2999 = vrot.lane.b32.xlu1 %v11024_v10, %s3735_s2  ;;  %v11026_v26 = vld [vmem:[#allocation204_spill] sm:$0xff]  ;;  %v2888_v19 = vpop.permute.xlu1 %2887  ;;  %v11029_v2 = vld [vmem:[#allocation586_spill] sm:$0xff] }
 0x481   :  { %2997 = vrot.lane.b32.xlu0 %v11025_v21, %s3735_s2  ;;  %v896_v13 = vsel %vm845_vm3, %v11027_v9, %v11026_v26  ;;  %v1703_v5 = vadd.f32 %v1575_v29, %v8017_v61  ;;  %v1704_v34 = vadd.f32 %v1576_v8, %v8026_v11  ;;  %v2086_v60 = vadd.f32 %v1958_v59, %v1702_v41  ;;  %v2886_v18 = vpop.permute.xlu0 %2885  ;;  %v11030_v29 = vld [vmem:[#allocation438_spill] sm:$0xff]  ;;  %v11033_v59 = vld [vmem:[#allocation304_spill] sm:$0xff] }
 0x482   :  { %v1705_v17 = vadd.f32 %v1577_v50, %v8036_v51  ;;  %v2791_v49 = vadd.f32 %v2663_v56, %v2342_v1  ;;  %v2792_v20 = vadd.f32 %v2664_v16, %v2343_v30  ;;  %vm3238_vm1 = vcmp.gt.f32.partialorder %v3174_v15, 0.0  ;;  %v11031_v8 = vld [vmem:[#allocation582_spill] sm:$0xff]  ;;  %v11032_v50 = vld [vmem:[#allocation579_spill] sm:$0xff]  ;;  %v11034_v56 = vld [vmem:[#allocation388_spill] sm:$0xff] }
 0x483   :  { %v2665_v12 = vsel %vm460_vm2, %v11029_v2, %v11028_v48  ;;  %v3510_v6 = vsel %vm3238_vm1, 1.0, %v10945_v35  ;;  %v3047_v9 = vsel %vm845_vm3, %v2884_v54, %v2886_v18  ;;  %v3048_v61 = vsel %vm845_vm3, %v2886_v18, %v2888_v19  ;;  %v11035_v16 = vld [vmem:[#allocation287_spill] sm:$0xff]  ;;  %v11037_v15 = vld [vmem:[#allocation437_spill] sm:$0xff] }
 0x484   :  { %v2344_v11 = vadd.f32 %v11030_v29, %v2085_v24  ;;  %3430 = vst [vmem:[#allocation2 + $0x68] sm:$0xff] %v3510_v6  ;;  %v3175_v41 = vadd.f32 %v3047_v9, %v2791_v49  ;;  %v3176_v51 = vadd.f32 %v3048_v61, %v2792_v20  ;;  %3003 = vrot.lane.b32.xlu1 %v11031_v8, %s3735_s2  ;;  %v11036_v30 = vld [vmem:[#allocation387_spill] sm:$0xff]  ;;  %v11039_v19 = vld [vmem:[#allocation389_spill] sm:$0xff]  ;;  %v2892_v6 = vpop.permute.xlu1 %2891 }
 0x485   :  { %3001 = vrot.lane.b32.xlu0 %v11032_v50, %s3735_s2  ;;  %v1578_v1 = vsel %vm460_vm2, %v11014_v55, %v11033_v59  ;;  %v1959_v54 = vsel %vm845_vm3, %v11035_v16, %v11034_v56  ;;  %v1960_v24 = vsel %vm845_vm3, %v11034_v56, %v11036_v30  ;;  %v2345_v49 = vadd.f32 %v11037_v15, %v2086_v60  ;;  %v11038_v20 = vld [vmem:[#allocation295_spill] sm:$0xff]  ;;  %v2890_v9 = vpop.permute.xlu0 %2889  ;;  %v11045_v15 = vld [vmem:[#allocation206_spill] sm:$0xff] }
 0x486   :  { %v1961_v18 = vsel %vm845_vm3, %v11039_v19, %v11038_v20  ;;  %v2793_v2 = vadd.f32 %v2665_v12, %v2344_v11  ;;  %vm3239_vm4 = vcmp.gt.f32.partialorder %v3175_v41, 0.0  ;;  %vm3240_vm5 = vcmp.gt.f32.partialorder %v3176_v51, 0.0  ;;  %v11040_v55 = vld [vmem:[#allocation591_spill] sm:$0xff]  ;;  %v11041_v12 = vld [vmem:[#allocation584_spill] sm:$0xff]  ;;  %v11044_v51 = vld [vmem:[#allocation61_spill] sm:$0xff] }
 0x487   :  { %v2666_v61 = vsel %vm460_vm2, %v11028_v48, %v11040_v55  ;;  %v3511_v29 = vsel %vm3239_vm4, 1.0, %v10945_v35  ;;  %v3512_v50 = vsel %vm3240_vm5, 1.0, %v10945_v35  ;;  %v3049_v59 = vsel %vm845_vm3, %v2890_v9, %v2892_v6  ;;  %v11042_v11 = vld [vmem:[#allocation587_spill] sm:$0xff]  ;;  %v11047_v19 = vld [vmem:[#allocation308_spill] sm:$0xff] }
 0x488   :  { %v2087_v60 = vadd.f32 %v1959_v54, %v1703_v5  ;;  %v2088_v56 = vadd.f32 %v1960_v24, %v1704_v34  ;;  %3431 = vst [vmem:[#allocation2 + $0x70] sm:$0xff] %v3511_v29  ;;  %3432 = vst [vmem:[#allocation2 + $0x78] sm:$0xff] %v3512_v50  ;;  %v3177_v16 = vadd.f32 %v3049_v59, %v2793_v2  ;;  %3007 = vrot.lane.b32.xlu1 %v11041_v12, %s3735_s2  ;;  %v11043_v41 = vld [vmem:[#allocation203_spill] sm:$0xff]  ;;  %v2896_v29 = vpop.permute.xlu1 %2895  ;;  %v11049_v50 = vld [vmem:[#allocation597_spill] sm:$0xff] }
 0x489   :  { %3005 = vrot.lane.b32.xlu0 %v11042_v11, %s3735_s2  ;;  %v8583_v48 = vsel %vm845_vm3, %v11026_v26, %v11043_v41  ;;  %v8586_v30 = vadd.f32 %v896_v13, %v11044_v51  ;;  %v11046_v5 = vld [vmem:[#allocation207_spill] sm:$0xff]  ;;  %v2089_v54 = vadd.f32 %v1961_v18, %v1705_v17  ;;  %v1706_v24 = vadd.f32 %v1578_v1, %v8077_v45  ;;  %v2894_v26 = vpop.permute.xlu0 %2893  ;;  %v11050_v59 = vld [vmem:[#allocation590_spill] sm:$0xff]  ;;  %v11051_v12 = vld [vmem:[#allocation596_spill] sm:$0xff] }
 0x48a   :  { %v8591_v34 = vsel %vm845_vm3, %v11046_v5, %v11045_v15  ;;  %v11048_v2 = vld [vmem:[#allocation303_spill] sm:$0xff]  ;;  %v2794_v55 = vadd.f32 %v2666_v61, %v2345_v49  ;;  %vm3241_vm6 = vcmp.gt.f32.partialorder %v3177_v16, 0.0  ;;  %v2667_v13 = vsel %vm460_vm2, %v11050_v59, %v11049_v50  ;;  %v11052_v1 = vld [vmem:[#allocation442_spill] sm:$0xff]  ;;  %v11054_v61 = vld [vmem:[#allocation592_spill] sm:$0xff] }
 0x48b   :  { %v1579_v9 = vsel %vm460_vm2, %v11048_v2, %v11047_v19  ;;  %v2668_v41 = vsel %vm460_vm2, %v11049_v50, %v11051_v12  ;;  %v3513_v17 = vsel %vm3241_vm6, 1.0, %v10945_v35  ;;  %v3050_v45 = vsel %vm845_vm3, %v2892_v6, %v2894_v26  ;;  %v11053_v51 = vld [vmem:[#allocation446_spill] sm:$0xff]  ;;  %v11055_v16 = vld [vmem:[#allocation593_spill] sm:$0xff]  ;;  %v11056_v2 = vld [vmem:[#allocation307_spill] sm:$0xff] }
 0x48c   :  { %v2346_v18 = vadd.f32 %v11052_v1, %v2087_v60  ;;  %v2347_v5 = vadd.f32 %v11053_v51, %v2088_v56  ;;  %3433 = vst [vmem:[#allocation2 + $0x80] sm:$0xff] %v3513_v17  ;;  %v3178_v49 = vadd.f32 %v3050_v45, %v2794_v55  ;;  %3011 = vrot.lane.b32.xlu1 %v11054_v61, %s3735_s2  ;;  %v11057_v12 = vld [vmem:[#allocation390_spill] sm:$0xff]  ;;  %v11059_v26 = vld [vmem:[#allocation392_spill] sm:$0xff]  ;;  %v11060_v55 = vld [vmem:[#allocation299_spill] sm:$0xff]  ;;  %v2900_v51 = vpop.permute.xlu1 %2899 }
 0x48d   :  { %3009 = vrot.lane.b32.xlu0 %v11055_v16, %s3735_s2  ;;  %v1580_v50 = vsel %vm460_vm2, %v11047_v19, %v11056_v2  ;;  %v1707_v59 = vadd.f32 %v1579_v9, %v8071_v31  ;;  %v1962_v6 = vsel %vm845_vm3, %v11038_v20, %v11057_v12  ;;  %v11058_v60 = vld [vmem:[#allocation450_spill] sm:$0xff]  ;;  %v1963_v17 = vsel %vm845_vm3, %v11060_v55, %v11059_v26  ;;  %v2898_v61 = vpop.permute.xlu0 %2897  ;;  %v11061_v16 = vld [vmem:[#allocation601_spill] sm:$0xff] }
 0x48e   :  { %v2348_v56 = vadd.f32 %v11058_v60, %v2089_v54  ;;  %v2795_v45 = vadd.f32 %v2667_v13, %v2346_v18  ;;  %v2796_v1 = vadd.f32 %v2668_v41, %v2347_v5  ;;  %vm3242_vm7 = vcmp.gt.f32.partialorder %v3178_v49, 0.0  ;;  %v11062_v11 = vld [vmem:[#allocation602_spill] sm:$0xff]  ;;  %v11064_v41 = vld [vmem:[#allocation595_spill] sm:$0xff] }
 0x48f   :  { %v2669_v19 = vsel %vm460_vm2, %v11062_v11, %v11061_v16  ;;  %v3514_v31 = vsel %vm3242_vm7, 1.0, %v10945_v35  ;;  %v3051_v9 = vsel %vm845_vm3, %v2896_v29, %v2898_v61  ;;  %v3052_v20 = vsel %vm845_vm3, %v2898_v61, %v2900_v51  ;;  %v11063_v13 = vld [vmem:[#allocation598_spill] sm:$0xff]  ;;  %v11066_v11 = vld [vmem:[#allocation311_spill] sm:$0xff] }
 0x490   :  { %v2090_v54 = vadd.f32 %v1962_v6, %v1706_v24  ;;  %3434 = vst [vmem:[#allocation2 + $0x88] sm:$0xff] %v3514_v31  ;;  %v3179_v2 = vadd.f32 %v3051_v9, %v2795_v45  ;;  %v3180_v12 = vadd.f32 %v3052_v20, %v2796_v1  ;;  %3015 = vrot.lane.b32.xlu1 %v11063_v13, %s3735_s2  ;;  %v11065_v5 = vld [vmem:[#allocation310_spill] sm:$0xff]  ;;  %v11068_v24 = vld [vmem:[#allocation391_spill] sm:$0xff]  ;;  %v2904_v45 = vpop.permute.xlu1 %2903 }
 0x491   :  { %3013 = vrot.lane.b32.xlu0 %v11064_v41, %s3735_s2  ;;  %v1708_v18 = vadd.f32 %v1580_v50, %v8074_v28  ;;  %v1581_v49 = vsel %vm460_vm2, %v11066_v11, %v11065_v5  ;;  %v11067_v60 = vld [vmem:[#allocation314_spill] sm:$0xff]  ;;  %v1964_v61 = vsel %vm845_vm3, %v11059_v26, %v11068_v24  ;;  %v2091_v6 = vadd.f32 %v1963_v17, %v1707_v59  ;;  %v2902_v1 = vpop.permute.xlu0 %2901  ;;  %v11069_v51 = vld [vmem:[#allocation607_spill] sm:$0xff]  ;;  %v11070_v41 = vld [vmem:[#allocation449_spill] sm:$0xff] }
 0x492   :  { %v1582_v29 = vsel %vm460_vm2, %v11065_v5, %v11067_v60  ;;  %v2797_v55 = vadd.f32 %v2669_v19, %v2348_v56  ;;  %vm3243_vm8 = vcmp.gt.f32.partialorder %v3179_v2, 0.0  ;;  %vm3244_vm9 = vcmp.gt.f32.partialorder %v3180_v12, 0.0  ;;  %v11071_v56 = vld [vmem:[#allocation600_spill] sm:$0xff]  ;;  %v11072_v26 = vld [vmem:[#allocation603_spill] sm:$0xff]  ;;  %v11074_v2 = vld [vmem:[#allocation313_spill] sm:$0xff] }
 0x493   :  { %v2670_v28 = vsel %vm460_vm2, %v11061_v16, %v11069_v51  ;;  %v3515_v50 = vsel %vm3243_vm8, 1.0, %v10945_v35  ;;  %v3516_v31 = vsel %vm3244_vm9, 1.0, %v10945_v35  ;;  %v3053_v9 = vsel %vm845_vm3, %v2902_v1, %v2904_v45  ;;  %v11073_v19 = vld [vmem:[#allocation316_spill] sm:$0xff]  ;;  %v11076_v11 = vld [vmem:[#allocation394_spill] sm:$0xff] }
 0x494   :  { %v2092_v20 = vadd.f32 %v1964_v61, %v1708_v18  ;;  %v2349_v5 = vadd.f32 %v11070_v41, %v2090_v54  ;;  %3435 = vst [vmem:[#allocation2 + $0x90] sm:$0xff] %v3515_v50  ;;  %3436 = vst [vmem:[#allocation2 + $0x98] sm:$0xff] %v3516_v31  ;;  %v3181_v59 = vadd.f32 %v3053_v9, %v2797_v55  ;;  %3019 = vrot.lane.b32.xlu1 %v11071_v56, %s3735_s2  ;;  %v11075_v18 = vld [vmem:[#allocation393_spill] sm:$0xff]  ;;  %v11077_v60 = vld [vmem:[#allocation396_spill] sm:$0xff]  ;;  %v2908_v51 = vpop.permute.xlu1 %2907 }
 0x495   :  { %3017 = vrot.lane.b32.xlu0 %v11072_v26, %s3735_s2  ;;  %v1709_v16 = vadd.f32 %v1581_v49, %v8085_v37  ;;  %v1710_v17 = vadd.f32 %v1582_v29, %v8095_v47  ;;  %v1583_v12 = vsel %vm460_vm2, %v11074_v2, %v11073_v19  ;;  %v1965_v54 = vsel %vm845_vm3, %v11076_v11, %v11075_v18  ;;  %v11078_v61 = vld [vmem:[#allocation454_spill] sm:$0xff]  ;;  %v2906_v37 = vpop.permute.xlu0 %2905  ;;  %v11079_v49 = vld [vmem:[#allocation612_spill] sm:$0xff]  ;;  %v11081_v50 = vld [vmem:[#allocation611_spill] sm:$0xff] }
 0x496   :  { %v1966_v24 = vsel %vm845_vm3, %v11075_v18, %v11077_v60  ;;  %v2350_v55 = vadd.f32 %v11078_v61, %v2091_v6  ;;  %v2798_v1 = vadd.f32 %v2670_v28, %v2349_v5  ;;  %vm3245_vm10 = vcmp.gt.f32.partialorder %v3181_v59, 0.0  ;;  %v11080_v47 = vld [vmem:[#allocation606_spill] sm:$0xff]  ;;  %v11082_v2 = vld [vmem:[#allocation459_spill] sm:$0xff]  ;;  %v11083_v28 = vld [vmem:[#allocation608_spill] sm:$0xff] }
 0x497   :  { %v2671_v29 = vsel %vm460_vm2, %v11080_v47, %v11079_v49  ;;  %v2672_v31 = vsel %vm460_vm2, %v11079_v49, %v11081_v50  ;;  %v3517_v9 = vsel %vm3245_vm10, 1.0, %v10945_v35  ;;  %v3054_v41 = vsel %vm845_vm3, %v2904_v45, %v2906_v37  ;;  %v11084_v5 = vld [vmem:[#allocation609_spill] sm:$0xff]  ;;  %v11086_v60 = vld [vmem:[#allocation60_spill] sm:$0xff]  ;;  %v11087_v49 = vld [vmem:[#allocation315_spill] sm:$0xff] }
 0x498   :  { %v2093_v56 = vadd.f32 %v1965_v54, %v1709_v16  ;;  %v2351_v18 = vadd.f32 %v11082_v2, %v2092_v20  ;;  %3437 = vst [vmem:[#allocation2 + $0xa0] sm:$0xff] %v3517_v9  ;;  %v3182_v6 = vadd.f32 %v3054_v41, %v2798_v1  ;;  %3023 = vrot.lane.b32.xlu1 %v11083_v28, %s3735_s2  ;;  %v11085_v59 = vld [vmem:[#allocation65_spill] sm:$0xff]  ;;  %v2912_v37 = vpop.permute.xlu1 %2911  ;;  %v11088_v50 = vld [vmem:[#allocation615_spill] sm:$0xff]  ;;  %v11089_v9 = vld [vmem:[#allocation616_spill] sm:$0xff] }
 0x499   :  { %3021 = vrot.lane.b32.xlu0 %v11084_v5, %s3735_s2  ;;  %v1025_v11 = vadd.f32 %v8583_v48, %v11085_v59  ;;  %v1026_v61 = vadd.f32 %v8591_v34, %v11086_v60  ;;  %v1584_v45 = vsel %vm460_vm2, %v11073_v19, %v11087_v49  ;;  %v1711_v20 = vadd.f32 %v1583_v12, %v8098_v43  ;;  %v2910_v47 = vpop.permute.xlu0 %2909  ;;  %v11090_v12 = vld [vmem:[#allocation613_spill] sm:$0xff] }
 0x49a   :  { %v2094_v16 = vadd.f32 %v1966_v24, %v1710_v17  ;;  %v2799_v54 = vadd.f32 %v2671_v29, %v2350_v55  ;;  %v2800_v1 = vadd.f32 %v2672_v31, %v2351_v18  ;;  %vm3246_vm11 = vcmp.gt.f32.partialorder %v3182_v6, 0.0  ;;  %v11091_v24 = vld [vmem:[#allocation610_spill] sm:$0xff]  ;;  %v11092_v29 = vld [vmem:[#allocation317_spill] sm:$0xff]  ;;  %v11095_v6 = vld [vmem:[#allocation395_spill] sm:$0xff] }
 0x49b   :  { %v2673_v41 = vsel %vm460_vm2, %v11089_v9, %v11088_v50  ;;  %v3518_v48 = vsel %vm3246_vm11, 1.0, %v10945_v35  ;;  %v3055_v34 = vsel %vm845_vm3, %v2908_v51, %v2910_v47  ;;  %v3056_v2 = vsel %vm845_vm3, %v2910_v47, %v2912_v37  ;;  %v11093_v31 = vld [vmem:[#allocation318_spill] sm:$0xff]  ;;  %v11094_v51 = vld [vmem:[#allocation400_spill] sm:$0xff] }
 0x49c   :  { %v2352_v19 = vadd.f32 %v10715_v63, %v2093_v56  ;;  %3438 = vst [vmem:[#allocation2 + $0xa8] sm:$0xff] %v3518_v48  ;;  %v3183_v43 = vadd.f32 %v3055_v34, %v2799_v54  ;;  %v3184_v17 = vadd.f32 %v3056_v2, %v2800_v1  ;;  %3027 = vrot.lane.b32.xlu1 %v11090_v12, %s3735_s2  ;;  %v11096_v63 = vld [vmem:[#allocation399_spill] sm:$0xff]  ;;  %v2916_v54 = vpop.permute.xlu1 %2915  ;;  %v11100_v2 = vld [vmem:[#allocation274_spill] sm:$0xff] }
 0x49d   :  { %3025 = vrot.lane.b32.xlu0 %v11091_v24, %s3735_s2  ;;  %v1712_v55 = vadd.f32 %v1584_v45, %v8101_v42  ;;  %v1585_v18 = vsel %vm460_vm2, %v11093_v31, %v11092_v29  ;;  %v1967_v59 = vsel %vm845_vm3, %v11095_v6, %v11094_v51  ;;  %v1968_v56 = vsel %vm845_vm3, %v11094_v51, %v11096_v63  ;;  %v2914_v1 = vpop.permute.xlu0 %2913  ;;  %v11097_v42 = vld [vmem:[#allocation619_spill] sm:$0xff]  ;;  %v11105_v6 = vld [vmem:[#allocation320_spill] sm:$0xff] }
 0x49e   :  { %v2801_v60 = vadd.f32 %v2673_v41, %v2352_v19  ;;  %v2353_v49 = vadd.f32 %v10714_v22, %v2094_v16  ;;  %vm3247_vm12 = vcmp.gt.f32.partialorder %v3183_v43, 0.0  ;;  %vm3248_vm13 = vcmp.gt.f32.partialorder %v3184_v17, 0.0  ;;  %v11098_v22 = vld [vmem:[#allocation614_spill] sm:$0xff]  ;;  %v11099_v16 = vld [vmem:[#allocation617_spill] sm:$0xff] }
 0x49f   :  { %v2674_v45 = vsel %vm460_vm2, %v11088_v50, %v11097_v42  ;;  %v3519_v37 = vsel %vm3247_vm12, 1.0, %v10945_v35  ;;  %v3520_v47 = vsel %vm3248_vm13, 1.0, %v10945_v35  ;;  %v3057_v9 = vsel %vm845_vm3, %v2914_v1, %v2916_v54  ;;  %v11101_v19 = vld [vmem:[#allocation278_spill] sm:$0xff] }
 0x4a0   :  { %v2095_v48 = vadd.f32 %v1967_v59, %v1711_v20  ;;  %v2096_v34 = vadd.f32 %v1968_v56, %v1712_v55  ;;  %3439 = vst [vmem:[#allocation2 + $0xb0] sm:$0xff] %v3519_v37  ;;  %3440 = vst [vmem:[#allocation2 + $0xb8] sm:$0xff] %v3520_v47  ;;  %v3185_v41 = vadd.f32 %v3057_v9, %v2801_v60  ;;  %3031 = vrot.lane.b32.xlu1 %v11098_v22, %s3735_s2  ;;  %v11102_v17 = vld [vmem:[#allocation282_spill] sm:$0xff]  ;;  %v11104_v55 = vld [vmem:[#allocation403_spill] sm:$0xff] }
 0x4a1   :  { %3029 = vrot.lane.b32.xlu0 %v11099_v16, %s3735_s2  ;;  %v8720_v50 = vadd.f32 %v11100_v2, %v8586_v30  ;;  %v8723_v43 = vadd.f32 %v11101_v19, %v1025_v11  ;;  %v8726_v24 = vadd.f32 %v11102_v17, %v1026_v61  ;;  %v11103_v20 = vld [vmem:[#allocation402_spill] sm:$0xff]  ;;  %v1713_v51 = vadd.f32 %v1585_v18, %v8104_v32  ;;  %v2920_v30 = vpop.permute.xlu1 %2919  ;;  %v2918_v56 = vpop.permute.xlu0 %2917  ;;  %v11106_v60 = vld [vmem:[#allocation621_spill] sm:$0xff]  ;;  %v11108_v61 = vld [vmem:[#allocation620_spill] sm:$0xff]  ;;  %s3712_s2 = scalar_lea.vmem %s3487_s10, 8192 }
 0x4a2   :  { %v1969_v31 = vsel %vm845_vm3, %v11104_v55, %v11103_v20  ;;  %v1586_v59 = vsel %vm460_vm2, %v11092_v29, %v11105_v6  ;;  %v2802_v63 = vadd.f32 %v2674_v45, %v2353_v49  ;;  %vm3249_vm14 = vcmp.gt.f32.partialorder %v3185_v41, 0.0  ;;  %v11107_v11 = vld [vmem:[#allocation618_spill] sm:$0xff]  ;;  %v11111_v2 = vld [vmem:[#allocation319_spill] sm:$0xff]  ;;  %v11113_v55 = vld [vmem:[#allocation321_spill] sm:$0xff]  ;;  %p3713_p0 = scmp.ne.s32.totalorder %s3487_s10, %s3712_s2  ;;  %p3718_p2 = scmp.lt.s32.totalorder %s3712_s2, %s3712_s2 }
 0x4a3   :  { %v2675_v1 = vsel %vm460_vm2, %v11107_v11, %v11106_v60  ;;  %v2676_v42 = vsel %vm460_vm2, %v11106_v60, %v11108_v61  ;;  %v3521_v37 = vsel %vm3249_vm14, 1.0, %v10945_v35  ;;  %v3058_v32 = vsel %vm845_vm3, %v2916_v54, %v2918_v56  ;;  %v11109_v45 = vld [vmem:[#allocation210_spill] sm:$0xff] }
 0x4a4   :  { %v2097_v18 = vadd.f32 %v1969_v31, %v1713_v51  ;;  %v2354_v47 = vadd.f32 %v10737_v27, %v2095_v48  ;;  %v2355_v29 = vadd.f32 %v10754_v57, %v2096_v34  ;;  %3441 = vst [vmem:[#allocation2 + $0xc0] sm:$0xff] %v3521_v37  ;;  %v3186_v49 = vadd.f32 %v3058_v32, %v2802_v63  ;;  %v11110_v22 = vld [vmem:[#allocation322_spill] sm:$0xff]  ;;  %v11115_v51 = vld [vmem:[#allocation623_spill] sm:$0xff]  ;;  %p3719_p3 = por %p3718_p2, %p3717_p1 }
 0x4a5   :  { %v899_v9 = vsel %vm845_vm3, %v11045_v15, %v11109_v45  ;;  %v1714_v41 = vadd.f32 %v1586_v59, %v8118_v7  ;;  %v1587_v19 = vsel %vm460_vm2, %v11111_v2, %v11110_v22  ;;  %v11112_v17 = vld [vmem:[#allocation406_spill] sm:$0xff]  ;;  %v1588_v27 = vsel %vm460_vm2, %v11110_v22, %v11113_v55  ;;  %v2924_v34 = vpop.permute.xlu1 %2923  ;;  %v2922_v31 = vpop.permute.xlu0 %2921  ;;  %v11121_v45 = vld [vmem:[#allocation323_spill] sm:$0xff]  ;;  %v11122_v22 = vld [vmem:[#allocation324_spill] sm:$0xff] }
 0x4a6   :  { %v1970_v54 = vsel %vm845_vm3, %v11103_v20, %v11112_v17  ;;  %v2803_v57 = vadd.f32 %v2675_v1, %v2354_v47  ;;  %v2804_v48 = vadd.f32 %v2676_v42, %v2355_v29  ;;  %vm3250_vm15 = vcmp.gt.f32.partialorder %v3186_v49, 0.0  ;;  %v11114_v15 = vld [vmem:[#allocation622_spill] sm:$0xff]  ;;  %v11116_v1 = vld [vmem:[#allocation471_spill] sm:$0xff]  ;;  %v11117_v42 = vld [vmem:[#allocation477_spill] sm:$0xff]  ;;  %p3720_p4 = pnand %p3719_p3, %p3713_p0 }
 0x4a7   :  { %v2677_v7 = vsel %vm460_vm2, %v11115_v51, %v11114_v15  ;;  %v3522_v6 = vsel %vm3250_vm15, 1.0, %v10945_v35  ;;  %v3059_v59 = vsel %vm845_vm3, %v2920_v30, %v2922_v31  ;;  %v3060_v63 = vsel %vm845_vm3, %v2922_v31, %v2924_v34  ;;  %v11118_v32 = vld [vmem:[#allocation410_spill] sm:$0xff]  ;;  %v11119_v47 = vld [vmem:[#allocation405_spill] sm:$0xff]  ;;  %v11124_v34 = vld [vmem:[#allocation480_spill] sm:$0xff] }
 0x4a8   :  { %v2098_v20 = vadd.f32 %v1970_v54, %v1714_v41  ;;  %v2356_v56 = vadd.f32 %v10768_v25, %v2097_v18  ;;  %3442 = vst [vmem:[#allocation2 + $0xc8] sm:$0xff] %v3522_v6  ;;  %v3187_v60 = vadd.f32 %v3059_v59, %v2803_v57  ;;  %v3188_v11 = vadd.f32 %v3060_v63, %v2804_v48  ;;  %v11120_v49 = vld [vmem:[#allocation409_spill] sm:$0xff]  ;;  %v11126_v59 = vld [vmem:[#allocation214_spill] sm:$0xff] }
 0x4a9   :  { %v1715_v61 = vadd.f32 %v1587_v19, %v11116_v1  ;;  %v1716_v37 = vadd.f32 %v1588_v27, %v11117_v42  ;;  %v1971_v29 = vsel %vm845_vm3, %v11119_v47, %v11118_v32  ;;  %v1972_v30 = vsel %vm845_vm3, %v11118_v32, %v11120_v49  ;;  %v2928_v18 = vpop.permute.xlu1 %2927  ;;  %v2926_v2 = vpop.permute.xlu0 %2925  ;;  %v11123_v19 = vld [vmem:[#allocation625_spill] sm:$0xff]  ;;  %v11131_v42 = vld [vmem:[#allocation95_spill] sm:$0xff] }
 0x4aa   :  { %v1589_v41 = vsel %vm460_vm2, %v11122_v22, %v11121_v45  ;;  %v2805_v25 = vadd.f32 %v2677_v7, %v2356_v56  ;;  %vm3251_vm0 = vcmp.gt.f32.partialorder %v3187_v60, 0.0  ;;  %vm3252_vm1 = vcmp.gt.f32.partialorder %v3188_v11, 0.0  ;;  %v11125_v7 = vld [vmem:[#allocation64_spill] sm:$0xff]  ;;  %v11127_v63 = vld [vmem:[#allocation209_spill] sm:$0xff]  ;;  %v11133_v49 = vld [vmem:[#allocation627_spill] sm:$0xff] }
 0x4ab   :  { %v2678_v17 = vsel %vm460_vm2, %v11114_v15, %v11123_v19  ;;  %v3523_v54 = vsel %vm3251_vm0, 1.0, %v10945_v35  ;;  %v3524_v55 = vsel %vm3252_vm1, 1.0, %v10945_v35  ;;  %v3061_v27 = vsel %vm845_vm3, %v2926_v2, %v2928_v18  ;;  %v11128_v15 = vld [vmem:[#allocation213_spill] sm:$0xff]  ;;  %v11129_v11 = vld [vmem:[#allocation412_spill] sm:$0xff] }
 0x4ac   :  { %v2099_v57 = vadd.f32 %v1971_v29, %v1715_v61  ;;  %v2100_v48 = vadd.f32 %v1972_v30, %v1716_v37  ;;  %v2357_v31 = vadd.f32 %v11124_v34, %v2098_v20  ;;  %3443 = vst [vmem:[#allocation2 + $0xd0] sm:$0xff] %v3523_v54  ;;  %3444 = vst [vmem:[#allocation2 + $0xd8] sm:$0xff] %v3524_v55  ;;  %v11130_v1 = vld [vmem:[#allocation413_spill] sm:$0xff]  ;;  %v11132_v20 = vld [vmem:[#allocation326_spill] sm:$0xff] }
 0x4ad   :  { %v3189_v51 = vadd.f32 %v3061_v27, %v2805_v25  ;;  %v1027_v6 = vadd.f32 %v899_v9, %v11125_v7  ;;  %v900_v56 = vsel %vm845_vm3, %v11127_v63, %v11126_v59  ;;  %v901_v60 = vsel %vm845_vm3, %v11126_v59, %v11128_v15  ;;  %v2932_v9 = vpop.permute.xlu1 %2931  ;;  %v2930_v29 = vpop.permute.xlu0 %2929  ;;  %v11134_v30 = vld [vmem:[#allocation624_spill] sm:$0xff]  ;;  %v11135_v25 = vld [vmem:[#allocation626_spill] sm:$0xff]  ;;  %v11141_v15 = vld [vmem:[#allocation325_spill] sm:$0xff] }
 0x4ae   :  { %v1973_v61 = vsel %vm845_vm3, %v11130_v1, %v11129_v11  ;;  %v1717_v37 = vadd.f32 %v1589_v41, %v11131_v42  ;;  %v1590_v32 = vsel %vm460_vm2, %v11121_v45, %v11132_v20  ;;  %v2806_v47 = vadd.f32 %v2678_v17, %v2357_v31  ;;  %v11136_v55 = vld [vmem:[#allocation486_spill] sm:$0xff]  ;;  %v11137_v45 = vld [vmem:[#allocation491_spill] sm:$0xff]  ;;  %v11138_v31 = vld [vmem:[#allocation68_spill] sm:$0xff] }
 0x4af   :  { %vm3253_vm4 = vcmp.gt.f32.partialorder %v3189_v51, 0.0  ;;  %v2679_v22 = vsel %vm460_vm2, %v11134_v30, %v11133_v49  ;;  %v2680_v2 = vsel %vm460_vm2, %v11133_v49, %v11135_v25  ;;  %v3062_v41 = vsel %vm845_vm3, %v2928_v18, %v2930_v29  ;;  %v11139_v7 = vld [vmem:[#allocation92_spill] sm:$0xff]  ;;  %v11143_v18 = vld [vmem:[#allocation327_spill] sm:$0xff]  ;;  %v11145_v29 = vld [vmem:[#allocation629_spill] sm:$0xff] }
 0x4b0   :  { %v3525_v19 = vsel %vm3253_vm4, 1.0, %v10945_v35  ;;  %v2101_v54 = vadd.f32 %v1973_v61, %v1717_v37  ;;  %v2358_v27 = vadd.f32 %v11136_v55, %v2099_v57  ;;  %v2359_v17 = vadd.f32 %v11137_v45, %v2100_v48  ;;  %v11140_v63 = vld [vmem:[#allocation328_spill] sm:$0xff]  ;;  %v11148_v45 = vld [vmem:[#allocation94_spill] sm:$0xff] }
 0x4b1   :  { %3445 = vst [vmem:[#allocation2 + $0xe0] sm:$0xff] %v3525_v19  ;;  %v3190_v34 = vadd.f32 %v3062_v41, %v2806_v47  ;;  %v1028_v51 = vadd.f32 %v900_v56, %v11138_v31  ;;  %v1718_v59 = vadd.f32 %v1590_v32, %v11139_v7  ;;  %v1591_v1 = vsel %vm460_vm2, %v11141_v15, %v11140_v63  ;;  %v11142_v42 = vld [vmem:[#allocation416_spill] sm:$0xff]  ;;  %v2936_v37 = vpop.permute.xlu1 %2935  ;;  %v2934_v47 = vpop.permute.xlu0 %2933  ;;  %v11146_v19 = vld [vmem:[#allocation497_spill] sm:$0xff]  ;;  %v11150_v31 = vld [vmem:[#allocation415_spill] sm:$0xff] }
 0x4b2   :  { %v1974_v20 = vsel %vm845_vm3, %v11129_v11, %v11142_v42  ;;  %v1592_v57 = vsel %vm460_vm2, %v11140_v63, %v11143_v18  ;;  %v2807_v61 = vadd.f32 %v2679_v22, %v2358_v27  ;;  %v2808_v48 = vadd.f32 %v2680_v2, %v2359_v17  ;;  %v11144_v56 = vld [vmem:[#allocation628_spill] sm:$0xff]  ;;  %v11147_v2 = vld [vmem:[#allocation487_spill] sm:$0xff]  ;;  %v11152_v15 = vld [vmem:[#allocation329_spill] sm:$0xff] }
 0x4b3   :  { %vm3254_vm5 = vcmp.gt.f32.partialorder %v3190_v34, 0.0  ;;  %v2681_v32 = vsel %vm460_vm2, %v11145_v29, %v11144_v56  ;;  %v3063_v30 = vsel %vm845_vm3, %v2932_v9, %v2934_v47  ;;  %v3064_v25 = vsel %vm845_vm3, %v2934_v47, %v2936_v37  ;;  %v11149_v34 = vld [vmem:[#allocation420_spill] sm:$0xff]  ;;  %v11151_v63 = vld [vmem:[#allocation419_spill] sm:$0xff]  ;;  %v11153_v42 = vld [vmem:[#allocation330_spill] sm:$0xff] }
 0x4b4   :  { %v3526_v49 = vsel %vm3254_vm5, 1.0, %v10945_v35  ;;  %v2102_v11 = vadd.f32 %v1974_v20, %v1718_v59  ;;  %v2360_v41 = vadd.f32 %v11146_v19, %v2101_v54  ;;  %v3191_v55 = vadd.f32 %v3063_v30, %v2807_v61 }
 0x4b5   :  { %3446 = vst [vmem:[#allocation2 + $0xe8] sm:$0xff] %v3526_v49  ;;  %v3192_v22 = vadd.f32 %v3064_v25, %v2808_v48  ;;  %v1719_v27 = vadd.f32 %v1591_v1, %v11147_v2  ;;  %v1720_v17 = vadd.f32 %v1592_v57, %v11148_v45  ;;  %v1975_v7 = vsel %vm845_vm3, %v11150_v31, %v11149_v34  ;;  %v2940_v20 = vpop.permute.xlu1 %2939  ;;  %v2938_v18 = vpop.permute.xlu0 %2937  ;;  %v11154_v1 = vld [vmem:[#allocation631_spill] sm:$0xff]  ;;  %v11155_v49 = vld [vmem:[#allocation496_spill] sm:$0xff]  ;;  %v11156_v25 = vld [vmem:[#allocation69_spill] sm:$0xff] }
 0x4b6   :  { %v1976_v9 = vsel %vm845_vm3, %v11149_v34, %v11151_v63  ;;  %v1593_v59 = vsel %vm460_vm2, %v11153_v42, %v11152_v15  ;;  %v2809_v54 = vadd.f32 %v2681_v32, %v2360_v41  ;;  %vm3255_vm6 = vcmp.gt.f32.partialorder %v3191_v55, 0.0  ;;  %v11157_v41 = vld [vmem:[#allocation286_spill] sm:$0xff]  ;;  %v11160_v45 = vld [vmem:[#allocation423_spill] sm:$0xff] }
 0x4b7   :  { %vm3256_vm7 = vcmp.gt.f32.partialorder %v3192_v22, 0.0  ;;  %v2682_v57 = vsel %vm460_vm2, %v11144_v56, %v11154_v1  ;;  %v3527_v61 = vsel %vm3255_vm6, 1.0, %v10945_v35  ;;  %v3065_v37 = vsel %vm845_vm3, %v2938_v18, %v2940_v20  ;;  %v11158_v22 = vld [vmem:[#allocation281_spill] sm:$0xff]  ;;  %v11159_v2 = vld [vmem:[#allocation422_spill] sm:$0xff]  ;;  %v11161_v31 = vld [vmem:[#allocation99_spill] sm:$0xff] }
 0x4b8   :  { %v3528_v48 = vsel %vm3256_vm7, 1.0, %v10945_v35  ;;  %v2103_v47 = vadd.f32 %v1975_v7, %v1719_v27  ;;  %v2104_v29 = vadd.f32 %v1976_v9, %v1720_v17  ;;  %v2361_v30 = vadd.f32 %v11155_v49, %v2102_v11  ;;  %3447 = vst [vmem:[#allocation2 + $0xf0] sm:$0xff] %v3527_v61  ;;  %v11162_v17 = vld [vmem:[#allocation332_spill] sm:$0xff]  ;;  %v11163_v9 = vld [vmem:[#allocation633_spill] sm:$0xff]  ;;  %v11166_v61 = vld [vmem:[#allocation502_spill] sm:$0xff] }
 0x4b9   :  { %3448 = vst [vmem:[#allocation2 + $0xf8] sm:$0xff] %v3528_v48  ;;  %v3193_v32 = vadd.f32 %v3065_v37, %v2809_v54  ;;  %v1029_v19 = vadd.f32 %v901_v60, %v11156_v25  ;;  %v8845_v55 = vadd.f32 %v11157_v41, %v1028_v51  ;;  %v8848_v56 = vadd.f32 %v11158_v22, %v1027_v6  ;;  %v2944_v63 = vpop.permute.xlu1 %2943  ;;  %v2942_v60 = vpop.permute.xlu0 %2941  ;;  %v11164_v51 = vld [vmem:[#allocation630_spill] sm:$0xff]  ;;  %v11165_v6 = vld [vmem:[#allocation632_spill] sm:$0xff]  ;;  %v11170_v25 = vld [vmem:[#allocation101_spill] sm:$0xff] }
 0x4ba   :  { %v1977_v34 = vsel %vm845_vm3, %v11160_v45, %v11159_v2  ;;  %v1721_v27 = vadd.f32 %v1593_v59, %v11161_v31  ;;  %v1594_v11 = vsel %vm460_vm2, %v11152_v15, %v11162_v17  ;;  %v2810_v7 = vadd.f32 %v2682_v57, %v2361_v30  ;;  %v11167_v15 = vld [vmem:[#allocation507_spill] sm:$0xff]  ;;  %v11168_v49 = vld [vmem:[#allocation216_spill] sm:$0xff]  ;;  %v11169_v30 = vld [vmem:[#allocation217_spill] sm:$0xff] }
 0x4bb   :  { %vm3257_vm8 = vcmp.gt.f32.partialorder %v3193_v32, 0.0  ;;  %v2683_v42 = vsel %vm460_vm2, %v11164_v51, %v11163_v9  ;;  %v2684_v54 = vsel %vm460_vm2, %v11163_v9, %v11165_v6  ;;  %v3066_v59 = vsel %vm845_vm3, %v2940_v20, %v2942_v60  ;;  %v11171_v22 = vld [vmem:[#allocation334_spill] sm:$0xff]  ;;  %v11172_v45 = vld [vmem:[#allocation331_spill] sm:$0xff] }
 0x4bc   :  { %v3529_v18 = vsel %vm3257_vm8, 1.0, %v10945_v35  ;;  %v2105_v1 = vadd.f32 %v1977_v34, %v1721_v27  ;;  %v2362_v48 = vadd.f32 %v11166_v61, %v2103_v47  ;;  %v2363_v57 = vadd.f32 %v11167_v15, %v2104_v29  ;;  %v11173_v17 = vld [vmem:[#allocation426_spill] sm:$0xff]  ;;  %v11174_v34 = vld [vmem:[#allocation333_spill] sm:$0xff]  ;;  %v11176_v51 = vld [vmem:[#allocation635_spill] sm:$0xff] }
 0x4bd   :  { %3449 = vst [vmem:[#allocation2 + $0x100] sm:$0xff] %v3529_v18  ;;  %v3194_v37 = vadd.f32 %v3066_v59, %v2810_v7  ;;  %v902_v32 = vsel %vm845_vm3, %v11169_v30, %v11168_v49  ;;  %v1722_v41 = vadd.f32 %v1594_v11, %v11170_v25  ;;  %v1595_v31 = vsel %vm460_vm2, %v11172_v45, %v11171_v22  ;;  %v2948_v7 = vpop.permute.xlu1 %2947  ;;  %v2946_v60 = vpop.permute.xlu0 %2945  ;;  %v11175_v9 = vld [vmem:[#allocation634_spill] sm:$0xff]  ;;  %v11179_v25 = vld [vmem:[#allocation429_spill] sm:$0xff]  ;;  %v11181_v45 = vld [vmem:[#allocation336_spill] sm:$0xff] }
 0x4be   :  { %v1978_v20 = vsel %vm845_vm3, %v11159_v2, %v11173_v17  ;;  %v1596_v47 = vsel %vm460_vm2, %v11171_v22, %v11174_v34  ;;  %v2811_v29 = vadd.f32 %v2683_v42, %v2362_v48  ;;  %v2812_v27 = vadd.f32 %v2684_v54, %v2363_v57  ;;  %v11177_v57 = vld [vmem:[#allocation430_spill] sm:$0xff]  ;;  %v11180_v22 = vld [vmem:[#allocation335_spill] sm:$0xff] }
 0x4bf   :  { %vm3258_vm9 = vcmp.gt.f32.partialorder %v3194_v37, 0.0  ;;  %v2685_v11 = vsel %vm460_vm2, %v11176_v51, %v11175_v9  ;;  %v3067_v18 = vsel %vm845_vm3, %v2944_v63, %v2946_v60  ;;  %v3068_v59 = vsel %vm845_vm3, %v2946_v60, %v2948_v7  ;;  %v11178_v37 = vld [vmem:[#allocation425_spill] sm:$0xff] }
 0x4c0   :  { %v3530_v6 = vsel %vm3258_vm9, 1.0, %v10945_v35  ;;  %v2106_v2 = vadd.f32 %v1978_v20, %v1722_v41  ;;  %v2364_v61 = vadd.f32 %v10888_v62, %v2105_v1  ;;  %v3195_v15 = vadd.f32 %v3067_v18, %v2811_v29  ;;  %v11183_v60 = vld [vmem:[#allocation73_spill] sm:$0xff] }
 0x4c1   :  { %3450 = vst [vmem:[#allocation2 + $0x108] sm:$0xff] %v3530_v6  ;;  %v3196_v42 = vadd.f32 %v3068_v59, %v2812_v27  ;;  %v1723_v54 = vadd.f32 %v1595_v31, %v8217_v58  ;;  %v1724_v48 = vadd.f32 %v1596_v47, %v8220_v40  ;;  %v1979_v30 = vsel %vm845_vm3, %v11178_v37, %v11177_v57  ;;  %v2952_v1 = vpop.permute.xlu1 %2951  ;;  %v2950_v17 = vpop.permute.xlu0 %2949  ;;  %v11182_v58 = vld [vmem:[#allocation637_spill] sm:$0xff]  ;;  %v11186_v59 = vld [vmem:[#allocation432_spill] sm:$0xff] }
 0x4c2   :  { %v1980_v63 = vsel %vm845_vm3, %v11177_v57, %v11179_v25  ;;  %v1597_v41 = vsel %vm460_vm2, %v11181_v45, %v11180_v22  ;;  %v2813_v62 = vadd.f32 %v2685_v11, %v2364_v61  ;;  %vm3259_vm10 = vcmp.gt.f32.partialorder %v3195_v15, 0.0  ;;  %v11184_v11 = vld [vmem:[#allocation220_spill] sm:$0xff]  ;;  %v11187_v61 = vld [vmem:[#allocation433_spill] sm:$0xff] }
 0x4c3   :  { %vm3260_vm11 = vcmp.gt.f32.partialorder %v3196_v42, 0.0  ;;  %v2686_v40 = vsel %vm460_vm2, %v11175_v9, %v11182_v58  ;;  %v3531_v31 = vsel %vm3259_vm10, 1.0, %v10945_v35  ;;  %v3069_v34 = vsel %vm845_vm3, %v2950_v17, %v2952_v1  ;;  %v11185_v9 = vld [vmem:[#allocation290_spill] sm:$0xff]  ;;  %v11190_v37 = vld [vmem:[#allocation9_spill] sm:$0xff] }
 0x4c4   :  { %v3532_v20 = vsel %vm3260_vm11, 1.0, %v10945_v35  ;;  %v2107_v47 = vadd.f32 %v1979_v30, %v1723_v54  ;;  %v2108_v29 = vadd.f32 %v1980_v63, %v1724_v48  ;;  %v2365_v27 = vadd.f32 %v10887_v0, %v2106_v2  ;;  %3451 = vst [vmem:[#allocation2 + $0x110] sm:$0xff] %v3531_v31  ;;  %v11188_v42 = vld [vmem:[#allocation102_spill] sm:$0xff]  ;;  %v11191_v30 = vld [vmem:[#allocation636_spill] sm:$0xff]  ;;  %v11195_v31 = vld [vmem:[#allocation79_spill] sm:$0xff] }
 0x4c5   :  { %3452 = vst [vmem:[#allocation2 + $0x118] sm:$0xff] %v3532_v20  ;;  %v3197_v7 = vadd.f32 %v3069_v34, %v2813_v62  ;;  %v1030_v51 = vadd.f32 %v902_v32, %v11183_v60  ;;  %v903_v6 = vsel %vm845_vm3, %v11168_v49, %v11184_v11  ;;  %v8910_v18 = vadd.f32 %v11185_v9, %v1029_v19  ;;  %v11189_v48 = vld [vmem:[#allocation338_spill] sm:$0xff]  ;;  %v2954_v57 = vpop.permute.xlu0 %2953  ;;  %v11192_v19 = vld [vmem:[#allocation13_spill] sm:$0xff]  ;;  %v11196_v34 = vld [vmem:[#allocation103_spill] sm:$0xff] }
 0x4c6   :  { %v1981_v15 = vsel %vm845_vm3, %v11187_v61, %v11186_v59  ;;  %v1725_v54 = vadd.f32 %v1597_v41, %v11188_v42  ;;  %v1598_v0 = vsel %vm460_vm2, %v11180_v22, %v11189_v48  ;;  %v2814_v2 = vadd.f32 %v2686_v40, %v2365_v27  ;;  %v2956_v32 = vpop.permute.xlu1 %2955  ;;  %v11193_v62 = vld [vmem:[#allocation518_spill] sm:$0xff]  ;;  %v11194_v22 = vld [vmem:[#allocation523_spill] sm:$0xff]  ;;  %v11198_v60 = vld [vmem:[#allocation337_spill] sm:$0xff] }
 0x4c7   :  { %vm3261_vm12 = vcmp.gt.f32.partialorder %v3197_v7, 0.0  ;;  %v2687_v49 = vsel %vm460_vm2, %v11191_v30, %v11190_v37  ;;  %v2688_v25 = vsel %vm460_vm2, %v11190_v37, %v11192_v19  ;;  %v3070_v45 = vsel %vm845_vm3, %v2952_v1, %v2954_v57  ;;  %v11197_v7 = vld [vmem:[#allocation340_spill] sm:$0xff]  ;;  %v11200_v1 = vld [vmem:[#allocation339_spill] sm:$0xff]  ;;  %v11202_v48 = vld [vmem:[#allocation17_spill] sm:$0xff] }
 0x4c8   :  { %v3533_v63 = vsel %vm3261_vm12, 1.0, %v10945_v35  ;;  %v2109_v41 = vadd.f32 %v1981_v15, %v1725_v54  ;;  %v2366_v17 = vadd.f32 %v11193_v62, %v2107_v47  ;;  %v2367_v58 = vadd.f32 %v11194_v22, %v2108_v29  ;;  %v11199_v9 = vld [vmem:[#allocation436_spill] sm:$0xff]  ;;  %v11203_v30 = vld [vmem:[#allocation529_spill] sm:$0xff]  ;;  %v11205_v62 = vld [vmem:[#allocation107_spill] sm:$0xff] }
 0x4c9   :  { %3453 = vst [vmem:[#allocation2 + $0x120] sm:$0xff] %v3533_v63  ;;  %v3198_v40 = vadd.f32 %v3070_v45, %v2814_v2  ;;  %v1031_v20 = vadd.f32 %v903_v6, %v11195_v31  ;;  %v1726_v27 = vadd.f32 %v1598_v0, %v11196_v34  ;;  %v1599_v11 = vsel %vm460_vm2, %v11198_v60, %v11197_v7  ;;  %v11201_v6 = vld [vmem:[#allocation8_spill] sm:$0xff]  ;;  %v11206_v22 = vld [vmem:[#allocation441_spill] sm:$0xff] }
 0x4ca   :  { %v1982_v61 = vsel %vm845_vm3, %v11186_v59, %v11199_v9  ;;  %v1600_v47 = vsel %vm460_vm2, %v11197_v7, %v11200_v1  ;;  %v2815_v15 = vadd.f32 %v2687_v49, %v2366_v17  ;;  %v2816_v29 = vadd.f32 %v2688_v25, %v2367_v58  ;;  %v2960_v42 = vpop.permute.xlu1 %2959  ;;  %v11204_v25 = vld [vmem:[#allocation105_spill] sm:$0xff]  ;;  %v11207_v58 = vld [vmem:[#allocation435_spill] sm:$0xff]  ;;  %v11208_v31 = vld [vmem:[#allocation440_spill] sm:$0xff] }
 0x4cb   :  { %vm3262_vm13 = vcmp.gt.f32.partialorder %v3198_v40, 0.0  ;;  %v2958_v54 = vpop.permute.xlu0 %2957  ;;  %v2689_v0 = vsel %vm460_vm2, %v11202_v48, %v11201_v6  ;;  %v2110_v59 = vadd.f32 %v1982_v61, %v1726_v27  ;;  %v2368_v19 = vadd.f32 %v11203_v30, %v2109_v41  ;;  %v11209_v34 = vld [vmem:[#allocation341_spill] sm:$0xff]  ;;  %v11210_v7 = vld [vmem:[#allocation342_spill] sm:$0xff] }
 0x4cc   :  { %v3534_v2 = vsel %vm3262_vm13, 1.0, %v10945_v35  ;;  %v3071_v57 = vsel %vm845_vm3, %v2956_v32, %v2958_v54  ;;  %v3072_v37 = vsel %vm845_vm3, %v2958_v54, %v2960_v42  ;;  %v1727_v45 = vadd.f32 %v1599_v11, %v11204_v25  ;;  %v11211_v11 = vld [vmem:[#allocation16_spill] sm:$0xff]  ;;  %v11215_v30 = vld [vmem:[#allocation294_spill] sm:$0xff]  ;;  %v11218_v25 = vld [vmem:[#allocation445_spill] sm:$0xff] }
 0x4cd   :  { %3454 = vst [vmem:[#allocation2 + $0x128] sm:$0xff] %v3534_v2  ;;  %v3199_v63 = vadd.f32 %v3071_v57, %v2815_v15  ;;  %v3200_v49 = vadd.f32 %v3072_v37, %v2816_v29  ;;  %v1728_v17 = vadd.f32 %v1600_v47, %v11205_v62  ;;  %v1983_v40 = vsel %vm845_vm3, %v11207_v58, %v11206_v22  ;;  %v11212_v54 = vld [vmem:[#allocation528_spill] sm:$0xff]  ;;  %v11213_v2 = vld [vmem:[#allocation225_spill] sm:$0xff]  ;;  %v11214_v57 = vld [vmem:[#allocation219_spill] sm:$0xff] }
 0x4ce   :  { %v1984_v32 = vsel %vm845_vm3, %v11206_v22, %v11208_v31  ;;  %v1601_v27 = vsel %vm460_vm2, %v11210_v7, %v11209_v34  ;;  %v2817_v41 = vadd.f32 %v2689_v0, %v2368_v19  ;;  %v2964_v60 = vpop.permute.xlu1 %2963  ;;  %v2690_v61 = vsel %vm460_vm2, %v11201_v6, %v11211_v11  ;;  %v11216_v6 = vld [vmem:[#allocation293_spill] sm:$0xff]  ;;  %v11219_v62 = vld [vmem:[#allocation104_spill] sm:$0xff] }
 0x4cf   :  { %vm3263_vm14 = vcmp.gt.f32.partialorder %v3199_v63, 0.0  ;;  %vm3264_vm15 = vcmp.gt.f32.partialorder %v3200_v49, 0.0  ;;  %v2962_v9 = vpop.permute.xlu0 %2961  ;;  %v2111_v29 = vadd.f32 %v1983_v40, %v1727_v45  ;;  %v2112_v42 = vadd.f32 %v1984_v32, %v1728_v17  ;;  %v11217_v49 = vld [vmem:[#allocation444_spill] sm:$0xff]  ;;  %v11221_v32 = vld [vmem:[#allocation21_spill] sm:$0xff] }
 0x4d0   :  { %v3535_v1 = vsel %vm3263_vm14, 1.0, %v10945_v35  ;;  %v3536_v47 = vsel %vm3264_vm15, 1.0, %v10945_v35  ;;  %v3073_v15 = vsel %vm845_vm3, %v2962_v9, %v2964_v60  ;;  %v2369_v48 = vadd.f32 %v11212_v54, %v2110_v59  ;;  %v11220_v59 = vld [vmem:[#allocation344_spill] sm:$0xff]  ;;  %v11225_v54 = vld [vmem:[#allocation106_spill] sm:$0xff] }
 0x4d1   :  { %3455 = vst [vmem:[#allocation2 + $0x130] sm:$0xff] %v3535_v1  ;;  %3456 = vst [vmem:[#allocation2 + $0x138] sm:$0xff] %v3536_v47  ;;  %v3201_v0 = vadd.f32 %v3073_v15, %v2817_v41  ;;  %v904_v37 = vsel %vm845_vm3, %v11214_v57, %v11213_v2  ;;  %v8969_v19 = vadd.f32 %v11215_v30, %v1030_v51  ;;  %v11222_v51 = vld [vmem:[#allocation12_spill] sm:$0xff]  ;;  %v11227_v57 = vld [vmem:[#allocation343_spill] sm:$0xff] }
 0x4d2   :  { %v8972_v63 = vadd.f32 %v11216_v6, %v1031_v20  ;;  %v1985_v45 = vsel %vm845_vm3, %v11218_v25, %v11217_v49  ;;  %v1729_v17 = vadd.f32 %v1601_v27, %v11219_v62  ;;  %v1602_v22 = vsel %vm460_vm2, %v11209_v34, %v11220_v59  ;;  %v2968_v40 = vpop.permute.xlu1 %2967  ;;  %v11223_v20 = vld [vmem:[#allocation20_spill] sm:$0xff]  ;;  %v11229_v25 = vld [vmem:[#allocation345_spill] sm:$0xff] }
 0x4d3   :  { %v2818_v58 = vadd.f32 %v2690_v61, %v2369_v48  ;;  %vm3265_vm0 = vcmp.gt.f32.partialorder %v3201_v0, 0.0  ;;  %v2966_v31 = vpop.permute.xlu0 %2965  ;;  %v2691_v7 = vsel %vm460_vm2, %v11222_v51, %v11221_v32  ;;  %v2692_v41 = vsel %vm460_vm2, %v11221_v32, %v11223_v20  ;;  %v11224_v47 = vld [vmem:[#allocation224_spill] sm:$0xff]  ;;  %v11226_v0 = vld [vmem:[#allocation346_spill] sm:$0xff]  ;;  %v11231_v62 = vld [vmem:[#allocation29_spill] sm:$0xff] }
 0x4d4   :  { %v3537_v9 = vsel %vm3265_vm0, 1.0, %v10945_v35  ;;  %v3074_v27 = vsel %vm845_vm3, %v2964_v60, %v2966_v31  ;;  %v2113_v11 = vadd.f32 %v1985_v45, %v1729_v17  ;;  %v2370_v1 = vadd.f32 %v10946_v23, %v2111_v29  ;;  %v11228_v6 = vld [vmem:[#allocation448_spill] sm:$0xff] }
 0x4d5   :  { %v2371_v34 = vadd.f32 %v10952_v33, %v2112_v42  ;;  %3457 = vst [vmem:[#allocation2 + $0x140] sm:$0xff] %v3537_v9  ;;  %v3202_v61 = vadd.f32 %v3074_v27, %v2818_v58  ;;  %v905_v15 = vsel %vm845_vm3, %v11213_v2, %v11224_v47  ;;  %v1730_v48 = vadd.f32 %v1602_v22, %v11225_v54  ;;  %v11230_v2 = vld [vmem:[#allocation25_spill] sm:$0xff]  ;;  %v11237_v47 = vld [vmem:[#allocation347_spill] sm:$0xff]  ;;  %v11238_v54 = vld [vmem:[#allocation348_spill] sm:$0xff] }
 0x4d6   :  { %v1603_v30 = vsel %vm460_vm2, %v11227_v57, %v11226_v0  ;;  %v1986_v60 = vsel %vm845_vm3, %v11217_v49, %v11228_v6  ;;  %v1604_v23 = vsel %vm460_vm2, %v11226_v0, %v11229_v25  ;;  %v2819_v33 = vadd.f32 %v2691_v7, %v2370_v1  ;;  %v2972_v42 = vpop.permute.xlu1 %2971  ;;  %v11232_v7 = vld [vmem:[#allocation443_spill] sm:$0xff]  ;;  %v11234_v27 = vld [vmem:[#allocation453_spill] sm:$0xff] }
 0x4d7   :  { %v2820_v29 = vadd.f32 %v2692_v41, %v2371_v34  ;;  %vm3266_vm1 = vcmp.gt.f32.partialorder %v3202_v61, 0.0  ;;  %v2970_v45 = vpop.permute.xlu0 %2969  ;;  %v2693_v17 = vsel %vm460_vm2, %v11231_v62, %v11230_v2  ;;  %v2114_v49 = vadd.f32 %v1986_v60, %v1730_v48  ;;  %v11233_v41 = vld [vmem:[#allocation493_spill] sm:$0xff]  ;;  %v11235_v1 = vld [vmem:[#allocation447_spill] sm:$0xff]  ;;  %v11236_v61 = vld [vmem:[#allocation452_spill] sm:$0xff] }
 0x4d8   :  { %v3538_v59 = vsel %vm3266_vm1, 1.0, %v10945_v35  ;;  %v3075_v22 = vsel %vm845_vm3, %v2968_v40, %v2970_v45  ;;  %v3076_v58 = vsel %vm845_vm3, %v2970_v45, %v2972_v42  ;;  %v2372_v31 = vadd.f32 %v10967_v53, %v2113_v11  ;;  %v11239_v57 = vld [vmem:[#allocation33_spill] sm:$0xff] }
 0x4d9   :  { %3458 = vst [vmem:[#allocation2 + $0x148] sm:$0xff] %v3538_v59  ;;  %v3203_v32 = vadd.f32 %v3075_v22, %v2819_v33  ;;  %v3204_v51 = vadd.f32 %v3076_v58, %v2820_v29  ;;  %v1731_v20 = vadd.f32 %v1603_v30, %v11232_v7  ;;  %v1732_v9 = vadd.f32 %v1604_v23, %v11233_v41  ;;  %v11240_v45 = vld [vmem:[#allocation81_spill] sm:$0xff]  ;;  %v11242_v22 = vld [vmem:[#allocation228_spill] sm:$0xff] }
 0x4da   :  { %v1987_v34 = vsel %vm845_vm3, %v11235_v1, %v11234_v27  ;;  %v1988_v40 = vsel %vm845_vm3, %v11234_v27, %v11236_v61  ;;  %v1605_v48 = vsel %vm460_vm2, %v11238_v54, %v11237_v47  ;;  %v2821_v53 = vadd.f32 %v2693_v17, %v2372_v31  ;;  %v2976_v11 = vpop.permute.xlu1 %2975  ;;  %v11241_v17 = vld [vmem:[#allocation83_spill] sm:$0xff]  ;;  %v11243_v58 = vld [vmem:[#allocation229_spill] sm:$0xff] }
 0x4db   :  { %vm3267_vm4 = vcmp.gt.f32.partialorder %v3203_v32, 0.0  ;;  %vm3268_vm5 = vcmp.gt.f32.partialorder %v3204_v51, 0.0  ;;  %v2974_v0 = vpop.permute.xlu0 %2973  ;;  %v2694_v30 = vsel %vm460_vm2, %v11230_v2, %v11239_v57  ;;  %v2115_v23 = vadd.f32 %v1987_v34, %v1731_v20  ;;  %v11244_v31 = vld [vmem:[#allocation457_spill] sm:$0xff]  ;;  %v11245_v32 = vld [vmem:[#allocation458_spill] sm:$0xff] }
 0x4dc   :  { %v3539_v6 = vsel %vm3267_vm4, 1.0, %v10945_v35  ;;  %v3540_v60 = vsel %vm3268_vm5, 1.0, %v10945_v35  ;;  %v3077_v25 = vsel %vm845_vm3, %v2974_v0, %v2976_v11  ;;  %v2116_v33 = vadd.f32 %v1988_v40, %v1732_v9  ;;  %v11246_v20 = vld [vmem:[#allocation350_spill] sm:$0xff]  ;;  %v11247_v9 = vld [vmem:[#allocation53_spill] sm:$0xff] }
 0x4dd   :  { %v2373_v29 = vadd.f32 %v10966_v39, %v2114_v49  ;;  %3459 = vst [vmem:[#allocation2 + $0x150] sm:$0xff] %v3539_v6  ;;  %3460 = vst [vmem:[#allocation2 + $0x158] sm:$0xff] %v3540_v60  ;;  %v3205_v42 = vadd.f32 %v3077_v25, %v2821_v53  ;;  %v1032_v62 = vadd.f32 %v904_v37, %v11240_v45  ;;  %v11249_v1 = vld [vmem:[#allocation49_spill] sm:$0xff]  ;;  %v11250_v53 = vld [vmem:[#allocation80_spill] sm:$0xff] }
 0x4de   :  { %v1033_v59 = vadd.f32 %v905_v15, %v11241_v17  ;;  %v906_v2 = vsel %vm845_vm3, %v11243_v58, %v11242_v22  ;;  %v1989_v51 = vsel %vm845_vm3, %v11245_v32, %v11244_v31  ;;  %v1733_v7 = vadd.f32 %v1605_v48, %v8447_v44  ;;  %v2980_v41 = vpop.permute.xlu1 %2979  ;;  %v11248_v15 = vld [vmem:[#allocation32_spill] sm:$0xff]  ;;  %v11252_v6 = vld [vmem:[#allocation349_spill] sm:$0xff]  ;;  %v11253_v25 = vld [vmem:[#allocation463_spill] sm:$0xff] }
 0x4df   :  { %v1606_v39 = vsel %vm460_vm2, %v11237_v47, %v11246_v20  ;;  %v2822_v49 = vadd.f32 %v2694_v30, %v2373_v29  ;;  %vm3269_vm6 = vcmp.gt.f32.partialorder %v3205_v42, 0.0  ;;  %v2978_v37 = vpop.permute.xlu0 %2977  ;;  %v2695_v27 = vsel %vm460_vm2, %v11248_v15, %v11247_v9  ;;  %v11251_v30 = vld [vmem:[#allocation352_spill] sm:$0xff] }
 0x4e0   :  { %v2696_v34 = vsel %vm460_vm2, %v11247_v9, %v11249_v1  ;;  %v3541_v61 = vsel %vm3269_vm6, 1.0, %v10945_v35  ;;  %v3078_v44 = vsel %vm845_vm3, %v2976_v11, %v2978_v37  ;;  %v2117_v40 = vadd.f32 %v1989_v51, %v1733_v7  ;;  %v11254_v11 = vld [vmem:[#allocation351_spill] sm:$0xff]  ;;  %v11255_v45 = vld [vmem:[#allocation76_spill] sm:$0xff]  ;;  %v11257_v37 = vld [vmem:[#allocation469_spill] sm:$0xff] }
 0x4e1   :  { %v2374_v54 = vadd.f32 %v10972_v38, %v2115_v23  ;;  %v2375_v47 = vadd.f32 %v10984_v14, %v2116_v33  ;;  %3461 = vst [vmem:[#allocation2 + $0x160] sm:$0xff] %v3541_v61  ;;  %v3206_v48 = vadd.f32 %v3078_v44, %v2822_v49  ;;  %v1034_v0 = vadd.f32 %v906_v2, %v11250_v53  ;;  %v11256_v17 = vld [vmem:[#allocation72_spill] sm:$0xff]  ;;  %v11258_v9 = vld [vmem:[#allocation462_spill] sm:$0xff]  ;;  %v11260_v1 = vld [vmem:[#allocation353_spill] sm:$0xff] }
 0x4e2   :  { %v1734_v57 = vadd.f32 %v1606_v39, %v8451_v4  ;;  %v1607_v60 = vsel %vm460_vm2, %v11252_v6, %v11251_v30  ;;  %v1990_v29 = vsel %vm845_vm3, %v11244_v31, %v11253_v25  ;;  %v1608_v38 = vsel %vm460_vm2, %v11251_v30, %v11254_v11  ;;  %v2984_v33 = vpop.permute.xlu1 %2983 }
 0x4e3   :  { %v2823_v23 = vadd.f32 %v2695_v27, %v2374_v54  ;;  %v2824_v14 = vadd.f32 %v2696_v34, %v2375_v47  ;;  %vm3270_vm7 = vcmp.gt.f32.partialorder %v3206_v48, 0.0  ;;  %v2982_v42 = vpop.permute.xlu0 %2981  ;;  %v2697_v4 = vsel %vm460_vm2, %v11256_v17, %v11255_v45  ;;  %v11259_v27 = vld [vmem:[#allocation468_spill] sm:$0xff]  ;;  %v11261_v34 = vld [vmem:[#allocation354_spill] sm:$0xff] }
 0x4e4   :  { %v3542_v58 = vsel %vm3270_vm7, 1.0, %v10945_v35  ;;  %v3079_v2 = vsel %vm845_vm3, %v2980_v41, %v2982_v42  ;;  %v3080_v32 = vsel %vm845_vm3, %v2982_v42, %v2984_v33  ;;  %v2118_v31 = vadd.f32 %v1990_v29, %v1734_v57  ;;  %v11264_v29 = vld [vmem:[#allocation302_spill] sm:$0xff]  ;;  %v11268_v17 = vld [vmem:[#allocation356_spill] sm:$0xff] }
 0x4e5   :  { %v2376_v51 = vadd.f32 %v10994_v36, %v2117_v40  ;;  %3462 = vst [vmem:[#allocation2 + $0x168] sm:$0xff] %v3542_v58  ;;  %v3207_v7 = vadd.f32 %v3079_v2, %v2823_v23  ;;  %v3208_v20 = vadd.f32 %v3080_v32, %v2824_v14  ;;  %v1735_v39 = vadd.f32 %v1607_v60, %v8720_v50  ;;  %v11262_v50 = vld [vmem:[#allocation78_spill] sm:$0xff]  ;;  %v11266_v14 = vld [vmem:[#allocation473_spill] sm:$0xff] }
 0x4e6   :  { %v1736_v49 = vadd.f32 %v1608_v38, %v8723_v43  ;;  %v1991_v15 = vsel %vm845_vm3, %v11258_v9, %v11257_v37  ;;  %v1992_v41 = vsel %vm845_vm3, %v11257_v37, %v11259_v27  ;;  %v1609_v61 = vsel %vm460_vm2, %v11261_v34, %v11260_v1  ;;  %v2988_v44 = vpop.permute.xlu1 %2987  ;;  %v11263_v60 = vld [vmem:[#allocation298_spill] sm:$0xff]  ;;  %v11269_v2 = vld [vmem:[#allocation89_spill] sm:$0xff]  ;;  %v11272_v37 = vld [vmem:[#allocation232_spill] sm:$0xff] }
 0x4e7   :  { %v2825_v36 = vadd.f32 %v2697_v4, %v2376_v51  ;;  %vm3271_vm8 = vcmp.gt.f32.partialorder %v3207_v7, 0.0  ;;  %vm3272_vm9 = vcmp.gt.f32.partialorder %v3208_v20, 0.0  ;;  %v2986_v40 = vpop.permute.xlu0 %2985  ;;  %v2698_v43 = vsel %vm460_vm2, %v11255_v45, %v11262_v50  ;;  %v11265_v38 = vld [vmem:[#allocation306_spill] sm:$0xff]  ;;  %v11275_v34 = vld [vmem:[#allocation479_spill] sm:$0xff] }
 0x4e8   :  { %v3543_v54 = vsel %vm3271_vm8, 1.0, %v10945_v35  ;;  %v3544_v47 = vsel %vm3272_vm9, 1.0, %v10945_v35  ;;  %v3081_v48 = vsel %vm845_vm3, %v2986_v40, %v2988_v44  ;;  %v2119_v53 = vadd.f32 %v1991_v15, %v1735_v39  ;;  %v11267_v33 = vld [vmem:[#allocation474_spill] sm:$0xff] }
 0x4e9   :  { %v2120_v57 = vadd.f32 %v1992_v41, %v1736_v49  ;;  %v2377_v30 = vadd.f32 %v10993_v46, %v2118_v31  ;;  %3463 = vst [vmem:[#allocation2 + $0x170] sm:$0xff] %v3543_v54  ;;  %3464 = vst [vmem:[#allocation2 + $0x178] sm:$0xff] %v3544_v47  ;;  %v3209_v6 = vadd.f32 %v3081_v48, %v2825_v36  ;;  %v11273_v27 = vld [vmem:[#allocation358_spill] sm:$0xff]  ;;  %v11274_v41 = vld [vmem:[#allocation355_spill] sm:$0xff] }
 0x4ea   :  { %v9088_v25 = vadd.f32 %v11263_v60, %v1032_v62  ;;  %v9091_v11 = vadd.f32 %v11264_v29, %v1033_v59  ;;  %v9094_v23 = vadd.f32 %v11265_v38, %v1034_v0  ;;  %v1993_v42 = vsel %vm845_vm3, %v11267_v33, %v11266_v14  ;;  %v2992_v62 = vpop.permute.xlu1 %2991  ;;  %v11270_v59 = vld [vmem:[#allocation75_spill] sm:$0xff]  ;;  %v11276_v36 = vld [vmem:[#allocation357_spill] sm:$0xff] }
 0x4eb   :  { %v1737_v45 = vadd.f32 %v1609_v61, %v8726_v24  ;;  %v1610_v46 = vsel %vm460_vm2, %v11260_v1, %v11268_v17  ;;  %v2826_v4 = vadd.f32 %v2698_v43, %v2377_v30  ;;  %vm3273_vm10 = vcmp.gt.f32.partialorder %v3209_v6, 0.0  ;;  %v2990_v58 = vpop.permute.xlu0 %2989  ;;  %v11271_v0 = vld [vmem:[#allocation87_spill] sm:$0xff]  ;;  %v11278_v43 = vld [vmem:[#allocation88_spill] sm:$0xff]  ;;  %v11279_v38 = vld [vmem:[#allocation485_spill] sm:$0xff] }
 0x4ec   :  { %v2699_v32 = vsel %vm460_vm2, %v11270_v59, %v11269_v2  ;;  %v2700_v31 = vsel %vm460_vm2, %v11269_v2, %v11271_v0  ;;  %v3545_v51 = vsel %vm3273_vm10, 1.0, %v10945_v35  ;;  %v3082_v24 = vsel %vm845_vm3, %v2988_v44, %v2990_v58  ;;  %v11282_v17 = vld [vmem:[#allocation359_spill] sm:$0xff] }
 0x4ed   :  { %v2121_v7 = vadd.f32 %v1993_v42, %v1737_v45  ;;  %v2378_v20 = vadd.f32 %v11004_v52, %v2119_v53  ;;  %v2379_v39 = vadd.f32 %v11010_v3, %v2120_v57  ;;  %3465 = vst [vmem:[#allocation2 + $0x180] sm:$0xff] %v3545_v51  ;;  %v3210_v49 = vadd.f32 %v3082_v24, %v2826_v4  ;;  %v11281_v42 = vld [vmem:[#allocation484_spill] sm:$0xff] }
 0x4ee   :  { %v907_v9 = vsel %vm845_vm3, %v11242_v22, %v11272_v37  ;;  %v1738_v15 = vadd.f32 %v1610_v46, %v8848_v56  ;;  %v1611_v1 = vsel %vm460_vm2, %v11274_v41, %v11273_v27  ;;  %v1994_v61 = vsel %vm845_vm3, %v11266_v14, %v11275_v34  ;;  %v2996_v40 = vpop.permute.xlu1 %2995  ;;  %v11277_v22 = vld [vmem:[#allocation86_spill] sm:$0xff]  ;;  %v11283_v46 = vld [vmem:[#allocation360_spill] sm:$0xff]  ;;  %v11289_v41 = vld [vmem:[#allocation489_spill] sm:$0xff] }
 0x4ef   :  { %v1612_v52 = vsel %vm460_vm2, %v11273_v27, %v11276_v36  ;;  %v2827_v3 = vadd.f32 %v2699_v32, %v2378_v20  ;;  %v2828_v44 = vadd.f32 %v2700_v31, %v2379_v39  ;;  %vm3274_vm11 = vcmp.gt.f32.partialorder %v3210_v49, 0.0  ;;  %v2994_v50 = vpop.permute.xlu0 %2993  ;;  %v11280_v14 = vld [vmem:[#allocation478_spill] sm:$0xff]  ;;  %v11286_v39 = vld [vmem:[#allocation237_spill] sm:$0xff]  ;;  %v11287_v49 = vld [vmem:[#allocation231_spill] sm:$0xff] }
 0x4f0   :  { %v2701_v56 = vsel %vm460_vm2, %v11278_v43, %v11277_v22  ;;  %v3546_v54 = vsel %vm3274_vm11, 1.0, %v10945_v35  ;;  %v3083_v47 = vsel %vm845_vm3, %v2992_v62, %v2994_v50  ;;  %v3084_v48 = vsel %vm845_vm3, %v2994_v50, %v2996_v40  ;;  %v11293_v40 = vld [vmem:[#allocation90_spill] sm:$0xff] }
 0x4f1   :  { %v2122_v53 = vadd.f32 %v1994_v61, %v1738_v15  ;;  %v2380_v57 = vadd.f32 %v11025_v21, %v2121_v7  ;;  %3466 = vst [vmem:[#allocation2 + $0x188] sm:$0xff] %v3546_v54  ;;  %v3211_v30 = vadd.f32 %v3083_v47, %v2827_v3  ;;  %v3212_v6 = vadd.f32 %v3084_v48, %v2828_v44  ;;  %v11285_v7 = vld [vmem:[#allocation82_spill] sm:$0xff]  ;;  %v11288_v15 = vld [vmem:[#allocation236_spill] sm:$0xff]  ;;  %v11292_v44 = vld [vmem:[#allocation93_spill] sm:$0xff] }
 0x4f2   :  { %v1739_v60 = vadd.f32 %v1611_v1, %v8845_v55  ;;  %v1740_v29 = vadd.f32 %v1612_v52, %v8910_v18  ;;  %v1995_v33 = vsel %vm845_vm3, %v11280_v14, %v11279_v38  ;;  %v1996_v45 = vsel %vm845_vm3, %v11279_v38, %v11281_v42  ;;  %v3000_v62 = vpop.permute.xlu1 %2999  ;;  %v11284_v55 = vld [vmem:[#allocation91_spill] sm:$0xff]  ;;  %v11290_v1 = vld [vmem:[#allocation490_spill] sm:$0xff]  ;;  %v11298_v38 = vld [vmem:[#allocation361_spill] sm:$0xff] }
 0x4f3   :  { %v1613_v4 = vsel %vm460_vm2, %v11283_v46, %v11282_v17  ;;  %v2829_v21 = vadd.f32 %v2701_v56, %v2380_v57  ;;  %vm3275_vm12 = vcmp.gt.f32.partialorder %v3211_v30, 0.0  ;;  %vm3276_vm13 = vcmp.gt.f32.partialorder %v3212_v6, 0.0  ;;  %v2998_v58 = vpop.permute.xlu0 %2997  ;;  %v11295_v48 = vld [vmem:[#allocation587_spill] sm:$0xff]  ;;  %v11296_v30 = vld [vmem:[#allocation84_spill] sm:$0xff] }
 0x4f4   :  { %v2702_v18 = vsel %vm460_vm2, %v11277_v22, %v11284_v55  ;;  %v3547_v2 = vsel %vm3275_vm12, 1.0, %v10945_v35  ;;  %v3548_v59 = vsel %vm3276_vm13, 1.0, %v10945_v35  ;;  %v3085_v32 = vsel %vm845_vm3, %v2998_v58, %v3000_v62  ;;  %v11294_v22 = vld [vmem:[#allocation455_spill] sm:$0xff]  ;;  %v11302_v58 = vld [vmem:[#allocation460_spill] sm:$0xff] }
 0x4f5   :  { %v2123_v0 = vadd.f32 %v1995_v33, %v1739_v60  ;;  %v2124_v31 = vadd.f32 %v1996_v45, %v1740_v29  ;;  %v2381_v51 = vadd.f32 %v11024_v10, %v2122_v53  ;;  %3467 = vst [vmem:[#allocation2 + $0x190] sm:$0xff] %v3547_v2  ;;  %3468 = vst [vmem:[#allocation2 + $0x198] sm:$0xff] %v3548_v59  ;;  %v11291_v10 = vld [vmem:[#allocation362_spill] sm:$0xff]  ;;  %v11297_v29 = vld [vmem:[#allocation364_spill] sm:$0xff] }
 0x4f6   :  { %v3213_v24 = vadd.f32 %v3085_v32, %v2829_v21  ;;  %v1035_v20 = vadd.f32 %v907_v9, %v11285_v7  ;;  %v908_v37 = vsel %vm845_vm3, %v11287_v49, %v11286_v39  ;;  %v909_v27 = vsel %vm845_vm3, %v11286_v39, %v11288_v15  ;;  %v3004_v9 = vpop.permute.xlu1 %3003  ;;  %v11299_v33 = vld [vmem:[#allocation495_spill] sm:$0xff]  ;;  %v11303_v32 = vld [vmem:[#allocation593_spill] sm:$0xff]  ;;  %v11305_v49 = vld [vmem:[#allocation494_spill] sm:$0xff] }
 0x4f7   :  { %v1997_v34 = vsel %vm845_vm3, %v11290_v1, %v11289_v41  ;;  %v1741_v61 = vadd.f32 %v1613_v4, %v8969_v19  ;;  %v1614_v36 = vsel %vm460_vm2, %v11282_v17, %v11291_v10  ;;  %v2830_v52 = vadd.f32 %v2702_v18, %v2381_v51  ;;  %v3002_v3 = vpop.permute.xlu0 %3001  ;;  %v11300_v45 = vld [vmem:[#allocation363_spill] sm:$0xff]  ;;  %v11304_v39 = vld [vmem:[#allocation501_spill] sm:$0xff]  ;;  %v11306_v15 = vld [vmem:[#allocation500_spill] sm:$0xff] }
 0x4f8   :  { %vm3277_vm14 = vcmp.gt.f32.partialorder %v3213_v24, 0.0  ;;  %v2703_v50 = vsel %vm460_vm2, %v11293_v40, %v11292_v44  ;;  %v2704_v43 = vsel %vm460_vm2, %v11292_v44, %v11294_v22  ;;  %v3086_v19 = vsel %vm845_vm3, %v3000_v62, %v3002_v3  ;;  %v11301_v62 = vld [vmem:[#allocation461_spill] sm:$0xff]  ;;  %v11307_v1 = vld [vmem:[#allocation223_spill] sm:$0xff]  ;;  %v11310_v22 = vld [vmem:[#allocation592_spill] sm:$0xff] }
 0x4f9   :  { %v3549_v56 = vsel %vm3277_vm14, 1.0, %v10945_v35  ;;  %v2125_v54 = vadd.f32 %v1997_v34, %v1741_v61  ;;  %v2382_v47 = vadd.f32 %v11031_v8, %v2123_v0  ;;  %v2383_v53 = vadd.f32 %v11295_v48, %v2124_v31  ;;  %v11308_v34 = vld [vmem:[#allocation365_spill] sm:$0xff] }
 0x4fa   :  { %3469 = vst [vmem:[#allocation2 + $0x1a0] sm:$0xff] %v3549_v56  ;;  %v3214_v57 = vadd.f32 %v3086_v19, %v2830_v52  ;;  %v1036_v6 = vadd.f32 %v908_v37, %v11296_v30  ;;  %v1742_v60 = vadd.f32 %v1614_v36, %v8972_v63  ;;  %v1615_v14 = vsel %vm460_vm2, %v11298_v38, %v11297_v29  ;;  %v3008_v4 = vpop.permute.xlu1 %3007  ;;  %v11311_v19 = vld [vmem:[#allocation85_spill] sm:$0xff] }
 0x4fb   :  { %v1998_v42 = vsel %vm845_vm3, %v11289_v41, %v11299_v33  ;;  %v1616_v8 = vsel %vm460_vm2, %v11297_v29, %v11300_v45  ;;  %v2831_v17 = vadd.f32 %v2703_v50, %v2382_v47  ;;  %v2832_v46 = vadd.f32 %v2704_v43, %v2383_v53  ;;  %v3006_v21 = vpop.permute.xlu0 %3005  ;;  %v11312_v47 = vld [vmem:[#allocation309_spill] sm:$0xff] }
 0x4fc   :  { %vm3278_vm15 = vcmp.gt.f32.partialorder %v3214_v57, 0.0  ;;  %v2705_v63 = vsel %vm460_vm2, %v11302_v58, %v11301_v62  ;;  %v3087_v18 = vsel %vm845_vm3, %v3004_v9, %v3006_v21  ;;  %v3088_v2 = vsel %vm845_vm3, %v3006_v21, %v3008_v4  ;;  %v11313_v53 = vld [vmem:[#allocation305_spill] sm:$0xff] }
 0x4fd   :  { %v3550_v55 = vsel %vm3278_vm15, 1.0, %v10945_v35  ;;  %v2126_v59 = vadd.f32 %v1998_v42, %v1742_v60  ;;  %v2384_v0 = vadd.f32 %v11303_v32, %v2125_v54  ;;  %v3215_v31 = vadd.f32 %v3087_v18, %v2831_v17  ;;  %v11314_v30 = vld [vmem:[#allocation505_spill] sm:$0xff]  ;;  %v11315_v60 = vld [vmem:[#allocation506_spill] sm:$0xff]  ;;  %v11322_v32 = vld [vmem:[#allocation227_spill] sm:$0xff] }
 0x4fe   :  { %3470 = vst [vmem:[#allocation2 + $0x1a8] sm:$0xff] %v3550_v55  ;;  %v3216_v51 = vadd.f32 %v3088_v2, %v2832_v46  ;;  %v1743_v24 = vadd.f32 %v1615_v14, %v9088_v25  ;;  %v1744_v7 = vadd.f32 %v1616_v8, %v9091_v11  ;;  %v1999_v37 = vsel %vm845_vm3, %v11305_v49, %v11304_v39  ;;  %v3012_v36 = vpop.permute.xlu1 %3011  ;;  %v11309_v25 = vld [vmem:[#allocation439_spill] sm:$0xff]  ;;  %v11316_v14 = vld [vmem:[#allocation366_spill] sm:$0xff]  ;;  %v11319_v46 = vld [vmem:[#allocation476_spill] sm:$0xff] }
 0x4ff   :  { %v2000_v41 = vsel %vm845_vm3, %v11304_v39, %v11306_v15  ;;  %v1617_v61 = vsel %vm460_vm2, %v11308_v34, %v11307_v1  ;;  %v2833_v10 = vadd.f32 %v2705_v63, %v2384_v0  ;;  %vm3279_vm0 = vcmp.gt.f32.partialorder %v3215_v31, 0.0  ;;  %v3010_v52 = vpop.permute.xlu0 %3009  ;;  %v11317_v17 = vld [vmem:[#allocation482_spill] sm:$0xff]  ;;  %v11320_v55 = vld [vmem:[#allocation312_spill] sm:$0xff]  ;;  %v11323_v31 = vld [vmem:[#allocation511_spill] sm:$0xff] }
 0x500   :  { %vm3280_vm1 = vcmp.gt.f32.partialorder %v3216_v51, 0.0  ;;  %v2706_v11 = vsel %vm460_vm2, %v11301_v62, %v11309_v25  ;;  %v3551_v9 = vsel %vm3279_vm0, 1.0, %v10945_v35  ;;  %v3089_v44 = vsel %vm845_vm3, %v3010_v52, %v3012_v36  ;;  %v11326_v15 = vld [vmem:[#allocation97_spill] sm:$0xff] }
 0x501   :  { %v3552_v3 = vsel %vm3280_vm1, 1.0, %v10945_v35  ;;  %v2127_v40 = vadd.f32 %v1999_v37, %v1743_v24  ;;  %v2128_v50 = vadd.f32 %v2000_v41, %v1744_v7  ;;  %v2385_v43 = vadd.f32 %v11310_v22, %v2126_v59  ;;  %3471 = vst [vmem:[#allocation2 + $0x1b0] sm:$0xff] %v3551_v9  ;;  %v11321_v59 = vld [vmem:[#allocation368_spill] sm:$0xff]  ;;  %v11324_v24 = vld [vmem:[#allocation367_spill] sm:$0xff]  ;;  %v11327_v9 = vld [vmem:[#allocation517_spill] sm:$0xff] }
 0x502   :  { %3472 = vst [vmem:[#allocation2 + $0x1b8] sm:$0xff] %v3552_v3  ;;  %v3217_v56 = vadd.f32 %v3089_v44, %v2833_v10  ;;  %v1037_v54 = vadd.f32 %v909_v27, %v11311_v19  ;;  %v1297_v48 = vadd.f32 %v11312_v47, %v1036_v6  ;;  %v1296_v57 = vadd.f32 %v11313_v53, %v1035_v20  ;;  %v3016_v45 = vpop.permute.xlu1 %3015  ;;  %v11318_v27 = vld [vmem:[#allocation466_spill] sm:$0xff]  ;;  %v11325_v37 = vld [vmem:[#allocation96_spill] sm:$0xff] }
 0x503   :  { %v2001_v29 = vsel %vm845_vm3, %v11315_v60, %v11314_v30  ;;  %v1745_v38 = vadd.f32 %v1617_v61, %v9094_v23  ;;  %v1618_v33 = vsel %vm460_vm2, %v11307_v1, %v11316_v14  ;;  %v2834_v42 = vadd.f32 %v2706_v11, %v2385_v43  ;;  %v3014_v8 = vpop.permute.xlu0 %3013  ;;  %v11328_v3 = vld [vmem:[#allocation510_spill] sm:$0xff] }
 0x504   :  { %vm3281_vm4 = vcmp.gt.f32.partialorder %v3217_v56, 0.0  ;;  %v2707_v6 = vsel %vm460_vm2, %v11318_v27, %v11317_v17  ;;  %v2708_v20 = vsel %vm460_vm2, %v11317_v17, %v11319_v46  ;;  %v3090_v23 = vsel %vm845_vm3, %v3012_v36, %v3014_v8 }
 0x505   :  { %v3553_v4 = vsel %vm3281_vm4, 1.0, %v10945_v35  ;;  %v2129_v21 = vadd.f32 %v2001_v29, %v1745_v38  ;;  %v2386_v62 = vadd.f32 %v11063_v13, %v2127_v40  ;;  %v2387_v58 = vadd.f32 %v11072_v26, %v2128_v50  ;;  %v11329_v40 = vld [vmem:[#allocation516_spill] sm:$0xff] }
 0x506   :  { %3473 = vst [vmem:[#allocation2 + $0x1c0] sm:$0xff] %v3553_v4  ;;  %v3218_v63 = vadd.f32 %v3090_v23, %v2834_v42  ;;  %v1298_v18 = vadd.f32 %v11320_v55, %v1037_v54  ;;  %v1746_v2 = vadd.f32 %v1618_v33, %v1296_v57  ;;  %v1619_v0 = vsel %vm460_vm2, %v11322_v32, %v11321_v59  ;;  %v3020_v26 = vpop.permute.xlu1 %3019  ;;  %v11330_v54 = vld [vmem:[#allocation100_spill] sm:$0xff]  ;;  %v11333_v4 = vld [vmem:[#allocation498_spill] sm:$0xff] }
 0x507   :  { %v2002_v51 = vsel %vm845_vm3, %v11314_v30, %v11323_v31  ;;  %v1620_v7 = vsel %vm460_vm2, %v11321_v59, %v11324_v24  ;;  %v2835_v13 = vadd.f32 %v2707_v6, %v2386_v62  ;;  %v2836_v39 = vadd.f32 %v2708_v20, %v2387_v58  ;;  %v3018_v49 = vpop.permute.xlu0 %3017  ;;  %v11331_v42 = vld [vmem:[#allocation492_spill] sm:$0xff] }
 0x508   :  { %vm3282_vm5 = vcmp.gt.f32.partialorder %v3218_v63, 0.0  ;;  %v2709_v41 = vsel %vm460_vm2, %v11326_v15, %v11325_v37  ;;  %v3091_v34 = vsel %vm845_vm3, %v3016_v45, %v3018_v49  ;;  %v3092_v61 = vsel %vm845_vm3, %v3018_v49, %v3020_v26  ;;  %v11332_v45 = vld [vmem:[#allocation98_spill] sm:$0xff] }
 0x509   :  { %v3554_v1 = vsel %vm3282_vm5, 1.0, %v10945_v35  ;;  %v2130_v10 = vadd.f32 %v2002_v51, %v1746_v2  ;;  %v2388_v36 = vadd.f32 %v11084_v5, %v2129_v21  ;;  %v3219_v52 = vadd.f32 %v3091_v34, %v2835_v13 }
 0x50a   :  { %3474 = vst [vmem:[#allocation2 + $0x1c8] sm:$0xff] %v3554_v1  ;;  %v3220_v25 = vadd.f32 %v3092_v61, %v2836_v39  ;;  %v1747_v11 = vadd.f32 %v1619_v0, %v1297_v48  ;;  %v2003_v44 = vsel %vm845_vm3, %v11328_v3, %v11327_v9  ;;  %v2004_v50 = vsel %vm845_vm3, %v11327_v9, %v11329_v40  ;;  %v3024_v56 = vpop.permute.xlu1 %3023 }
 0x50b   :  { %v1748_v22 = vadd.f32 %v1620_v7, %v1298_v18  ;;  %v2837_v43 = vadd.f32 %v2709_v41, %v2388_v36  ;;  %vm3283_vm6 = vcmp.gt.f32.partialorder %v3219_v52, 0.0  ;;  %v3022_v19 = vpop.permute.xlu0 %3021  ;;  %v2710_v5 = vsel %vm460_vm2, %v11325_v37, %v11330_v54 }
 0x50c   :  { %vm3284_vm7 = vcmp.gt.f32.partialorder %v3220_v25, 0.0  ;;  %v3555_v47 = vsel %vm3283_vm6, 1.0, %v10945_v35  ;;  %v3093_v53 = vsel %vm845_vm3, %v3022_v19, %v3024_v56  ;;  %v2131_v57 = vadd.f32 %v2003_v44, %v1747_v11 }
 0x50d   :  { %v3556_v48 = vsel %vm3284_vm7, 1.0, %v10945_v35  ;;  %v2132_v30 = vadd.f32 %v2004_v50, %v1748_v22  ;;  %v2389_v60 = vadd.f32 %v11083_v28, %v2130_v10  ;;  %3475 = vst [vmem:[#allocation2 + $0x1d0] sm:$0xff] %v3555_v47  ;;  %v3221_v29 = vadd.f32 %v3093_v53, %v2837_v43 }
 0x50e   :  { %3476 = vst [vmem:[#allocation2 + $0x1d8] sm:$0xff] %v3556_v48  ;;  %v3028_v14 = vpop.permute.xlu1 %3027  ;;  %v2711_v8 = vsel %vm460_vm2, %v11332_v45, %v11331_v42  ;;  %v2390_v6 = vadd.f32 %v11090_v12, %v2131_v57 }
 0x50f   :  { %v2838_v38 = vadd.f32 %v2710_v5, %v2389_v60  ;;  %vm3285_vm8 = vcmp.gt.f32.partialorder %v3221_v29, 0.0  ;;  %v3026_v33 = vpop.permute.xlu0 %3025  ;;  %v2391_v46 = vadd.f32 %v11099_v16, %v2132_v30 }
 0x510   :  { %v3557_v17 = vsel %vm3285_vm8, 1.0, %v10945_v35  ;;  %v3094_v27 = vsel %vm845_vm3, %v3024_v56, %v3026_v33  ;;  %v2839_v20 = vadd.f32 %v2711_v8, %v2390_v6 }
 0x511   :  { %3477 = vst [vmem:[#allocation2 + $0x1e0] sm:$0xff] %v3557_v17  ;;  %v3222_v28 = vadd.f32 %v3094_v27, %v2838_v38  ;;  %v2840_v23 = vadd.f32 %v11333_v4, %v2391_v46 }
 0x512   :  { %v3032_v21 = vpop.permute.xlu1 %3031 }
 0x513   :  { %vm3286_vm9 = vcmp.gt.f32.partialorder %v3222_v28, 0.0  ;;  %v3030_v62 = vpop.permute.xlu0 %3029 }
 0x514   :  { %v3558_v58 = vsel %vm3286_vm9, 1.0, %v10945_v35  ;;  %v3095_v63 = vsel %vm845_vm3, %v3028_v14, %v3030_v62  ;;  %v3096_v55 = vsel %vm845_vm3, %v3030_v62, %v3032_v21 }
 0x515   :  { %3478 = vst [vmem:[#allocation2 + $0x1e8] sm:$0xff] %v3558_v58  ;;  %v3223_v12 = vadd.f32 %v3095_v63, %v2839_v20  ;;  %v3224_v18 = vadd.f32 %v3096_v55, %v2840_v23 }
 0x517   :  { %vm3287_vm2 = vcmp.gt.f32.partialorder %v3223_v12, 0.0  ;;  %vm3288_vm10 = vcmp.gt.f32.partialorder %v3224_v18, 0.0 }
 0x518   :  { %v3559_v16 = vsel %vm3287_vm2, 1.0, %v10945_v35  ;;  %v3560_v2 = vsel %vm3288_vm10, 1.0, %v10945_v35 }
 0x519   :  { %3479 = vst [vmem:[#allocation2 + $0x1f0] sm:$0xff] %v3559_v16  ;;  %3480 = vst [vmem:[#allocation2 + $0x1f8] sm:$0xff] %v3560_v2 }
 0x51a   :  { %3723 = shalt.err (!%p3720_p4)
}
 0x51b   :  { %s3738_s30 = smov 256   ;;  %s3739_s3 = smov 16  }
 0x51c   :  { %3492 = dma.vmem_to_hbm [thread:$0]  %s3487_s10, 8192, %s9278_s1, [#allocation3], %s3738_s30, %s3738_s30, %s3739_s3  }
 0x51d   :  { %3732 = dma.done.wait [#allocation3], 8192  }
 0x51e   :  { %3733 = vsyncadd [#allocation3], 4294959104 }
 0x51f   :  { %3496 = vsyncpa [#allocation3], 1 }

</bundles_post_ra>
